<compile_context>
chip_gen: v5e
topology: v5e:2x2
jax: 0.10.0
libtpu: 0.0.40
codegen_flags: <defaults>
</compile_context>

<pallas_src>
import functools
import numpy as np
import jax
import jax.numpy as jnp
from jax import lax
from jax.experimental import pallas as pl
from jax.experimental.pallas import tpu as pltpu


_CPARAMS = pltpu.CompilerParams(
    dimension_semantics=("parallel",),
    vmem_limit_bytes=48 * 1024 * 1024,   # <= v7x 64 MiB physical, ample on v5e/v6e
)

_ROW_TILE_CAP = 512  # rows per matmul block (~85% of HBM roofline measured on v6e)


def _pick_tm(m, cap=_ROW_TILE_CAP):
    """Largest multiple-of-8 divisor of m that fits `cap` AND keeps the grid at
    >= 2 steps (so both v7x TensorCores get work).  Every M in this network is
    small and divisible by 8, so the tm=m fallback is bounded (no VMEM hazard)."""
    if m <= 8:
        return m
    t = max((min(cap, m // 2) // 8) * 8, 8)
    while t >= 8:
        if m % t == 0:
            return t
        t -= 8
    return m


# ----------------------------- Pallas kernels ------------------------------

def _mm_kernel(x_ref, w_ref, s_ref, b_ref, o_ref, *, relu):
    # o = maybe_relu((x @ w) * scale + shift); bf16 MXU operands, f32 epilogue.
    acc = jnp.dot(x_ref[...], w_ref[...], preferred_element_type=jnp.float32)
    acc = acc * s_ref[...] + b_ref[...]
    if relu:
        acc = jnp.maximum(acc, 0.0)
    o_ref[...] = acc.astype(o_ref.dtype)


def _mm_res_kernel(x_ref, w_ref, s_ref, b_ref, r_ref, o_ref, *, relu):
    # o = maybe_relu((x @ w) * scale + shift + residual); residual read as bf16.
    acc = jnp.dot(x_ref[...], w_ref[...], preferred_element_type=jnp.float32)
    acc = acc * s_ref[...] + b_ref[...] + r_ref[...].astype(jnp.float32)
    if relu:
        acc = jnp.maximum(acc, 0.0)
    o_ref[...] = acc.astype(o_ref.dtype)


def _down_kernel(p_ref, w_ref, pp_ref, s_ref, t_ref, o_ref, *, cin):
    # Fused DownsamplerBlock: stride-2 3x3 conv + 2x2 maxpool + concat + BN + ReLU.
    p16 = p_ref[...]
    acc = jnp.dot(p16, w_ref[...], preferred_element_type=jnp.float32)

    def tap(kh, kw):
        off = (kh * 3 + kw) * cin
        return p16[:, off:off + cin]

    # 2x2/stride-2 max pool recovered from the (1,1),(1,2),(2,1),(2,2) im2col taps
    pool = jnp.maximum(jnp.maximum(tap(1, 1), tap(1, 2)),
                       jnp.maximum(tap(2, 1), tap(2, 2)))
    # place pooled channels into columns [cout-cin, cout) with a 0/1 matmul so the
    # output store stays a single lane-dense full-width store.
    acc = acc + jnp.dot(pool, pp_ref[...], preferred_element_type=jnp.float32)
    o_ref[...] = jnp.maximum(acc * s_ref[...] + t_ref[...], 0.0).astype(o_ref.dtype)


def _fcb_tail_dw_kernel(xp_ref, r_ref, dww_ref, pww_ref, s_ref, b_ref, w11_ref,
                        pm_ref, o_ref, *, taps, dil, ph, pw, H, W):
    # Fused FCB tail: depthwise dilated 3x3 (VPU, only taps not fully inside the
    # zero padding) + pointwise 1x1 + BN + ReLU + 1x1 conv + residual + ReLU,
    # with channel_shuffle folded into the 1x1 columns and a permutation matmul
    # on the residual.  One HBM round trip for the whole tail.
    xp = xp_ref[...]
    wv = dww_ref[...]
    C = xp.shape[-1]
    acc = jnp.zeros((H, W, C), jnp.float32)
    for kh, kw in taps:
        hs = ph + (kh - 1) * dil
        ws = pw + (kw - 1) * dil
        acc = acc + xp[hs:hs + H, ws:ws + W, :].astype(jnp.float32) * wv[kh, kw, :]
    d = acc.reshape(H * W, C).astype(jnp.bfloat16)
    y = jnp.dot(d, pww_ref[...], preferred_element_type=jnp.float32)
    y = jnp.maximum(y * s_ref[...] + b_ref[...], 0.0).astype(jnp.bfloat16)
    z = jnp.dot(y, w11_ref[...], preferred_element_type=jnp.float32)
    z = z + jnp.dot(r_ref[...], pm_ref[...], preferred_element_type=jnp.float32)
    o_ref[...] = jnp.maximum(z, 0.0).astype(o_ref.dtype)


def _fcb_tail_pw_kernel(x_ref, r_ref, pww_ref, s_ref, b_ref, w11_ref, pm_ref, o_ref):
    # Same tail when the dilation >= map size: the depthwise conv degenerates to
    # its centre tap which is folded into the pointwise weights (row-tiled).
    y = jnp.dot(x_ref[...], pww_ref[...], preferred_element_type=jnp.float32)
    y = jnp.maximum(y * s_ref[...] + b_ref[...], 0.0).astype(jnp.bfloat16)
    z = jnp.dot(y, w11_ref[...], preferred_element_type=jnp.float32)
    z = z + jnp.dot(r_ref[...], pm_ref[...], preferred_element_type=jnp.float32)
    o_ref[...] = jnp.maximum(z, 0.0).astype(o_ref.dtype)


def _cls_wup_kernel(x_ref, w_ref, b_ref, mw_ref, o_ref, *, H, W, WO):
    # classifier (1x1 conv, commuted in front of the bilinear upsample - exact
    # because align_corners=True rows sum to 1) + W-axis x4 upsample (separable).
    logits = jnp.dot(x_ref[...], w_ref[...],
                     preferred_element_type=jnp.float32) + b_ref[...]   # (H*W, nc)
    nc = logits.shape[-1]
    l3 = logits.reshape(H, W, nc).astype(jnp.bfloat16)
    mwb = jnp.broadcast_to(mw_ref[...], (H, WO, W))
    t1 = lax.dot_general(mwb, l3, (((2,), (1,)), ((0,), (0,))),
                         preferred_element_type=jnp.float32)            # (H, WO, nc)
    o_ref[...] = t1.astype(o_ref.dtype)


def _hup_kernel(x_ref, mh_ref, o_ref):
    # H-axis x4 upsample as a plain 2D matmul; the store is lane-dense
    # (last dim = 4*W*nc = 128) so no masked partial stores on the final output.
    o_ref[...] = jnp.dot(mh_ref[...], x_ref[...], preferred_element_type=jnp.float32)


# --------------------------- pallas_call wrappers ---------------------------

def matmul_affine(x, w, scale, shift, residual=None, relu=False,
                  out_dtype=jnp.bfloat16):
    """maybe_relu((x @ w) * scale + shift [+ residual]); row-tiled bf16 matmul."""
    M, K = x.shape
    N = w.shape[1]
    s2 = jnp.asarray(scale, jnp.float32).reshape(1, N)
    b2 = jnp.asarray(shift, jnp.float32).reshape(1, N)
    tm = _pick_tm(M)
    in_specs = [pl.BlockSpec((tm, K), lambda i: (i, 0)),
                pl.BlockSpec((K, N), lambda i: (0, 0)),
                pl.BlockSpec((1, N), lambda i: (0, 0)),
                pl.BlockSpec((1, N), lambda i: (0, 0))]
    args = [x.astype(jnp.bfloat16), w.astype(jnp.bfloat16), s2, b2]
    if residual is not None:
        in_specs.append(pl.BlockSpec((tm, N), lambda i: (i, 0)))
        args.append(residual.astype(jnp.bfloat16))
        kern = functools.partial(_mm_res_kernel, relu=relu)
    else:
        kern = functools.partial(_mm_kernel, relu=relu)
    return pl.pallas_call(
        kern,
        out_shape=jax.ShapeDtypeStruct((M, N), out_dtype),
        grid=(M // tm,),
        in_specs=in_specs,
        out_specs=pl.BlockSpec((tm, N), lambda i: (i, 0)),
        compiler_params=_CPARAMS,
    )(*args)


def _im2col(x, kh, kw, ph, pw, sh=1, sw=1, dh=1, dw=1):
    # TODO(synk): at large resolutions replace with halo BlockSpecs + in-kernel
    # shifted-dot accumulation; at these map sizes the expansion is a few KB.
    n, h, w, c = x.shape
    ho = (h + 2 * ph - dh * (kh - 1) - 1) // sh + 1
    wo = (w + 2 * pw - dw * (kw - 1) - 1) // sw + 1
    xp = jnp.pad(x, ((0, 0), (ph, ph), (pw, pw), (0, 0)))
    cols = []
    for i in range(kh):
        for j in range(kw):
            cols.append(xp[:, i * dh: i * dh + sh * (ho - 1) + 1: sh,
                           j * dw: j * dw + sw * (wo - 1) + 1: sw, :])
    patches = jnp.concatenate(cols, axis=-1).reshape(n * ho * wo, kh * kw * c)
    return patches, ho, wo


def downsampler_fwd(x, p):
    n, h, w, cin = x.shape
    assert h % 2 == 0 and w % 2 == 0, "DownsamplerBlock expects even spatial dims"
    c1 = p['w'].shape[-1]                     # cout - cin (conv channels come first)
    cout = c1 + cin
    patches, ho, wo = _im2col(x, 3, 3, 1, 1, sh=2, sw=2)
    wmat = p['w'].reshape(9 * cin, c1)
    w_full = jnp.concatenate([wmat, jnp.zeros((9 * cin, cin), wmat.dtype)], axis=1)
    place = np.zeros((cin, cout), np.float32)
    place[np.arange(cin), c1 + np.arange(cin)] = 1.0
    scale, shift = p['bn']
    # fold the conv bias into the BN shift of the conv channels
    t = jnp.concatenate([shift[:c1] + scale[:c1] * p['b'], shift[c1:]])
    M = patches.shape[0]
    tm = _pick_tm(M)
    out2d = pl.pallas_call(
        functools.partial(_down_kernel, cin=cin),
        out_shape=jax.ShapeDtypeStruct((M, cout), jnp.bfloat16),
        grid=(M // tm,),
        in_specs=[pl.BlockSpec((tm, 9 * cin), lambda i: (i, 0)),
                  pl.BlockSpec((9 * cin, cout), lambda i: (0, 0)),
                  pl.BlockSpec((cin, cout), lambda i: (0, 0)),
                  pl.BlockSpec((1, cout), lambda i: (0, 0)),
                  pl.BlockSpec((1, cout), lambda i: (0, 0))],
        out_specs=pl.BlockSpec((tm, cout), lambda i: (i, 0)),
        compiler_params=_CPARAMS,
    )(patches.astype(jnp.bfloat16), w_full.astype(jnp.bfloat16),
      jnp.asarray(place, jnp.bfloat16),
      scale.reshape(1, cout).astype(jnp.float32),
      t.reshape(1, cout).astype(jnp.float32))
    return out2d.reshape(n, ho, wo, cout)


def _shuffle_perm(c):
    # channel_shuffle(groups=2): out[..., k] = in[..., (k % 2) * (c // 2) + k // 2]
    k = np.arange(c)
    return (k % 2) * (c // 2) + k // 2


def fcb_tail(xc2d, res2d, p, taps, dil, n, h, w):
    """dilation1 (SeparableConv2d + BN + ReLU) + conv1x1 + residual + ReLU + shuffle."""
    c = xc2d.shape[-1]
    ds, db = p['dbn']
    perm = _shuffle_perm(c)
    w11p = p['w11'][0, 0][:, perm]               # shuffle folded into the 1x1 columns
    pmat = np.zeros((c, c), np.float32)
    pmat[perm, np.arange(c)] = 1.0               # residual permutation (0/1 matmul)
    pw_w = p['pw'][0, 0]
    ds2 = ds.reshape(1, c).astype(jnp.float32)
    db2 = db.reshape(1, c).astype(jnp.float32)

    if list(taps) == [(1, 1)]:
        # dilation >= map size: fold the centre depthwise tap into the pointwise
        # weights and use the row-tiled pure-matmul tail.
        pw_eff = pw_w * p['dw'][1, 1][:, None]
        M = n * h * w
        tm = _pick_tm(M)
        return pl.pallas_call(
            _fcb_tail_pw_kernel,
            out_shape=jax.ShapeDtypeStruct((M, c), jnp.bfloat16),
            grid=(M // tm,),
            in_specs=[pl.BlockSpec((tm, c), lambda i: (i, 0)),
                      pl.BlockSpec((tm, c), lambda i: (i, 0)),
                      pl.BlockSpec((c, c), lambda i: (0, 0)),
                      pl.BlockSpec((1, c), lambda i: (0, 0)),
                      pl.BlockSpec((1, c), lambda i: (0, 0)),
                      pl.BlockSpec((c, c), lambda i: (0, 0)),
                      pl.BlockSpec((c, c), lambda i: (0, 0))],
            out_specs=pl.BlockSpec((tm, c), lambda i: (i, 0)),
            compiler_params=_CPARAMS,
        )(xc2d.astype(jnp.bfloat16), res2d.astype(jnp.bfloat16),
          pw_eff.astype(jnp.bfloat16), ds2, db2,
          w11p.astype(jnp.bfloat16), jnp.asarray(pmat, jnp.bfloat16))

    ph = dil if any(kh != 1 for kh, _ in taps) else 0
    pwid = dil if any(kw != 1 for _, kw in taps) else 0
    xc = xc2d.reshape(n, h, w, c)
    xp = jnp.pad(xc, ((0, 0), (ph, ph), (pwid, pwid), (0, 0)))
    hp, wp = h + 2 * ph, w + 2 * pwid
    kern = functools.partial(_fcb_tail_dw_kernel, taps=tuple(taps), dil=dil,
                             ph=ph, pw=pwid, H=h, W=w)
    return pl.pallas_call(
        kern,
        out_shape=jax.ShapeDtypeStruct((n * h * w, c), jnp.bfloat16),
        grid=(n,),
        in_specs=[pl.BlockSpec((None, hp, wp, c), lambda i: (i, 0, 0, 0)),
                  pl.BlockSpec((h * w, c), lambda i: (i, 0)),
                  pl.BlockSpec((3, 3, c), lambda i: (0, 0, 0)),
                  pl.BlockSpec((c, c), lambda i: (0, 0)),
                  pl.BlockSpec((1, c), lambda i: (0, 0)),
                  pl.BlockSpec((1, c), lambda i: (0, 0)),
                  pl.BlockSpec((c, c), lambda i: (0, 0)),
                  pl.BlockSpec((c, c), lambda i: (0, 0))],
        out_specs=pl.BlockSpec((h * w, c), lambda i: (i, 0)),
        compiler_params=_CPARAMS,
    )(xp.astype(jnp.bfloat16), res2d.astype(jnp.bfloat16),
      p['dw'].astype(jnp.float32), pw_w.astype(jnp.bfloat16), ds2, db2,
      w11p.astype(jnp.bfloat16), jnp.asarray(pmat, jnp.bfloat16))


def _interp_matrix(n_in, n_out):
    # bilinear, align_corners=True (matches F.interpolate(..., align_corners=True))
    m = np.zeros((n_out, n_in), np.float32)
    if n_in == 1:
        m[:, 0] = 1.0
        return m
    for i in range(n_out):
        src = i * (n_in - 1) / (n_out - 1)
        i0 = int(np.floor(src))
        i1 = min(i0 + 1, n_in - 1)
        w1 = src - i0
        m[i, i0] += 1.0 - w1
        m[i, i1] += w1
    return m


def classify_and_upsample_x4(x2d, n, h, w, wcls, bcls):
    """1x1 classifier commuted before the x4 bilinear upsample; separable (W then H)."""
    c = x2d.shape[-1]
    nc = wcls.shape[-1]
    ho, wo = 4 * h, 4 * w
    mh = jnp.asarray(_interp_matrix(h, ho), jnp.bfloat16)   # (ho, h)
    mw = jnp.asarray(_interp_matrix(w, wo), jnp.bfloat16)   # (wo, w)
    t1 = pl.pallas_call(
        functools.partial(_cls_wup_kernel, H=h, W=w, WO=wo),
        out_shape=jax.ShapeDtypeStruct((n, h, wo, nc), jnp.bfloat16),
        grid=(n,),
        in_specs=[pl.BlockSpec((h * w, c), lambda i: (i, 0)),
                  pl.BlockSpec((c, nc), lambda i: (0, 0)),
                  pl.BlockSpec((1, nc), lambda i: (0, 0)),
                  pl.BlockSpec((wo, w), lambda i: (0, 0))],
        out_specs=pl.BlockSpec((None, h, wo, nc), lambda i: (i, 0, 0, 0)),
        compiler_params=_CPARAMS,
    )(x2d.astype(jnp.bfloat16), wcls.astype(jnp.bfloat16),
      bcls.reshape(1, nc).astype(jnp.float32), mw)
    t1f = t1.reshape(n, h, wo * nc)          # free view; makes the final store lane-dense
    out = pl.pallas_call(
        _hup_kernel,
        out_shape=jax.ShapeDtypeStruct((n, ho, wo * nc), jnp.float32),
        grid=(n,),
        in_specs=[pl.BlockSpec((None, h, wo * nc), lambda i: (i, 0, 0)),
                  pl.BlockSpec((ho, h), lambda i: (0, 0))],
        out_specs=pl.BlockSpec((None, ho, wo * nc), lambda i: (i, 0, 0)),
        compiler_params=_CPARAMS,
    )(t1f, mh)
    return out.reshape(n, ho, wo, nc)


# ------------------------------ parameter init ------------------------------

def _init_conv_w(key, kh, kw, cin, cout):
    fan = kh * kw * cin
    return (jax.random.normal(key, (kh, kw, cin, cout), jnp.float32)
            / np.sqrt(fan)).astype(jnp.float32)


def _init_bn(key, c, eps=1e-3):
    k1, k2 = jax.random.split(key)
    gamma = 1.0 + 0.1 * jax.random.normal(k1, (c,), jnp.float32)
    beta = 0.1 * jax.random.normal(k2, (c,), jnp.float32)
    # eval mode: running_mean=0, running_var=1
    return gamma / jnp.sqrt(1.0 + eps), beta


def init_downsampler(key, cin, cout):
    k = jax.random.split(key, 3)
    return dict(
        w=_init_conv_w(k[0], 3, 3, cin, cout - cin),
        b=0.05 * jax.random.normal(k[1], (cout - cin,), jnp.float32),
        bn=_init_bn(k[2], cout, eps=1e-3),
    )


def init_fcb(key, cin, cout, dil):
    c2 = cout // 2
    k = jax.random.split(key, 7)
    return dict(
        w31=_init_conv_w(k[0], 3, 1, cin // 2, c2),
        w13=_init_conv_w(k[1], 1, 3, cin // 2, c2),
        w11=_init_conv_w(k[2], 1, 1, cout, cout),
        bn=_init_bn(k[3], c2, eps=1e-3),
        dw=(jax.random.normal(k[4], (3, 3, cout), jnp.float32) / 3.0),
        pw=_init_conv_w(k[5], 1, 1, cout, cout),
        dbn=_init_bn(k[6], cout, eps=1e-3),
        dil=dil,
    )


def init_fpn(key, pyr_c, skip_c):
    k = jax.random.split(key, 2)
    return dict(w=_init_conv_w(k[0], 1, 1, skip_c, pyr_c),
                b=0.05 * jax.random.normal(k[1], (pyr_c,), jnp.float32))


def init_encoder(key, num_classes):
    ks = iter(jax.random.split(key, 64))
    p = {'initial': init_downsampler(next(ks), 3, 32)}
    layers = []
    for _ in range(3):
        layers.append(('fcb', init_fcb(next(ks), 32, 32, 1)))
    layers.append(('down', init_downsampler(next(ks), 32, 64)))
    for _ in range(2):
        layers.append(('fcb', init_fcb(next(ks), 64, 64, 1)))
    layers.append(('down', init_downsampler(next(ks), 64, 128)))
    for d in (1, 2, 5, 9):
        layers.append(('fcb', init_fcb(next(ks), 128, 128, d)))
    for d in (2, 5, 9, 17):
        layers.append(('fcb', init_fcb(next(ks), 128, 128, d)))
    p['layers'] = layers
    p['p5_w'] = _init_conv_w(next(ks), 1, 1, 128, 128)
    p['p5_b'] = 0.05 * jax.random.normal(next(ks), (128,), jnp.float32)
    p['p4'] = init_fpn(next(ks), 128, 128)
    p['p3'] = init_fpn(next(ks), 128, 64)
    p['cls_w'] = _init_conv_w(next(ks), 1, 1, 128, num_classes)
    p['cls_b'] = 0.05 * jax.random.normal(next(ks), (num_classes,), jnp.float32)
    return p


# ------------------------------- blocks (NHWC) -------------------------------

def _block_diag(a, b):
    ka, na = a.shape
    kb, nb = b.shape
    top = jnp.concatenate([a, jnp.zeros((ka, nb), a.dtype)], axis=1)
    bot = jnp.concatenate([jnp.zeros((kb, na), b.dtype), b], axis=1)
    return jnp.concatenate([top, bot], axis=0)


def fcb_fwd(x, p):
    n, h, w, c = x.shape
    c2 = c // 2
    res2d = x.reshape(n * h * w, c)                # bf16 residual (upcast in-kernel)
    s, b = p['bn']                                 # shared BN (applied after EACH conv)
    s2 = jnp.concatenate([s, s])
    b2 = jnp.concatenate([b, b])
    w31 = p['w31'].reshape(3 * c2, c2)
    w13 = p['w13'].reshape(3 * c2, c2)

    # stage A: branch1 conv3x1 pad (0,1) -> (h-2, w+2); branch2 conv1x3 pad (1,0) -> (h+2, w-2)
    pa1, h1, w1 = _im2col(x[..., :c2], 3, 1, 0, 1)
    pa2, h2, w2 = _im2col(x[..., c2:], 1, 3, 1, 0)
    if pa1.shape[0] == pa2.shape[0]:               # H == W: both branches in one matmul
        yA = matmul_affine(jnp.concatenate([pa1, pa2], axis=-1),
                           _block_diag(w31, w13), s2, b2)
        y1 = yA[:, :c2].reshape(n, h1, w1, c2)
        y2 = yA[:, c2:].reshape(n, h2, w2, c2)
    else:
        y1 = matmul_affine(pa1, w31, s, b).reshape(n, h1, w1, c2)
        y2 = matmul_affine(pa2, w13, s, b).reshape(n, h2, w2, c2)

    # stage B: branch1 conv1x3, branch2 conv3x1 -> both back to (h, w); BN again
    pb1, _, _ = _im2col(y1, 1, 3, 1, 0)
    pb2, _, _ = _im2col(y2, 3, 1, 0, 1)
    xc2d = matmul_affine(jnp.concatenate([pb1, pb2], axis=-1),
                         _block_diag(w13, w31), s2, b2)    # == torch.cat([x1', x2'], C)
    # Dropout2d: identity in eval mode.
    # TODO(synk): training-mode BN statistics / Dropout2d masks are not implemented.

    dil = p['dil']
    taps = [(kh, kw) for kh in range(3) for kw in range(3)
            if abs(kh - 1) * dil < h and abs(kw - 1) * dil < w]
    out2d = fcb_tail(xc2d, res2d, p, taps, dil, n, h, w)   # fused DW+PW+1x1+res+shuffle
    return out2d.reshape(n, h, w, c)


# TODO(synk): FPNBlock / SeparableConv2d definitions are not in the reference file;
# assumed the standard forms (FPN lateral: nearest-upsample x to the skip's
# resolution + biased 1x1 conv on skip + add; SeparableConv2d = depthwise conv
# (padding=dilation, no bias) + pointwise 1x1 (no bias)).
def fpn_fwd(x, skip, p):
    n, hs, ws, cs = skip.shape
    hx, wx = x.shape[1], x.shape[2]
    if (hs, ws) != (hx, wx):
        x = jnp.repeat(jnp.repeat(x, hs // hx, axis=1), ws // wx, axis=2)
    cout = p['w'].shape[-1]
    out2d = matmul_affine(skip.reshape(n * hs * ws, cs), p['w'][0, 0],
                          jnp.ones((cout,), jnp.float32), p['b'],
                          residual=x.reshape(n * hs * ws, cout))
    return out2d.reshape(n, hs, ws, cout)


def encoder_fwd(x_nchw, p):
    x = jnp.transpose(x_nchw, (0, 2, 3, 1)).astype(jnp.bfloat16)   # NCHW -> NHWC, bf16
    out = downsampler_fwd(x, p['initial'])
    feature = []
    for idx, (kind, lp) in enumerate(p['layers']):
        out = downsampler_fwd(out, lp) if kind == 'down' else fcb_fwd(out, lp)
        if idx in (3, 6):
            feature.append(out)

    # p5 (1x1 conv) and the same-resolution p4 lateral fused into one matmul
    n5, h5, w5, c5 = out.shape
    f1 = feature[1]
    pyr = p['p5_w'].shape[-1]
    if f1.shape[1:3] == (h5, w5):
        xcat = jnp.concatenate([out.reshape(n5 * h5 * w5, c5),
                                f1.reshape(n5 * h5 * w5, f1.shape[-1])], axis=-1)
        wcat = jnp.concatenate([p['p5_w'][0, 0], p['p4']['w'][0, 0]], axis=0)
        p4 = matmul_affine(xcat, wcat, jnp.ones((pyr,), jnp.float32),
                           p['p5_b'] + p['p4']['b']).reshape(n5, h5, w5, pyr)
    else:
        p5 = matmul_affine(out.reshape(n5 * h5 * w5, c5), p['p5_w'][0, 0],
                           jnp.ones((pyr,), jnp.float32),
                           p['p5_b']).reshape(n5, h5, w5, pyr)
        p4 = fpn_fwd(p5, f1, p['p4'])
    p3 = fpn_fwd(p4, feature[0], p['p3'])

    n3, h3, w3, c3 = p3.shape
    logits = classify_and_upsample_x4(p3.reshape(n3 * h3 * w3, c3), n3, h3, w3,
                                      p['cls_w'][0, 0], p['cls_b'])
    return jnp.transpose(logits, (0, 3, 1, 2)).astype(jnp.float32)   # NHWC -> NCHW


if __name__ == "__main__":
    num_classes = 4
    key = jax.random.PRNGKey(0)
    kp, kx = jax.random.split(key)
    params = init_encoder(kp, num_classes)
    # NCHW input (matches the PyTorch module); 32x32 keeps every stage valid.
    x = jax.random.normal(kx, (2, 3, 32, 32), jnp.float32)
    # params are closed over so static config (layer kinds, dilations) stays Python.
    fwd = jax.jit(lambda inp: encoder_fwd(inp, params))
    out = jax.block_until_ready(fwd(x))
    assert out.shape == (2, num_classes, 32, 32), out.shape
    assert bool(jnp.all(jnp.isfinite(out)))
    print("KERNEL_OK")
</pallas_src>

<mosaic_0001>
module attributes {stable_mosaic.version = 11 : i64} {
  func.func @_down_kernel(%arg0: i32, %arg1: memref<256x27xbf16, #tpu.memory_space<vmem>>, %arg2: memref<27x32xbf16, #tpu.memory_space<vmem>>, %arg3: memref<3x32xbf16, #tpu.memory_space<vmem>>, %arg4: memref<1x32xf32, #tpu.memory_space<vmem>>, %arg5: memref<1x32xf32, #tpu.memory_space<vmem>>, %arg6: memref<256x32xbf16, #tpu.memory_space<vmem>>) attributes {dimension_semantics = [#tpu.dimension_semantics<parallel>], iteration_bounds = array<i64: 2>, scalar_prefetch = 0 : i64, scratch_operands = 0 : i64, tpu.core_type = #tpu.core_type<tc>, window_params = [{transform_indices = @transform_0, window_bounds = array<i64: 256, 27>}, {pipeline_mode = #tpu.pipeline_mode<synchronous>, transform_indices = @transform_1, window_bounds = array<i64: 27, 32>}, {pipeline_mode = #tpu.pipeline_mode<synchronous>, transform_indices = @transform_2, window_bounds = array<i64: 3, 32>}, {pipeline_mode = #tpu.pipeline_mode<synchronous>, transform_indices = @transform_3, window_bounds = array<i64: 1, 32>}, {pipeline_mode = #tpu.pipeline_mode<synchronous>, transform_indices = @transform_4, window_bounds = array<i64: 1, 32>}, {transform_indices = @transform_5, window_bounds = array<i64: 256, 32>}]} {
    %c0 = arith.constant 0 : index
    %c0_0 = arith.constant 0 : index
    %0 = vector.load %arg1[%c0, %c0_0] : memref<256x27xbf16, #tpu.memory_space<vmem>>, vector<256x27xbf16>
    %c0_1 = arith.constant 0 : index
    %c0_2 = arith.constant 0 : index
    %1 = vector.load %arg2[%c0_1, %c0_2] : memref<27x32xbf16, #tpu.memory_space<vmem>>, vector<27x32xbf16>
    %cst = arith.constant dense<0.000000e+00> : vector<256x32xf32>
    %2 = tpu.matmul %0, %1, %cst {dimension_numbers = #tpu.dot_dimension_numbers<[1], [0], [0], [1], [0, 0, 1, 1], [], []>} : vector<256x27xbf16>, vector<27x32xbf16>, vector<256x32xf32> -> vector<256x32xf32>
    %3 = vector.extract_strided_slice %0 {offsets = [0, 12], sizes = [256, 3], strides = [1, 1]} : vector<256x27xbf16> to vector<256x3xbf16>
    %4 = vector.extract_strided_slice %0 {offsets = [0, 15], sizes = [256, 3], strides = [1, 1]} : vector<256x27xbf16> to vector<256x3xbf16>
    %5 = arith.maximumf %3, %4 : vector<256x3xbf16>
    %6 = vector.extract_strided_slice %0 {offsets = [0, 21], sizes = [256, 3], strides = [1, 1]} : vector<256x27xbf16> to vector<256x3xbf16>
    %7 = vector.extract_strided_slice %0 {offsets = [0, 24], sizes = [256, 3], strides = [1, 1]} : vector<256x27xbf16> to vector<256x3xbf16>
    %8 = arith.maximumf %6, %7 : vector<256x3xbf16>
    %9 = arith.maximumf %5, %8 : vector<256x3xbf16>
    %c0_3 = arith.constant 0 : index
    %c0_4 = arith.constant 0 : index
    %10 = vector.load %arg3[%c0_3, %c0_4] : memref<3x32xbf16, #tpu.memory_space<vmem>>, vector<3x32xbf16>
    %cst_5 = arith.constant dense<0.000000e+00> : vector<256x32xf32>
    %11 = tpu.matmul %9, %10, %cst_5 {dimension_numbers = #tpu.dot_dimension_numbers<[1], [0], [0], [1], [0, 0, 1, 1], [], []>} : vector<256x3xbf16>, vector<3x32xbf16>, vector<256x32xf32> -> vector<256x32xf32>
    %12 = arith.addf %2, %11 : vector<256x32xf32>
    %c0_6 = arith.constant 0 : index
    %c0_7 = arith.constant 0 : index
    %13 = vector.load %arg4[%c0_6, %c0_7] : memref<1x32xf32, #tpu.memory_space<vmem>>, vector<1x32xf32>
    %14 = vector.broadcast %13 : vector<1x32xf32> to vector<256x32xf32>
    %15 = arith.mulf %12, %14 : vector<256x32xf32>
    %c0_8 = arith.constant 0 : index
    %c0_9 = arith.constant 0 : index
    %16 = vector.load %arg5[%c0_8, %c0_9] : memref<1x32xf32, #tpu.memory_space<vmem>>, vector<1x32xf32>
    %17 = vector.broadcast %16 : vector<1x32xf32> to vector<256x32xf32>
    %18 = arith.addf %15, %17 : vector<256x32xf32>
    %cst_10 = arith.constant 0.000000e+00 : f32
    %19 = vector.broadcast %cst_10 : f32 to vector<256x32xf32>
    %20 = arith.maximumf %18, %19 : vector<256x32xf32>
    %21 = arith.truncf %20 : vector<256x32xf32> to vector<256x32xbf16>
    %c0_11 = arith.constant 0 : index
    %c0_12 = arith.constant 0 : index
    %22 = vector.load %arg6[%c0_11, %c0_12] : memref<256x32xbf16, #tpu.memory_space<vmem>>, vector<256x32xbf16>
    tpu.vector_store %arg6[%c0_11, %c0_12], %21 {strides = array<i32>} : memref<256x32xbf16, #tpu.memory_space<vmem>>, vector<256x32xbf16>,
    return
  }
  func.func @transform_0(%arg0: i32) -> (i32, i32) {
    %c0_i32 = arith.constant 0 : i32
    %c0_i32_0 = arith.constant 0 : i32
    return %arg0, %c0_i32 : i32, i32
  }
  func.func @transform_1(%arg0: i32) -> (i32, i32) {
    %c0_i32 = arith.constant 0 : i32
    %c0_i32_0 = arith.constant 0 : i32
    %c0_i32_1 = arith.constant 0 : i32
    return %c0_i32, %c0_i32_0 : i32, i32
  }
  func.func @transform_2(%arg0: i32) -> (i32, i32) {
    %c0_i32 = arith.constant 0 : i32
    %c0_i32_0 = arith.constant 0 : i32
    %c0_i32_1 = arith.constant 0 : i32
    return %c0_i32, %c0_i32_0 : i32, i32
  }
  func.func @transform_3(%arg0: i32) -> (i32, i32) {
    %c0_i32 = arith.constant 0 : i32
    %c0_i32_0 = arith.constant 0 : i32
    %c0_i32_1 = arith.constant 0 : i32
    return %c0_i32, %c0_i32_0 : i32, i32
  }
  func.func @transform_4(%arg0: i32) -> (i32, i32) {
    %c0_i32 = arith.constant 0 : i32
    %c0_i32_0 = arith.constant 0 : i32
    %c0_i32_1 = arith.constant 0 : i32
    return %c0_i32, %c0_i32_0 : i32, i32
  }
  func.func @transform_5(%arg0: i32) -> (i32, i32) {
    %c0_i32 = arith.constant 0 : i32
    %c0_i32_0 = arith.constant 0 : i32
    return %arg0, %c0_i32 : i32, i32
  }
}

module attributes {stable_mosaic.version = 11 : i64} {
  func.func @_mm_kernel(%arg0: i32, %arg1: memref<168x96xbf16, #tpu.memory_space<vmem>>, %arg2: memref<96x32xbf16, #tpu.memory_space<vmem>>, %arg3: memref<1x32xf32, #tpu.memory_space<vmem>>, %arg4: memref<1x32xf32, #tpu.memory_space<vmem>>, %arg5: memref<168x32xbf16, #tpu.memory_space<vmem>>) attributes {dimension_semantics = [#tpu.dimension_semantics<parallel>], iteration_bounds = array<i64: 3>, scalar_prefetch = 0 : i64, scratch_operands = 0 : i64, tpu.core_type = #tpu.core_type<tc>, window_params = [{transform_indices = @transform_0, window_bounds = array<i64: 168, 96>}, {pipeline_mode = #tpu.pipeline_mode<synchronous>, transform_indices = @transform_1, window_bounds = array<i64: 96, 32>}, {pipeline_mode = #tpu.pipeline_mode<synchronous>, transform_indices = @transform_2, window_bounds = array<i64: 1, 32>}, {pipeline_mode = #tpu.pipeline_mode<synchronous>, transform_indices = @transform_3, window_bounds = array<i64: 1, 32>}, {transform_indices = @transform_4, window_bounds = array<i64: 168, 32>}]} {
    %c0 = arith.constant 0 : index
    %c0_0 = arith.constant 0 : index
    %0 = vector.load %arg1[%c0, %c0_0] : memref<168x96xbf16, #tpu.memory_space<vmem>>, vector<168x96xbf16>
    %c0_1 = arith.constant 0 : index
    %c0_2 = arith.constant 0 : index
    %1 = vector.load %arg2[%c0_1, %c0_2] : memref<96x32xbf16, #tpu.memory_space<vmem>>, vector<96x32xbf16>
    %cst = arith.constant dense<0.000000e+00> : vector<168x32xf32>
    %2 = tpu.matmul %0, %1, %cst {dimension_numbers = #tpu.dot_dimension_numbers<[1], [0], [0], [1], [0, 0, 1, 1], [], []>} : vector<168x96xbf16>, vector<96x32xbf16>, vector<168x32xf32> -> vector<168x32xf32>
    %c0_3 = arith.constant 0 : index
    %c0_4 = arith.constant 0 : index
    %3 = vector.load %arg3[%c0_3, %c0_4] : memref<1x32xf32, #tpu.memory_space<vmem>>, vector<1x32xf32>
    %4 = vector.broadcast %3 : vector<1x32xf32> to vector<168x32xf32>
    %5 = arith.mulf %2, %4 : vector<168x32xf32>
    %c0_5 = arith.constant 0 : index
    %c0_6 = arith.constant 0 : index
    %6 = vector.load %arg4[%c0_5, %c0_6] : memref<1x32xf32, #tpu.memory_space<vmem>>, vector<1x32xf32>
    %7 = vector.broadcast %6 : vector<1x32xf32> to vector<168x32xf32>
    %8 = arith.addf %5, %7 : vector<168x32xf32>
    %9 = arith.truncf %8 : vector<168x32xf32> to vector<168x32xbf16>
    %c0_7 = arith.constant 0 : index
    %c0_8 = arith.constant 0 : index
    %10 = vector.load %arg5[%c0_7, %c0_8] : memref<168x32xbf16, #tpu.memory_space<vmem>>, vector<168x32xbf16>
    tpu.vector_store %arg5[%c0_7, %c0_8], %9 {strides = array<i32>} : memref<168x32xbf16, #tpu.memory_space<vmem>>, vector<168x32xbf16>,
    return
  }
  func.func @transform_0(%arg0: i32) -> (i32, i32) {
    %c0_i32 = arith.constant 0 : i32
    %c0_i32_0 = arith.constant 0 : i32
    return %arg0, %c0_i32 : i32, i32
  }
  func.func @transform_1(%arg0: i32) -> (i32, i32) {
    %c0_i32 = arith.constant 0 : i32
    %c0_i32_0 = arith.constant 0 : i32
    %c0_i32_1 = arith.constant 0 : i32
    return %c0_i32, %c0_i32_0 : i32, i32
  }
  func.func @transform_2(%arg0: i32) -> (i32, i32) {
    %c0_i32 = arith.constant 0 : i32
    %c0_i32_0 = arith.constant 0 : i32
    %c0_i32_1 = arith.constant 0 : i32
    return %c0_i32, %c0_i32_0 : i32, i32
  }
  func.func @transform_3(%arg0: i32) -> (i32, i32) {
    %c0_i32 = arith.constant 0 : i32
    %c0_i32_0 = arith.constant 0 : i32
    %c0_i32_1 = arith.constant 0 : i32
    return %c0_i32, %c0_i32_0 : i32, i32
  }
  func.func @transform_4(%arg0: i32) -> (i32, i32) {
    %c0_i32 = arith.constant 0 : i32
    %c0_i32_0 = arith.constant 0 : i32
    return %arg0, %c0_i32 : i32, i32
  }
}

module attributes {stable_mosaic.version = 11 : i64} {
  func.func @_mm_kernel(%arg0: i32, %arg1: memref<256x96xbf16, #tpu.memory_space<vmem>>, %arg2: memref<96x32xbf16, #tpu.memory_space<vmem>>, %arg3: memref<1x32xf32, #tpu.memory_space<vmem>>, %arg4: memref<1x32xf32, #tpu.memory_space<vmem>>, %arg5: memref<256x32xbf16, #tpu.memory_space<vmem>>) attributes {dimension_semantics = [#tpu.dimension_semantics<parallel>], iteration_bounds = array<i64: 2>, scalar_prefetch = 0 : i64, scratch_operands = 0 : i64, tpu.core_type = #tpu.core_type<tc>, window_params = [{transform_indices = @transform_0, window_bounds = array<i64: 256, 96>}, {pipeline_mode = #tpu.pipeline_mode<synchronous>, transform_indices = @transform_1, window_bounds = array<i64: 96, 32>}, {pipeline_mode = #tpu.pipeline_mode<synchronous>, transform_indices = @transform_2, window_bounds = array<i64: 1, 32>}, {pipeline_mode = #tpu.pipeline_mode<synchronous>, transform_indices = @transform_3, window_bounds = array<i64: 1, 32>}, {transform_indices = @transform_4, window_bounds = array<i64: 256, 32>}]} {
    %c0 = arith.constant 0 : index
    %c0_0 = arith.constant 0 : index
    %0 = vector.load %arg1[%c0, %c0_0] : memref<256x96xbf16, #tpu.memory_space<vmem>>, vector<256x96xbf16>
    %c0_1 = arith.constant 0 : index
    %c0_2 = arith.constant 0 : index
    %1 = vector.load %arg2[%c0_1, %c0_2] : memref<96x32xbf16, #tpu.memory_space<vmem>>, vector<96x32xbf16>
    %cst = arith.constant dense<0.000000e+00> : vector<256x32xf32>
    %2 = tpu.matmul %0, %1, %cst {dimension_numbers = #tpu.dot_dimension_numbers<[1], [0], [0], [1], [0, 0, 1, 1], [], []>} : vector<256x96xbf16>, vector<96x32xbf16>, vector<256x32xf32> -> vector<256x32xf32>
    %c0_3 = arith.constant 0 : index
    %c0_4 = arith.constant 0 : index
    %3 = vector.load %arg3[%c0_3, %c0_4] : memref<1x32xf32, #tpu.memory_space<vmem>>, vector<1x32xf32>
    %4 = vector.broadcast %3 : vector<1x32xf32> to vector<256x32xf32>
    %5 = arith.mulf %2, %4 : vector<256x32xf32>
    %c0_5 = arith.constant 0 : index
    %c0_6 = arith.constant 0 : index
    %6 = vector.load %arg4[%c0_5, %c0_6] : memref<1x32xf32, #tpu.memory_space<vmem>>, vector<1x32xf32>
    %7 = vector.broadcast %6 : vector<1x32xf32> to vector<256x32xf32>
    %8 = arith.addf %5, %7 : vector<256x32xf32>
    %9 = arith.truncf %8 : vector<256x32xf32> to vector<256x32xbf16>
    %c0_7 = arith.constant 0 : index
    %c0_8 = arith.constant 0 : index
    %10 = vector.load %arg5[%c0_7, %c0_8] : memref<256x32xbf16, #tpu.memory_space<vmem>>, vector<256x32xbf16>
    tpu.vector_store %arg5[%c0_7, %c0_8], %9 {strides = array<i32>} : memref<256x32xbf16, #tpu.memory_space<vmem>>, vector<256x32xbf16>,
    return
  }
  func.func @transform_0(%arg0: i32) -> (i32, i32) {
    %c0_i32 = arith.constant 0 : i32
    %c0_i32_0 = arith.constant 0 : i32
    return %arg0, %c0_i32 : i32, i32
  }
  func.func @transform_1(%arg0: i32) -> (i32, i32) {
    %c0_i32 = arith.constant 0 : i32
    %c0_i32_0 = arith.constant 0 : i32
    %c0_i32_1 = arith.constant 0 : i32
    return %c0_i32, %c0_i32_0 : i32, i32
  }
  func.func @transform_2(%arg0: i32) -> (i32, i32) {
    %c0_i32 = arith.constant 0 : i32
    %c0_i32_0 = arith.constant 0 : i32
    %c0_i32_1 = arith.constant 0 : i32
    return %c0_i32, %c0_i32_0 : i32, i32
  }
  func.func @transform_3(%arg0: i32) -> (i32, i32) {
    %c0_i32 = arith.constant 0 : i32
    %c0_i32_0 = arith.constant 0 : i32
    %c0_i32_1 = arith.constant 0 : i32
    return %c0_i32, %c0_i32_0 : i32, i32
  }
  func.func @transform_4(%arg0: i32) -> (i32, i32) {
    %c0_i32 = arith.constant 0 : i32
    %c0_i32_0 = arith.constant 0 : i32
    return %arg0, %c0_i32 : i32, i32
  }
}

module attributes {stable_mosaic.version = 11 : i64} {
  func.func @_fcb_tail_dw_kernel(%arg0: i32, %arg1: memref<1x18x18x32xbf16, #tpu.memory_space<vmem>>, %arg2: memref<256x32xbf16, #tpu.memory_space<vmem>>, %arg3: memref<3x3x32xf32, #tpu.memory_space<vmem>>, %arg4: memref<32x32xbf16, #tpu.memory_space<vmem>>, %arg5: memref<1x32xf32, #tpu.memory_space<vmem>>, %arg6: memref<1x32xf32, #tpu.memory_space<vmem>>, %arg7: memref<32x32xbf16, #tpu.memory_space<vmem>>, %arg8: memref<32x32xbf16, #tpu.memory_space<vmem>>, %arg9: memref<256x32xbf16, #tpu.memory_space<vmem>>) attributes {dimension_semantics = [#tpu.dimension_semantics<parallel>], iteration_bounds = array<i64: 2>, scalar_prefetch = 0 : i64, scratch_operands = 0 : i64, tpu.core_type = #tpu.core_type<tc>, window_params = [{transform_indices = @transform_0, window_bounds = array<i64: 1, 18, 18, 32>}, {transform_indices = @transform_1, window_bounds = array<i64: 256, 32>}, {pipeline_mode = #tpu.pipeline_mode<synchronous>, transform_indices = @transform_2, window_bounds = array<i64: 3, 3, 32>}, {pipeline_mode = #tpu.pipeline_mode<synchronous>, transform_indices = @transform_3, window_bounds = array<i64: 32, 32>}, {pipeline_mode = #tpu.pipeline_mode<synchronous>, transform_indices = @transform_4, window_bounds = array<i64: 1, 32>}, {pipeline_mode = #tpu.pipeline_mode<synchronous>, transform_indices = @transform_5, window_bounds = array<i64: 1, 32>}, {pipeline_mode = #tpu.pipeline_mode<synchronous>, transform_indices = @transform_6, window_bounds = array<i64: 32, 32>}, {pipeline_mode = #tpu.pipeline_mode<synchronous>, transform_indices = @transform_7, window_bounds = array<i64: 32, 32>}, {transform_indices = @transform_8, window_bounds = array<i64: 256, 32>}]} {
    %c0 = arith.constant 0 : index
    %c0_0 = arith.constant 0 : index
    %c0_1 = arith.constant 0 : index
    %c0_2 = arith.constant 0 : index
    %0 = vector.load %arg1[%c0, %c0_0, %c0_1, %c0_2] : memref<1x18x18x32xbf16, #tpu.memory_space<vmem>>, vector<1x18x18x32xbf16>
    %1 = vector.shape_cast %0 : vector<1x18x18x32xbf16> to vector<18x18x32xbf16>
    %c0_3 = arith.constant 0 : index
    %c0_4 = arith.constant 0 : index
    %c0_5 = arith.constant 0 : index
    %2 = vector.load %arg3[%c0_3, %c0_4, %c0_5] : memref<3x3x32xf32, #tpu.memory_space<vmem>>, vector<3x3x32xf32>
    %cst = arith.constant 0.000000e+00 : f32
    %3 = vector.broadcast %cst : f32 to vector<16x16x32xf32>
    %4 = vector.extract_strided_slice %1 {offsets = [0, 0, 0], sizes = [16, 16, 32], strides = [1, 1, 1]} : vector<18x18x32xbf16> to vector<16x16x32xbf16>
    %5 = arith.extf %4 : vector<16x16x32xbf16> to vector<16x16x32xf32>
    %6 = vector.extract_strided_slice %2 {offsets = [0, 0, 0], sizes = [1, 1, 32], strides = [1, 1, 1]} : vector<3x3x32xf32> to vector<1x1x32xf32>
    %7 = vector.shape_cast %6 : vector<1x1x32xf32> to vector<32xf32>
    %8 = vector.shape_cast %7 : vector<32xf32> to vector<1x1x32xf32>
    %9 = vector.broadcast %8 : vector<1x1x32xf32> to vector<16x16x32xf32>
    %10 = arith.mulf %5, %9 : vector<16x16x32xf32>
    %11 = arith.addf %3, %10 : vector<16x16x32xf32>
    %12 = vector.extract_strided_slice %1 {offsets = [0, 1, 0], sizes = [16, 16, 32], strides = [1, 1, 1]} : vector<18x18x32xbf16> to vector<16x16x32xbf16>
    %13 = arith.extf %12 : vector<16x16x32xbf16> to vector<16x16x32xf32>
    %14 = vector.extract_strided_slice %2 {offsets = [0, 1, 0], sizes = [1, 1, 32], strides = [1, 1, 1]} : vector<3x3x32xf32> to vector<1x1x32xf32>
    %15 = vector.shape_cast %14 : vector<1x1x32xf32> to vector<32xf32>
    %16 = vector.shape_cast %15 : vector<32xf32> to vector<1x1x32xf32>
    %17 = vector.broadcast %16 : vector<1x1x32xf32> to vector<16x16x32xf32>
    %18 = arith.mulf %13, %17 : vector<16x16x32xf32>
    %19 = arith.addf %11, %18 : vector<16x16x32xf32>
    %20 = vector.extract_strided_slice %1 {offsets = [0, 2, 0], sizes = [16, 16, 32], strides = [1, 1, 1]} : vector<18x18x32xbf16> to vector<16x16x32xbf16>
    %21 = arith.extf %20 : vector<16x16x32xbf16> to vector<16x16x32xf32>
    %22 = vector.extract_strided_slice %2 {offsets = [0, 2, 0], sizes = [1, 1, 32], strides = [1, 1, 1]} : vector<3x3x32xf32> to vector<1x1x32xf32>
    %23 = vector.shape_cast %22 : vector<1x1x32xf32> to vector<32xf32>
    %24 = vector.shape_cast %23 : vector<32xf32> to vector<1x1x32xf32>
    %25 = vector.broadcast %24 : vector<1x1x32xf32> to vector<16x16x32xf32>
    %26 = arith.mulf %21, %25 : vector<16x16x32xf32>
    %27 = arith.addf %19, %26 : vector<16x16x32xf32>
    %28 = vector.extract_strided_slice %1 {offsets = [1, 0, 0], sizes = [16, 16, 32], strides = [1, 1, 1]} : vector<18x18x32xbf16> to vector<16x16x32xbf16>
    %29 = arith.extf %28 : vector<16x16x32xbf16> to vector<16x16x32xf32>
    %30 = vector.extract_strided_slice %2 {offsets = [1, 0, 0], sizes = [1, 1, 32], strides = [1, 1, 1]} : vector<3x3x32xf32> to vector<1x1x32xf32>
    %31 = vector.shape_cast %30 : vector<1x1x32xf32> to vector<32xf32>
    %32 = vector.shape_cast %31 : vector<32xf32> to vector<1x1x32xf32>
    %33 = vector.broadcast %32 : vector<1x1x32xf32> to vector<16x16x32xf32>
    %34 = arith.mulf %29, %33 : vector<16x16x32xf32>
    %35 = arith.addf %27, %34 : vector<16x16x32xf32>
    %36 = vector.extract_strided_slice %1 {offsets = [1, 1, 0], sizes = [16, 16, 32], strides = [1, 1, 1]} : vector<18x18x32xbf16> to vector<16x16x32xbf16>
    %37 = arith.extf %36 : vector<16x16x32xbf16> to vector<16x16x32xf32>
    %38 = vector.extract_strided_slice %2 {offsets = [1, 1, 0], sizes = [1, 1, 32], strides = [1, 1, 1]} : vector<3x3x32xf32> to vector<1x1x32xf32>
    %39 = vector.shape_cast %38 : vector<1x1x32xf32> to vector<32xf32>
    %40 = vector.shape_cast %39 : vector<32xf32> to vector<1x1x32xf32>
    %41 = vector.broadcast %40 : vector<1x1x32xf32> to vector<16x16x32xf32>
    %42 = arith.mulf %37, %41 : vector<16x16x32xf32>
    %43 = arith.addf %35, %42 : vector<16x16x32xf32>
    %44 = vector.extract_strided_slice %1 {offsets = [1, 2, 0], sizes = [16, 16, 32], strides = [1, 1, 1]} : vector<18x18x32xbf16> to vector<16x16x32xbf16>
    %45 = arith.extf %44 : vector<16x16x32xbf16> to vector<16x16x32xf32>
    %46 = vector.extract_strided_slice %2 {offsets = [1, 2, 0], sizes = [1, 1, 32], strides = [1, 1, 1]} : vector<3x3x32xf32> to vector<1x1x32xf32>
    %47 = vector.shape_cast %46 : vector<1x1x32xf32> to vector<32xf32>
    %48 = vector.shape_cast %47 : vector<32xf32> to vector<1x1x32xf32>
    %49 = vector.broadcast %48 : vector<1x1x32xf32> to vector<16x16x32xf32>
    %50 = arith.mulf %45, %49 : vector<16x16x32xf32>
    %51 = arith.addf %43, %50 : vector<16x16x32xf32>
    %52 = vector.extract_strided_slice %1 {offsets = [2, 0, 0], sizes = [16, 16, 32], strides = [1, 1, 1]} : vector<18x18x32xbf16> to vector<16x16x32xbf16>
    %53 = arith.extf %52 : vector<16x16x32xbf16> to vector<16x16x32xf32>
    %54 = vector.extract_strided_slice %2 {offsets = [2, 0, 0], sizes = [1, 1, 32], strides = [1, 1, 1]} : vector<3x3x32xf32> to vector<1x1x32xf32>
    %55 = vector.shape_cast %54 : vector<1x1x32xf32> to vector<32xf32>
    %56 = vector.shape_cast %55 : vector<32xf32> to vector<1x1x32xf32>
    %57 = vector.broadcast %56 : vector<1x1x32xf32> to vector<16x16x32xf32>
    %58 = arith.mulf %53, %57 : vector<16x16x32xf32>
    %59 = arith.addf %51, %58 : vector<16x16x32xf32>
    %60 = vector.extract_strided_slice %1 {offsets = [2, 1, 0], sizes = [16, 16, 32], strides = [1, 1, 1]} : vector<18x18x32xbf16> to vector<16x16x32xbf16>
    %61 = arith.extf %60 : vector<16x16x32xbf16> to vector<16x16x32xf32>
    %62 = vector.extract_strided_slice %2 {offsets = [2, 1, 0], sizes = [1, 1, 32], strides = [1, 1, 1]} : vector<3x3x32xf32> to vector<1x1x32xf32>
    %63 = vector.shape_cast %62 : vector<1x1x32xf32> to vector<32xf32>
    %64 = vector.shape_cast %63 : vector<32xf32> to vector<1x1x32xf32>
    %65 = vector.broadcast %64 : vector<1x1x32xf32> to vector<16x16x32xf32>
    %66 = arith.mulf %61, %65 : vector<16x16x32xf32>
    %67 = arith.addf %59, %66 : vector<16x16x32xf32>
    %68 = vector.extract_strided_slice %1 {offsets = [2, 2, 0], sizes = [16, 16, 32], strides = [1, 1, 1]} : vector<18x18x32xbf16> to vector<16x16x32xbf16>
    %69 = arith.extf %68 : vector<16x16x32xbf16> to vector<16x16x32xf32>
    %70 = vector.extract_strided_slice %2 {offsets = [2, 2, 0], sizes = [1, 1, 32], strides = [1, 1, 1]} : vector<3x3x32xf32> to vector<1x1x32xf32>
    %71 = vector.shape_cast %70 : vector<1x1x32xf32> to vector<32xf32>
    %72 = vector.shape_cast %71 : vector<32xf32> to vector<1x1x32xf32>
    %73 = vector.broadcast %72 : vector<1x1x32xf32> to vector<16x16x32xf32>
    %74 = arith.mulf %69, %73 : vector<16x16x32xf32>
    %75 = arith.addf %67, %74 : vector<16x16x32xf32>
    %76 = vector.shape_cast %75 : vector<16x16x32xf32> to vector<256x32xf32>
    %77 = arith.truncf %76 : vector<256x32xf32> to vector<256x32xbf16>
    %c0_6 = arith.constant 0 : index
    %c0_7 = arith.constant 0 : index
    %78 = vector.load %arg4[%c0_6, %c0_7] : memref<32x32xbf16, #tpu.memory_space<vmem>>, vector<32x32xbf16>
    %cst_8 = arith.constant dense<0.000000e+00> : vector<256x32xf32>
    %79 = tpu.matmul %77, %78, %cst_8 {dimension_numbers = #tpu.dot_dimension_numbers<[1], [0], [0], [1], [0, 0, 1, 1], [], []>} : vector<256x32xbf16>, vector<32x32xbf16>, vector<256x32xf32> -> vector<256x32xf32>
    %c0_9 = arith.constant 0 : index
    %c0_10 = arith.constant 0 : index
    %80 = vector.load %arg5[%c0_9, %c0_10] : memref<1x32xf32, #tpu.memory_space<vmem>>, vector<1x32xf32>
    %81 = vector.broadcast %80 : vector<1x32xf32> to vector<256x32xf32>
    %82 = arith.mulf %79, %81 : vector<256x32xf32>
    %c0_11 = arith.constant 0 : index
    %c0_12 = arith.constant 0 : index
    %83 = vector.load %arg6[%c0_11, %c0_12] : memref<1x32xf32, #tpu.memory_space<vmem>>, vector<1x32xf32>
    %84 = vector.broadcast %83 : vector<1x32xf32> to vector<256x32xf32>
    %85 = arith.addf %82, %84 : vector<256x32xf32>
    %cst_13 = arith.constant 0.000000e+00 : f32
    %86 = vector.broadcast %cst_13 : f32 to vector<256x32xf32>
    %87 = arith.maximumf %85, %86 : vector<256x32xf32>
    %88 = arith.truncf %87 : vector<256x32xf32> to vector<256x32xbf16>
    %c0_14 = arith.constant 0 : index
    %c0_15 = arith.constant 0 : index
    %89 = vector.load %arg7[%c0_14, %c0_15] : memref<32x32xbf16, #tpu.memory_space<vmem>>, vector<32x32xbf16>
    %cst_16 = arith.constant dense<0.000000e+00> : vector<256x32xf32>
    %90 = tpu.matmul %88, %89, %cst_16 {dimension_numbers = #tpu.dot_dimension_numbers<[1], [0], [0], [1], [0, 0, 1, 1], [], []>} : vector<256x32xbf16>, vector<32x32xbf16>, vector<256x32xf32> -> vector<256x32xf32>
    %c0_17 = arith.constant 0 : index
    %c0_18 = arith.constant 0 : index
    %91 = vector.load %arg2[%c0_17, %c0_18] : memref<256x32xbf16, #tpu.memory_space<vmem>>, vector<256x32xbf16>
    %c0_19 = arith.constant 0 : index
    %c0_20 = arith.constant 0 : index
    %92 = vector.load %arg8[%c0_19, %c0_20] : memref<32x32xbf16, #tpu.memory_space<vmem>>, vector<32x32xbf16>
    %cst_21 = arith.constant dense<0.000000e+00> : vector<256x32xf32>
    %93 = tpu.matmul %91, %92, %cst_21 {dimension_numbers = #tpu.dot_dimension_numbers<[1], [0], [0], [1], [0, 0, 1, 1], [], []>} : vector<256x32xbf16>, vector<32x32xbf16>, vector<256x32xf32> -> vector<256x32xf32>
    %94 = arith.addf %90, %93 : vector<256x32xf32>
    %cst_22 = arith.constant 0.000000e+00 : f32
    %95 = vector.broadcast %cst_22 : f32 to vector<256x32xf32>
    %96 = arith.maximumf %94, %95 : vector<256x32xf32>
    %97 = arith.truncf %96 : vector<256x32xf32> to vector<256x32xbf16>
    %c0_23 = arith.constant 0 : index
    %c0_24 = arith.constant 0 : index
    %98 = vector.load %arg9[%c0_23, %c0_24] : memref<256x32xbf16, #tpu.memory_space<vmem>>, vector<256x32xbf16>
    tpu.vector_store %arg9[%c0_23, %c0_24], %97 {strides = array<i32>} : memref<256x32xbf16, #tpu.memory_space<vmem>>, vector<256x32xbf16>,
    return
  }
  func.func @transform_0(%arg0: i32) -> (i32, i32, i32, i32) {
    %c0_i32 = arith.constant 0 : i32
    %c0_i32_0 = arith.constant 0 : i32
    %c0_i32_1 = arith.constant 0 : i32
    %c0_i32_2 = arith.constant 0 : i32
    return %arg0, %c0_i32, %c0_i32_0, %c0_i32_1 : i32, i32, i32, i32
  }
  func.func @transform_1(%arg0: i32) -> (i32, i32) {
    %c0_i32 = arith.constant 0 : i32
    %c0_i32_0 = arith.constant 0 : i32
    return %arg0, %c0_i32 : i32, i32
  }
  func.func @transform_2(%arg0: i32) -> (i32, i32, i32) {
    %c0_i32 = arith.constant 0 : i32
    %c0_i32_0 = arith.constant 0 : i32
    %c0_i32_1 = arith.constant 0 : i32
    %c0_i32_2 = arith.constant 0 : i32
    return %c0_i32, %c0_i32_0, %c0_i32_1 : i32, i32, i32
  }
  func.func @transform_3(%arg0: i32) -> (i32, i32) {
    %c0_i32 = arith.constant 0 : i32
    %c0_i32_0 = arith.constant 0 : i32
    %c0_i32_1 = arith.constant 0 : i32
    return %c0_i32, %c0_i32_0 : i32, i32
  }
  func.func @transform_4(%arg0: i32) -> (i32, i32) {
    %c0_i32 = arith.constant 0 : i32
    %c0_i32_0 = arith.constant 0 : i32
    %c0_i32_1 = arith.constant 0 : i32
    return %c0_i32, %c0_i32_0 : i32, i32
  }
  func.func @transform_5(%arg0: i32) -> (i32, i32) {
    %c0_i32 = arith.constant 0 : i32
    %c0_i32_0 = arith.constant 0 : i32
    %c0_i32_1 = arith.constant 0 : i32
    return %c0_i32, %c0_i32_0 : i32, i32
  }
  func.func @transform_6(%arg0: i32) -> (i32, i32) {
    %c0_i32 = arith.constant 0 : i32
    %c0_i32_0 = arith.constant 0 : i32
    %c0_i32_1 = arith.constant 0 : i32
    return %c0_i32, %c0_i32_0 : i32, i32
  }
  func.func @transform_7(%arg0: i32) -> (i32, i32) {
    %c0_i32 = arith.constant 0 : i32
    %c0_i32_0 = arith.constant 0 : i32
    %c0_i32_1 = arith.constant 0 : i32
    return %c0_i32, %c0_i32_0 : i32, i32
  }
  func.func @transform_8(%arg0: i32) -> (i32, i32) {
    %c0_i32 = arith.constant 0 : i32
    %c0_i32_0 = arith.constant 0 : i32
    return %arg0, %c0_i32 : i32, i32
  }
}

module attributes {stable_mosaic.version = 11 : i64} {
  func.func @_down_kernel(%arg0: i32, %arg1: memref<64x288xbf16, #tpu.memory_space<vmem>>, %arg2: memref<288x64xbf16, #tpu.memory_space<vmem>>, %arg3: memref<32x64xbf16, #tpu.memory_space<vmem>>, %arg4: memref<1x64xf32, #tpu.memory_space<vmem>>, %arg5: memref<1x64xf32, #tpu.memory_space<vmem>>, %arg6: memref<64x64xbf16, #tpu.memory_space<vmem>>) attributes {dimension_semantics = [#tpu.dimension_semantics<parallel>], iteration_bounds = array<i64: 2>, scalar_prefetch = 0 : i64, scratch_operands = 0 : i64, tpu.core_type = #tpu.core_type<tc>, window_params = [{transform_indices = @transform_0, window_bounds = array<i64: 64, 288>}, {pipeline_mode = #tpu.pipeline_mode<synchronous>, transform_indices = @transform_1, window_bounds = array<i64: 288, 64>}, {pipeline_mode = #tpu.pipeline_mode<synchronous>, transform_indices = @transform_2, window_bounds = array<i64: 32, 64>}, {pipeline_mode = #tpu.pipeline_mode<synchronous>, transform_indices = @transform_3, window_bounds = array<i64: 1, 64>}, {pipeline_mode = #tpu.pipeline_mode<synchronous>, transform_indices = @transform_4, window_bounds = array<i64: 1, 64>}, {transform_indices = @transform_5, window_bounds = array<i64: 64, 64>}]} {
    %c0 = arith.constant 0 : index
    %c0_0 = arith.constant 0 : index
    %0 = vector.load %arg1[%c0, %c0_0] : memref<64x288xbf16, #tpu.memory_space<vmem>>, vector<64x288xbf16>
    %c0_1 = arith.constant 0 : index
    %c0_2 = arith.constant 0 : index
    %1 = vector.load %arg2[%c0_1, %c0_2] : memref<288x64xbf16, #tpu.memory_space<vmem>>, vector<288x64xbf16>
    %cst = arith.constant dense<0.000000e+00> : vector<64x64xf32>
    %2 = tpu.matmul %0, %1, %cst {dimension_numbers = #tpu.dot_dimension_numbers<[1], [0], [0], [1], [0, 0, 1, 1], [], []>} : vector<64x288xbf16>, vector<288x64xbf16>, vector<64x64xf32> -> vector<64x64xf32>
    %3 = vector.extract_strided_slice %0 {offsets = [0, 128], sizes = [64, 32], strides = [1, 1]} : vector<64x288xbf16> to vector<64x32xbf16>
    %4 = vector.extract_strided_slice %0 {offsets = [0, 160], sizes = [64, 32], strides = [1, 1]} : vector<64x288xbf16> to vector<64x32xbf16>
    %5 = arith.maximumf %3, %4 : vector<64x32xbf16>
    %6 = vector.extract_strided_slice %0 {offsets = [0, 224], sizes = [64, 32], strides = [1, 1]} : vector<64x288xbf16> to vector<64x32xbf16>
    %7 = vector.extract_strided_slice %0 {offsets = [0, 256], sizes = [64, 32], strides = [1, 1]} : vector<64x288xbf16> to vector<64x32xbf16>
    %8 = arith.maximumf %6, %7 : vector<64x32xbf16>
    %9 = arith.maximumf %5, %8 : vector<64x32xbf16>
    %c0_3 = arith.constant 0 : index
    %c0_4 = arith.constant 0 : index
    %10 = vector.load %arg3[%c0_3, %c0_4] : memref<32x64xbf16, #tpu.memory_space<vmem>>, vector<32x64xbf16>
    %cst_5 = arith.constant dense<0.000000e+00> : vector<64x64xf32>
    %11 = tpu.matmul %9, %10, %cst_5 {dimension_numbers = #tpu.dot_dimension_numbers<[1], [0], [0], [1], [0, 0, 1, 1], [], []>} : vector<64x32xbf16>, vector<32x64xbf16>, vector<64x64xf32> -> vector<64x64xf32>
    %12 = arith.addf %2, %11 : vector<64x64xf32>
    %c0_6 = arith.constant 0 : index
    %c0_7 = arith.constant 0 : index
    %13 = vector.load %arg4[%c0_6, %c0_7] : memref<1x64xf32, #tpu.memory_space<vmem>>, vector<1x64xf32>
    %14 = vector.broadcast %13 : vector<1x64xf32> to vector<64x64xf32>
    %15 = arith.mulf %12, %14 : vector<64x64xf32>
    %c0_8 = arith.constant 0 : index
    %c0_9 = arith.constant 0 : index
    %16 = vector.load %arg5[%c0_8, %c0_9] : memref<1x64xf32, #tpu.memory_space<vmem>>, vector<1x64xf32>
    %17 = vector.broadcast %16 : vector<1x64xf32> to vector<64x64xf32>
    %18 = arith.addf %15, %17 : vector<64x64xf32>
    %cst_10 = arith.constant 0.000000e+00 : f32
    %19 = vector.broadcast %cst_10 : f32 to vector<64x64xf32>
    %20 = arith.maximumf %18, %19 : vector<64x64xf32>
    %21 = arith.truncf %20 : vector<64x64xf32> to vector<64x64xbf16>
    %c0_11 = arith.constant 0 : index
    %c0_12 = arith.constant 0 : index
    %22 = vector.load %arg6[%c0_11, %c0_12] : memref<64x64xbf16, #tpu.memory_space<vmem>>, vector<64x64xbf16>
    tpu.vector_store %arg6[%c0_11, %c0_12], %21 {strides = array<i32>} : memref<64x64xbf16, #tpu.memory_space<vmem>>, vector<64x64xbf16>,
    return
  }
  func.func @transform_0(%arg0: i32) -> (i32, i32) {
    %c0_i32 = arith.constant 0 : i32
    %c0_i32_0 = arith.constant 0 : i32
    return %arg0, %c0_i32 : i32, i32
  }
  func.func @transform_1(%arg0: i32) -> (i32, i32) {
    %c0_i32 = arith.constant 0 : i32
    %c0_i32_0 = arith.constant 0 : i32
    %c0_i32_1 = arith.constant 0 : i32
    return %c0_i32, %c0_i32_0 : i32, i32
  }
  func.func @transform_2(%arg0: i32) -> (i32, i32) {
    %c0_i32 = arith.constant 0 : i32
    %c0_i32_0 = arith.constant 0 : i32
    %c0_i32_1 = arith.constant 0 : i32
    return %c0_i32, %c0_i32_0 : i32, i32
  }
  func.func @transform_3(%arg0: i32) -> (i32, i32) {
    %c0_i32 = arith.constant 0 : i32
    %c0_i32_0 = arith.constant 0 : i32
    %c0_i32_1 = arith.constant 0 : i32
    return %c0_i32, %c0_i32_0 : i32, i32
  }
  func.func @transform_4(%arg0: i32) -> (i32, i32) {
    %c0_i32 = arith.constant 0 : i32
    %c0_i32_0 = arith.constant 0 : i32
    %c0_i32_1 = arith.constant 0 : i32
    return %c0_i32, %c0_i32_0 : i32, i32
  }
  func.func @transform_5(%arg0: i32) -> (i32, i32) {
    %c0_i32 = arith.constant 0 : i32
    %c0_i32_0 = arith.constant 0 : i32
    return %arg0, %c0_i32 : i32, i32
  }
}

module attributes {stable_mosaic.version = 11 : i64} {
  func.func @_mm_kernel(%arg0: i32, %arg1: memref<40x192xbf16, #tpu.memory_space<vmem>>, %arg2: memref<192x64xbf16, #tpu.memory_space<vmem>>, %arg3: memref<1x64xf32, #tpu.memory_space<vmem>>, %arg4: memref<1x64xf32, #tpu.memory_space<vmem>>, %arg5: memref<40x64xbf16, #tpu.memory_space<vmem>>) attributes {dimension_semantics = [#tpu.dimension_semantics<parallel>], iteration_bounds = array<i64: 3>, scalar_prefetch = 0 : i64, scratch_operands = 0 : i64, tpu.core_type = #tpu.core_type<tc>, window_params = [{transform_indices = @transform_0, window_bounds = array<i64: 40, 192>}, {pipeline_mode = #tpu.pipeline_mode<synchronous>, transform_indices = @transform_1, window_bounds = array<i64: 192, 64>}, {pipeline_mode = #tpu.pipeline_mode<synchronous>, transform_indices = @transform_2, window_bounds = array<i64: 1, 64>}, {pipeline_mode = #tpu.pipeline_mode<synchronous>, transform_indices = @transform_3, window_bounds = array<i64: 1, 64>}, {transform_indices = @transform_4, window_bounds = array<i64: 40, 64>}]} {
    %c0 = arith.constant 0 : index
    %c0_0 = arith.constant 0 : index
    %0 = vector.load %arg1[%c0, %c0_0] : memref<40x192xbf16, #tpu.memory_space<vmem>>, vector<40x192xbf16>
    %c0_1 = arith.constant 0 : index
    %c0_2 = arith.constant 0 : index
    %1 = vector.load %arg2[%c0_1, %c0_2] : memref<192x64xbf16, #tpu.memory_space<vmem>>, vector<192x64xbf16>
    %cst = arith.constant dense<0.000000e+00> : vector<40x64xf32>
    %2 = tpu.matmul %0, %1, %cst {dimension_numbers = #tpu.dot_dimension_numbers<[1], [0], [0], [1], [0, 0, 1, 1], [], []>} : vector<40x192xbf16>, vector<192x64xbf16>, vector<40x64xf32> -> vector<40x64xf32>
    %c0_3 = arith.constant 0 : index
    %c0_4 = arith.constant 0 : index
    %3 = vector.load %arg3[%c0_3, %c0_4] : memref<1x64xf32, #tpu.memory_space<vmem>>, vector<1x64xf32>
    %4 = vector.broadcast %3 : vector<1x64xf32> to vector<40x64xf32>
    %5 = arith.mulf %2, %4 : vector<40x64xf32>
    %c0_5 = arith.constant 0 : index
    %c0_6 = arith.constant 0 : index
    %6 = vector.load %arg4[%c0_5, %c0_6] : memref<1x64xf32, #tpu.memory_space<vmem>>, vector<1x64xf32>
    %7 = vector.broadcast %6 : vector<1x64xf32> to vector<40x64xf32>
    %8 = arith.addf %5, %7 : vector<40x64xf32>
    %9 = arith.truncf %8 : vector<40x64xf32> to vector<40x64xbf16>
    %c0_7 = arith.constant 0 : index
    %c0_8 = arith.constant 0 : index
    %10 = vector.load %arg5[%c0_7, %c0_8] : memref<40x64xbf16, #tpu.memory_space<vmem>>, vector<40x64xbf16>
    tpu.vector_store %arg5[%c0_7, %c0_8], %9 {strides = array<i32>} : memref<40x64xbf16, #tpu.memory_space<vmem>>, vector<40x64xbf16>,
    return
  }
  func.func @transform_0(%arg0: i32) -> (i32, i32) {
    %c0_i32 = arith.constant 0 : i32
    %c0_i32_0 = arith.constant 0 : i32
    return %arg0, %c0_i32 : i32, i32
  }
  func.func @transform_1(%arg0: i32) -> (i32, i32) {
    %c0_i32 = arith.constant 0 : i32
    %c0_i32_0 = arith.constant 0 : i32
    %c0_i32_1 = arith.constant 0 : i32
    return %c0_i32, %c0_i32_0 : i32, i32
  }
  func.func @transform_2(%arg0: i32) -> (i32, i32) {
    %c0_i32 = arith.constant 0 : i32
    %c0_i32_0 = arith.constant 0 : i32
    %c0_i32_1 = arith.constant 0 : i32
    return %c0_i32, %c0_i32_0 : i32, i32
  }
  func.func @transform_3(%arg0: i32) -> (i32, i32) {
    %c0_i32 = arith.constant 0 : i32
    %c0_i32_0 = arith.constant 0 : i32
    %c0_i32_1 = arith.constant 0 : i32
    return %c0_i32, %c0_i32_0 : i32, i32
  }
  func.func @transform_4(%arg0: i32) -> (i32, i32) {
    %c0_i32 = arith.constant 0 : i32
    %c0_i32_0 = arith.constant 0 : i32
    return %arg0, %c0_i32 : i32, i32
  }
}

module attributes {stable_mosaic.version = 11 : i64} {
  func.func @_mm_kernel(%arg0: i32, %arg1: memref<64x192xbf16, #tpu.memory_space<vmem>>, %arg2: memref<192x64xbf16, #tpu.memory_space<vmem>>, %arg3: memref<1x64xf32, #tpu.memory_space<vmem>>, %arg4: memref<1x64xf32, #tpu.memory_space<vmem>>, %arg5: memref<64x64xbf16, #tpu.memory_space<vmem>>) attributes {dimension_semantics = [#tpu.dimension_semantics<parallel>], iteration_bounds = array<i64: 2>, scalar_prefetch = 0 : i64, scratch_operands = 0 : i64, tpu.core_type = #tpu.core_type<tc>, window_params = [{transform_indices = @transform_0, window_bounds = array<i64: 64, 192>}, {pipeline_mode = #tpu.pipeline_mode<synchronous>, transform_indices = @transform_1, window_bounds = array<i64: 192, 64>}, {pipeline_mode = #tpu.pipeline_mode<synchronous>, transform_indices = @transform_2, window_bounds = array<i64: 1, 64>}, {pipeline_mode = #tpu.pipeline_mode<synchronous>, transform_indices = @transform_3, window_bounds = array<i64: 1, 64>}, {transform_indices = @transform_4, window_bounds = array<i64: 64, 64>}]} {
    %c0 = arith.constant 0 : index
    %c0_0 = arith.constant 0 : index
    %0 = vector.load %arg1[%c0, %c0_0] : memref<64x192xbf16, #tpu.memory_space<vmem>>, vector<64x192xbf16>
    %c0_1 = arith.constant 0 : index
    %c0_2 = arith.constant 0 : index
    %1 = vector.load %arg2[%c0_1, %c0_2] : memref<192x64xbf16, #tpu.memory_space<vmem>>, vector<192x64xbf16>
    %cst = arith.constant dense<0.000000e+00> : vector<64x64xf32>
    %2 = tpu.matmul %0, %1, %cst {dimension_numbers = #tpu.dot_dimension_numbers<[1], [0], [0], [1], [0, 0, 1, 1], [], []>} : vector<64x192xbf16>, vector<192x64xbf16>, vector<64x64xf32> -> vector<64x64xf32>
    %c0_3 = arith.constant 0 : index
    %c0_4 = arith.constant 0 : index
    %3 = vector.load %arg3[%c0_3, %c0_4] : memref<1x64xf32, #tpu.memory_space<vmem>>, vector<1x64xf32>
    %4 = vector.broadcast %3 : vector<1x64xf32> to vector<64x64xf32>
    %5 = arith.mulf %2, %4 : vector<64x64xf32>
    %c0_5 = arith.constant 0 : index
    %c0_6 = arith.constant 0 : index
    %6 = vector.load %arg4[%c0_5, %c0_6] : memref<1x64xf32, #tpu.memory_space<vmem>>, vector<1x64xf32>
    %7 = vector.broadcast %6 : vector<1x64xf32> to vector<64x64xf32>
    %8 = arith.addf %5, %7 : vector<64x64xf32>
    %9 = arith.truncf %8 : vector<64x64xf32> to vector<64x64xbf16>
    %c0_7 = arith.constant 0 : index
    %c0_8 = arith.constant 0 : index
    %10 = vector.load %arg5[%c0_7, %c0_8] : memref<64x64xbf16, #tpu.memory_space<vmem>>, vector<64x64xbf16>
    tpu.vector_store %arg5[%c0_7, %c0_8], %9 {strides = array<i32>} : memref<64x64xbf16, #tpu.memory_space<vmem>>, vector<64x64xbf16>,
    return
  }
  func.func @transform_0(%arg0: i32) -> (i32, i32) {
    %c0_i32 = arith.constant 0 : i32
    %c0_i32_0 = arith.constant 0 : i32
    return %arg0, %c0_i32 : i32, i32
  }
  func.func @transform_1(%arg0: i32) -> (i32, i32) {
    %c0_i32 = arith.constant 0 : i32
    %c0_i32_0 = arith.constant 0 : i32
    %c0_i32_1 = arith.constant 0 : i32
    return %c0_i32, %c0_i32_0 : i32, i32
  }
  func.func @transform_2(%arg0: i32) -> (i32, i32) {
    %c0_i32 = arith.constant 0 : i32
    %c0_i32_0 = arith.constant 0 : i32
    %c0_i32_1 = arith.constant 0 : i32
    return %c0_i32, %c0_i32_0 : i32, i32
  }
  func.func @transform_3(%arg0: i32) -> (i32, i32) {
    %c0_i32 = arith.constant 0 : i32
    %c0_i32_0 = arith.constant 0 : i32
    %c0_i32_1 = arith.constant 0 : i32
    return %c0_i32, %c0_i32_0 : i32, i32
  }
  func.func @transform_4(%arg0: i32) -> (i32, i32) {
    %c0_i32 = arith.constant 0 : i32
    %c0_i32_0 = arith.constant 0 : i32
    return %arg0, %c0_i32 : i32, i32
  }
}

module attributes {stable_mosaic.version = 11 : i64} {
  func.func @_fcb_tail_dw_kernel(%arg0: i32, %arg1: memref<1x10x10x64xbf16, #tpu.memory_space<vmem>>, %arg2: memref<64x64xbf16, #tpu.memory_space<vmem>>, %arg3: memref<3x3x64xf32, #tpu.memory_space<vmem>>, %arg4: memref<64x64xbf16, #tpu.memory_space<vmem>>, %arg5: memref<1x64xf32, #tpu.memory_space<vmem>>, %arg6: memref<1x64xf32, #tpu.memory_space<vmem>>, %arg7: memref<64x64xbf16, #tpu.memory_space<vmem>>, %arg8: memref<64x64xbf16, #tpu.memory_space<vmem>>, %arg9: memref<64x64xbf16, #tpu.memory_space<vmem>>) attributes {dimension_semantics = [#tpu.dimension_semantics<parallel>], iteration_bounds = array<i64: 2>, scalar_prefetch = 0 : i64, scratch_operands = 0 : i64, tpu.core_type = #tpu.core_type<tc>, window_params = [{transform_indices = @transform_0, window_bounds = array<i64: 1, 10, 10, 64>}, {transform_indices = @transform_1, window_bounds = array<i64: 64, 64>}, {pipeline_mode = #tpu.pipeline_mode<synchronous>, transform_indices = @transform_2, window_bounds = array<i64: 3, 3, 64>}, {pipeline_mode = #tpu.pipeline_mode<synchronous>, transform_indices = @transform_3, window_bounds = array<i64: 64, 64>}, {pipeline_mode = #tpu.pipeline_mode<synchronous>, transform_indices = @transform_4, window_bounds = array<i64: 1, 64>}, {pipeline_mode = #tpu.pipeline_mode<synchronous>, transform_indices = @transform_5, window_bounds = array<i64: 1, 64>}, {pipeline_mode = #tpu.pipeline_mode<synchronous>, transform_indices = @transform_6, window_bounds = array<i64: 64, 64>}, {pipeline_mode = #tpu.pipeline_mode<synchronous>, transform_indices = @transform_7, window_bounds = array<i64: 64, 64>}, {transform_indices = @transform_8, window_bounds = array<i64: 64, 64>}]} {
    %c0 = arith.constant 0 : index
    %c0_0 = arith.constant 0 : index
    %c0_1 = arith.constant 0 : index
    %c0_2 = arith.constant 0 : index
    %0 = vector.load %arg1[%c0, %c0_0, %c0_1, %c0_2] : memref<1x10x10x64xbf16, #tpu.memory_space<vmem>>, vector<1x10x10x64xbf16>
    %1 = vector.shape_cast %0 : vector<1x10x10x64xbf16> to vector<10x10x64xbf16>
    %c0_3 = arith.constant 0 : index
    %c0_4 = arith.constant 0 : index
    %c0_5 = arith.constant 0 : index
    %2 = vector.load %arg3[%c0_3, %c0_4, %c0_5] : memref<3x3x64xf32, #tpu.memory_space<vmem>>, vector<3x3x64xf32>
    %cst = arith.constant 0.000000e+00 : f32
    %3 = vector.broadcast %cst : f32 to vector<8x8x64xf32>
    %4 = vector.extract_strided_slice %1 {offsets = [0, 0, 0], sizes = [8, 8, 64], strides = [1, 1, 1]} : vector<10x10x64xbf16> to vector<8x8x64xbf16>
    %5 = arith.extf %4 : vector<8x8x64xbf16> to vector<8x8x64xf32>
    %6 = vector.extract_strided_slice %2 {offsets = [0, 0, 0], sizes = [1, 1, 64], strides = [1, 1, 1]} : vector<3x3x64xf32> to vector<1x1x64xf32>
    %7 = vector.shape_cast %6 : vector<1x1x64xf32> to vector<64xf32>
    %8 = vector.shape_cast %7 : vector<64xf32> to vector<1x1x64xf32>
    %9 = vector.broadcast %8 : vector<1x1x64xf32> to vector<8x8x64xf32>
    %10 = arith.mulf %5, %9 : vector<8x8x64xf32>
    %11 = arith.addf %3, %10 : vector<8x8x64xf32>
    %12 = vector.extract_strided_slice %1 {offsets = [0, 1, 0], sizes = [8, 8, 64], strides = [1, 1, 1]} : vector<10x10x64xbf16> to vector<8x8x64xbf16>
    %13 = arith.extf %12 : vector<8x8x64xbf16> to vector<8x8x64xf32>
    %14 = vector.extract_strided_slice %2 {offsets = [0, 1, 0], sizes = [1, 1, 64], strides = [1, 1, 1]} : vector<3x3x64xf32> to vector<1x1x64xf32>
    %15 = vector.shape_cast %14 : vector<1x1x64xf32> to vector<64xf32>
    %16 = vector.shape_cast %15 : vector<64xf32> to vector<1x1x64xf32>
    %17 = vector.broadcast %16 : vector<1x1x64xf32> to vector<8x8x64xf32>
    %18 = arith.mulf %13, %17 : vector<8x8x64xf32>
    %19 = arith.addf %11, %18 : vector<8x8x64xf32>
    %20 = vector.extract_strided_slice %1 {offsets = [0, 2, 0], sizes = [8, 8, 64], strides = [1, 1, 1]} : vector<10x10x64xbf16> to vector<8x8x64xbf16>
    %21 = arith.extf %20 : vector<8x8x64xbf16> to vector<8x8x64xf32>
    %22 = vector.extract_strided_slice %2 {offsets = [0, 2, 0], sizes = [1, 1, 64], strides = [1, 1, 1]} : vector<3x3x64xf32> to vector<1x1x64xf32>
    %23 = vector.shape_cast %22 : vector<1x1x64xf32> to vector<64xf32>
    %24 = vector.shape_cast %23 : vector<64xf32> to vector<1x1x64xf32>
    %25 = vector.broadcast %24 : vector<1x1x64xf32> to vector<8x8x64xf32>
    %26 = arith.mulf %21, %25 : vector<8x8x64xf32>
    %27 = arith.addf %19, %26 : vector<8x8x64xf32>
    %28 = vector.extract_strided_slice %1 {offsets = [1, 0, 0], sizes = [8, 8, 64], strides = [1, 1, 1]} : vector<10x10x64xbf16> to vector<8x8x64xbf16>
    %29 = arith.extf %28 : vector<8x8x64xbf16> to vector<8x8x64xf32>
    %30 = vector.extract_strided_slice %2 {offsets = [1, 0, 0], sizes = [1, 1, 64], strides = [1, 1, 1]} : vector<3x3x64xf32> to vector<1x1x64xf32>
    %31 = vector.shape_cast %30 : vector<1x1x64xf32> to vector<64xf32>
    %32 = vector.shape_cast %31 : vector<64xf32> to vector<1x1x64xf32>
    %33 = vector.broadcast %32 : vector<1x1x64xf32> to vector<8x8x64xf32>
    %34 = arith.mulf %29, %33 : vector<8x8x64xf32>
    %35 = arith.addf %27, %34 : vector<8x8x64xf32>
    %36 = vector.extract_strided_slice %1 {offsets = [1, 1, 0], sizes = [8, 8, 64], strides = [1, 1, 1]} : vector<10x10x64xbf16> to vector<8x8x64xbf16>
    %37 = arith.extf %36 : vector<8x8x64xbf16> to vector<8x8x64xf32>
    %38 = vector.extract_strided_slice %2 {offsets = [1, 1, 0], sizes = [1, 1, 64], strides = [1, 1, 1]} : vector<3x3x64xf32> to vector<1x1x64xf32>
    %39 = vector.shape_cast %38 : vector<1x1x64xf32> to vector<64xf32>
    %40 = vector.shape_cast %39 : vector<64xf32> to vector<1x1x64xf32>
    %41 = vector.broadcast %40 : vector<1x1x64xf32> to vector<8x8x64xf32>
    %42 = arith.mulf %37, %41 : vector<8x8x64xf32>
    %43 = arith.addf %35, %42 : vector<8x8x64xf32>
    %44 = vector.extract_strided_slice %1 {offsets = [1, 2, 0], sizes = [8, 8, 64], strides = [1, 1, 1]} : vector<10x10x64xbf16> to vector<8x8x64xbf16>
    %45 = arith.extf %44 : vector<8x8x64xbf16> to vector<8x8x64xf32>
    %46 = vector.extract_strided_slice %2 {offsets = [1, 2, 0], sizes = [1, 1, 64], strides = [1, 1, 1]} : vector<3x3x64xf32> to vector<1x1x64xf32>
    %47 = vector.shape_cast %46 : vector<1x1x64xf32> to vector<64xf32>
    %48 = vector.shape_cast %47 : vector<64xf32> to vector<1x1x64xf32>
    %49 = vector.broadcast %48 : vector<1x1x64xf32> to vector<8x8x64xf32>
    %50 = arith.mulf %45, %49 : vector<8x8x64xf32>
    %51 = arith.addf %43, %50 : vector<8x8x64xf32>
    %52 = vector.extract_strided_slice %1 {offsets = [2, 0, 0], sizes = [8, 8, 64], strides = [1, 1, 1]} : vector<10x10x64xbf16> to vector<8x8x64xbf16>
    %53 = arith.extf %52 : vector<8x8x64xbf16> to vector<8x8x64xf32>
    %54 = vector.extract_strided_slice %2 {offsets = [2, 0, 0], sizes = [1, 1, 64], strides = [1, 1, 1]} : vector<3x3x64xf32> to vector<1x1x64xf32>
    %55 = vector.shape_cast %54 : vector<1x1x64xf32> to vector<64xf32>
    %56 = vector.shape_cast %55 : vector<64xf32> to vector<1x1x64xf32>
    %57 = vector.broadcast %56 : vector<1x1x64xf32> to vector<8x8x64xf32>
    %58 = arith.mulf %53, %57 : vector<8x8x64xf32>
    %59 = arith.addf %51, %58 : vector<8x8x64xf32>
    %60 = vector.extract_strided_slice %1 {offsets = [2, 1, 0], sizes = [8, 8, 64], strides = [1, 1, 1]} : vector<10x10x64xbf16> to vector<8x8x64xbf16>
    %61 = arith.extf %60 : vector<8x8x64xbf16> to vector<8x8x64xf32>
    %62 = vector.extract_strided_slice %2 {offsets = [2, 1, 0], sizes = [1, 1, 64], strides = [1, 1, 1]} : vector<3x3x64xf32> to vector<1x1x64xf32>
    %63 = vector.shape_cast %62 : vector<1x1x64xf32> to vector<64xf32>
    %64 = vector.shape_cast %63 : vector<64xf32> to vector<1x1x64xf32>
    %65 = vector.broadcast %64 : vector<1x1x64xf32> to vector<8x8x64xf32>
    %66 = arith.mulf %61, %65 : vector<8x8x64xf32>
    %67 = arith.addf %59, %66 : vector<8x8x64xf32>
    %68 = vector.extract_strided_slice %1 {offsets = [2, 2, 0], sizes = [8, 8, 64], strides = [1, 1, 1]} : vector<10x10x64xbf16> to vector<8x8x64xbf16>
    %69 = arith.extf %68 : vector<8x8x64xbf16> to vector<8x8x64xf32>
    %70 = vector.extract_strided_slice %2 {offsets = [2, 2, 0], sizes = [1, 1, 64], strides = [1, 1, 1]} : vector<3x3x64xf32> to vector<1x1x64xf32>
    %71 = vector.shape_cast %70 : vector<1x1x64xf32> to vector<64xf32>
    %72 = vector.shape_cast %71 : vector<64xf32> to vector<1x1x64xf32>
    %73 = vector.broadcast %72 : vector<1x1x64xf32> to vector<8x8x64xf32>
    %74 = arith.mulf %69, %73 : vector<8x8x64xf32>
    %75 = arith.addf %67, %74 : vector<8x8x64xf32>
    %76 = vector.shape_cast %75 : vector<8x8x64xf32> to vector<64x64xf32>
    %77 = arith.truncf %76 : vector<64x64xf32> to vector<64x64xbf16>
    %c0_6 = arith.constant 0 : index
    %c0_7 = arith.constant 0 : index
    %78 = vector.load %arg4[%c0_6, %c0_7] : memref<64x64xbf16, #tpu.memory_space<vmem>>, vector<64x64xbf16>
    %cst_8 = arith.constant dense<0.000000e+00> : vector<64x64xf32>
    %79 = tpu.matmul %77, %78, %cst_8 {dimension_numbers = #tpu.dot_dimension_numbers<[1], [0], [0], [1], [0, 0, 1, 1], [], []>} : vector<64x64xbf16>, vector<64x64xbf16>, vector<64x64xf32> -> vector<64x64xf32>
    %c0_9 = arith.constant 0 : index
    %c0_10 = arith.constant 0 : index
    %80 = vector.load %arg5[%c0_9, %c0_10] : memref<1x64xf32, #tpu.memory_space<vmem>>, vector<1x64xf32>
    %81 = vector.broadcast %80 : vector<1x64xf32> to vector<64x64xf32>
    %82 = arith.mulf %79, %81 : vector<64x64xf32>
    %c0_11 = arith.constant 0 : index
    %c0_12 = arith.constant 0 : index
    %83 = vector.load %arg6[%c0_11, %c0_12] : memref<1x64xf32, #tpu.memory_space<vmem>>, vector<1x64xf32>
    %84 = vector.broadcast %83 : vector<1x64xf32> to vector<64x64xf32>
    %85 = arith.addf %82, %84 : vector<64x64xf32>
    %cst_13 = arith.constant 0.000000e+00 : f32
    %86 = vector.broadcast %cst_13 : f32 to vector<64x64xf32>
    %87 = arith.maximumf %85, %86 : vector<64x64xf32>
    %88 = arith.truncf %87 : vector<64x64xf32> to vector<64x64xbf16>
    %c0_14 = arith.constant 0 : index
    %c0_15 = arith.constant 0 : index
    %89 = vector.load %arg7[%c0_14, %c0_15] : memref<64x64xbf16, #tpu.memory_space<vmem>>, vector<64x64xbf16>
    %cst_16 = arith.constant dense<0.000000e+00> : vector<64x64xf32>
    %90 = tpu.matmul %88, %89, %cst_16 {dimension_numbers = #tpu.dot_dimension_numbers<[1], [0], [0], [1], [0, 0, 1, 1], [], []>} : vector<64x64xbf16>, vector<64x64xbf16>, vector<64x64xf32> -> vector<64x64xf32>
    %c0_17 = arith.constant 0 : index
    %c0_18 = arith.constant 0 : index
    %91 = vector.load %arg2[%c0_17, %c0_18] : memref<64x64xbf16, #tpu.memory_space<vmem>>, vector<64x64xbf16>
    %c0_19 = arith.constant 0 : index
    %c0_20 = arith.constant 0 : index
    %92 = vector.load %arg8[%c0_19, %c0_20] : memref<64x64xbf16, #tpu.memory_space<vmem>>, vector<64x64xbf16>
    %cst_21 = arith.constant dense<0.000000e+00> : vector<64x64xf32>
    %93 = tpu.matmul %91, %92, %cst_21 {dimension_numbers = #tpu.dot_dimension_numbers<[1], [0], [0], [1], [0, 0, 1, 1], [], []>} : vector<64x64xbf16>, vector<64x64xbf16>, vector<64x64xf32> -> vector<64x64xf32>
    %94 = arith.addf %90, %93 : vector<64x64xf32>
    %cst_22 = arith.constant 0.000000e+00 : f32
    %95 = vector.broadcast %cst_22 : f32 to vector<64x64xf32>
    %96 = arith.maximumf %94, %95 : vector<64x64xf32>
    %97 = arith.truncf %96 : vector<64x64xf32> to vector<64x64xbf16>
    %c0_23 = arith.constant 0 : index
    %c0_24 = arith.constant 0 : index
    %98 = vector.load %arg9[%c0_23, %c0_24] : memref<64x64xbf16, #tpu.memory_space<vmem>>, vector<64x64xbf16>
    tpu.vector_store %arg9[%c0_23, %c0_24], %97 {strides = array<i32>} : memref<64x64xbf16, #tpu.memory_space<vmem>>, vector<64x64xbf16>,
    return
  }
  func.func @transform_0(%arg0: i32) -> (i32, i32, i32, i32) {
    %c0_i32 = arith.constant 0 : i32
    %c0_i32_0 = arith.constant 0 : i32
    %c0_i32_1 = arith.constant 0 : i32
    %c0_i32_2 = arith.constant 0 : i32
    return %arg0, %c0_i32, %c0_i32_0, %c0_i32_1 : i32, i32, i32, i32
  }
  func.func @transform_1(%arg0: i32) -> (i32, i32) {
    %c0_i32 = arith.constant 0 : i32
    %c0_i32_0 = arith.constant 0 : i32
    return %arg0, %c0_i32 : i32, i32
  }
  func.func @transform_2(%arg0: i32) -> (i32, i32, i32) {
    %c0_i32 = arith.constant 0 : i32
    %c0_i32_0 = arith.constant 0 : i32
    %c0_i32_1 = arith.constant 0 : i32
    %c0_i32_2 = arith.constant 0 : i32
    return %c0_i32, %c0_i32_0, %c0_i32_1 : i32, i32, i32
  }
  func.func @transform_3(%arg0: i32) -> (i32, i32) {
    %c0_i32 = arith.constant 0 : i32
    %c0_i32_0 = arith.constant 0 : i32
    %c0_i32_1 = arith.constant 0 : i32
    return %c0_i32, %c0_i32_0 : i32, i32
  }
  func.func @transform_4(%arg0: i32) -> (i32, i32) {
    %c0_i32 = arith.constant 0 : i32
    %c0_i32_0 = arith.constant 0 : i32
    %c0_i32_1 = arith.constant 0 : i32
    return %c0_i32, %c0_i32_0 : i32, i32
  }
  func.func @transform_5(%arg0: i32) -> (i32, i32) {
    %c0_i32 = arith.constant 0 : i32
    %c0_i32_0 = arith.constant 0 : i32
    %c0_i32_1 = arith.constant 0 : i32
    return %c0_i32, %c0_i32_0 : i32, i32
  }
  func.func @transform_6(%arg0: i32) -> (i32, i32) {
    %c0_i32 = arith.constant 0 : i32
    %c0_i32_0 = arith.constant 0 : i32
    %c0_i32_1 = arith.constant 0 : i32
    return %c0_i32, %c0_i32_0 : i32, i32
  }
  func.func @transform_7(%arg0: i32) -> (i32, i32) {
    %c0_i32 = arith.constant 0 : i32
    %c0_i32_0 = arith.constant 0 : i32
    %c0_i32_1 = arith.constant 0 : i32
    return %c0_i32, %c0_i32_0 : i32, i32
  }
  func.func @transform_8(%arg0: i32) -> (i32, i32) {
    %c0_i32 = arith.constant 0 : i32
    %c0_i32_0 = arith.constant 0 : i32
    return %arg0, %c0_i32 : i32, i32
  }
}

module attributes {stable_mosaic.version = 11 : i64} {
  func.func @_down_kernel(%arg0: i32, %arg1: memref<16x576xbf16, #tpu.memory_space<vmem>>, %arg2: memref<576x128xbf16, #tpu.memory_space<vmem>>, %arg3: memref<64x128xbf16, #tpu.memory_space<vmem>>, %arg4: memref<1x128xf32, #tpu.memory_space<vmem>>, %arg5: memref<1x128xf32, #tpu.memory_space<vmem>>, %arg6: memref<16x128xbf16, #tpu.memory_space<vmem>>) attributes {dimension_semantics = [#tpu.dimension_semantics<parallel>], iteration_bounds = array<i64: 2>, scalar_prefetch = 0 : i64, scratch_operands = 0 : i64, tpu.core_type = #tpu.core_type<tc>, window_params = [{transform_indices = @transform_0, window_bounds = array<i64: 16, 576>}, {pipeline_mode = #tpu.pipeline_mode<synchronous>, transform_indices = @transform_1, window_bounds = array<i64: 576, 128>}, {pipeline_mode = #tpu.pipeline_mode<synchronous>, transform_indices = @transform_2, window_bounds = array<i64: 64, 128>}, {pipeline_mode = #tpu.pipeline_mode<synchronous>, transform_indices = @transform_3, window_bounds = array<i64: 1, 128>}, {pipeline_mode = #tpu.pipeline_mode<synchronous>, transform_indices = @transform_4, window_bounds = array<i64: 1, 128>}, {transform_indices = @transform_5, window_bounds = array<i64: 16, 128>}]} {
    %c0 = arith.constant 0 : index
    %c0_0 = arith.constant 0 : index
    %0 = vector.load %arg1[%c0, %c0_0] : memref<16x576xbf16, #tpu.memory_space<vmem>>, vector<16x576xbf16>
    %c0_1 = arith.constant 0 : index
    %c0_2 = arith.constant 0 : index
    %1 = vector.load %arg2[%c0_1, %c0_2] : memref<576x128xbf16, #tpu.memory_space<vmem>>, vector<576x128xbf16>
    %cst = arith.constant dense<0.000000e+00> : vector<16x128xf32>
    %2 = tpu.matmul %0, %1, %cst {dimension_numbers = #tpu.dot_dimension_numbers<[1], [0], [0], [1], [0, 0, 1, 1], [], []>} : vector<16x576xbf16>, vector<576x128xbf16>, vector<16x128xf32> -> vector<16x128xf32>
    %3 = vector.extract_strided_slice %0 {offsets = [0, 256], sizes = [16, 64], strides = [1, 1]} : vector<16x576xbf16> to vector<16x64xbf16>
    %4 = vector.extract_strided_slice %0 {offsets = [0, 320], sizes = [16, 64], strides = [1, 1]} : vector<16x576xbf16> to vector<16x64xbf16>
    %5 = arith.maximumf %3, %4 : vector<16x64xbf16>
    %6 = vector.extract_strided_slice %0 {offsets = [0, 448], sizes = [16, 64], strides = [1, 1]} : vector<16x576xbf16> to vector<16x64xbf16>
    %7 = vector.extract_strided_slice %0 {offsets = [0, 512], sizes = [16, 64], strides = [1, 1]} : vector<16x576xbf16> to vector<16x64xbf16>
    %8 = arith.maximumf %6, %7 : vector<16x64xbf16>
    %9 = arith.maximumf %5, %8 : vector<16x64xbf16>
    %c0_3 = arith.constant 0 : index
    %c0_4 = arith.constant 0 : index
    %10 = vector.load %arg3[%c0_3, %c0_4] : memref<64x128xbf16, #tpu.memory_space<vmem>>, vector<64x128xbf16>
    %cst_5 = arith.constant dense<0.000000e+00> : vector<16x128xf32>
    %11 = tpu.matmul %9, %10, %cst_5 {dimension_numbers = #tpu.dot_dimension_numbers<[1], [0], [0], [1], [0, 0, 1, 1], [], []>} : vector<16x64xbf16>, vector<64x128xbf16>, vector<16x128xf32> -> vector<16x128xf32>
    %12 = arith.addf %2, %11 : vector<16x128xf32>
    %c0_6 = arith.constant 0 : index
    %c0_7 = arith.constant 0 : index
    %13 = vector.load %arg4[%c0_6, %c0_7] : memref<1x128xf32, #tpu.memory_space<vmem>>, vector<1x128xf32>
    %14 = vector.broadcast %13 : vector<1x128xf32> to vector<16x128xf32>
    %15 = arith.mulf %12, %14 : vector<16x128xf32>
    %c0_8 = arith.constant 0 : index
    %c0_9 = arith.constant 0 : index
    %16 = vector.load %arg5[%c0_8, %c0_9] : memref<1x128xf32, #tpu.memory_space<vmem>>, vector<1x128xf32>
    %17 = vector.broadcast %16 : vector<1x128xf32> to vector<16x128xf32>
    %18 = arith.addf %15, %17 : vector<16x128xf32>
    %cst_10 = arith.constant 0.000000e+00 : f32
    %19 = vector.broadcast %cst_10 : f32 to vector<16x128xf32>
    %20 = arith.maximumf %18, %19 : vector<16x128xf32>
    %21 = arith.truncf %20 : vector<16x128xf32> to vector<16x128xbf16>
    %c0_11 = arith.constant 0 : index
    %c0_12 = arith.constant 0 : index
    %22 = vector.load %arg6[%c0_11, %c0_12] : memref<16x128xbf16, #tpu.memory_space<vmem>>, vector<16x128xbf16>
    tpu.vector_store %arg6[%c0_11, %c0_12], %21 {strides = array<i32>} : memref<16x128xbf16, #tpu.memory_space<vmem>>, vector<16x128xbf16>,
    return
  }
  func.func @transform_0(%arg0: i32) -> (i32, i32) {
    %c0_i32 = arith.constant 0 : i32
    %c0_i32_0 = arith.constant 0 : i32
    return %arg0, %c0_i32 : i32, i32
  }
  func.func @transform_1(%arg0: i32) -> (i32, i32) {
    %c0_i32 = arith.constant 0 : i32
    %c0_i32_0 = arith.constant 0 : i32
    %c0_i32_1 = arith.constant 0 : i32
    return %c0_i32, %c0_i32_0 : i32, i32
  }
  func.func @transform_2(%arg0: i32) -> (i32, i32) {
    %c0_i32 = arith.constant 0 : i32
    %c0_i32_0 = arith.constant 0 : i32
    %c0_i32_1 = arith.constant 0 : i32
    return %c0_i32, %c0_i32_0 : i32, i32
  }
  func.func @transform_3(%arg0: i32) -> (i32, i32) {
    %c0_i32 = arith.constant 0 : i32
    %c0_i32_0 = arith.constant 0 : i32
    %c0_i32_1 = arith.constant 0 : i32
    return %c0_i32, %c0_i32_0 : i32, i32
  }
  func.func @transform_4(%arg0: i32) -> (i32, i32) {
    %c0_i32 = arith.constant 0 : i32
    %c0_i32_0 = arith.constant 0 : i32
    %c0_i32_1 = arith.constant 0 : i32
    return %c0_i32, %c0_i32_0 : i32, i32
  }
  func.func @transform_5(%arg0: i32) -> (i32, i32) {
    %c0_i32 = arith.constant 0 : i32
    %c0_i32_0 = arith.constant 0 : i32
    return %arg0, %c0_i32 : i32, i32
  }
}

module attributes {stable_mosaic.version = 11 : i64} {
  func.func @_mm_kernel(%arg0: i32, %arg1: memref<8x384xbf16, #tpu.memory_space<vmem>>, %arg2: memref<384x128xbf16, #tpu.memory_space<vmem>>, %arg3: memref<1x128xf32, #tpu.memory_space<vmem>>, %arg4: memref<1x128xf32, #tpu.memory_space<vmem>>, %arg5: memref<8x128xbf16, #tpu.memory_space<vmem>>) attributes {dimension_semantics = [#tpu.dimension_semantics<parallel>], iteration_bounds = array<i64: 3>, scalar_prefetch = 0 : i64, scratch_operands = 0 : i64, tpu.core_type = #tpu.core_type<tc>, window_params = [{transform_indices = @transform_0, window_bounds = array<i64: 8, 384>}, {pipeline_mode = #tpu.pipeline_mode<synchronous>, transform_indices = @transform_1, window_bounds = array<i64: 384, 128>}, {pipeline_mode = #tpu.pipeline_mode<synchronous>, transform_indices = @transform_2, window_bounds = array<i64: 1, 128>}, {pipeline_mode = #tpu.pipeline_mode<synchronous>, transform_indices = @transform_3, window_bounds = array<i64: 1, 128>}, {transform_indices = @transform_4, window_bounds = array<i64: 8, 128>}]} {
    %c0 = arith.constant 0 : index
    %c0_0 = arith.constant 0 : index
    %0 = vector.load %arg1[%c0, %c0_0] : memref<8x384xbf16, #tpu.memory_space<vmem>>, vector<8x384xbf16>
    %c0_1 = arith.constant 0 : index
    %c0_2 = arith.constant 0 : index
    %1 = vector.load %arg2[%c0_1, %c0_2] : memref<384x128xbf16, #tpu.memory_space<vmem>>, vector<384x128xbf16>
    %cst = arith.constant dense<0.000000e+00> : vector<8x128xf32>
    %2 = tpu.matmul %0, %1, %cst {dimension_numbers = #tpu.dot_dimension_numbers<[1], [0], [0], [1], [0, 0, 1, 1], [], []>} : vector<8x384xbf16>, vector<384x128xbf16>, vector<8x128xf32> -> vector<8x128xf32>
    %c0_3 = arith.constant 0 : index
    %c0_4 = arith.constant 0 : index
    %3 = vector.load %arg3[%c0_3, %c0_4] : memref<1x128xf32, #tpu.memory_space<vmem>>, vector<1x128xf32>
    %4 = vector.broadcast %3 : vector<1x128xf32> to vector<8x128xf32>
    %5 = arith.mulf %2, %4 : vector<8x128xf32>
    %c0_5 = arith.constant 0 : index
    %c0_6 = arith.constant 0 : index
    %6 = vector.load %arg4[%c0_5, %c0_6] : memref<1x128xf32, #tpu.memory_space<vmem>>, vector<1x128xf32>
    %7 = vector.broadcast %6 : vector<1x128xf32> to vector<8x128xf32>
    %8 = arith.addf %5, %7 : vector<8x128xf32>
    %9 = arith.truncf %8 : vector<8x128xf32> to vector<8x128xbf16>
    %c0_7 = arith.constant 0 : index
    %c0_8 = arith.constant 0 : index
    %10 = vector.load %arg5[%c0_7, %c0_8] : memref<8x128xbf16, #tpu.memory_space<vmem>>, vector<8x128xbf16>
    tpu.vector_store %arg5[%c0_7, %c0_8], %9 {strides = array<i32>} : memref<8x128xbf16, #tpu.memory_space<vmem>>, vector<8x128xbf16>,
    return
  }
  func.func @transform_0(%arg0: i32) -> (i32, i32) {
    %c0_i32 = arith.constant 0 : i32
    %c0_i32_0 = arith.constant 0 : i32
    return %arg0, %c0_i32 : i32, i32
  }
  func.func @transform_1(%arg0: i32) -> (i32, i32) {
    %c0_i32 = arith.constant 0 : i32
    %c0_i32_0 = arith.constant 0 : i32
    %c0_i32_1 = arith.constant 0 : i32
    return %c0_i32, %c0_i32_0 : i32, i32
  }
  func.func @transform_2(%arg0: i32) -> (i32, i32) {
    %c0_i32 = arith.constant 0 : i32
    %c0_i32_0 = arith.constant 0 : i32
    %c0_i32_1 = arith.constant 0 : i32
    return %c0_i32, %c0_i32_0 : i32, i32
  }
  func.func @transform_3(%arg0: i32) -> (i32, i32) {
    %c0_i32 = arith.constant 0 : i32
    %c0_i32_0 = arith.constant 0 : i32
    %c0_i32_1 = arith.constant 0 : i32
    return %c0_i32, %c0_i32_0 : i32, i32
  }
  func.func @transform_4(%arg0: i32) -> (i32, i32) {
    %c0_i32 = arith.constant 0 : i32
    %c0_i32_0 = arith.constant 0 : i32
    return %arg0, %c0_i32 : i32, i32
  }
}

module attributes {stable_mosaic.version = 11 : i64} {
  func.func @_mm_kernel(%arg0: i32, %arg1: memref<16x384xbf16, #tpu.memory_space<vmem>>, %arg2: memref<384x128xbf16, #tpu.memory_space<vmem>>, %arg3: memref<1x128xf32, #tpu.memory_space<vmem>>, %arg4: memref<1x128xf32, #tpu.memory_space<vmem>>, %arg5: memref<16x128xbf16, #tpu.memory_space<vmem>>) attributes {dimension_semantics = [#tpu.dimension_semantics<parallel>], iteration_bounds = array<i64: 2>, scalar_prefetch = 0 : i64, scratch_operands = 0 : i64, tpu.core_type = #tpu.core_type<tc>, window_params = [{transform_indices = @transform_0, window_bounds = array<i64: 16, 384>}, {pipeline_mode = #tpu.pipeline_mode<synchronous>, transform_indices = @transform_1, window_bounds = array<i64: 384, 128>}, {pipeline_mode = #tpu.pipeline_mode<synchronous>, transform_indices = @transform_2, window_bounds = array<i64: 1, 128>}, {pipeline_mode = #tpu.pipeline_mode<synchronous>, transform_indices = @transform_3, window_bounds = array<i64: 1, 128>}, {transform_indices = @transform_4, window_bounds = array<i64: 16, 128>}]} {
    %c0 = arith.constant 0 : index
    %c0_0 = arith.constant 0 : index
    %0 = vector.load %arg1[%c0, %c0_0] : memref<16x384xbf16, #tpu.memory_space<vmem>>, vector<16x384xbf16>
    %c0_1 = arith.constant 0 : index
    %c0_2 = arith.constant 0 : index
    %1 = vector.load %arg2[%c0_1, %c0_2] : memref<384x128xbf16, #tpu.memory_space<vmem>>, vector<384x128xbf16>
    %cst = arith.constant dense<0.000000e+00> : vector<16x128xf32>
    %2 = tpu.matmul %0, %1, %cst {dimension_numbers = #tpu.dot_dimension_numbers<[1], [0], [0], [1], [0, 0, 1, 1], [], []>} : vector<16x384xbf16>, vector<384x128xbf16>, vector<16x128xf32> -> vector<16x128xf32>
    %c0_3 = arith.constant 0 : index
    %c0_4 = arith.constant 0 : index
    %3 = vector.load %arg3[%c0_3, %c0_4] : memref<1x128xf32, #tpu.memory_space<vmem>>, vector<1x128xf32>
    %4 = vector.broadcast %3 : vector<1x128xf32> to vector<16x128xf32>
    %5 = arith.mulf %2, %4 : vector<16x128xf32>
    %c0_5 = arith.constant 0 : index
    %c0_6 = arith.constant 0 : index
    %6 = vector.load %arg4[%c0_5, %c0_6] : memref<1x128xf32, #tpu.memory_space<vmem>>, vector<1x128xf32>
    %7 = vector.broadcast %6 : vector<1x128xf32> to vector<16x128xf32>
    %8 = arith.addf %5, %7 : vector<16x128xf32>
    %9 = arith.truncf %8 : vector<16x128xf32> to vector<16x128xbf16>
    %c0_7 = arith.constant 0 : index
    %c0_8 = arith.constant 0 : index
    %10 = vector.load %arg5[%c0_7, %c0_8] : memref<16x128xbf16, #tpu.memory_space<vmem>>, vector<16x128xbf16>
    tpu.vector_store %arg5[%c0_7, %c0_8], %9 {strides = array<i32>} : memref<16x128xbf16, #tpu.memory_space<vmem>>, vector<16x128xbf16>,
    return
  }
  func.func @transform_0(%arg0: i32) -> (i32, i32) {
    %c0_i32 = arith.constant 0 : i32
    %c0_i32_0 = arith.constant 0 : i32
    return %arg0, %c0_i32 : i32, i32
  }
  func.func @transform_1(%arg0: i32) -> (i32, i32) {
    %c0_i32 = arith.constant 0 : i32
    %c0_i32_0 = arith.constant 0 : i32
    %c0_i32_1 = arith.constant 0 : i32
    return %c0_i32, %c0_i32_0 : i32, i32
  }
  func.func @transform_2(%arg0: i32) -> (i32, i32) {
    %c0_i32 = arith.constant 0 : i32
    %c0_i32_0 = arith.constant 0 : i32
    %c0_i32_1 = arith.constant 0 : i32
    return %c0_i32, %c0_i32_0 : i32, i32
  }
  func.func @transform_3(%arg0: i32) -> (i32, i32) {
    %c0_i32 = arith.constant 0 : i32
    %c0_i32_0 = arith.constant 0 : i32
    %c0_i32_1 = arith.constant 0 : i32
    return %c0_i32, %c0_i32_0 : i32, i32
  }
  func.func @transform_4(%arg0: i32) -> (i32, i32) {
    %c0_i32 = arith.constant 0 : i32
    %c0_i32_0 = arith.constant 0 : i32
    return %arg0, %c0_i32 : i32, i32
  }
}

module attributes {stable_mosaic.version = 11 : i64} {
  func.func @_fcb_tail_dw_kernel(%arg0: i32, %arg1: memref<1x8x8x128xbf16, #tpu.memory_space<vmem>>, %arg2: memref<16x128xbf16, #tpu.memory_space<vmem>>, %arg3: memref<3x3x128xf32, #tpu.memory_space<vmem>>, %arg4: memref<128x128xbf16, #tpu.memory_space<vmem>>, %arg5: memref<1x128xf32, #tpu.memory_space<vmem>>, %arg6: memref<1x128xf32, #tpu.memory_space<vmem>>, %arg7: memref<128x128xbf16, #tpu.memory_space<vmem>>, %arg8: memref<128x128xbf16, #tpu.memory_space<vmem>>, %arg9: memref<16x128xbf16, #tpu.memory_space<vmem>>) attributes {dimension_semantics = [#tpu.dimension_semantics<parallel>], iteration_bounds = array<i64: 2>, scalar_prefetch = 0 : i64, scratch_operands = 0 : i64, tpu.core_type = #tpu.core_type<tc>, window_params = [{transform_indices = @transform_0, window_bounds = array<i64: 1, 8, 8, 128>}, {transform_indices = @transform_1, window_bounds = array<i64: 16, 128>}, {pipeline_mode = #tpu.pipeline_mode<synchronous>, transform_indices = @transform_2, window_bounds = array<i64: 3, 3, 128>}, {pipeline_mode = #tpu.pipeline_mode<synchronous>, transform_indices = @transform_3, window_bounds = array<i64: 128, 128>}, {pipeline_mode = #tpu.pipeline_mode<synchronous>, transform_indices = @transform_4, window_bounds = array<i64: 1, 128>}, {pipeline_mode = #tpu.pipeline_mode<synchronous>, transform_indices = @transform_5, window_bounds = array<i64: 1, 128>}, {pipeline_mode = #tpu.pipeline_mode<synchronous>, transform_indices = @transform_6, window_bounds = array<i64: 128, 128>}, {pipeline_mode = #tpu.pipeline_mode<synchronous>, transform_indices = @transform_7, window_bounds = array<i64: 128, 128>}, {transform_indices = @transform_8, window_bounds = array<i64: 16, 128>}]} {
    %c0 = arith.constant 0 : index
    %c0_0 = arith.constant 0 : index
    %c0_1 = arith.constant 0 : index
    %c0_2 = arith.constant 0 : index
    %0 = vector.load %arg1[%c0, %c0_0, %c0_1, %c0_2] : memref<1x8x8x128xbf16, #tpu.memory_space<vmem>>, vector<1x8x8x128xbf16>
    %1 = vector.shape_cast %0 : vector<1x8x8x128xbf16> to vector<8x8x128xbf16>
    %c0_3 = arith.constant 0 : index
    %c0_4 = arith.constant 0 : index
    %c0_5 = arith.constant 0 : index
    %2 = vector.load %arg3[%c0_3, %c0_4, %c0_5] : memref<3x3x128xf32, #tpu.memory_space<vmem>>, vector<3x3x128xf32>
    %cst = arith.constant 0.000000e+00 : f32
    %3 = vector.broadcast %cst : f32 to vector<4x4x128xf32>
    %4 = vector.extract_strided_slice %1 {offsets = [0, 0, 0], sizes = [4, 4, 128], strides = [1, 1, 1]} : vector<8x8x128xbf16> to vector<4x4x128xbf16>
    %5 = arith.extf %4 : vector<4x4x128xbf16> to vector<4x4x128xf32>
    %6 = vector.extract_strided_slice %2 {offsets = [0, 0, 0], sizes = [1, 1, 128], strides = [1, 1, 1]} : vector<3x3x128xf32> to vector<1x1x128xf32>
    %7 = vector.shape_cast %6 : vector<1x1x128xf32> to vector<128xf32>
    %8 = vector.shape_cast %7 : vector<128xf32> to vector<1x1x128xf32>
    %9 = vector.broadcast %8 : vector<1x1x128xf32> to vector<4x4x128xf32>
    %10 = arith.mulf %5, %9 : vector<4x4x128xf32>
    %11 = arith.addf %3, %10 : vector<4x4x128xf32>
    %12 = vector.extract_strided_slice %1 {offsets = [0, 2, 0], sizes = [4, 4, 128], strides = [1, 1, 1]} : vector<8x8x128xbf16> to vector<4x4x128xbf16>
    %13 = arith.extf %12 : vector<4x4x128xbf16> to vector<4x4x128xf32>
    %14 = vector.extract_strided_slice %2 {offsets = [0, 1, 0], sizes = [1, 1, 128], strides = [1, 1, 1]} : vector<3x3x128xf32> to vector<1x1x128xf32>
    %15 = vector.shape_cast %14 : vector<1x1x128xf32> to vector<128xf32>
    %16 = vector.shape_cast %15 : vector<128xf32> to vector<1x1x128xf32>
    %17 = vector.broadcast %16 : vector<1x1x128xf32> to vector<4x4x128xf32>
    %18 = arith.mulf %13, %17 : vector<4x4x128xf32>
    %19 = arith.addf %11, %18 : vector<4x4x128xf32>
    %20 = vector.extract_strided_slice %1 {offsets = [0, 4, 0], sizes = [4, 4, 128], strides = [1, 1, 1]} : vector<8x8x128xbf16> to vector<4x4x128xbf16>
    %21 = arith.extf %20 : vector<4x4x128xbf16> to vector<4x4x128xf32>
    %22 = vector.extract_strided_slice %2 {offsets = [0, 2, 0], sizes = [1, 1, 128], strides = [1, 1, 1]} : vector<3x3x128xf32> to vector<1x1x128xf32>
    %23 = vector.shape_cast %22 : vector<1x1x128xf32> to vector<128xf32>
    %24 = vector.shape_cast %23 : vector<128xf32> to vector<1x1x128xf32>
    %25 = vector.broadcast %24 : vector<1x1x128xf32> to vector<4x4x128xf32>
    %26 = arith.mulf %21, %25 : vector<4x4x128xf32>
    %27 = arith.addf %19, %26 : vector<4x4x128xf32>
    %28 = vector.extract_strided_slice %1 {offsets = [2, 0, 0], sizes = [4, 4, 128], strides = [1, 1, 1]} : vector<8x8x128xbf16> to vector<4x4x128xbf16>
    %29 = arith.extf %28 : vector<4x4x128xbf16> to vector<4x4x128xf32>
    %30 = vector.extract_strided_slice %2 {offsets = [1, 0, 0], sizes = [1, 1, 128], strides = [1, 1, 1]} : vector<3x3x128xf32> to vector<1x1x128xf32>
    %31 = vector.shape_cast %30 : vector<1x1x128xf32> to vector<128xf32>
    %32 = vector.shape_cast %31 : vector<128xf32> to vector<1x1x128xf32>
    %33 = vector.broadcast %32 : vector<1x1x128xf32> to vector<4x4x128xf32>
    %34 = arith.mulf %29, %33 : vector<4x4x128xf32>
    %35 = arith.addf %27, %34 : vector<4x4x128xf32>
    %36 = vector.extract_strided_slice %1 {offsets = [2, 2, 0], sizes = [4, 4, 128], strides = [1, 1, 1]} : vector<8x8x128xbf16> to vector<4x4x128xbf16>
    %37 = arith.extf %36 : vector<4x4x128xbf16> to vector<4x4x128xf32>
    %38 = vector.extract_strided_slice %2 {offsets = [1, 1, 0], sizes = [1, 1, 128], strides = [1, 1, 1]} : vector<3x3x128xf32> to vector<1x1x128xf32>
    %39 = vector.shape_cast %38 : vector<1x1x128xf32> to vector<128xf32>
    %40 = vector.shape_cast %39 : vector<128xf32> to vector<1x1x128xf32>
    %41 = vector.broadcast %40 : vector<1x1x128xf32> to vector<4x4x128xf32>
    %42 = arith.mulf %37, %41 : vector<4x4x128xf32>
    %43 = arith.addf %35, %42 : vector<4x4x128xf32>
    %44 = vector.extract_strided_slice %1 {offsets = [2, 4, 0], sizes = [4, 4, 128], strides = [1, 1, 1]} : vector<8x8x128xbf16> to vector<4x4x128xbf16>
    %45 = arith.extf %44 : vector<4x4x128xbf16> to vector<4x4x128xf32>
    %46 = vector.extract_strided_slice %2 {offsets = [1, 2, 0], sizes = [1, 1, 128], strides = [1, 1, 1]} : vector<3x3x128xf32> to vector<1x1x128xf32>
    %47 = vector.shape_cast %46 : vector<1x1x128xf32> to vector<128xf32>
    %48 = vector.shape_cast %47 : vector<128xf32> to vector<1x1x128xf32>
    %49 = vector.broadcast %48 : vector<1x1x128xf32> to vector<4x4x128xf32>
    %50 = arith.mulf %45, %49 : vector<4x4x128xf32>
    %51 = arith.addf %43, %50 : vector<4x4x128xf32>
    %52 = vector.extract_strided_slice %1 {offsets = [4, 0, 0], sizes = [4, 4, 128], strides = [1, 1, 1]} : vector<8x8x128xbf16> to vector<4x4x128xbf16>
    %53 = arith.extf %52 : vector<4x4x128xbf16> to vector<4x4x128xf32>
    %54 = vector.extract_strided_slice %2 {offsets = [2, 0, 0], sizes = [1, 1, 128], strides = [1, 1, 1]} : vector<3x3x128xf32> to vector<1x1x128xf32>
    %55 = vector.shape_cast %54 : vector<1x1x128xf32> to vector<128xf32>
    %56 = vector.shape_cast %55 : vector<128xf32> to vector<1x1x128xf32>
    %57 = vector.broadcast %56 : vector<1x1x128xf32> to vector<4x4x128xf32>
    %58 = arith.mulf %53, %57 : vector<4x4x128xf32>
    %59 = arith.addf %51, %58 : vector<4x4x128xf32>
    %60 = vector.extract_strided_slice %1 {offsets = [4, 2, 0], sizes = [4, 4, 128], strides = [1, 1, 1]} : vector<8x8x128xbf16> to vector<4x4x128xbf16>
    %61 = arith.extf %60 : vector<4x4x128xbf16> to vector<4x4x128xf32>
    %62 = vector.extract_strided_slice %2 {offsets = [2, 1, 0], sizes = [1, 1, 128], strides = [1, 1, 1]} : vector<3x3x128xf32> to vector<1x1x128xf32>
    %63 = vector.shape_cast %62 : vector<1x1x128xf32> to vector<128xf32>
    %64 = vector.shape_cast %63 : vector<128xf32> to vector<1x1x128xf32>
    %65 = vector.broadcast %64 : vector<1x1x128xf32> to vector<4x4x128xf32>
    %66 = arith.mulf %61, %65 : vector<4x4x128xf32>
    %67 = arith.addf %59, %66 : vector<4x4x128xf32>
    %68 = vector.extract_strided_slice %1 {offsets = [4, 4, 0], sizes = [4, 4, 128], strides = [1, 1, 1]} : vector<8x8x128xbf16> to vector<4x4x128xbf16>
    %69 = arith.extf %68 : vector<4x4x128xbf16> to vector<4x4x128xf32>
    %70 = vector.extract_strided_slice %2 {offsets = [2, 2, 0], sizes = [1, 1, 128], strides = [1, 1, 1]} : vector<3x3x128xf32> to vector<1x1x128xf32>
    %71 = vector.shape_cast %70 : vector<1x1x128xf32> to vector<128xf32>
    %72 = vector.shape_cast %71 : vector<128xf32> to vector<1x1x128xf32>
    %73 = vector.broadcast %72 : vector<1x1x128xf32> to vector<4x4x128xf32>
    %74 = arith.mulf %69, %73 : vector<4x4x128xf32>
    %75 = arith.addf %67, %74 : vector<4x4x128xf32>
    %76 = vector.shape_cast %75 : vector<4x4x128xf32> to vector<16x128xf32>
    %77 = arith.truncf %76 : vector<16x128xf32> to vector<16x128xbf16>
    %c0_6 = arith.constant 0 : index
    %c0_7 = arith.constant 0 : index
    %78 = vector.load %arg4[%c0_6, %c0_7] : memref<128x128xbf16, #tpu.memory_space<vmem>>, vector<128x128xbf16>
    %cst_8 = arith.constant dense<0.000000e+00> : vector<16x128xf32>
    %79 = tpu.matmul %77, %78, %cst_8 {dimension_numbers = #tpu.dot_dimension_numbers<[1], [0], [0], [1], [0, 0, 1, 1], [], []>} : vector<16x128xbf16>, vector<128x128xbf16>, vector<16x128xf32> -> vector<16x128xf32>
    %c0_9 = arith.constant 0 : index
    %c0_10 = arith.constant 0 : index
    %80 = vector.load %arg5[%c0_9, %c0_10] : memref<1x128xf32, #tpu.memory_space<vmem>>, vector<1x128xf32>
    %81 = vector.broadcast %80 : vector<1x128xf32> to vector<16x128xf32>
    %82 = arith.mulf %79, %81 : vector<16x128xf32>
    %c0_11 = arith.constant 0 : index
    %c0_12 = arith.constant 0 : index
    %83 = vector.load %arg6[%c0_11, %c0_12] : memref<1x128xf32, #tpu.memory_space<vmem>>, vector<1x128xf32>
    %84 = vector.broadcast %83 : vector<1x128xf32> to vector<16x128xf32>
    %85 = arith.addf %82, %84 : vector<16x128xf32>
    %cst_13 = arith.constant 0.000000e+00 : f32
    %86 = vector.broadcast %cst_13 : f32 to vector<16x128xf32>
    %87 = arith.maximumf %85, %86 : vector<16x128xf32>
    %88 = arith.truncf %87 : vector<16x128xf32> to vector<16x128xbf16>
    %c0_14 = arith.constant 0 : index
    %c0_15 = arith.constant 0 : index
    %89 = vector.load %arg7[%c0_14, %c0_15] : memref<128x128xbf16, #tpu.memory_space<vmem>>, vector<128x128xbf16>
    %cst_16 = arith.constant dense<0.000000e+00> : vector<16x128xf32>
    %90 = tpu.matmul %88, %89, %cst_16 {dimension_numbers = #tpu.dot_dimension_numbers<[1], [0], [0], [1], [0, 0, 1, 1], [], []>} : vector<16x128xbf16>, vector<128x128xbf16>, vector<16x128xf32> -> vector<16x128xf32>
    %c0_17 = arith.constant 0 : index
    %c0_18 = arith.constant 0 : index
    %91 = vector.load %arg2[%c0_17, %c0_18] : memref<16x128xbf16, #tpu.memory_space<vmem>>, vector<16x128xbf16>
    %c0_19 = arith.constant 0 : index
    %c0_20 = arith.constant 0 : index
    %92 = vector.load %arg8[%c0_19, %c0_20] : memref<128x128xbf16, #tpu.memory_space<vmem>>, vector<128x128xbf16>
    %cst_21 = arith.constant dense<0.000000e+00> : vector<16x128xf32>
    %93 = tpu.matmul %91, %92, %cst_21 {dimension_numbers = #tpu.dot_dimension_numbers<[1], [0], [0], [1], [0, 0, 1, 1], [], []>} : vector<16x128xbf16>, vector<128x128xbf16>, vector<16x128xf32> -> vector<16x128xf32>
    %94 = arith.addf %90, %93 : vector<16x128xf32>
    %cst_22 = arith.constant 0.000000e+00 : f32
    %95 = vector.broadcast %cst_22 : f32 to vector<16x128xf32>
    %96 = arith.maximumf %94, %95 : vector<16x128xf32>
    %97 = arith.truncf %96 : vector<16x128xf32> to vector<16x128xbf16>
    %c0_23 = arith.constant 0 : index
    %c0_24 = arith.constant 0 : index
    %98 = vector.load %arg9[%c0_23, %c0_24] : memref<16x128xbf16, #tpu.memory_space<vmem>>, vector<16x128xbf16>
    tpu.vector_store %arg9[%c0_23, %c0_24], %97 {strides = array<i32>} : memref<16x128xbf16, #tpu.memory_space<vmem>>, vector<16x128xbf16>,
    return
  }
  func.func @transform_0(%arg0: i32) -> (i32, i32, i32, i32) {
    %c0_i32 = arith.constant 0 : i32
    %c0_i32_0 = arith.constant 0 : i32
    %c0_i32_1 = arith.constant 0 : i32
    %c0_i32_2 = arith.constant 0 : i32
    return %arg0, %c0_i32, %c0_i32_0, %c0_i32_1 : i32, i32, i32, i32
  }
  func.func @transform_1(%arg0: i32) -> (i32, i32) {
    %c0_i32 = arith.constant 0 : i32
    %c0_i32_0 = arith.constant 0 : i32
    return %arg0, %c0_i32 : i32, i32
  }
  func.func @transform_2(%arg0: i32) -> (i32, i32, i32) {
    %c0_i32 = arith.constant 0 : i32
    %c0_i32_0 = arith.constant 0 : i32
    %c0_i32_1 = arith.constant 0 : i32
    %c0_i32_2 = arith.constant 0 : i32
    return %c0_i32, %c0_i32_0, %c0_i32_1 : i32, i32, i32
  }
  func.func @transform_3(%arg0: i32) -> (i32, i32) {
    %c0_i32 = arith.constant 0 : i32
    %c0_i32_0 = arith.constant 0 : i32
    %c0_i32_1 = arith.constant 0 : i32
    return %c0_i32, %c0_i32_0 : i32, i32
  }
  func.func @transform_4(%arg0: i32) -> (i32, i32) {
    %c0_i32 = arith.constant 0 : i32
    %c0_i32_0 = arith.constant 0 : i32
    %c0_i32_1 = arith.constant 0 : i32
    return %c0_i32, %c0_i32_0 : i32, i32
  }
  func.func @transform_5(%arg0: i32) -> (i32, i32) {
    %c0_i32 = arith.constant 0 : i32
    %c0_i32_0 = arith.constant 0 : i32
    %c0_i32_1 = arith.constant 0 : i32
    return %c0_i32, %c0_i32_0 : i32, i32
  }
  func.func @transform_6(%arg0: i32) -> (i32, i32) {
    %c0_i32 = arith.constant 0 : i32
    %c0_i32_0 = arith.constant 0 : i32
    %c0_i32_1 = arith.constant 0 : i32
    return %c0_i32, %c0_i32_0 : i32, i32
  }
  func.func @transform_7(%arg0: i32) -> (i32, i32) {
    %c0_i32 = arith.constant 0 : i32
    %c0_i32_0 = arith.constant 0 : i32
    %c0_i32_1 = arith.constant 0 : i32
    return %c0_i32, %c0_i32_0 : i32, i32
  }
  func.func @transform_8(%arg0: i32) -> (i32, i32) {
    %c0_i32 = arith.constant 0 : i32
    %c0_i32_0 = arith.constant 0 : i32
    return %arg0, %c0_i32 : i32, i32
  }
}

module attributes {stable_mosaic.version = 11 : i64} {
  func.func @_fcb_tail_dw_kernel(%arg0: i32, %arg1: memref<1x6x6x128xbf16, #tpu.memory_space<vmem>>, %arg2: memref<16x128xbf16, #tpu.memory_space<vmem>>, %arg3: memref<3x3x128xf32, #tpu.memory_space<vmem>>, %arg4: memref<128x128xbf16, #tpu.memory_space<vmem>>, %arg5: memref<1x128xf32, #tpu.memory_space<vmem>>, %arg6: memref<1x128xf32, #tpu.memory_space<vmem>>, %arg7: memref<128x128xbf16, #tpu.memory_space<vmem>>, %arg8: memref<128x128xbf16, #tpu.memory_space<vmem>>, %arg9: memref<16x128xbf16, #tpu.memory_space<vmem>>) attributes {dimension_semantics = [#tpu.dimension_semantics<parallel>], iteration_bounds = array<i64: 2>, scalar_prefetch = 0 : i64, scratch_operands = 0 : i64, tpu.core_type = #tpu.core_type<tc>, window_params = [{transform_indices = @transform_0, window_bounds = array<i64: 1, 6, 6, 128>}, {transform_indices = @transform_1, window_bounds = array<i64: 16, 128>}, {pipeline_mode = #tpu.pipeline_mode<synchronous>, transform_indices = @transform_2, window_bounds = array<i64: 3, 3, 128>}, {pipeline_mode = #tpu.pipeline_mode<synchronous>, transform_indices = @transform_3, window_bounds = array<i64: 128, 128>}, {pipeline_mode = #tpu.pipeline_mode<synchronous>, transform_indices = @transform_4, window_bounds = array<i64: 1, 128>}, {pipeline_mode = #tpu.pipeline_mode<synchronous>, transform_indices = @transform_5, window_bounds = array<i64: 1, 128>}, {pipeline_mode = #tpu.pipeline_mode<synchronous>, transform_indices = @transform_6, window_bounds = array<i64: 128, 128>}, {pipeline_mode = #tpu.pipeline_mode<synchronous>, transform_indices = @transform_7, window_bounds = array<i64: 128, 128>}, {transform_indices = @transform_8, window_bounds = array<i64: 16, 128>}]} {
    %c0 = arith.constant 0 : index
    %c0_0 = arith.constant 0 : index
    %c0_1 = arith.constant 0 : index
    %c0_2 = arith.constant 0 : index
    %0 = vector.load %arg1[%c0, %c0_0, %c0_1, %c0_2] : memref<1x6x6x128xbf16, #tpu.memory_space<vmem>>, vector<1x6x6x128xbf16>
    %1 = vector.shape_cast %0 : vector<1x6x6x128xbf16> to vector<6x6x128xbf16>
    %c0_3 = arith.constant 0 : index
    %c0_4 = arith.constant 0 : index
    %c0_5 = arith.constant 0 : index
    %2 = vector.load %arg3[%c0_3, %c0_4, %c0_5] : memref<3x3x128xf32, #tpu.memory_space<vmem>>, vector<3x3x128xf32>
    %cst = arith.constant 0.000000e+00 : f32
    %3 = vector.broadcast %cst : f32 to vector<4x4x128xf32>
    %4 = vector.extract_strided_slice %1 {offsets = [0, 0, 0], sizes = [4, 4, 128], strides = [1, 1, 1]} : vector<6x6x128xbf16> to vector<4x4x128xbf16>
    %5 = arith.extf %4 : vector<4x4x128xbf16> to vector<4x4x128xf32>
    %6 = vector.extract_strided_slice %2 {offsets = [0, 0, 0], sizes = [1, 1, 128], strides = [1, 1, 1]} : vector<3x3x128xf32> to vector<1x1x128xf32>
    %7 = vector.shape_cast %6 : vector<1x1x128xf32> to vector<128xf32>
    %8 = vector.shape_cast %7 : vector<128xf32> to vector<1x1x128xf32>
    %9 = vector.broadcast %8 : vector<1x1x128xf32> to vector<4x4x128xf32>
    %10 = arith.mulf %5, %9 : vector<4x4x128xf32>
    %11 = arith.addf %3, %10 : vector<4x4x128xf32>
    %12 = vector.extract_strided_slice %1 {offsets = [0, 1, 0], sizes = [4, 4, 128], strides = [1, 1, 1]} : vector<6x6x128xbf16> to vector<4x4x128xbf16>
    %13 = arith.extf %12 : vector<4x4x128xbf16> to vector<4x4x128xf32>
    %14 = vector.extract_strided_slice %2 {offsets = [0, 1, 0], sizes = [1, 1, 128], strides = [1, 1, 1]} : vector<3x3x128xf32> to vector<1x1x128xf32>
    %15 = vector.shape_cast %14 : vector<1x1x128xf32> to vector<128xf32>
    %16 = vector.shape_cast %15 : vector<128xf32> to vector<1x1x128xf32>
    %17 = vector.broadcast %16 : vector<1x1x128xf32> to vector<4x4x128xf32>
    %18 = arith.mulf %13, %17 : vector<4x4x128xf32>
    %19 = arith.addf %11, %18 : vector<4x4x128xf32>
    %20 = vector.extract_strided_slice %1 {offsets = [0, 2, 0], sizes = [4, 4, 128], strides = [1, 1, 1]} : vector<6x6x128xbf16> to vector<4x4x128xbf16>
    %21 = arith.extf %20 : vector<4x4x128xbf16> to vector<4x4x128xf32>
    %22 = vector.extract_strided_slice %2 {offsets = [0, 2, 0], sizes = [1, 1, 128], strides = [1, 1, 1]} : vector<3x3x128xf32> to vector<1x1x128xf32>
    %23 = vector.shape_cast %22 : vector<1x1x128xf32> to vector<128xf32>
    %24 = vector.shape_cast %23 : vector<128xf32> to vector<1x1x128xf32>
    %25 = vector.broadcast %24 : vector<1x1x128xf32> to vector<4x4x128xf32>
    %26 = arith.mulf %21, %25 : vector<4x4x128xf32>
    %27 = arith.addf %19, %26 : vector<4x4x128xf32>
    %28 = vector.extract_strided_slice %1 {offsets = [1, 0, 0], sizes = [4, 4, 128], strides = [1, 1, 1]} : vector<6x6x128xbf16> to vector<4x4x128xbf16>
    %29 = arith.extf %28 : vector<4x4x128xbf16> to vector<4x4x128xf32>
    %30 = vector.extract_strided_slice %2 {offsets = [1, 0, 0], sizes = [1, 1, 128], strides = [1, 1, 1]} : vector<3x3x128xf32> to vector<1x1x128xf32>
    %31 = vector.shape_cast %30 : vector<1x1x128xf32> to vector<128xf32>
    %32 = vector.shape_cast %31 : vector<128xf32> to vector<1x1x128xf32>
    %33 = vector.broadcast %32 : vector<1x1x128xf32> to vector<4x4x128xf32>
    %34 = arith.mulf %29, %33 : vector<4x4x128xf32>
    %35 = arith.addf %27, %34 : vector<4x4x128xf32>
    %36 = vector.extract_strided_slice %1 {offsets = [1, 1, 0], sizes = [4, 4, 128], strides = [1, 1, 1]} : vector<6x6x128xbf16> to vector<4x4x128xbf16>
    %37 = arith.extf %36 : vector<4x4x128xbf16> to vector<4x4x128xf32>
    %38 = vector.extract_strided_slice %2 {offsets = [1, 1, 0], sizes = [1, 1, 128], strides = [1, 1, 1]} : vector<3x3x128xf32> to vector<1x1x128xf32>
    %39 = vector.shape_cast %38 : vector<1x1x128xf32> to vector<128xf32>
    %40 = vector.shape_cast %39 : vector<128xf32> to vector<1x1x128xf32>
    %41 = vector.broadcast %40 : vector<1x1x128xf32> to vector<4x4x128xf32>
    %42 = arith.mulf %37, %41 : vector<4x4x128xf32>
    %43 = arith.addf %35, %42 : vector<4x4x128xf32>
    %44 = vector.extract_strided_slice %1 {offsets = [1, 2, 0], sizes = [4, 4, 128], strides = [1, 1, 1]} : vector<6x6x128xbf16> to vector<4x4x128xbf16>
    %45 = arith.extf %44 : vector<4x4x128xbf16> to vector<4x4x128xf32>
    %46 = vector.extract_strided_slice %2 {offsets = [1, 2, 0], sizes = [1, 1, 128], strides = [1, 1, 1]} : vector<3x3x128xf32> to vector<1x1x128xf32>
    %47 = vector.shape_cast %46 : vector<1x1x128xf32> to vector<128xf32>
    %48 = vector.shape_cast %47 : vector<128xf32> to vector<1x1x128xf32>
    %49 = vector.broadcast %48 : vector<1x1x128xf32> to vector<4x4x128xf32>
    %50 = arith.mulf %45, %49 : vector<4x4x128xf32>
    %51 = arith.addf %43, %50 : vector<4x4x128xf32>
    %52 = vector.extract_strided_slice %1 {offsets = [2, 0, 0], sizes = [4, 4, 128], strides = [1, 1, 1]} : vector<6x6x128xbf16> to vector<4x4x128xbf16>
    %53 = arith.extf %52 : vector<4x4x128xbf16> to vector<4x4x128xf32>
    %54 = vector.extract_strided_slice %2 {offsets = [2, 0, 0], sizes = [1, 1, 128], strides = [1, 1, 1]} : vector<3x3x128xf32> to vector<1x1x128xf32>
    %55 = vector.shape_cast %54 : vector<1x1x128xf32> to vector<128xf32>
    %56 = vector.shape_cast %55 : vector<128xf32> to vector<1x1x128xf32>
    %57 = vector.broadcast %56 : vector<1x1x128xf32> to vector<4x4x128xf32>
    %58 = arith.mulf %53, %57 : vector<4x4x128xf32>
    %59 = arith.addf %51, %58 : vector<4x4x128xf32>
    %60 = vector.extract_strided_slice %1 {offsets = [2, 1, 0], sizes = [4, 4, 128], strides = [1, 1, 1]} : vector<6x6x128xbf16> to vector<4x4x128xbf16>
    %61 = arith.extf %60 : vector<4x4x128xbf16> to vector<4x4x128xf32>
    %62 = vector.extract_strided_slice %2 {offsets = [2, 1, 0], sizes = [1, 1, 128], strides = [1, 1, 1]} : vector<3x3x128xf32> to vector<1x1x128xf32>
    %63 = vector.shape_cast %62 : vector<1x1x128xf32> to vector<128xf32>
    %64 = vector.shape_cast %63 : vector<128xf32> to vector<1x1x128xf32>
    %65 = vector.broadcast %64 : vector<1x1x128xf32> to vector<4x4x128xf32>
    %66 = arith.mulf %61, %65 : vector<4x4x128xf32>
    %67 = arith.addf %59, %66 : vector<4x4x128xf32>
    %68 = vector.extract_strided_slice %1 {offsets = [2, 2, 0], sizes = [4, 4, 128], strides = [1, 1, 1]} : vector<6x6x128xbf16> to vector<4x4x128xbf16>
    %69 = arith.extf %68 : vector<4x4x128xbf16> to vector<4x4x128xf32>
    %70 = vector.extract_strided_slice %2 {offsets = [2, 2, 0], sizes = [1, 1, 128], strides = [1, 1, 1]} : vector<3x3x128xf32> to vector<1x1x128xf32>
    %71 = vector.shape_cast %70 : vector<1x1x128xf32> to vector<128xf32>
    %72 = vector.shape_cast %71 : vector<128xf32> to vector<1x1x128xf32>
    %73 = vector.broadcast %72 : vector<1x1x128xf32> to vector<4x4x128xf32>
    %74 = arith.mulf %69, %73 : vector<4x4x128xf32>
    %75 = arith.addf %67, %74 : vector<4x4x128xf32>
    %76 = vector.shape_cast %75 : vector<4x4x128xf32> to vector<16x128xf32>
    %77 = arith.truncf %76 : vector<16x128xf32> to vector<16x128xbf16>
    %c0_6 = arith.constant 0 : index
    %c0_7 = arith.constant 0 : index
    %78 = vector.load %arg4[%c0_6, %c0_7] : memref<128x128xbf16, #tpu.memory_space<vmem>>, vector<128x128xbf16>
    %cst_8 = arith.constant dense<0.000000e+00> : vector<16x128xf32>
    %79 = tpu.matmul %77, %78, %cst_8 {dimension_numbers = #tpu.dot_dimension_numbers<[1], [0], [0], [1], [0, 0, 1, 1], [], []>} : vector<16x128xbf16>, vector<128x128xbf16>, vector<16x128xf32> -> vector<16x128xf32>
    %c0_9 = arith.constant 0 : index
    %c0_10 = arith.constant 0 : index
    %80 = vector.load %arg5[%c0_9, %c0_10] : memref<1x128xf32, #tpu.memory_space<vmem>>, vector<1x128xf32>
    %81 = vector.broadcast %80 : vector<1x128xf32> to vector<16x128xf32>
    %82 = arith.mulf %79, %81 : vector<16x128xf32>
    %c0_11 = arith.constant 0 : index
    %c0_12 = arith.constant 0 : index
    %83 = vector.load %arg6[%c0_11, %c0_12] : memref<1x128xf32, #tpu.memory_space<vmem>>, vector<1x128xf32>
    %84 = vector.broadcast %83 : vector<1x128xf32> to vector<16x128xf32>
    %85 = arith.addf %82, %84 : vector<16x128xf32>
    %cst_13 = arith.constant 0.000000e+00 : f32
    %86 = vector.broadcast %cst_13 : f32 to vector<16x128xf32>
    %87 = arith.maximumf %85, %86 : vector<16x128xf32>
    %88 = arith.truncf %87 : vector<16x128xf32> to vector<16x128xbf16>
    %c0_14 = arith.constant 0 : index
    %c0_15 = arith.constant 0 : index
    %89 = vector.load %arg7[%c0_14, %c0_15] : memref<128x128xbf16, #tpu.memory_space<vmem>>, vector<128x128xbf16>
    %cst_16 = arith.constant dense<0.000000e+00> : vector<16x128xf32>
    %90 = tpu.matmul %88, %89, %cst_16 {dimension_numbers = #tpu.dot_dimension_numbers<[1], [0], [0], [1], [0, 0, 1, 1], [], []>} : vector<16x128xbf16>, vector<128x128xbf16>, vector<16x128xf32> -> vector<16x128xf32>
    %c0_17 = arith.constant 0 : index
    %c0_18 = arith.constant 0 : index
    %91 = vector.load %arg2[%c0_17, %c0_18] : memref<16x128xbf16, #tpu.memory_space<vmem>>, vector<16x128xbf16>
    %c0_19 = arith.constant 0 : index
    %c0_20 = arith.constant 0 : index
    %92 = vector.load %arg8[%c0_19, %c0_20] : memref<128x128xbf16, #tpu.memory_space<vmem>>, vector<128x128xbf16>
    %cst_21 = arith.constant dense<0.000000e+00> : vector<16x128xf32>
    %93 = tpu.matmul %91, %92, %cst_21 {dimension_numbers = #tpu.dot_dimension_numbers<[1], [0], [0], [1], [0, 0, 1, 1], [], []>} : vector<16x128xbf16>, vector<128x128xbf16>, vector<16x128xf32> -> vector<16x128xf32>
    %94 = arith.addf %90, %93 : vector<16x128xf32>
    %cst_22 = arith.constant 0.000000e+00 : f32
    %95 = vector.broadcast %cst_22 : f32 to vector<16x128xf32>
    %96 = arith.maximumf %94, %95 : vector<16x128xf32>
    %97 = arith.truncf %96 : vector<16x128xf32> to vector<16x128xbf16>
    %c0_23 = arith.constant 0 : index
    %c0_24 = arith.constant 0 : index
    %98 = vector.load %arg9[%c0_23, %c0_24] : memref<16x128xbf16, #tpu.memory_space<vmem>>, vector<16x128xbf16>
    tpu.vector_store %arg9[%c0_23, %c0_24], %97 {strides = array<i32>} : memref<16x128xbf16, #tpu.memory_space<vmem>>, vector<16x128xbf16>,
    return
  }
  func.func @transform_0(%arg0: i32) -> (i32, i32, i32, i32) {
    %c0_i32 = arith.constant 0 : i32
    %c0_i32_0 = arith.constant 0 : i32
    %c0_i32_1 = arith.constant 0 : i32
    %c0_i32_2 = arith.constant 0 : i32
    return %arg0, %c0_i32, %c0_i32_0, %c0_i32_1 : i32, i32, i32, i32
  }
  func.func @transform_1(%arg0: i32) -> (i32, i32) {
    %c0_i32 = arith.constant 0 : i32
    %c0_i32_0 = arith.constant 0 : i32
    return %arg0, %c0_i32 : i32, i32
  }
  func.func @transform_2(%arg0: i32) -> (i32, i32, i32) {
    %c0_i32 = arith.constant 0 : i32
    %c0_i32_0 = arith.constant 0 : i32
    %c0_i32_1 = arith.constant 0 : i32
    %c0_i32_2 = arith.constant 0 : i32
    return %c0_i32, %c0_i32_0, %c0_i32_1 : i32, i32, i32
  }
  func.func @transform_3(%arg0: i32) -> (i32, i32) {
    %c0_i32 = arith.constant 0 : i32
    %c0_i32_0 = arith.constant 0 : i32
    %c0_i32_1 = arith.constant 0 : i32
    return %c0_i32, %c0_i32_0 : i32, i32
  }
  func.func @transform_4(%arg0: i32) -> (i32, i32) {
    %c0_i32 = arith.constant 0 : i32
    %c0_i32_0 = arith.constant 0 : i32
    %c0_i32_1 = arith.constant 0 : i32
    return %c0_i32, %c0_i32_0 : i32, i32
  }
  func.func @transform_5(%arg0: i32) -> (i32, i32) {
    %c0_i32 = arith.constant 0 : i32
    %c0_i32_0 = arith.constant 0 : i32
    %c0_i32_1 = arith.constant 0 : i32
    return %c0_i32, %c0_i32_0 : i32, i32
  }
  func.func @transform_6(%arg0: i32) -> (i32, i32) {
    %c0_i32 = arith.constant 0 : i32
    %c0_i32_0 = arith.constant 0 : i32
    %c0_i32_1 = arith.constant 0 : i32
    return %c0_i32, %c0_i32_0 : i32, i32
  }
  func.func @transform_7(%arg0: i32) -> (i32, i32) {
    %c0_i32 = arith.constant 0 : i32
    %c0_i32_0 = arith.constant 0 : i32
    %c0_i32_1 = arith.constant 0 : i32
    return %c0_i32, %c0_i32_0 : i32, i32
  }
  func.func @transform_8(%arg0: i32) -> (i32, i32) {
    %c0_i32 = arith.constant 0 : i32
    %c0_i32_0 = arith.constant 0 : i32
    return %arg0, %c0_i32 : i32, i32
  }
}

module attributes {stable_mosaic.version = 11 : i64} {
  func.func @_fcb_tail_pw_kernel(%arg0: i32, %arg1: memref<16x128xbf16, #tpu.memory_space<vmem>>, %arg2: memref<16x128xbf16, #tpu.memory_space<vmem>>, %arg3: memref<128x128xbf16, #tpu.memory_space<vmem>>, %arg4: memref<1x128xf32, #tpu.memory_space<vmem>>, %arg5: memref<1x128xf32, #tpu.memory_space<vmem>>, %arg6: memref<128x128xbf16, #tpu.memory_space<vmem>>, %arg7: memref<128x128xbf16, #tpu.memory_space<vmem>>, %arg8: memref<16x128xbf16, #tpu.memory_space<vmem>>) attributes {dimension_semantics = [#tpu.dimension_semantics<parallel>], iteration_bounds = array<i64: 2>, scalar_prefetch = 0 : i64, scratch_operands = 0 : i64, tpu.core_type = #tpu.core_type<tc>, window_params = [{transform_indices = @transform_0, window_bounds = array<i64: 16, 128>}, {transform_indices = @transform_1, window_bounds = array<i64: 16, 128>}, {pipeline_mode = #tpu.pipeline_mode<synchronous>, transform_indices = @transform_2, window_bounds = array<i64: 128, 128>}, {pipeline_mode = #tpu.pipeline_mode<synchronous>, transform_indices = @transform_3, window_bounds = array<i64: 1, 128>}, {pipeline_mode = #tpu.pipeline_mode<synchronous>, transform_indices = @transform_4, window_bounds = array<i64: 1, 128>}, {pipeline_mode = #tpu.pipeline_mode<synchronous>, transform_indices = @transform_5, window_bounds = array<i64: 128, 128>}, {pipeline_mode = #tpu.pipeline_mode<synchronous>, transform_indices = @transform_6, window_bounds = array<i64: 128, 128>}, {transform_indices = @transform_7, window_bounds = array<i64: 16, 128>}]} {
    %c0 = arith.constant 0 : index
    %c0_0 = arith.constant 0 : index
    %0 = vector.load %arg1[%c0, %c0_0] : memref<16x128xbf16, #tpu.memory_space<vmem>>, vector<16x128xbf16>
    %c0_1 = arith.constant 0 : index
    %c0_2 = arith.constant 0 : index
    %1 = vector.load %arg3[%c0_1, %c0_2] : memref<128x128xbf16, #tpu.memory_space<vmem>>, vector<128x128xbf16>
    %cst = arith.constant dense<0.000000e+00> : vector<16x128xf32>
    %2 = tpu.matmul %0, %1, %cst {dimension_numbers = #tpu.dot_dimension_numbers<[1], [0], [0], [1], [0, 0, 1, 1], [], []>} : vector<16x128xbf16>, vector<128x128xbf16>, vector<16x128xf32> -> vector<16x128xf32>
    %c0_3 = arith.constant 0 : index
    %c0_4 = arith.constant 0 : index
    %3 = vector.load %arg4[%c0_3, %c0_4] : memref<1x128xf32, #tpu.memory_space<vmem>>, vector<1x128xf32>
    %4 = vector.broadcast %3 : vector<1x128xf32> to vector<16x128xf32>
    %5 = arith.mulf %2, %4 : vector<16x128xf32>
    %c0_5 = arith.constant 0 : index
    %c0_6 = arith.constant 0 : index
    %6 = vector.load %arg5[%c0_5, %c0_6] : memref<1x128xf32, #tpu.memory_space<vmem>>, vector<1x128xf32>
    %7 = vector.broadcast %6 : vector<1x128xf32> to vector<16x128xf32>
    %8 = arith.addf %5, %7 : vector<16x128xf32>
    %cst_7 = arith.constant 0.000000e+00 : f32
    %9 = vector.broadcast %cst_7 : f32 to vector<16x128xf32>
    %10 = arith.maximumf %8, %9 : vector<16x128xf32>
    %11 = arith.truncf %10 : vector<16x128xf32> to vector<16x128xbf16>
    %c0_8 = arith.constant 0 : index
    %c0_9 = arith.constant 0 : index
    %12 = vector.load %arg6[%c0_8, %c0_9] : memref<128x128xbf16, #tpu.memory_space<vmem>>, vector<128x128xbf16>
    %cst_10 = arith.constant dense<0.000000e+00> : vector<16x128xf32>
    %13 = tpu.matmul %11, %12, %cst_10 {dimension_numbers = #tpu.dot_dimension_numbers<[1], [0], [0], [1], [0, 0, 1, 1], [], []>} : vector<16x128xbf16>, vector<128x128xbf16>, vector<16x128xf32> -> vector<16x128xf32>
    %c0_11 = arith.constant 0 : index
    %c0_12 = arith.constant 0 : index
    %14 = vector.load %arg2[%c0_11, %c0_12] : memref<16x128xbf16, #tpu.memory_space<vmem>>, vector<16x128xbf16>
    %c0_13 = arith.constant 0 : index
    %c0_14 = arith.constant 0 : index
    %15 = vector.load %arg7[%c0_13, %c0_14] : memref<128x128xbf16, #tpu.memory_space<vmem>>, vector<128x128xbf16>
    %cst_15 = arith.constant dense<0.000000e+00> : vector<16x128xf32>
    %16 = tpu.matmul %14, %15, %cst_15 {dimension_numbers = #tpu.dot_dimension_numbers<[1], [0], [0], [1], [0, 0, 1, 1], [], []>} : vector<16x128xbf16>, vector<128x128xbf16>, vector<16x128xf32> -> vector<16x128xf32>
    %17 = arith.addf %13, %16 : vector<16x128xf32>
    %cst_16 = arith.constant 0.000000e+00 : f32
    %18 = vector.broadcast %cst_16 : f32 to vector<16x128xf32>
    %19 = arith.maximumf %17, %18 : vector<16x128xf32>
    %20 = arith.truncf %19 : vector<16x128xf32> to vector<16x128xbf16>
    %c0_17 = arith.constant 0 : index
    %c0_18 = arith.constant 0 : index
    %21 = vector.load %arg8[%c0_17, %c0_18] : memref<16x128xbf16, #tpu.memory_space<vmem>>, vector<16x128xbf16>
    tpu.vector_store %arg8[%c0_17, %c0_18], %20 {strides = array<i32>} : memref<16x128xbf16, #tpu.memory_space<vmem>>, vector<16x128xbf16>,
    return
  }
  func.func @transform_0(%arg0: i32) -> (i32, i32) {
    %c0_i32 = arith.constant 0 : i32
    %c0_i32_0 = arith.constant 0 : i32
    return %arg0, %c0_i32 : i32, i32
  }
  func.func @transform_1(%arg0: i32) -> (i32, i32) {
    %c0_i32 = arith.constant 0 : i32
    %c0_i32_0 = arith.constant 0 : i32
    return %arg0, %c0_i32 : i32, i32
  }
  func.func @transform_2(%arg0: i32) -> (i32, i32) {
    %c0_i32 = arith.constant 0 : i32
    %c0_i32_0 = arith.constant 0 : i32
    %c0_i32_1 = arith.constant 0 : i32
    return %c0_i32, %c0_i32_0 : i32, i32
  }
  func.func @transform_3(%arg0: i32) -> (i32, i32) {
    %c0_i32 = arith.constant 0 : i32
    %c0_i32_0 = arith.constant 0 : i32
    %c0_i32_1 = arith.constant 0 : i32
    return %c0_i32, %c0_i32_0 : i32, i32
  }
  func.func @transform_4(%arg0: i32) -> (i32, i32) {
    %c0_i32 = arith.constant 0 : i32
    %c0_i32_0 = arith.constant 0 : i32
    %c0_i32_1 = arith.constant 0 : i32
    return %c0_i32, %c0_i32_0 : i32, i32
  }
  func.func @transform_5(%arg0: i32) -> (i32, i32) {
    %c0_i32 = arith.constant 0 : i32
    %c0_i32_0 = arith.constant 0 : i32
    %c0_i32_1 = arith.constant 0 : i32
    return %c0_i32, %c0_i32_0 : i32, i32
  }
  func.func @transform_6(%arg0: i32) -> (i32, i32) {
    %c0_i32 = arith.constant 0 : i32
    %c0_i32_0 = arith.constant 0 : i32
    %c0_i32_1 = arith.constant 0 : i32
    return %c0_i32, %c0_i32_0 : i32, i32
  }
  func.func @transform_7(%arg0: i32) -> (i32, i32) {
    %c0_i32 = arith.constant 0 : i32
    %c0_i32_0 = arith.constant 0 : i32
    return %arg0, %c0_i32 : i32, i32
  }
}

module attributes {stable_mosaic.version = 11 : i64} {
  func.func @_mm_kernel(%arg0: i32, %arg1: memref<16x256xbf16, #tpu.memory_space<vmem>>, %arg2: memref<256x128xbf16, #tpu.memory_space<vmem>>, %arg3: memref<1x128xf32, #tpu.memory_space<vmem>>, %arg4: memref<1x128xf32, #tpu.memory_space<vmem>>, %arg5: memref<16x128xbf16, #tpu.memory_space<vmem>>) attributes {dimension_semantics = [#tpu.dimension_semantics<parallel>], iteration_bounds = array<i64: 2>, scalar_prefetch = 0 : i64, scratch_operands = 0 : i64, tpu.core_type = #tpu.core_type<tc>, window_params = [{transform_indices = @transform_0, window_bounds = array<i64: 16, 256>}, {pipeline_mode = #tpu.pipeline_mode<synchronous>, transform_indices = @transform_1, window_bounds = array<i64: 256, 128>}, {pipeline_mode = #tpu.pipeline_mode<synchronous>, transform_indices = @transform_2, window_bounds = array<i64: 1, 128>}, {pipeline_mode = #tpu.pipeline_mode<synchronous>, transform_indices = @transform_3, window_bounds = array<i64: 1, 128>}, {transform_indices = @transform_4, window_bounds = array<i64: 16, 128>}]} {
    %c0 = arith.constant 0 : index
    %c0_0 = arith.constant 0 : index
    %0 = vector.load %arg1[%c0, %c0_0] : memref<16x256xbf16, #tpu.memory_space<vmem>>, vector<16x256xbf16>
    %c0_1 = arith.constant 0 : index
    %c0_2 = arith.constant 0 : index
    %1 = vector.load %arg2[%c0_1, %c0_2] : memref<256x128xbf16, #tpu.memory_space<vmem>>, vector<256x128xbf16>
    %cst = arith.constant dense<0.000000e+00> : vector<16x128xf32>
    %2 = tpu.matmul %0, %1, %cst {dimension_numbers = #tpu.dot_dimension_numbers<[1], [0], [0], [1], [0, 0, 1, 1], [], []>} : vector<16x256xbf16>, vector<256x128xbf16>, vector<16x128xf32> -> vector<16x128xf32>
    %c0_3 = arith.constant 0 : index
    %c0_4 = arith.constant 0 : index
    %3 = vector.load %arg3[%c0_3, %c0_4] : memref<1x128xf32, #tpu.memory_space<vmem>>, vector<1x128xf32>
    %4 = vector.broadcast %3 : vector<1x128xf32> to vector<16x128xf32>
    %5 = arith.mulf %2, %4 : vector<16x128xf32>
    %c0_5 = arith.constant 0 : index
    %c0_6 = arith.constant 0 : index
    %6 = vector.load %arg4[%c0_5, %c0_6] : memref<1x128xf32, #tpu.memory_space<vmem>>, vector<1x128xf32>
    %7 = vector.broadcast %6 : vector<1x128xf32> to vector<16x128xf32>
    %8 = arith.addf %5, %7 : vector<16x128xf32>
    %9 = arith.truncf %8 : vector<16x128xf32> to vector<16x128xbf16>
    %c0_7 = arith.constant 0 : index
    %c0_8 = arith.constant 0 : index
    %10 = vector.load %arg5[%c0_7, %c0_8] : memref<16x128xbf16, #tpu.memory_space<vmem>>, vector<16x128xbf16>
    tpu.vector_store %arg5[%c0_7, %c0_8], %9 {strides = array<i32>} : memref<16x128xbf16, #tpu.memory_space<vmem>>, vector<16x128xbf16>,
    return
  }
  func.func @transform_0(%arg0: i32) -> (i32, i32) {
    %c0_i32 = arith.constant 0 : i32
    %c0_i32_0 = arith.constant 0 : i32
    return %arg0, %c0_i32 : i32, i32
  }
  func.func @transform_1(%arg0: i32) -> (i32, i32) {
    %c0_i32 = arith.constant 0 : i32
    %c0_i32_0 = arith.constant 0 : i32
    %c0_i32_1 = arith.constant 0 : i32
    return %c0_i32, %c0_i32_0 : i32, i32
  }
  func.func @transform_2(%arg0: i32) -> (i32, i32) {
    %c0_i32 = arith.constant 0 : i32
    %c0_i32_0 = arith.constant 0 : i32
    %c0_i32_1 = arith.constant 0 : i32
    return %c0_i32, %c0_i32_0 : i32, i32
  }
  func.func @transform_3(%arg0: i32) -> (i32, i32) {
    %c0_i32 = arith.constant 0 : i32
    %c0_i32_0 = arith.constant 0 : i32
    %c0_i32_1 = arith.constant 0 : i32
    return %c0_i32, %c0_i32_0 : i32, i32
  }
  func.func @transform_4(%arg0: i32) -> (i32, i32) {
    %c0_i32 = arith.constant 0 : i32
    %c0_i32_0 = arith.constant 0 : i32
    return %arg0, %c0_i32 : i32, i32
  }
}

module attributes {stable_mosaic.version = 11 : i64} {
  func.func @_mm_res_kernel(%arg0: i32, %arg1: memref<64x64xbf16, #tpu.memory_space<vmem>>, %arg2: memref<64x128xbf16, #tpu.memory_space<vmem>>, %arg3: memref<1x128xf32, #tpu.memory_space<vmem>>, %arg4: memref<1x128xf32, #tpu.memory_space<vmem>>, %arg5: memref<64x128xbf16, #tpu.memory_space<vmem>>, %arg6: memref<64x128xbf16, #tpu.memory_space<vmem>>) attributes {dimension_semantics = [#tpu.dimension_semantics<parallel>], iteration_bounds = array<i64: 2>, scalar_prefetch = 0 : i64, scratch_operands = 0 : i64, tpu.core_type = #tpu.core_type<tc>, window_params = [{transform_indices = @transform_0, window_bounds = array<i64: 64, 64>}, {pipeline_mode = #tpu.pipeline_mode<synchronous>, transform_indices = @transform_1, window_bounds = array<i64: 64, 128>}, {pipeline_mode = #tpu.pipeline_mode<synchronous>, transform_indices = @transform_2, window_bounds = array<i64: 1, 128>}, {pipeline_mode = #tpu.pipeline_mode<synchronous>, transform_indices = @transform_3, window_bounds = array<i64: 1, 128>}, {transform_indices = @transform_4, window_bounds = array<i64: 64, 128>}, {transform_indices = @transform_5, window_bounds = array<i64: 64, 128>}]} {
    %c0 = arith.constant 0 : index
    %c0_0 = arith.constant 0 : index
    %0 = vector.load %arg1[%c0, %c0_0] : memref<64x64xbf16, #tpu.memory_space<vmem>>, vector<64x64xbf16>
    %c0_1 = arith.constant 0 : index
    %c0_2 = arith.constant 0 : index
    %1 = vector.load %arg2[%c0_1, %c0_2] : memref<64x128xbf16, #tpu.memory_space<vmem>>, vector<64x128xbf16>
    %cst = arith.constant dense<0.000000e+00> : vector<64x128xf32>
    %2 = tpu.matmul %0, %1, %cst {dimension_numbers = #tpu.dot_dimension_numbers<[1], [0], [0], [1], [0, 0, 1, 1], [], []>} : vector<64x64xbf16>, vector<64x128xbf16>, vector<64x128xf32> -> vector<64x128xf32>
    %c0_3 = arith.constant 0 : index
    %c0_4 = arith.constant 0 : index
    %3 = vector.load %arg3[%c0_3, %c0_4] : memref<1x128xf32, #tpu.memory_space<vmem>>, vector<1x128xf32>
    %4 = vector.broadcast %3 : vector<1x128xf32> to vector<64x128xf32>
    %5 = arith.mulf %2, %4 : vector<64x128xf32>
    %c0_5 = arith.constant 0 : index
    %c0_6 = arith.constant 0 : index
    %6 = vector.load %arg4[%c0_5, %c0_6] : memref<1x128xf32, #tpu.memory_space<vmem>>, vector<1x128xf32>
    %7 = vector.broadcast %6 : vector<1x128xf32> to vector<64x128xf32>
    %8 = arith.addf %5, %7 : vector<64x128xf32>
    %c0_7 = arith.constant 0 : index
    %c0_8 = arith.constant 0 : index
    %9 = vector.load %arg5[%c0_7, %c0_8] : memref<64x128xbf16, #tpu.memory_space<vmem>>, vector<64x128xbf16>
    %10 = arith.extf %9 : vector<64x128xbf16> to vector<64x128xf32>
    %11 = arith.addf %8, %10 : vector<64x128xf32>
    %12 = arith.truncf %11 : vector<64x128xf32> to vector<64x128xbf16>
    %c0_9 = arith.constant 0 : index
    %c0_10 = arith.constant 0 : index
    %13 = vector.load %arg6[%c0_9, %c0_10] : memref<64x128xbf16, #tpu.memory_space<vmem>>, vector<64x128xbf16>
    tpu.vector_store %arg6[%c0_9, %c0_10], %12 {strides = array<i32>} : memref<64x128xbf16, #tpu.memory_space<vmem>>, vector<64x128xbf16>,
    return
  }
  func.func @transform_0(%arg0: i32) -> (i32, i32) {
    %c0_i32 = arith.constant 0 : i32
    %c0_i32_0 = arith.constant 0 : i32
    return %arg0, %c0_i32 : i32, i32
  }
  func.func @transform_1(%arg0: i32) -> (i32, i32) {
    %c0_i32 = arith.constant 0 : i32
    %c0_i32_0 = arith.constant 0 : i32
    %c0_i32_1 = arith.constant 0 : i32
    return %c0_i32, %c0_i32_0 : i32, i32
  }
  func.func @transform_2(%arg0: i32) -> (i32, i32) {
    %c0_i32 = arith.constant 0 : i32
    %c0_i32_0 = arith.constant 0 : i32
    %c0_i32_1 = arith.constant 0 : i32
    return %c0_i32, %c0_i32_0 : i32, i32
  }
  func.func @transform_3(%arg0: i32) -> (i32, i32) {
    %c0_i32 = arith.constant 0 : i32
    %c0_i32_0 = arith.constant 0 : i32
    %c0_i32_1 = arith.constant 0 : i32
    return %c0_i32, %c0_i32_0 : i32, i32
  }
  func.func @transform_4(%arg0: i32) -> (i32, i32) {
    %c0_i32 = arith.constant 0 : i32
    %c0_i32_0 = arith.constant 0 : i32
    return %arg0, %c0_i32 : i32, i32
  }
  func.func @transform_5(%arg0: i32) -> (i32, i32) {
    %c0_i32 = arith.constant 0 : i32
    %c0_i32_0 = arith.constant 0 : i32
    return %arg0, %c0_i32 : i32, i32
  }
}

module attributes {stable_mosaic.version = 11 : i64} {
  func.func @_cls_wup_kernel(%arg0: i32, %arg1: memref<64x128xbf16, #tpu.memory_space<vmem>>, %arg2: memref<128x4xbf16, #tpu.memory_space<vmem>>, %arg3: memref<1x4xf32, #tpu.memory_space<vmem>>, %arg4: memref<32x8xbf16, #tpu.memory_space<vmem>>, %arg5: memref<1x8x32x4xbf16, #tpu.memory_space<vmem>>) attributes {dimension_semantics = [#tpu.dimension_semantics<parallel>], iteration_bounds = array<i64: 2>, scalar_prefetch = 0 : i64, scratch_operands = 0 : i64, tpu.core_type = #tpu.core_type<tc>, window_params = [{transform_indices = @transform_0, window_bounds = array<i64: 64, 128>}, {pipeline_mode = #tpu.pipeline_mode<synchronous>, transform_indices = @transform_1, window_bounds = array<i64: 128, 4>}, {pipeline_mode = #tpu.pipeline_mode<synchronous>, transform_indices = @transform_2, window_bounds = array<i64: 1, 4>}, {pipeline_mode = #tpu.pipeline_mode<synchronous>, transform_indices = @transform_3, window_bounds = array<i64: 32, 8>}, {transform_indices = @transform_4, window_bounds = array<i64: 1, 8, 32, 4>}]} {
    %c0 = arith.constant 0 : index
    %c0_0 = arith.constant 0 : index
    %0 = vector.load %arg1[%c0, %c0_0] : memref<64x128xbf16, #tpu.memory_space<vmem>>, vector<64x128xbf16>
    %c0_1 = arith.constant 0 : index
    %c0_2 = arith.constant 0 : index
    %1 = vector.load %arg2[%c0_1, %c0_2] : memref<128x4xbf16, #tpu.memory_space<vmem>>, vector<128x4xbf16>
    %cst = arith.constant dense<0.000000e+00> : vector<64x4xf32>
    %2 = tpu.matmul %0, %1, %cst {dimension_numbers = #tpu.dot_dimension_numbers<[1], [0], [0], [1], [0, 0, 1, 1], [], []>} : vector<64x128xbf16>, vector<128x4xbf16>, vector<64x4xf32> -> vector<64x4xf32>
    %c0_3 = arith.constant 0 : index
    %c0_4 = arith.constant 0 : index
    %3 = vector.load %arg3[%c0_3, %c0_4] : memref<1x4xf32, #tpu.memory_space<vmem>>, vector<1x4xf32>
    %4 = vector.broadcast %3 : vector<1x4xf32> to vector<64x4xf32>
    %5 = arith.addf %2, %4 : vector<64x4xf32>
    %6 = vector.shape_cast %5 : vector<64x4xf32> to vector<8x8x4xf32>
    %7 = arith.truncf %6 : vector<8x8x4xf32> to vector<8x8x4xbf16>
    %c0_5 = arith.constant 0 : index
    %c0_6 = arith.constant 0 : index
    %8 = vector.load %arg4[%c0_5, %c0_6] : memref<32x8xbf16, #tpu.memory_space<vmem>>, vector<32x8xbf16>
    %9 = vector.shape_cast %8 : vector<32x8xbf16> to vector<1x32x8xbf16>
    %10 = vector.broadcast %9 : vector<1x32x8xbf16> to vector<8x32x8xbf16>
    %cst_7 = arith.constant dense<0.000000e+00> : vector<8x32x4xf32>
    %11 = tpu.matmul %10, %7, %cst_7 {dimension_numbers = #tpu.dot_dimension_numbers<[2], [1], [1], [2], [0, 0, 0, 1, 1, 2], [0], [0]>} : vector<8x32x8xbf16>, vector<8x8x4xbf16>, vector<8x32x4xf32> -> vector<8x32x4xf32>
    %12 = arith.truncf %11 : vector<8x32x4xf32> to vector<8x32x4xbf16>
    %c0_8 = arith.constant 0 : index
    %c0_9 = arith.constant 0 : index
    %c0_10 = arith.constant 0 : index
    %c0_11 = arith.constant 0 : index
    %13 = vector.load %arg5[%c0_8, %c0_9, %c0_10, %c0_11] : memref<1x8x32x4xbf16, #tpu.memory_space<vmem>>, vector<1x8x32x4xbf16>
    %14 = vector.shape_cast %13 : vector<1x8x32x4xbf16> to vector<8x32x4xbf16>
    %15 = vector.shape_cast %12 : vector<8x32x4xbf16> to vector<1x8x32x4xbf16>
    tpu.vector_store %arg5[%c0_8, %c0_9, %c0_10, %c0_11], %15 {strides = array<i32>} : memref<1x8x32x4xbf16, #tpu.memory_space<vmem>>, vector<1x8x32x4xbf16>,
    return
  }
  func.func @transform_0(%arg0: i32) -> (i32, i32) {
    %c0_i32 = arith.constant 0 : i32
    %c0_i32_0 = arith.constant 0 : i32
    return %arg0, %c0_i32 : i32, i32
  }
  func.func @transform_1(%arg0: i32) -> (i32, i32) {
    %c0_i32 = arith.constant 0 : i32
    %c0_i32_0 = arith.constant 0 : i32
    %c0_i32_1 = arith.constant 0 : i32
    return %c0_i32, %c0_i32_0 : i32, i32
  }
  func.func @transform_2(%arg0: i32) -> (i32, i32) {
    %c0_i32 = arith.constant 0 : i32
    %c0_i32_0 = arith.constant 0 : i32
    %c0_i32_1 = arith.constant 0 : i32
    return %c0_i32, %c0_i32_0 : i32, i32
  }
  func.func @transform_3(%arg0: i32) -> (i32, i32) {
    %c0_i32 = arith.constant 0 : i32
    %c0_i32_0 = arith.constant 0 : i32
    %c0_i32_1 = arith.constant 0 : i32
    return %c0_i32, %c0_i32_0 : i32, i32
  }
  func.func @transform_4(%arg0: i32) -> (i32, i32, i32, i32) {
    %c0_i32 = arith.constant 0 : i32
    %c0_i32_0 = arith.constant 0 : i32
    %c0_i32_1 = arith.constant 0 : i32
    %c0_i32_2 = arith.constant 0 : i32
    return %arg0, %c0_i32, %c0_i32_0, %c0_i32_1 : i32, i32, i32, i32
  }
}

module attributes {stable_mosaic.version = 11 : i64} {
  func.func @_hup_kernel(%arg0: i32, %arg1: memref<1x8x128xbf16, #tpu.memory_space<vmem>>, %arg2: memref<32x8xbf16, #tpu.memory_space<vmem>>, %arg3: memref<1x32x128xf32, #tpu.memory_space<vmem>>) attributes {dimension_semantics = [#tpu.dimension_semantics<parallel>], iteration_bounds = array<i64: 2>, scalar_prefetch = 0 : i64, scratch_operands = 0 : i64, tpu.core_type = #tpu.core_type<tc>, window_params = [{transform_indices = @transform_0, window_bounds = array<i64: 1, 8, 128>}, {pipeline_mode = #tpu.pipeline_mode<synchronous>, transform_indices = @transform_1, window_bounds = array<i64: 32, 8>}, {transform_indices = @transform_2, window_bounds = array<i64: 1, 32, 128>}]} {
    %c0 = arith.constant 0 : index
    %c0_0 = arith.constant 0 : index
    %0 = vector.load %arg2[%c0, %c0_0] : memref<32x8xbf16, #tpu.memory_space<vmem>>, vector<32x8xbf16>
    %c0_1 = arith.constant 0 : index
    %c0_2 = arith.constant 0 : index
    %c0_3 = arith.constant 0 : index
    %1 = vector.load %arg1[%c0_1, %c0_2, %c0_3] : memref<1x8x128xbf16, #tpu.memory_space<vmem>>, vector<1x8x128xbf16>
    %2 = vector.shape_cast %1 : vector<1x8x128xbf16> to vector<8x128xbf16>
    %cst = arith.constant dense<0.000000e+00> : vector<32x128xf32>
    %3 = tpu.matmul %0, %2, %cst {dimension_numbers = #tpu.dot_dimension_numbers<[1], [0], [0], [1], [0, 0, 1, 1], [], []>} : vector<32x8xbf16>, vector<8x128xbf16>, vector<32x128xf32> -> vector<32x128xf32>
    %c0_4 = arith.constant 0 : index
    %c0_5 = arith.constant 0 : index
    %c0_6 = arith.constant 0 : index
    %4 = vector.load %arg3[%c0_4, %c0_5, %c0_6] : memref<1x32x128xf32, #tpu.memory_space<vmem>>, vector<1x32x128xf32>
    %5 = vector.shape_cast %4 : vector<1x32x128xf32> to vector<32x128xf32>
    %6 = vector.shape_cast %3 : vector<32x128xf32> to vector<1x32x128xf32>
    tpu.vector_store %arg3[%c0_4, %c0_5, %c0_6], %6 {strides = array<i32>} : memref<1x32x128xf32, #tpu.memory_space<vmem>>, vector<1x32x128xf32>,
    return
  }
  func.func @transform_0(%arg0: i32) -> (i32, i32, i32) {
    %c0_i32 = arith.constant 0 : i32
    %c0_i32_0 = arith.constant 0 : i32
    %c0_i32_1 = arith.constant 0 : i32
    return %arg0, %c0_i32, %c0_i32_0 : i32, i32, i32
  }
  func.func @transform_1(%arg0: i32) -> (i32, i32) {
    %c0_i32 = arith.constant 0 : i32
    %c0_i32_0 = arith.constant 0 : i32
    %c0_i32_1 = arith.constant 0 : i32
    return %c0_i32, %c0_i32_0 : i32, i32
  }
  func.func @transform_2(%arg0: i32) -> (i32, i32, i32) {
    %c0_i32 = arith.constant 0 : i32
    %c0_i32_0 = arith.constant 0 : i32
    %c0_i32_1 = arith.constant 0 : i32
    return %arg0, %c0_i32, %c0_i32_0 : i32, i32, i32
  }
}

</mosaic_0001>

<bundles_post_ra>
// kernel: _lambda_.46
= control target key start
LH: loop header
LB: loop body
LE: loop exit
PB: predicated region body
PF: predicated region fallthrough
CT: control target
= control target key end

     0   :  { %s1704_s18 = smov 0   ;;  %s2256_s0 = inlined_call_operand.vmem [shape: bf16[512,27], index: 0, kind: input, shape index: {}]   ;;  %s2257_s1 = inlined_call_operand.vmem [shape: bf16[27,32], index: 1, kind: input, shape index: {}]   ;;  %s2258_s2 = inlined_call_operand.vmem [shape: bf16[3,32], index: 2, kind: input, shape index: {}]   ;;  %s2259_s3 = inlined_call_operand.vmem [shape: f32[1,32], index: 3, kind: input, shape index: {}]   ;;  %s2260_s4 = inlined_call_operand.vmem [shape: f32[1,32], index: 4, kind: input, shape index: {}]   ;;  %s2261_s5 = inlined_call_operand.vmem [shape: bf16[512,32], index: 5, kind: output, shape index: {}]  }
   0x1 LB: > { %s1352_s19 = sadd.s32 4294967295, %s1668_s18   ;;  %p1356_p0 = scmp.ge.s32.totalorder %s1668_s18, 1  ;;  %s1668_s18 = sphi %s1704_s18, %s15_s18  }
   0x2   : > { %p188_p1 = scmp.lt.s32.totalorder %s1668_s18, 3 }
   0x4   : > { %p189_p2 = pnand %p1356_p0, %p188_p1 }
   0x5   : > { %s1357_s20 = sshll.u32 (!%p189_p2), %s1352_s19, 5  ;;  %s1670_s25 = smov (!%p189_p2), 125  }
   0x6   : > { %192 = sbr.rel (%p189_p2) target bundleno = 779 (0x30b), region = 40  ;;  %p217_p3 = scmp.lt.s32.totalorder (!%p189_p2), %s1357_s20, 63 }
   0x7   : > { %s1671_s26 = smov (!%p189_p2), 119   ;;  %s1672_s27 = smov (!%p189_p2), 116  }
   0xb   : > { %s2263_s20 = smov (!%p217_p3, %s1357_s20), 63  ;;  %vm1031_vm0 = vcmask 1044480   ;;  %vm1032_vm1 = vcmask 1045504   ;;  %vm795_vm2 = vcmask 1040384   ;;  %vm796_vm3 = vcmask 1041408  }
   0xc   : > { %s1358_s21 = sshll.u32 %s2263_s20, 2  ;;  %vm982_vm4 = vcmask 220160   ;;  %vm746_vm5 = vcmask 23552   ;;  %vm1263_vm6 = vcmask 257024  }
   0xd   : > { %s1720_s24 = scalar_lea.vmem %s2256_s0, %s1358_s21  ;;  %s2095_s17 = scalar_lea.vmem %s2261_s5, %s1358_s21 }
   0xe   : > { %v247_v0 = vld [vmem:[%s1720_s24 + $0x48] sm:$0xff]   ;;  %v229_v1 = vld [vmem:[%s1720_s24] sm:$0xff]   ;;  %v233_v6 = vld [vmem:[%s1720_s24 + $0x10] sm:$0xff]  }
   0xf   : > { %v283_v2 = vunpack.c.l.bf16 %v247_v0  ;;  %v284_v3 = vunpack.c.h.bf16 %v247_v0  ;;  %v265_v4 = vunpack.c.l.bf16 %v229_v1  ;;  %v266_v5 = vunpack.c.h.bf16 %v229_v1  ;;  %v231_v7 = vld [vmem:[%s1720_s24 + $0x8] sm:$0xff]   ;;  %v1727_v8 = vld [vmem:[%s1720_s24 + $0x50] sm:$0xff]   ;;  %v1738_v20 = vld [vmem:[%s1720_s24 + $0x58] sm:$0xff]  }
  0x10   : > { %v269_v11 = vunpack.c.l.bf16 %v233_v6  ;;  %v270_v12 = vunpack.c.h.bf16 %v233_v6  ;;  %v267_v13 = vunpack.c.l.bf16 %v231_v7  ;;  %v268_v14 = vunpack.c.h.bf16 %v231_v7  ;;  %v1741_v21 = vld [vmem:[%s1720_s24 + $0x18] sm:$0xff]   ;;  %v1755_v28 = vld [vmem:[%s1720_s24 + $0x20] sm:$0xff]   ;;  %v1775_v48 = vld [vmem:[%s1720_s24 + $0x28] sm:$0xff]  }
  0x11   : > { %v1510_v9 = vpack.i.bf16 %v284_v3, %v283_v2  ;;  %v1500_v10 = vpack.i.bf16 %v266_v5, %v265_v4  ;;  %v285_v15 = vunpack.c.l.bf16 %v1727_v8  ;;  %v286_v16 = vunpack.c.h.bf16 %v1727_v8  ;;  %v1798_v63 = vld [vmem:[%s1720_s24 + $0x68] sm:$0xff]  }
  0x12   : > { %v1515_v18 = vpack.i.bf16 %v270_v12, %v269_v11  ;;  %v1505_v19 = vpack.i.bf16 %v268_v14, %v267_v13  ;;  %v287_v22 = vunpack.c.l.bf16 %v1738_v20  ;;  %v288_v23 = vunpack.c.h.bf16 %v1738_v20 }
  0x13   : > { %1511 = vrot.lane.b32.xlu1 %v1510_v9, %s1670_s25  ;;  %1501 = vrot.lane.b32.xlu0 %v1500_v10, %s1670_s25  ;;  %v1520_v17 = vpack.i.bf16 %v286_v16, %v285_v15  ;;  %v271_v24 = vunpack.c.l.bf16 %v1741_v21  ;;  %v272_v25 = vunpack.c.h.bf16 %v1741_v21  ;;  %v273_v29 = vunpack.c.l.bf16 %v1755_v28 }
  0x14   : > { %v1535_v26 = vpack.i.bf16 %v288_v23, %v287_v22  ;;  %v274_v30 = vunpack.c.h.bf16 %v1755_v28  ;;  %v275_v56 = vunpack.c.l.bf16 %v1775_v48  ;;  %v276_v57 = vunpack.c.h.bf16 %v1775_v48 }
  0x15   : > { %1521 = vrot.lane.b32.xlu2 %v1520_v17, %s1670_s25  ;;  %v1530_v27 = vpack.i.bf16 %v272_v25, %v271_v24  ;;  %v291_v7 = vunpack.c.l.bf16 %v1798_v63  ;;  %v292_v9 = vunpack.c.h.bf16 %v1798_v63 }
  0x16   : > { %v1545_v31 = vpack.i.bf16 %v274_v30, %v273_v29  ;;  %v1565_v60 = vpack.i.bf16 %v276_v57, %v275_v56 }
  0x1b   : > { %1516 = vrot.lane.b32.xlu1 %v1515_v18, %s1670_s25  ;;  %1506 = vrot.lane.b32.xlu0 %v1505_v19, %s1670_s25 }
  0x23   : > { %1536 = vrot.lane.b32.xlu1 %v1535_v26, %s1670_s25  ;;  %1531 = vrot.lane.b32.xlu0 %v1530_v27, %s1670_s25 }
  0x2b   : > { %1546 = vrot.lane.b32.xlu0 %v1545_v31, %s1670_s25 }
  0x6f   : > { %v1522_v55 = vpop.permute.xlu2 %1521 }
  0x70   : > { %v1524_v58 = vunpack.i.h.bf16 %v1522_v55  ;;  %v1523_v59 = vunpack.i.l.bf16 %v1522_v55 }
  0x72   : > { %v1814_v6 = vmax.f32 %v285_v15, %v1523_v59  ;;  %v1570_v15 = vpack.i.bf16 %v292_v9, %v291_v7 }
  0x85   : > { %v1512_v32 = vpop.permute.xlu1 %1511  ;;  %v1502_v33 = vpop.permute.xlu0 %1501 }
  0x86   : > { %v1514_v34 = vunpack.i.h.bf16 %v1512_v32  ;;  %v1513_v35 = vunpack.i.l.bf16 %v1512_v32  ;;  %v1504_v36 = vunpack.i.h.bf16 %v1502_v33  ;;  %v1503_v37 = vunpack.i.l.bf16 %v1502_v33  ;;  %v1863_v33 = vld [vmem:[%s1720_s24 + $0x30] sm:$0xff]  }
  0x88   : > { %v1766_v38 = vmax.f32 %v284_v3, %v1514_v34  ;;  %v1768_v39 = vmax.f32 %v283_v2, %v1513_v35  ;;  %v1770_v40 = vmax.f32 %v266_v5, %v1504_v36  ;;  %v1772_v41 = vmax.f32 %v265_v4, %v1503_v37  ;;  %v1805_v4 = vld [vmem:[%s1720_s24 + $0x60] sm:$0xff]  }
  0x89   : > { %v1810_v5 = vmax.f32 %v286_v16, %v1524_v58  ;;  %v277_v35 = vunpack.c.l.bf16 %v1863_v33  ;;  %v278_v36 = vunpack.c.h.bf16 %v1863_v33 }
  0x8a   : > { %v1550_v49 = vpack.i.bf16 %v1766_v38, %v1768_v39  ;;  %v1525_v50 = vpack.i.bf16 %v1770_v40, %v1772_v41 }
  0x8c   : > { %1551 = vrot.lane.b32.xlu1 %v1550_v49, %s1671_s26  ;;  %1526 = vrot.lane.b32.xlu2 %v1525_v50, %s1671_s26 }
  0x8d   : > { %v1517_v42 = vpop.permute.xlu1 %1516  ;;  %v1507_v43 = vpop.permute.xlu0 %1506 }
  0x8e   : > { %v1519_v44 = vunpack.i.h.bf16 %v1517_v42  ;;  %v1518_v45 = vunpack.i.l.bf16 %v1517_v42  ;;  %v1509_v46 = vunpack.i.h.bf16 %v1507_v43  ;;  %v1508_v47 = vunpack.i.l.bf16 %v1507_v43 }
  0x90   : > { %v1781_v51 = vmax.f32 %v270_v12, %v1519_v44  ;;  %v1783_v52 = vmax.f32 %v269_v11, %v1518_v45  ;;  %v1785_v53 = vmax.f32 %v268_v14, %v1509_v46  ;;  %v1787_v54 = vmax.f32 %v267_v13, %v1508_v47  ;;  %v1878_v46 = vld [vmem:[%s1720_s24 + $0x70] sm:$0xff]  }
  0x91   : > { %v289_v12 = vunpack.c.l.bf16 %v1805_v4  ;;  %v290_v13 = vunpack.c.h.bf16 %v1805_v4 }
  0x92   : > { %v1560_v0 = vpack.i.bf16 %v1781_v51, %v1783_v52  ;;  %v1540_v1 = vpack.i.bf16 %v1785_v53, %v1787_v54 }
  0x93   : > { %v1555_v16 = vpack.i.bf16 %v290_v13, %v289_v12 }
  0x94   : > { %1561 = vrot.lane.b32.xlu0 %v1560_v0, %s1671_s26  ;;  %1566 = vrot.lane.b32.xlu1 %v1565_v60, %s1670_s25 }
  0x95   : > { %v1537_v61 = vpop.permute.xlu1 %1536  ;;  %v1532_v62 = vpop.permute.xlu0 %1531  ;;  %1541 = vrot.lane.b32.xlu2 %v1540_v1, %s1671_s26 }
  0x96   : > { %v1539_v2 = vunpack.i.h.bf16 %v1537_v61  ;;  %v1538_v3 = vunpack.i.l.bf16 %v1537_v61  ;;  %v1534_v14 = vunpack.i.h.bf16 %v1532_v62  ;;  %v1533_v8 = vunpack.i.l.bf16 %v1532_v62 }
  0x98   : > { %v1820_v10 = vmax.f32 %v288_v23, %v1539_v2  ;;  %v1822_v11 = vmax.f32 %v287_v22, %v1538_v3  ;;  %v1832_v20 = vmax.f32 %v272_v25, %v1534_v14  ;;  %v1836_v22 = vmax.f32 %v271_v24, %v1533_v8  ;;  %v1906_v14 = vld [vmem:[%s1720_s24 + $0x78] sm:$0xff]  }
  0x99   : > { %v1575_v25 = vpack.i.bf16 %v1810_v5, %v1814_v6 }
  0x9a   : > { %v1590_v21 = vpack.i.bf16 %v1820_v10, %v1822_v11  ;;  %v1580_v27 = vpack.i.bf16 %v1832_v20, %v1836_v22 }
  0x9c   : > { %1571 = vrot.lane.b32.xlu1 %v1570_v15, %s1670_s25 }
  0x9d   : > { %v1547_v17 = vpop.permute.xlu0 %1546  ;;  %1556 = vrot.lane.b32.xlu2 %v1555_v16, %s1670_s25 }
  0x9e   : > { %v1549_v18 = vunpack.i.h.bf16 %v1547_v17  ;;  %v1548_v19 = vunpack.i.l.bf16 %v1547_v17  ;;  %v295_v17 = vunpack.c.l.bf16 %v1906_v14 }
  0xa0   : > { %v1842_v23 = vmax.f32 %v274_v30, %v1549_v18  ;;  %v1846_v26 = vmax.f32 %v273_v29, %v1548_v19  ;;  %v296_v18 = vunpack.c.h.bf16 %v1906_v14 }
  0xa2   : > { %v1600_v24 = vpack.i.bf16 %v1842_v23, %v1846_v26 }
  0xa4   : > { %1591 = vrot.lane.b32.xlu1 %v1590_v21, %s1671_s26 }
  0xa5   : > { %1576 = vrot.lane.b32.xlu2 %v1575_v25, %s1671_s26 }
  0xac   : > { %1601 = vrot.lane.b32.xlu1 %v1600_v24, %s1671_s26 }
  0xad   : > { %1581 = vrot.lane.b32.xlu2 %v1580_v27, %s1671_s26 }
  0xe6   : > { %v1527_v28 = vpop.permute.xlu2 %1526 }
  0xe7   : > { %v1529_v29 = vunpack.i.h.bf16 %v1527_v28  ;;  %v1528_v30 = vunpack.i.l.bf16 %v1527_v28 }
  0xe9   : > { %v650_v31 = vmax.f32 %v1770_v40, %v1529_v29  ;;  %v649_v32 = vmax.f32 %v1772_v41, %v1528_v30  ;;  %v1585_v40 = vpack.i.bf16 %v278_v36, %v277_v35  ;;  %v1875_v41 = vld [vmem:[%s1720_s24 + $0x38] sm:$0xff]   ;;  %v1615_v30 = vpack.i.bf16 %v296_v18, %v295_v17 }
  0xea   : > { %v279_v49 = vunpack.c.l.bf16 %v1875_v41  ;;  %v280_v50 = vunpack.c.h.bf16 %v1875_v41 }
  0xeb   : > { %v681_v34 = vpack.c.bf16 %v650_v31, %v649_v32  ;;  %v1926_v31 = vld [vmem:[%s1720_s24 + $0x40] sm:$0xff]  }
  0xec   : > { %v1605_v62 = vpack.i.bf16 %v280_v50, %v279_v49 }
  0xed   : > { %714 = vrot.lane.b32.xlu0 %v681_v34, %s1672_s27 }
  0xef   : > { %v1542_v37 = vpop.permute.xlu2 %1541 }
  0xf0   : > { %v1544_v42 = vunpack.i.h.bf16 %v1542_v37  ;;  %v1543_v43 = vunpack.i.l.bf16 %v1542_v37 }
  0xf2   : > { %v652_v44 = vmax.f32 %v1785_v53, %v1544_v42  ;;  %v651_v45 = vmax.f32 %v1787_v54, %v1543_v43  ;;  %v293_v53 = vunpack.c.l.bf16 %v1878_v46  ;;  %v294_v54 = vunpack.c.h.bf16 %v1878_v46 }
  0xf4   : > { %v682_v47 = vpack.c.bf16 %v652_v44, %v651_v45  ;;  %v1595_v0 = vpack.i.bf16 %v294_v54, %v293_v53 }
  0xf5   : > { %1586 = vrot.lane.b32.xlu0 %v1585_v40, %s1670_s25 }
  0xf6   : > { %716 = vrot.lane.b32.xlu2 %v682_v47, %s1672_s27 }
  0xf7   : > { %v1557_v55 = vpop.permute.xlu2 %1556 }
  0xf8   : > { %v1559_v58 = vunpack.i.h.bf16 %v1557_v55  ;;  %v1558_v59 = vunpack.i.l.bf16 %v1557_v55 }
  0xfa   : > { %v1886_v60 = vmax.f32 %v290_v13, %v1559_v58  ;;  %v1888_v61 = vmax.f32 %v289_v12, %v1558_v59 }
  0xfc   : > { %v1610_v4 = vpack.i.bf16 %v1886_v60, %v1888_v61 }
  0xfd   : > { %1596 = vrot.lane.b32.xlu0 %v1595_v0, %s1670_s25 }
  0xfe   : > { %1606 = vrot.lane.b32.xlu2 %v1605_v62, %s1670_s25  ;;  %v1552_v1 = vpop.permute.xlu1 %1551  ;;  %1611 = vrot.lane.b32.xlu1 %v1610_v4, %s1671_s26 }
  0xff   : > { %v1554_v2 = vunpack.i.h.bf16 %v1552_v1  ;;  %v1553_v3 = vunpack.i.l.bf16 %v1552_v1  ;;  %v1577_v15 = vpop.permute.xlu2 %1576 }
 0x100   : > { %v1579_v32 = vunpack.i.h.bf16 %v1577_v15 }
 0x101   : > { %v668_v12 = vmax.f32 %v1766_v38, %v1554_v2  ;;  %v667_v13 = vmax.f32 %v1768_v39, %v1553_v3 }
 0x102   : > { %v670_v48 = vmax.f32 %v1810_v5, %v1579_v32  ;;  %v1476_v32 = vld [vmem:[%s1720_s24 + $0x48] sm:$0xff] }
 0x103   : > { %v690_v8 = vpack.c.bf16 %v668_v12, %v667_v13 }
 0x105   : > { %732 = vrot.lane.b32.xlu0 %v690_v8, %s1672_s27 }
 0x106   : > { %v1562_v16 = vpop.permute.xlu0 %1561  ;;  %v1567_v19 = vpop.permute.xlu1 %1566 }
 0x107   : > { %v1564_v25 = vunpack.i.h.bf16 %v1562_v16  ;;  %v1563_v21 = vunpack.i.l.bf16 %v1562_v16  ;;  %v1569_v38 = vunpack.i.h.bf16 %v1567_v19  ;;  %v1568_v24 = vunpack.i.l.bf16 %v1567_v19  ;;  %v1582_v42 = vpop.permute.xlu2 %1581  ;;  %v697_v16 = vld [vmem:[%s2258_s2] sm:$0x3] }
 0x108   : > { %v1583_v55 = vunpack.i.l.bf16 %v1582_v42 }
 0x109   : > { %v654_v39 = vmax.f32 %v1781_v51, %v1564_v25  ;;  %v653_v27 = vmax.f32 %v1783_v52, %v1563_v21  ;;  %v1915_v28 = vmax.f32 %v276_v57, %v1569_v38  ;;  %v1919_v29 = vmax.f32 %v275_v56, %v1568_v24  ;;  %v1483_v21 = vld [vmem:[%s2257_s1] sm:$0xff] }
 0x10a   : > { %v1578_v51 = vunpack.i.l.bf16 %v1577_v15  ;;  %v281_v52 = vunpack.c.l.bf16 %v1926_v31  ;;  %v282_v57 = vunpack.c.h.bf16 %v1926_v31  ;;  %v655_v62 = vmax.f32 %v1836_v22, %v1583_v55  ;;  %v1484_v22 = vld [vmem:[%s2257_s1 + $0x8] sm:$0x30]  ;;  %v1467_v38 = vld [vmem:[%s1720_s24] sm:$0xff] }
 0x10b   : > { %v683_v34 = vpack.c.bf16 %v654_v39, %v653_v27  ;;  %v1620_v45 = vpack.i.bf16 %v1915_v28, %v1919_v29  ;;  %v1475_v24 = vld [vmem:[%s1720_s24 + $0x40] sm:$0xff]  ;;  %v1468_v27 = vld [vmem:[%s1720_s24 + $0x8] sm:$0xff] }
 0x10c   : > { %v669_v37 = vmax.f32 %v1814_v6, %v1578_v51  ;;  %v1625_v40 = vpack.i.bf16 %v282_v57, %v281_v52  ;;  %v1584_v6 = vunpack.i.h.bf16 %v1582_v42  ;;  %v1469_v42 = vld [vmem:[%s1720_s24 + $0x10] sm:$0xff] }
 0x10d   : > { %718 = vrot.lane.b32.xlu2 %v683_v34, %s1672_s27  ;;  %1616 = vrot.lane.b32.xlu0 %v1615_v30, %s1670_s25 }
 0x10e   : > { %v1572_v56 = vpop.permute.xlu1 %1571  ;;  %1621 = vrot.lane.b32.xlu1 %v1620_v45, %s1671_s26  ;;  %v691_v58 = vpack.c.bf16 %v670_v48, %v669_v37  ;;  %v656_v59 = vmax.f32 %v1832_v20, %v1584_v6  ;;  %v1447_v20 = vld [vmem:[%s2257_s1 + $0x8] sm:$0xf] }
 0x10f   : > { %v1574_v43 = vunpack.i.h.bf16 %v1572_v56  ;;  %v1573_v44 = vunpack.i.l.bf16 %v1572_v56  ;;  %v1448_v12 = vor.u32 %v1484_v22, %v1447_v20 }
 0x111   : > { %v1942_v47 = vmax.f32 %v292_v9, %v1574_v43  ;;  %v1946_v5 = vmax.f32 %v291_v7, %v1573_v44  ;;  %v684_v7 = vpack.c.bf16 %v656_v59, %v655_v62  ;;  %v1470_v62 = vld [vmem:[%s1720_s24 + $0x18] sm:$0xff] }
 0x113   : > { %v1630_v63 = vpack.i.bf16 %v1942_v47, %v1946_v5 }
 0x115   : > { %1626 = vrot.lane.b32.xlu2 %v1625_v40, %s1670_s25  ;;  %734 = vrot.lane.b32.xlu0 %v691_v58, %s1672_s27 }
 0x116   : > { %v1592_v0 = vpop.permute.xlu1 %1591  ;;  %1631 = vrot.lane.b32.xlu1 %v1630_v63, %s1671_s26 }
 0x117   : > { %v1594_v9 = vunpack.i.h.bf16 %v1592_v0  ;;  %v1593_v1 = vunpack.i.l.bf16 %v1592_v0 }
 0x119   : > { %v672_v2 = vmax.f32 %v1820_v10, %v1594_v9  ;;  %v671_v3 = vmax.f32 %v1822_v11, %v1593_v1  ;;  %v1673_v10 = vmov 65535  }
 0x11a   : > { %v1033_v13 = vsel %vm1031_vm0, 4294967295, %v1673_v10  ;;  %v797_v15 = vsel %vm795_vm2, 4294967295, %v1673_v10 }
 0x11b   : > { %v692_v4 = vpack.c.bf16 %v672_v2, %v671_v3  ;;  %v1034_v11 = vsel %vm1032_vm1, %v1033_v13, 0  ;;  %v798_v19 = vsel %vm796_vm3, %v797_v15, 0 }
 0x11c   : > { %v1036_v8 = vand.u32 %v1448_v12, %v1034_v11  ;;  %v800_v25 = vand.u32 %v798_v19, %v697_v16  ;;  %v1478_v12 = vld [vmem:[%s1720_s24 + $0x58] sm:$0xff] }
 0x11d   : > { %720 = vrot.lane.b32.xlu2 %v684_v7, %s1672_s27 }
 0x11e   : > { %736 = vrot.lane.b32.xlu1 %v692_v4, %s1672_s27  ;;  %1044 = vmatpush.bf16.msra.mxu1 %v1036_v8  ;;  %v1602_v55 = vpop.permute.xlu1 %1601 }
 0x11f   : > { %1486 = vmatpush.bf16.msra.mxu2 %v1036_v8  ;;  %809 = vmatpush.bf16.msra.mxu0 %v800_v25  ;;  %v1604_v58 = vunpack.i.h.bf16 %v1602_v55  ;;  %v1603_v0 = vunpack.i.l.bf16 %v1602_v55 }
 0x120   : > { %1485 = vmatpush.bf16.msra.mxu3 %v800_v25 }
 0x121   : > { %v657_v7 = vmax.f32 %v1846_v26, %v1603_v0 }
 0x122   : > { %1045 = vmatpush.bf16.msra.mxu1 %v1483_v21 }
 0x123   : > { %1487 = vmatpush.bf16.msra.mxu2 %v1483_v21 }
 0x125   : > { %1449 = vmatmul.msk.bf16.vlgmr.msra.gmra.mxu1 %vm982_vm4, %v1467_v38 }
 0x126   : > { %1457 = vmatmul.msk.bf16.vlgmr.msra.gmra.mxu2 %vm982_vm4, %v1475_v24 }
 0x135   : > { %1450 = vmatmul.msk.bf16.gmra.mxu1 %vm982_vm4, %v1468_v27 }
 0x136   : > { %1458 = vmatmul.msk.bf16.gmra.mxu2 %vm982_vm4, %v1476_v32 }
 0x145   : > { %1451 = vmatmul.msk.bf16.gmra.mxu1 %vm982_vm4, %v1469_v42 }
 0x150   : > { %v717_v39 = vpop.permute.xlu2 %716 }
 0x155   : > { %1452 = vmatmul.msk.bf16.gmra.mxu1 %vm982_vm4, %v1470_v62 }
 0x158   : > { %v1607_v30 = vpop.permute.xlu2 %1606 }
 0x159   : > { %v1609_v34 = vunpack.i.h.bf16 %v1607_v30  ;;  %v1608_v51 = vunpack.i.l.bf16 %v1607_v30 }
 0x15b   : > { %v1982_v48 = vmax.f32 %v280_v50, %v1609_v34  ;;  %v1986_v56 = vmax.f32 %v279_v49, %v1608_v51  ;;  %v1477_v50 = vld [vmem:[%s1720_s24 + $0x50] sm:$0xff]  ;;  %v1479_v51 = vld [vmem:[%s1720_s24 + $0x60] sm:$0xff] }
 0x15c   : > { %1459 = vmatmul.msk.bf16.gmra.mxu2 %vm982_vm4, %v1477_v50 }
 0x15d   : > { %v1645_v43 = vpack.i.bf16 %v1982_v48, %v1986_v56 }
 0x15f   : > { %v715_v37 = vpop.permute.xlu0 %714  ;;  %1646 = vrot.lane.b32.xlu1 %v1645_v43, %s1671_s26 }
 0x160   : > { %1361 = vmatmul.msk.bf16.vlgmr.msra.gmra.mxu0 %vm746_vm5, %v715_v37  ;;  %v1471_v37 = vld [vmem:[%s1720_s24 + $0x20] sm:$0xff] }
 0x165   : > { %1453 = vmatmul.msk.bf16.gmra.mxu1 %vm982_vm4, %v1471_v37 }
 0x167   : > { %v1587_v44 = vpop.permute.xlu0 %1586  ;;  %v719_v41 = vpop.permute.xlu2 %718 }
 0x168   : > { %v1589_v45 = vunpack.i.h.bf16 %v1587_v44  ;;  %v1588_v40 = vunpack.i.l.bf16 %v1587_v44 }
 0x16a   : > { %v1998_v49 = vmax.f32 %v278_v36, %v1589_v45  ;;  %v2002_v6 = vmax.f32 %v277_v35, %v1588_v40  ;;  %v658_v36 = vmax.f32 %v1842_v23, %v1604_v58 }
 0x16c   : > { %v1635_v63 = vpack.i.bf16 %v1998_v49, %v2002_v6  ;;  %1460 = vmatmul.msk.bf16.gmra.mxu2 %vm982_vm4, %v1478_v12 }
 0x16e   : > { %1636 = vrot.lane.b32.xlu0 %v1635_v63, %s1671_s26 }
 0x16f   : > { %v1597_v59 = vpop.permute.xlu0 %1596  ;;  %v1627_v2 = vpop.permute.xlu2 %1626 }
 0x170   : > { %v1599_v9 = vunpack.i.h.bf16 %v1597_v59  ;;  %v1598_v1 = vunpack.i.l.bf16 %v1597_v59  ;;  %1362 = vmatmul.msk.bf16.gmra.mxu0 %vm746_vm5, %v717_v39  ;;  %v1629_v3 = vunpack.i.h.bf16 %v1627_v2  ;;  %v1628_v4 = vunpack.i.l.bf16 %v1627_v2  ;;  %v1612_v20 = vpop.permute.xlu1 %1611 }
 0x171   : > { %v1614_v10 = vunpack.i.h.bf16 %v1612_v20  ;;  %v1613_v13 = vunpack.i.l.bf16 %v1612_v20 }
 0x172   : > { %v2011_v33 = vmax.f32 %v294_v54, %v1599_v9  ;;  %v2015_v35 = vmax.f32 %v293_v53, %v1598_v1  ;;  %v685_v53 = vpack.c.bf16 %v658_v36, %v657_v7  ;;  %v2026_v54 = vmax.f32 %v282_v57, %v1629_v3 }
 0x173   : > { %v2030_v23 = vmax.f32 %v281_v52, %v1628_v4  ;;  %v674_v26 = vmax.f32 %v1886_v60, %v1614_v10  ;;  %v673_v11 = vmax.f32 %v1888_v61, %v1613_v13 }
 0x174   : > { %v1640_v46 = vpack.i.bf16 %v2011_v33, %v2015_v35 }
 0x175   : > { %v693_v57 = vpack.c.bf16 %v674_v26, %v673_v11  ;;  %v1655_v61 = vpack.i.bf16 %v2026_v54, %v2030_v23 }
 0x176   : > { %1641 = vrot.lane.b32.xlu2 %v1640_v46, %s1671_s26  ;;  %722 = vrot.lane.b32.xlu0 %v685_v53, %s1672_s27 }
 0x177   : > { %v733_v22 = vpop.permute.xlu0 %732  ;;  %v721_v30 = vpop.permute.xlu2 %720 }
 0x178   : > { %1370 = vmatmul.msk.bf16.vlgmr.msra.gmra.mxu3 %vm746_vm5, %v733_v22  ;;  %v1480_v22 = vld [vmem:[%s1720_s24 + $0x68] sm:$0xff] }
 0x17c   : > { %1461 = vmatmul.msk.bf16.gmra.mxu2 %vm982_vm4, %v1479_v51 }
 0x17e   : > { %738 = vrot.lane.b32.xlu2 %v693_v57, %s1672_s27 }
 0x17f   : > { %v1617_v8 = vpop.permute.xlu0 %1616 }
 0x180   : > { %v1619_v15 = vunpack.i.h.bf16 %v1617_v8  ;;  %v1618_v16 = vunpack.i.l.bf16 %v1617_v8  ;;  %1363 = vmatmul.msk.bf16.gmra.mxu0 %vm746_vm5, %v719_v41  ;;  %v1622_v19 = vpop.permute.xlu1 %1621 }
 0x181   : > { %v1624_v60 = vunpack.i.h.bf16 %v1622_v19  ;;  %v1623_v25 = vunpack.i.l.bf16 %v1622_v19 }
 0x182   : > { %v2040_v31 = vmax.f32 %v296_v18, %v1619_v15  ;;  %v2044_v52 = vmax.f32 %v295_v17, %v1618_v16 }
 0x183   : > { %v660_v21 = vmax.f32 %v1915_v28, %v1624_v60  ;;  %v659_v38 = vmax.f32 %v1919_v29, %v1623_v25 }
 0x184   : > { %v1650_v14 = vpack.i.bf16 %v2040_v31, %v2044_v52 }
 0x185   : > { %v686_v18 = vpack.c.bf16 %v660_v21, %v659_v38 }
 0x186   : > { %1656 = vrot.lane.b32.xlu2 %v1655_v61, %s1671_s26  ;;  %1651 = vrot.lane.b32.xlu0 %v1650_v14, %s1671_s26 }
 0x187   : > { %v735_v24 = vpop.permute.xlu0 %734  ;;  %724 = vrot.lane.b32.xlu1 %v686_v18, %s1672_s27 }
 0x188   : > { %1371 = vmatmul.msk.bf16.gmra.mxu3 %vm746_vm5, %v735_v24  ;;  %v1632_v17 = vpop.permute.xlu1 %1631 }
 0x189   : > { %v1634_v39 = vunpack.i.h.bf16 %v1632_v17  ;;  %v1633_v28 = vunpack.i.l.bf16 %v1632_v17 }
 0x18b   : > { %v676_v29 = vmax.f32 %v1942_v47, %v1634_v39  ;;  %v675_v27 = vmax.f32 %v1946_v5, %v1633_v28 }
 0x18c   : > { %1462 = vmatmul.msk.bf16.gmra.mxu2 %vm982_vm4, %v1480_v22 }
 0x18d   : > { %v694_v32 = vpack.c.bf16 %v676_v29, %v675_v27 }
 0x18f   : > { %740 = vrot.lane.b32.xlu0 %v694_v32, %s1672_s27 }
 0x190   : > { %1364 = vmatmul.msk.bf16.gmra.mxu0 %vm746_vm5, %v721_v30  ;;  %v737_v34 = vpop.permute.xlu1 %736 }
 0x198   : > { %1372 = vmatmul.msk.bf16.gmra.mxu3 %vm746_vm5, %v737_v34 }
 0x1a2   : > { %v1047_v42 = vpop.f32.mrf.mxu1 }
 0x1a9   : > { %v2072_v9 = vpop.f32.mrf.mxu2 }
 0x1aa   : > { %v1049_v59 = vpop.f32.mrf.mxu1 }
 0x1b1   : > { %v2097_v26 = vpop.f32.mrf.mxu2 }
 0x1b2   : > { %v1052_v7 = vpop.f32.mrf.mxu1 }
 0x1b9   : > { %v1092_v18 = vpop.f32.mrf.mxu2 }
 0x1c1   : > { %v1094_v34 = vpop.f32.mrf.mxu2 }
 0x1d0   : > { %v1642_v47 = vpop.permute.xlu2 %1641 }
 0x1d1   : > { %v1647_v43 = vpop.permute.xlu1 %1646  ;;  %v1644_v50 = vunpack.i.h.bf16 %v1642_v47  ;;  %v1643_v45 = vunpack.i.l.bf16 %v1642_v47 }
 0x1d2   : > { %v1649_v44 = vunpack.i.h.bf16 %v1647_v43  ;;  %v1648_v5 = vunpack.i.l.bf16 %v1647_v43 }
 0x1d3   : > { %v678_v55 = vmax.f32 %v2011_v33, %v1644_v50  ;;  %v677_v58 = vmax.f32 %v2015_v35, %v1643_v45  ;;  %v2084_v35 = vld [vmem:[%s2260_s4] ss:$0 sm:$0xff] }
 0x1d4   : > { %v664_v40 = vmax.f32 %v1982_v48, %v1649_v44  ;;  %v663_v41 = vmax.f32 %v1986_v56, %v1648_v5  ;;  %v2077_v48 = vld [vmem:[%s2259_s3] ss:$0 sm:$0xff]  ;;  %v1472_v56 = vld [vmem:[%s1720_s24 + $0x28] sm:$0xff] }
 0x1d5   : > { %v695_v62 = vpack.c.bf16 %v678_v55, %v677_v58  ;;  %1454 = vmatmul.msk.bf16.gmra.mxu1 %vm982_vm4, %v1472_v56 }
 0x1d6   : > { %v688_v0 = vpack.c.bf16 %v664_v40, %v663_v41 }
 0x1d7   : > { %742 = vrot.lane.b32.xlu2 %v695_v62, %s1672_s27 }
 0x1d8   : > { %728 = vrot.lane.b32.xlu0 %v688_v0, %s1672_s27  ;;  %v739_v1 = vpop.permute.xlu2 %738 }
 0x1d9   : > { %1373 = vmatmul.msk.bf16.gmra.mxu3 %vm746_vm5, %v739_v1 }
 0x1dd   : > { %v811_v63 = vpop.f32.mrf.mxu0 }
 0x1de   : > { %v1048_v33 = vadd.f32 %v1047_v42, %v811_v63 }
 0x1e0   : > { %v1131_v36 = vmul.f32 %v2077_v48, %v1048_v33  ;;  %v1657_v4 = vpop.permute.xlu2 %1656  ;;  %v1637_v20 = vpop.permute.xlu0 %1636 }
 0x1e1   : > { %v1659_v12 = vunpack.i.h.bf16 %v1657_v4  ;;  %v1658_v10 = vunpack.i.l.bf16 %v1657_v4  ;;  %v1639_v13 = vunpack.i.h.bf16 %v1637_v20  ;;  %v1638_v46 = vunpack.i.l.bf16 %v1637_v20 }
 0x1e2   : > { %v1167_v2 = vadd.f32 %v2084_v35, %v1131_v36 }
 0x1e3   : > { %v666_v15 = vmax.f32 %v2026_v54, %v1659_v12  ;;  %v665_v16 = vmax.f32 %v2030_v23, %v1658_v10  ;;  %v662_v57 = vmax.f32 %v1998_v49, %v1639_v13  ;;  %v661_v19 = vmax.f32 %v2002_v6, %v1638_v46  ;;  %v1054_v54 = vpop.f32.mrf.mxu1 }
 0x1e4   : > { %v1199_v3 = vmax.f32 %v1167_v2, 0.0 }
 0x1e5   : > { %v813_v53 = vpop.f32.mrf.mxu0  ;;  %v689_v25 = vpack.c.bf16 %v666_v15, %v665_v16  ;;  %v687_v61 = vpack.c.bf16 %v662_v57, %v661_v19 }
 0x1e6   : > { %v1231_v11 = vpack.c.bf16 %v1199_v3, %v1199_v3  ;;  %v1050_v8 = vadd.f32 %v1049_v59, %v813_v53 }
 0x1e7   : > { %730 = vrot.lane.b32.xlu2 %v689_v25, %s1672_s27  ;;  %726 = vrot.lane.b32.xlu1 %v687_v61, %s1672_s27 }
 0x1e8   : > { %1264 = vst.msk [vmem:[%s2095_s17] sm:$0xf] %vm1263_vm6, %v1231_v11  ;;  %v1132_v60 = vmul.f32 %v2077_v48, %v1050_v8  ;;  %v723_v38 = vpop.permute.xlu0 %722 }
 0x1e9   : > { %1365 = vmatmul.msk.bf16.gmra.mxu0 %vm746_vm5, %v723_v38 }
 0x1ea   : > { %v1168_v21 = vadd.f32 %v2084_v35, %v1132_v60 }
 0x1eb   : > { %v1057_v29 = vpop.f32.mrf.mxu1 }
 0x1ec   : > { %v1200_v23 = vmax.f32 %v1168_v21, 0.0 }
 0x1ed   : > { %v816_v49 = vpop.f32.mrf.mxu0 }
 0x1ee   : > { %v1232_v6 = vpack.c.bf16 %v1200_v23, %v1200_v23  ;;  %v1053_v24 = vadd.f32 %v1052_v7, %v816_v49  ;;  %v1097_v7 = vpop.f32.mrf.mxu2 }
 0x1f0   : > { %1265 = vst.msk [vmem:[%s2095_s17 + $0x4] sm:$0xf] %vm1263_vm6, %v1232_v6  ;;  %v1133_v14 = vmul.f32 %v2077_v48, %v1053_v24 }
 0x1f2   : > { %v1169_v17 = vadd.f32 %v2084_v35, %v1133_v14 }
 0x1f3   : > { %v1059_v58 = vpop.f32.mrf.mxu1 }
 0x1f4   : > { %v1201_v39 = vmax.f32 %v1169_v17, 0.0 }
 0x1f5   : > { %v818_v28 = vpop.f32.mrf.mxu0 }
 0x1f6   : > { %v1233_v27 = vpack.c.bf16 %v1201_v39, %v1201_v39  ;;  %v1055_v30 = vadd.f32 %v1054_v54, %v818_v28  ;;  %v1099_v60 = vpop.f32.mrf.mxu2  ;;  %v1481_v28 = vld [vmem:[%s1720_s24 + $0x70] sm:$0xff] }
 0x1f7   : > { %1463 = vmatmul.msk.bf16.gmra.mxu2 %vm982_vm4, %v1481_v28 }
 0x1f8   : > { %1266 = vst.msk [vmem:[%s2095_s17 + $0x8] sm:$0xf] %vm1263_vm6, %v1233_v27  ;;  %v1134_v32 = vmul.f32 %v2077_v48, %v1055_v30  ;;  %v1652_v44 = vpop.permute.xlu0 %1651 }
 0x1f9   : > { %v725_v47 = vpop.permute.xlu1 %724  ;;  %v1654_v40 = vunpack.i.h.bf16 %v1652_v44  ;;  %v1653_v41 = vunpack.i.l.bf16 %v1652_v44 }
 0x1fa   : > { %v1170_v51 = vadd.f32 %v2084_v35, %v1134_v32  ;;  %1366 = vmatmul.msk.bf16.gmra.mxu0 %vm746_vm5, %v725_v47 }
 0x1fb   : > { %v856_v37 = vpop.f32.mrf.mxu3  ;;  %v680_v62 = vmax.f32 %v2040_v31, %v1654_v40  ;;  %v679_v0 = vmax.f32 %v2044_v52, %v1653_v41  ;;  %v1062_v46 = vpop.f32.mrf.mxu1 }
 0x1fc   : > { %v1202_v42 = vmax.f32 %v1170_v51, 0.0  ;;  %v1093_v43 = vadd.f32 %v1092_v18, %v856_v37 }
 0x1fd   : > { %v821_v5 = vpop.f32.mrf.mxu0  ;;  %v696_v63 = vpack.c.bf16 %v680_v62, %v679_v0 }
 0x1fe   : > { %v1234_v50 = vpack.c.bf16 %v1202_v42, %v1202_v42  ;;  %v1149_v45 = vmul.f32 %v2077_v48, %v1093_v43  ;;  %v1058_v55 = vadd.f32 %v1057_v29, %v821_v5  ;;  %v1102_v32 = vpop.f32.mrf.mxu2 }
 0x1ff   : > { %744 = vrot.lane.b32.xlu1 %v696_v63, %s1672_s27 }
 0x200   : > { %1267 = vst.msk [vmem:[%s2095_s17 + $0xc] sm:$0xf] %vm1263_vm6, %v1234_v50  ;;  %v1185_v59 = vadd.f32 %v2084_v35, %v1149_v45  ;;  %v1135_v1 = vmul.f32 %v2077_v48, %v1058_v55 }
 0x201   : > { %v741_v20 = vpop.permute.xlu0 %740 }
 0x202   : > { %v1217_v56 = vmax.f32 %v1185_v59, 0.0  ;;  %v1171_v33 = vadd.f32 %v2084_v35, %v1135_v1  ;;  %1374 = vmatmul.msk.bf16.gmra.mxu3 %vm746_vm5, %v741_v20 }
 0x203   : > { %v858_v36 = vpop.f32.mrf.mxu3  ;;  %v1064_v24 = vpop.f32.mrf.mxu1 }
 0x204   : > { %v1249_v2 = vpack.c.bf16 %v1217_v56, %v1217_v56  ;;  %v1095_v3 = vadd.f32 %v1094_v34, %v858_v36  ;;  %v1203_v4 = vmax.f32 %v1171_v33, 0.0  ;;  %v1473_v36 = vld [vmem:[%s1720_s24 + $0x30] sm:$0xff] }
 0x205   : > { %v823_v22 = vpop.f32.mrf.mxu0  ;;  %1455 = vmatmul.msk.bf16.gmra.mxu1 %vm982_vm4, %v1473_v36 }
 0x206   : > { %1282 = vst.msk [vmem:[%s2095_s17 + $0x48] sm:$0xf] %vm1263_vm6, %v1249_v2  ;;  %v1150_v31 = vmul.f32 %v2077_v48, %v1095_v3  ;;  %v1060_v52 = vadd.f32 %v1059_v58, %v823_v22  ;;  %v1235_v12 = vpack.c.bf16 %v1203_v4, %v1203_v4  ;;  %v1104_v41 = vpop.f32.mrf.mxu2  ;;  %v1482_v2 = vld [vmem:[%s1720_s24 + $0x78] sm:$0xff] }
 0x207   : > { %1464 = vmatmul.msk.bf16.gmra.mxu2 %vm982_vm4, %v1482_v2 }
 0x208   : > { %v1186_v10 = vadd.f32 %v2084_v35, %v1150_v31  ;;  %v1136_v13 = vmul.f32 %v2077_v48, %v1060_v52  ;;  %1268 = vst.msk [vmem:[%s2095_s17 + $0x10] sm:$0xf] %vm1263_vm6, %v1235_v12 }
 0x20a   : > { %v1218_v53 = vmax.f32 %v1186_v10, 0.0  ;;  %v1172_v11 = vadd.f32 %v2084_v35, %v1136_v13 }
 0x20b   : > { %v861_v8 = vpop.f32.mrf.mxu3  ;;  %v1067_v31 = vpop.f32.mrf.mxu1 }
 0x20c   : > { %v1250_v15 = vpack.c.bf16 %v1218_v53, %v1218_v53  ;;  %v1204_v16 = vmax.f32 %v1172_v11, 0.0  ;;  %v1098_v57 = vadd.f32 %v1097_v7, %v861_v8  ;;  %v1474_v7 = vld [vmem:[%s1720_s24 + $0x38] sm:$0xff] }
 0x20d   : > { %v826_v19 = vpop.f32.mrf.mxu0 }
 0x20e   : > { %1283 = vst.msk [vmem:[%s2095_s17 + $0x4c] sm:$0xf] %vm1263_vm6, %v1250_v15  ;;  %v1236_v25 = vpack.c.bf16 %v1204_v16, %v1204_v16  ;;  %v1151_v61 = vmul.f32 %v2077_v48, %v1098_v57  ;;  %v1063_v21 = vadd.f32 %v1062_v46, %v826_v19  ;;  %v1107_v3 = vpop.f32.mrf.mxu2 }
 0x210   : > { %1269 = vst.msk [vmem:[%s2095_s17 + $0x14] sm:$0xf] %vm1263_vm6, %v1236_v25  ;;  %v1187_v54 = vadd.f32 %v2084_v35, %v1151_v61  ;;  %v1137_v23 = vmul.f32 %v2077_v48, %v1063_v21 }
 0x212   : > { %v1219_v38 = vmax.f32 %v1187_v54, 0.0  ;;  %v1173_v49 = vadd.f32 %v2084_v35, %v1137_v23 }
 0x213   : > { %v863_v6 = vpop.f32.mrf.mxu3  ;;  %v1069_v57 = vpop.f32.mrf.mxu1 }
 0x214   : > { %v1251_v18 = vpack.c.bf16 %v1219_v38, %v1219_v38  ;;  %v1205_v14 = vmax.f32 %v1173_v49, 0.0  ;;  %v1100_v17 = vadd.f32 %v1099_v60, %v863_v6 }
 0x215   : > { %v828_v39 = vpop.f32.mrf.mxu0  ;;  %1456 = vmatmul.msk.bf16.gmra.mxu1 %vm982_vm4, %v1474_v7 }
 0x216   : > { %1284 = vst.msk [vmem:[%s2095_s17 + $0x50] sm:$0xf] %vm1263_vm6, %v1251_v18  ;;  %v1237_v29 = vpack.c.bf16 %v1205_v14, %v1205_v14  ;;  %v1152_v27 = vmul.f32 %v2077_v48, %v1100_v17  ;;  %v1065_v30 = vadd.f32 %v1064_v24, %v828_v39  ;;  %v1109_v10 = vpop.f32.mrf.mxu2 }
 0x218   : > { %1270 = vst.msk [vmem:[%s2095_s17 + $0x18] sm:$0xf] %vm1263_vm6, %v1237_v29  ;;  %v1188_v34 = vadd.f32 %v2084_v35, %v1152_v27  ;;  %v1138_v51 = vmul.f32 %v2077_v48, %v1065_v30 }
 0x21a   : > { %v1220_v37 = vmax.f32 %v1188_v34, 0.0  ;;  %v1174_v42 = vadd.f32 %v2084_v35, %v1138_v51 }
 0x21b   : > { %v866_v43 = vpop.f32.mrf.mxu3 }
 0x21c   : > { %v1252_v47 = vpack.c.bf16 %v1220_v37, %v1220_v37  ;;  %v1206_v44 = vmax.f32 %v1174_v42, 0.0  ;;  %v1103_v5 = vadd.f32 %v1102_v32, %v866_v43 }
 0x21e   : > { %1285 = vst.msk [vmem:[%s2095_s17 + $0x54] sm:$0xf] %vm1263_vm6, %v1252_v47  ;;  %v1238_v50 = vpack.c.bf16 %v1206_v44, %v1206_v44  ;;  %v1153_v45 = vmul.f32 %v2077_v48, %v1103_v5  ;;  %v1112_v5 = vpop.f32.mrf.mxu2 }
 0x220   : > { %1271 = vst.msk [vmem:[%s2095_s17 + $0x1c] sm:$0xf] %vm1263_vm6, %v1238_v50  ;;  %v1189_v40 = vadd.f32 %v2084_v35, %v1153_v45 }
 0x222   : > { %v1221_v55 = vmax.f32 %v1189_v40, 0.0 }
 0x223   : > { %v868_v58 = vpop.f32.mrf.mxu3 }
 0x224   : > { %v1253_v59 = vpack.c.bf16 %v1221_v55, %v1221_v55  ;;  %v1105_v62 = vadd.f32 %v1104_v41, %v868_v58 }
 0x226   : > { %1286 = vst.msk [vmem:[%s2095_s17 + $0x58] sm:$0xf] %vm1263_vm6, %v1253_v59  ;;  %v1154_v0 = vmul.f32 %v2077_v48, %v1105_v62  ;;  %v1114_v62 = vpop.f32.mrf.mxu2 }
 0x228   : > { %v1190_v1 = vadd.f32 %v2084_v35, %v1154_v0 }
 0x22a   : > { %v1222_v56 = vmax.f32 %v1190_v1, 0.0 }
 0x22c   : > { %v1254_v63 = vpack.c.bf16 %v1222_v56, %v1222_v56 }
 0x22e   : > { %1287 = vst.msk [vmem:[%s2095_s17 + $0x5c] sm:$0xf] %vm1263_vm6, %v1254_v63 }
 0x231   : > { %v743_v33 = vpop.permute.xlu2 %742 }
 0x232   : > { %1375 = vmatmul.msk.bf16.gmra.mxu3 %vm746_vm5, %v743_v33 }
 0x241   : > { %v731_v30 = vpop.permute.xlu2 %730 }
 0x24a   : > { %v729_v19 = vpop.permute.xlu0 %728 }
 0x252   : > { %v1072_v14 = vpop.f32.mrf.mxu1 }
 0x259   : > { %v727_v4 = vpop.permute.xlu1 %726 }
 0x25a   : > { %1367 = vmatmul.msk.bf16.gmra.mxu0 %vm746_vm5, %v727_v4  ;;  %v1074_v51 = vpop.f32.mrf.mxu1 }
 0x25c   : > { %v871_v20 = vpop.f32.mrf.mxu3 }
 0x25d   : > { %v1108_v22 = vadd.f32 %v1107_v3, %v871_v20 }
 0x25f   : > { %v1155_v52 = vmul.f32 %v2077_v48, %v1108_v22 }
 0x261   : > { %v1191_v12 = vadd.f32 %v2084_v35, %v1155_v52 }
 0x263   : > { %v1223_v13 = vmax.f32 %v1191_v12, 0.0 }
 0x264   : > { %v873_v46 = vpop.f32.mrf.mxu3 }
 0x265   : > { %v1255_v53 = vpack.c.bf16 %v1223_v13, %v1223_v13  ;;  %v1110_v11 = vadd.f32 %v1109_v10, %v873_v46 }
 0x266   : > { %v831_v8 = vpop.f32.mrf.mxu0 }
 0x267   : > { %1288 = vst.msk [vmem:[%s2095_s17 + $0x60] sm:$0xf] %vm1263_vm6, %v1255_v53  ;;  %v1156_v15 = vmul.f32 %v2077_v48, %v1110_v11  ;;  %v1068_v16 = vadd.f32 %v1067_v31, %v831_v8 }
 0x269   : > { %v1192_v60 = vadd.f32 %v2084_v35, %v1156_v15  ;;  %v1139_v25 = vmul.f32 %v2077_v48, %v1068_v16 }
 0x26a   : > { %1368 = vmatmul.msk.bf16.gmra.mxu0 %vm746_vm5, %v729_v19 }
 0x26b   : > { %v1224_v61 = vmax.f32 %v1192_v60, 0.0  ;;  %v1175_v21 = vadd.f32 %v2084_v35, %v1139_v25 }
 0x26d   : > { %v1256_v54 = vpack.c.bf16 %v1224_v61, %v1224_v61  ;;  %v1207_v23 = vmax.f32 %v1175_v21, 0.0 }
 0x26e   : > { %v833_v38 = vpop.f32.mrf.mxu0 }
 0x26f   : > { %1289 = vst.msk [vmem:[%s2095_s17 + $0x64] sm:$0xf] %vm1263_vm6, %v1256_v54  ;;  %v1239_v49 = vpack.c.bf16 %v1207_v23, %v1207_v23  ;;  %v1070_v6 = vadd.f32 %v1069_v57, %v833_v38 }
 0x271   : > { %1272 = vst.msk [vmem:[%s2095_s17 + $0x20] sm:$0xf] %vm1263_vm6, %v1239_v49  ;;  %v1140_v24 = vmul.f32 %v2077_v48, %v1070_v6  ;;  %v745_v18 = vpop.permute.xlu1 %744 }
 0x272   : > { %1376 = vmatmul.msk.bf16.gmra.mxu3 %vm746_vm5, %v745_v18 }
 0x273   : > { %v1176_v17 = vadd.f32 %v2084_v35, %v1140_v24 }
 0x275   : > { %v1208_v39 = vmax.f32 %v1176_v17, 0.0 }
 0x277   : > { %v836_v28 = vpop.f32.mrf.mxu0  ;;  %v1240_v29 = vpack.c.bf16 %v1208_v39, %v1208_v39 }
 0x278   : > { %v1073_v27 = vadd.f32 %v1072_v14, %v836_v28 }
 0x279   : > { %1273 = vst.msk [vmem:[%s2095_s17 + $0x24] sm:$0xf] %vm1263_vm6, %v1240_v29 }
 0x27a   : > { %v1141_v32 = vmul.f32 %v2077_v48, %v1073_v27  ;;  %1369 = vmatmul.msk.bf16.gmra.mxu0 %vm746_vm5, %v731_v30  ;;  %v1117_v3 = vpop.f32.mrf.mxu2 }
 0x27c   : > { %v1177_v34 = vadd.f32 %v2084_v35, %v1141_v32 }
 0x27e   : > { %v1209_v37 = vmax.f32 %v1177_v34, 0.0 }
 0x27f   : > { %v838_v42 = vpop.f32.mrf.mxu0 }
 0x280   : > { %v1241_v43 = vpack.c.bf16 %v1209_v37, %v1209_v37  ;;  %v1075_v47 = vadd.f32 %v1074_v51, %v838_v42 }
 0x282   : > { %1274 = vst.msk [vmem:[%s2095_s17 + $0x28] sm:$0xf] %vm1263_vm6, %v1241_v43  ;;  %v1142_v44 = vmul.f32 %v2077_v48, %v1075_v47  ;;  %v1119_v52 = vpop.f32.mrf.mxu2  ;;  %v1077_v16 = vpop.f32.mrf.mxu1 }
 0x284   : > { %v1178_v50 = vadd.f32 %v2084_v35, %v1142_v44 }
 0x285   : > { %v876_v40 = vpop.f32.mrf.mxu3 }
 0x286   : > { %v1210_v45 = vmax.f32 %v1178_v50, 0.0  ;;  %v1113_v41 = vadd.f32 %v1112_v5, %v876_v40 }
 0x288   : > { %v1242_v55 = vpack.c.bf16 %v1210_v45, %v1210_v45  ;;  %v1157_v58 = vmul.f32 %v2077_v48, %v1113_v41 }
 0x28a   : > { %1275 = vst.msk [vmem:[%s2095_s17 + $0x2c] sm:$0xf] %vm1263_vm6, %v1242_v55  ;;  %v1193_v59 = vadd.f32 %v2084_v35, %v1157_v58  ;;  %v1079_v60 = vpop.f32.mrf.mxu1  ;;  %v1122_v43 = vpop.f32.mrf.mxu2 }
 0x28c   : > { %v1225_v0 = vmax.f32 %v1193_v59, 0.0 }
 0x28d   : > { %v878_v1 = vpop.f32.mrf.mxu3 }
 0x28e   : > { %v1257_v56 = vpack.c.bf16 %v1225_v0, %v1225_v0  ;;  %v1115_v63 = vadd.f32 %v1114_v62, %v878_v1 }
 0x290   : > { %1290 = vst.msk [vmem:[%s2095_s17 + $0x68] sm:$0xf] %vm1263_vm6, %v1257_v56  ;;  %v1158_v33 = vmul.f32 %v2077_v48, %v1115_v63 }
 0x292   : > { %v1194_v36 = vadd.f32 %v2084_v35, %v1158_v33  ;;  %v1082_v6 = vpop.f32.mrf.mxu1  ;;  %v1124_v1 = vpop.f32.mrf.mxu2 }
 0x294   : > { %v1226_v7 = vmax.f32 %v1194_v36, 0.0 }
 0x296   : > { %v1258_v2 = vpack.c.bf16 %v1226_v7, %v1226_v7 }
 0x298   : > { %1291 = vst.msk [vmem:[%s2095_s17 + $0x6c] sm:$0xf] %vm1263_vm6, %v1258_v2 }
 0x29a   : > { %v1084_v27 = vpop.f32.mrf.mxu1 }
 0x2b5   : > { %v881_v4 = vpop.f32.mrf.mxu3 }
 0x2b6   : > { %v1118_v20 = vadd.f32 %v1117_v3, %v881_v4 }
 0x2b8   : > { %v1159_v22 = vmul.f32 %v2077_v48, %v1118_v20 }
 0x2ba   : > { %v1195_v31 = vadd.f32 %v2084_v35, %v1159_v22 }
 0x2bc   : > { %v1227_v12 = vmax.f32 %v1195_v31, 0.0 }
 0x2bd   : > { %v883_v10 = vpop.f32.mrf.mxu3 }
 0x2be   : > { %v1259_v13 = vpack.c.bf16 %v1227_v12, %v1227_v12  ;;  %v1120_v46 = vadd.f32 %v1119_v52, %v883_v10 }
 0x2c0   : > { %1292 = vst.msk [vmem:[%s2095_s17 + $0x70] sm:$0xf] %vm1263_vm6, %v1259_v13  ;;  %v1160_v53 = vmul.f32 %v2077_v48, %v1120_v46 }
 0x2c2   : > { %v1196_v11 = vadd.f32 %v2084_v35, %v1160_v53 }
 0x2c4   : > { %v1228_v8 = vmax.f32 %v1196_v11, 0.0 }
 0x2c6   : > { %v1260_v15 = vpack.c.bf16 %v1228_v8, %v1228_v8 }
 0x2c8   : > { %1293 = vst.msk [vmem:[%s2095_s17 + $0x74] sm:$0xf] %vm1263_vm6, %v1260_v15 }
 0x2d7   : > { %v841_v57 = vpop.f32.mrf.mxu0 }
 0x2d8   : > { %v1078_v19 = vadd.f32 %v1077_v16, %v841_v57 }
 0x2da   : > { %v1143_v25 = vmul.f32 %v2077_v48, %v1078_v19 }
 0x2dc   : > { %v1179_v61 = vadd.f32 %v2084_v35, %v1143_v25 }
 0x2de   : > { %v1211_v21 = vmax.f32 %v1179_v61, 0.0 }
 0x2df   : > { %v843_v54 = vpop.f32.mrf.mxu0 }
 0x2e0   : > { %v1243_v23 = vpack.c.bf16 %v1211_v21, %v1211_v21  ;;  %v1080_v38 = vadd.f32 %v1079_v60, %v843_v54 }
 0x2e2   : > { %1276 = vst.msk [vmem:[%s2095_s17 + $0x30] sm:$0xf] %vm1263_vm6, %v1243_v23  ;;  %v1144_v49 = vmul.f32 %v2077_v48, %v1080_v38 }
 0x2e4   : > { %v1180_v24 = vadd.f32 %v2084_v35, %v1144_v49 }
 0x2e6   : > { %v1212_v18 = vmax.f32 %v1180_v24, 0.0 }
 0x2e7   : > { %v846_v14 = vpop.f32.mrf.mxu0 }
 0x2e8   : > { %v1244_v17 = vpack.c.bf16 %v1212_v18, %v1212_v18  ;;  %v1083_v39 = vadd.f32 %v1082_v6, %v846_v14 }
 0x2ea   : > { %1277 = vst.msk [vmem:[%s2095_s17 + $0x34] sm:$0xf] %vm1263_vm6, %v1244_v17  ;;  %v1145_v28 = vmul.f32 %v2077_v48, %v1083_v39 }
 0x2ec   : > { %v1181_v29 = vadd.f32 %v2084_v35, %v1145_v28 }
 0x2ee   : > { %v1213_v30 = vmax.f32 %v1181_v29, 0.0 }
 0x2ef   : > { %v848_v32 = vpop.f32.mrf.mxu0 }
 0x2f0   : > { %v1245_v34 = vpack.c.bf16 %v1213_v30, %v1213_v30  ;;  %v1085_v51 = vadd.f32 %v1084_v27, %v848_v32 }
 0x2f2   : > { %1278 = vst.msk [vmem:[%s2095_s17 + $0x38] sm:$0xf] %vm1263_vm6, %v1245_v34  ;;  %v1146_v37 = vmul.f32 %v2077_v48, %v1085_v51 }
 0x2f4   : > { %v1182_v42 = vadd.f32 %v2084_v35, %v1146_v37 }
 0x2f5   : > { %v886_v44 = vpop.f32.mrf.mxu3 }
 0x2f6   : > { %v1214_v47 = vmax.f32 %v1182_v42, 0.0  ;;  %v1123_v5 = vadd.f32 %v1122_v43, %v886_v44 }
 0x2f7   : > { %v851_v50 = vpop.f32.mrf.mxu0 }
 0x2f8   : > { %v1246_v45 = vpack.c.bf16 %v1214_v47, %v1214_v47  ;;  %v1088_v40 = vadd.f32 %v2072_v9, %v851_v50  ;;  %v1161_v41 = vmul.f32 %v2077_v48, %v1123_v5 }
 0x2fa   : > { %1279 = vst.msk [vmem:[%s2095_s17 + $0x3c] sm:$0xf] %vm1263_vm6, %v1246_v45  ;;  %v1147_v55 = vmul.f32 %v2077_v48, %v1088_v40  ;;  %v1197_v58 = vadd.f32 %v2084_v35, %v1161_v41 }
 0x2fc   : > { %v1183_v59 = vadd.f32 %v2084_v35, %v1147_v55  ;;  %v1229_v62 = vmax.f32 %v1197_v58, 0.0 }
 0x2fd   : > { %v888_v56 = vpop.f32.mrf.mxu3 }
 0x2fe   : > { %v1215_v0 = vmax.f32 %v1183_v59, 0.0  ;;  %v1261_v63 = vpack.c.bf16 %v1229_v62, %v1229_v62  ;;  %v1125_v33 = vadd.f32 %v1124_v1, %v888_v56 }
 0x2ff   : > { %v853_v9 = vpop.f32.mrf.mxu0 }
 0x300   : > { %v1247_v36 = vpack.c.bf16 %v1215_v0, %v1215_v0  ;;  %v1090_v7 = vadd.f32 %v2097_v26, %v853_v9  ;;  %1294 = vst.msk [vmem:[%s2095_s17 + $0x78] sm:$0xf] %vm1263_vm6, %v1261_v63  ;;  %v1162_v2 = vmul.f32 %v2077_v48, %v1125_v33 }
 0x302   : > { %1280 = vst.msk [vmem:[%s2095_s17 + $0x40] sm:$0xf] %vm1263_vm6, %v1247_v36  ;;  %v1148_v3 = vmul.f32 %v2077_v48, %v1090_v7  ;;  %v1198_v4 = vadd.f32 %v2084_v35, %v1162_v2 }
 0x304   : > { %v1184_v20 = vadd.f32 %v2084_v35, %v1148_v3  ;;  %v1230_v22 = vmax.f32 %v1198_v4, 0.0 }
 0x306   : > { %v1216_v31 = vmax.f32 %v1184_v20, 0.0  ;;  %v1262_v52 = vpack.c.bf16 %v1230_v22, %v1230_v22 }
 0x308   : > { %v1248_v12 = vpack.c.bf16 %v1216_v31, %v1216_v31  ;;  %1295 = vst.msk [vmem:[%s2095_s17 + $0x7c] sm:$0xf] %vm1263_vm6, %v1262_v52 }
 0x30a   : > { %1281 = vst.msk [vmem:[%s2095_s17 + $0x44] sm:$0xf] %vm1263_vm6, %v1248_v12 }
 0x30b PF: > { %s15_s18 = sadd.s32 1, %s1668_s18  }
 0x30c   : > { %p12_p4 = scmp.ge.s32.totalorder %s15_s18, 4  }
 0x30e   :  { %14 = sbr.rel (!%p12_p4) target bundleno = 1 (0x1), region = 70 }

// kernel: _lambda_.47
= control target key start
LH: loop header
LB: loop body
LE: loop exit
PB: predicated region body
PF: predicated region fallthrough
CT: control target
= control target key end

     0   :  { %s731_s15 = smov 0   ;;  %s880_s0 = inlined_call_operand.vmem [shape: bf16[504,96], index: 0, kind: input, shape index: {}]   ;;  %s881_s1 = inlined_call_operand.vmem [shape: bf16[96,32], index: 1, kind: input, shape index: {}]   ;;  %s882_s2 = inlined_call_operand.vmem [shape: f32[1,32], index: 2, kind: input, shape index: {}]   ;;  %s883_s3 = inlined_call_operand.vmem [shape: f32[1,32], index: 3, kind: input, shape index: {}]   ;;  %s884_s4 = inlined_call_operand.vmem [shape: bf16[504,32], index: 4, kind: output, shape index: {}]  }
   0x1 LB: > { %s570_s16 = sadd.s32 4294967295, %s704_s15   ;;  %p574_p0 = scmp.ge.s32.totalorder %s704_s15, 1  ;;  %s704_s15 = sphi %s731_s15, %s14_s15  }
   0x2   : > { %p163_p1 = scmp.lt.s32.totalorder %s704_s15, 4 }
   0x4   : > { %p164_p2 = pnand %p574_p0, %p163_p1 }
   0x5   : > { %s189_s21 = smul.u32 (!%p164_p2), 21, %s570_s16 }
   0x6   : > { %167 = sbr.rel (%p164_p2) target bundleno = 214 (0xd6), region = 36 }
   0x7   : > { %p190_p3 = scmp.lt.s32.totalorder (!%p164_p2), %s189_s21, 62 }
   0xb   : > { %v669_v0 = vld [vmem:[%s881_s1 + $0x28] sm:$0xff]  ;;  %v668_v1 = vld [vmem:[%s881_s1 + $0x20] sm:$0xff]  ;;  %v667_v2 = vld [vmem:[%s881_s1 + $0x18] sm:$0xff]  ;;  %s886_s21 = smov (!%p190_p3, %s189_s21), 62  ;;  %vm324_vm0 = vcmask 785408   ;;  %vm492_vm1 = vcmask 257024  }
   0xc   : > { %670 = vmatpush.bf16.msra.mxu1 %v669_v0  ;;  %671 = vmatpush.bf16.msra.mxu2 %v669_v0  ;;  %v666_v3 = vld [vmem:[%s881_s1 + $0x10] sm:$0xff]  ;;  %v665_v4 = vld [vmem:[%s881_s1 + $0x8] sm:$0xff]  ;;  %s575_s28 = sshll.u32 %s886_s21, 2  ;;  %v664_v5 = vld [vmem:[%s881_s1] sm:$0xff] }
   0xd   : > { %672 = vmatpush.bf16.msra.mxu3 %v669_v0  ;;  %360 = vmatpush.bf16.msra.mxu0 %v669_v0  ;;  %s193_s7 = scalar_lea.vmem %s880_s0, %s575_s28  ;;  %v779_v19 = vld [vmem:[%s882_s2] ss:$0 sm:$0xff]  ;;  %s794_s14 = scalar_lea.vmem %s884_s4, %s575_s28 }
   0xe   : > { %v656_v6 = vld [vmem:[%s193_s7 + $0x10] sm:$0xff]  ;;  %v659_v7 = vld [vmem:[%s193_s7 + $0x28] sm:$0xff]  ;;  %v662_v8 = vld [vmem:[%s193_s7 + $0x40] sm:$0xff] }
   0xf   : > { %v654_v9 = vld [vmem:[%s193_s7] sm:$0xff]  ;;  %v657_v10 = vld [vmem:[%s193_s7 + $0x18] sm:$0xff]  ;;  %v660_v11 = vld [vmem:[%s193_s7 + $0x30] sm:$0xff] }
  0x10   : > { %673 = vmatpush.bf16.msra.mxu1 %v668_v1  ;;  %674 = vmatpush.bf16.msra.mxu2 %v668_v1  ;;  %v663_v12 = vld [vmem:[%s193_s7 + $0x48] sm:$0xff]  ;;  %v222_v14 = vld [vmem:[%s193_s7 + $0x50] sm:$0xf]  ;;  %v658_v16 = vld [vmem:[%s193_s7 + $0x20] sm:$0xff] }
  0x11   : > { %675 = vmatpush.bf16.msra.mxu3 %v668_v1  ;;  %361 = vmatpush.bf16.msra.mxu0 %v668_v1  ;;  %v655_v13 = vld [vmem:[%s193_s7 + $0x8] sm:$0xff]  ;;  %v276_v15 = vunpack.c.l.b16 %v222_v14  ;;  %v661_v17 = vld [vmem:[%s193_s7 + $0x38] sm:$0xff]  ;;  %v784_v20 = vld [vmem:[%s883_s3] ss:$0 sm:$0xff] }
  0x13   : > { %v287_v18 = vpack.c.b16 %v276_v15, %v276_v15 }
  0x14   : > { %676 = vmatpush.bf16.msra.mxu1 %v667_v2  ;;  %677 = vmatpush.bf16.msra.mxu2 %v667_v2 }
  0x15   : > { %678 = vmatpush.bf16.msra.mxu3 %v667_v2  ;;  %362 = vmatpush.bf16.msra.mxu0 %v667_v2 }
  0x18   : > { %679 = vmatpush.bf16.msra.mxu1 %v666_v3  ;;  %680 = vmatpush.bf16.msra.mxu2 %v666_v3 }
  0x19   : > { %681 = vmatpush.bf16.msra.mxu3 %v666_v3  ;;  %363 = vmatpush.bf16.msra.mxu0 %v666_v3 }
  0x1c   : > { %682 = vmatpush.bf16.msra.mxu1 %v665_v4  ;;  %683 = vmatpush.bf16.msra.mxu2 %v665_v4 }
  0x1d   : > { %684 = vmatpush.bf16.msra.mxu3 %v665_v4  ;;  %364 = vmatpush.bf16.msra.mxu0 %v665_v4 }
  0x20   : > { %685 = vmatpush.bf16.msra.mxu1 %v664_v5  ;;  %686 = vmatpush.bf16.msra.mxu2 %v664_v5 }
  0x21   : > { %687 = vmatpush.bf16.msra.mxu3 %v664_v5  ;;  %365 = vmatpush.bf16.msra.mxu0 %v664_v5 }
  0x23   : > { %643 = vmatmul.msk.bf16.vlgmr.msra.gmra.mxu1 %vm324_vm0, %v656_v6  ;;  %646 = vmatmul.msk.bf16.vlgmr.msra.gmra.mxu2 %vm324_vm0, %v659_v7 }
  0x24   : > { %649 = vmatmul.msk.bf16.vlgmr.msra.gmra.mxu3 %vm324_vm0, %v662_v8  ;;  %641 = vmatmul.msk.bf16.vlgmr.msra.gmra.mxu0 %vm324_vm0, %v654_v9 }
  0x33   : > { %644 = vmatmul.msk.bf16.gmra.mxu1 %vm324_vm0, %v657_v10  ;;  %647 = vmatmul.msk.bf16.gmra.mxu2 %vm324_vm0, %v660_v11 }
  0x34   : > { %650 = vmatmul.msk.bf16.gmra.mxu3 %vm324_vm0, %v663_v12  ;;  %642 = vmatmul.msk.bf16.gmra.mxu0 %vm324_vm0, %v655_v13 }
  0x43   : > { %645 = vmatmul.msk.bf16.gmra.mxu1 %vm324_vm0, %v658_v16  ;;  %648 = vmatmul.msk.bf16.gmra.mxu2 %vm324_vm0, %v661_v17 }
  0x44   : > { %651 = vmatmul.msk.bf16.gmra.mxu3 %vm324_vm0, %v287_v18 }
  0xa0   : > { %v377_v21 = vpop.f32.mrf.mxu1 }
  0xa1   : > { %v429_v22 = vmul.f32 %v779_v19, %v377_v21  ;;  %v367_v23 = vpop.f32.mrf.mxu0 }
  0xa2   : > { %v425_v24 = vmul.f32 %v779_v19, %v367_v23 }
  0xa3   : > { %v454_v25 = vadd.f32 %v784_v20, %v429_v22 }
  0xa4   : > { %v450_v26 = vadd.f32 %v784_v20, %v425_v24 }
  0xa5   : > { %v475_v27 = vpack.c.bf16 %v454_v25, %v454_v25 }
  0xa6   : > { %v392_v28 = vpop.f32.mrf.mxu2  ;;  %v471_v29 = vpack.c.bf16 %v450_v26, %v450_v26 }
  0xa7   : > { %497 = vst.msk [vmem:[%s794_s14 + $0x10] sm:$0xf] %vm492_vm1, %v475_v27  ;;  %v435_v30 = vmul.f32 %v779_v19, %v392_v28  ;;  %v407_v31 = vpop.f32.mrf.mxu3 }
  0xa8   : > { %v441_v32 = vmul.f32 %v779_v19, %v407_v31  ;;  %v379_v33 = vpop.f32.mrf.mxu1  ;;  %493 = vst.msk [vmem:[%s794_s14] sm:$0xf] %vm492_vm1, %v471_v29 }
  0xa9   : > { %v460_v34 = vadd.f32 %v784_v20, %v435_v30  ;;  %v430_v35 = vmul.f32 %v779_v19, %v379_v33  ;;  %v369_v36 = vpop.f32.mrf.mxu0 }
  0xaa   : > { %v466_v37 = vadd.f32 %v784_v20, %v441_v32  ;;  %v426_v38 = vmul.f32 %v779_v19, %v369_v36 }
  0xab   : > { %v481_v39 = vpack.c.bf16 %v460_v34, %v460_v34  ;;  %v455_v40 = vadd.f32 %v784_v20, %v430_v35 }
  0xac   : > { %v487_v41 = vpack.c.bf16 %v466_v37, %v466_v37  ;;  %v451_v42 = vadd.f32 %v784_v20, %v426_v38 }
  0xad   : > { %503 = vst.msk [vmem:[%s794_s14 + $0x28] sm:$0xf] %vm492_vm1, %v481_v39  ;;  %v476_v43 = vpack.c.bf16 %v455_v40, %v455_v40 }
  0xae   : > { %509 = vst.msk [vmem:[%s794_s14 + $0x40] sm:$0xf] %vm492_vm1, %v487_v41  ;;  %v394_v44 = vpop.f32.mrf.mxu2  ;;  %v472_v45 = vpack.c.bf16 %v451_v42, %v451_v42 }
  0xaf   : > { %498 = vst.msk [vmem:[%s794_s14 + $0x14] sm:$0xf] %vm492_vm1, %v476_v43  ;;  %v436_v46 = vmul.f32 %v779_v19, %v394_v44  ;;  %v409_v47 = vpop.f32.mrf.mxu3 }
  0xb0   : > { %v442_v48 = vmul.f32 %v779_v19, %v409_v47  ;;  %v382_v49 = vpop.f32.mrf.mxu1  ;;  %494 = vst.msk [vmem:[%s794_s14 + $0x4] sm:$0xf] %vm492_vm1, %v472_v45 }
  0xb1   : > { %v461_v50 = vadd.f32 %v784_v20, %v436_v46  ;;  %v431_v51 = vmul.f32 %v779_v19, %v382_v49  ;;  %v372_v52 = vpop.f32.mrf.mxu0 }
  0xb2   : > { %v467_v53 = vadd.f32 %v784_v20, %v442_v48  ;;  %v427_v54 = vmul.f32 %v779_v19, %v372_v52 }
  0xb3   : > { %v482_v55 = vpack.c.bf16 %v461_v50, %v461_v50  ;;  %v456_v56 = vadd.f32 %v784_v20, %v431_v51 }
  0xb4   : > { %v488_v57 = vpack.c.bf16 %v467_v53, %v467_v53  ;;  %v452_v58 = vadd.f32 %v784_v20, %v427_v54 }
  0xb5   : > { %504 = vst.msk [vmem:[%s794_s14 + $0x2c] sm:$0xf] %vm492_vm1, %v482_v55  ;;  %v477_v59 = vpack.c.bf16 %v456_v56, %v456_v56 }
  0xb6   : > { %510 = vst.msk [vmem:[%s794_s14 + $0x44] sm:$0xf] %vm492_vm1, %v488_v57  ;;  %v397_v60 = vpop.f32.mrf.mxu2  ;;  %v473_v61 = vpack.c.bf16 %v452_v58, %v452_v58 }
  0xb7   : > { %499 = vst.msk [vmem:[%s794_s14 + $0x18] sm:$0xf] %vm492_vm1, %v477_v59  ;;  %v437_v62 = vmul.f32 %v779_v19, %v397_v60  ;;  %v412_v63 = vpop.f32.mrf.mxu3 }
  0xb8   : > { %v443_v0 = vmul.f32 %v779_v19, %v412_v63  ;;  %v384_v1 = vpop.f32.mrf.mxu1  ;;  %495 = vst.msk [vmem:[%s794_s14 + $0x8] sm:$0xf] %vm492_vm1, %v473_v61 }
  0xb9   : > { %v462_v2 = vadd.f32 %v784_v20, %v437_v62  ;;  %v432_v3 = vmul.f32 %v779_v19, %v384_v1  ;;  %v374_v4 = vpop.f32.mrf.mxu0 }
  0xba   : > { %v468_v5 = vadd.f32 %v784_v20, %v443_v0  ;;  %v428_v6 = vmul.f32 %v779_v19, %v374_v4 }
  0xbb   : > { %v483_v7 = vpack.c.bf16 %v462_v2, %v462_v2  ;;  %v457_v8 = vadd.f32 %v784_v20, %v432_v3 }
  0xbc   : > { %v489_v9 = vpack.c.bf16 %v468_v5, %v468_v5  ;;  %v453_v10 = vadd.f32 %v784_v20, %v428_v6 }
  0xbd   : > { %505 = vst.msk [vmem:[%s794_s14 + $0x30] sm:$0xf] %vm492_vm1, %v483_v7  ;;  %v478_v11 = vpack.c.bf16 %v457_v8, %v457_v8 }
  0xbe   : > { %511 = vst.msk [vmem:[%s794_s14 + $0x48] sm:$0xf] %vm492_vm1, %v489_v9  ;;  %v399_v12 = vpop.f32.mrf.mxu2  ;;  %v474_v13 = vpack.c.bf16 %v453_v10, %v453_v10 }
  0xbf   : > { %500 = vst.msk [vmem:[%s794_s14 + $0x1c] sm:$0xf] %vm492_vm1, %v478_v11  ;;  %v438_v14 = vmul.f32 %v779_v19, %v399_v12  ;;  %v414_v15 = vpop.f32.mrf.mxu3 }
  0xc0   : > { %v444_v16 = vmul.f32 %v779_v19, %v414_v15  ;;  %v387_v17 = vpop.f32.mrf.mxu1  ;;  %496 = vst.msk [vmem:[%s794_s14 + $0xc] sm:$0xf] %vm492_vm1, %v474_v13 }
  0xc1   : > { %v463_v18 = vadd.f32 %v784_v20, %v438_v14  ;;  %v433_v21 = vmul.f32 %v779_v19, %v387_v17 }
  0xc2   : > { %v469_v22 = vadd.f32 %v784_v20, %v444_v16 }
  0xc3   : > { %v484_v23 = vpack.c.bf16 %v463_v18, %v463_v18  ;;  %v458_v24 = vadd.f32 %v784_v20, %v433_v21 }
  0xc4   : > { %v490_v25 = vpack.c.bf16 %v469_v22, %v469_v22 }
  0xc5   : > { %506 = vst.msk [vmem:[%s794_s14 + $0x34] sm:$0xf] %vm492_vm1, %v484_v23  ;;  %v479_v26 = vpack.c.bf16 %v458_v24, %v458_v24 }
  0xc6   : > { %512 = vst.msk [vmem:[%s794_s14 + $0x4c] sm:$0xf] %vm492_vm1, %v490_v25  ;;  %v402_v27 = vpop.f32.mrf.mxu2 }
  0xc7   : > { %501 = vst.msk [vmem:[%s794_s14 + $0x20] sm:$0xf] %vm492_vm1, %v479_v26  ;;  %v439_v28 = vmul.f32 %v779_v19, %v402_v27  ;;  %v417_v29 = vpop.f32.mrf.mxu3 }
  0xc8   : > { %v445_v30 = vmul.f32 %v779_v19, %v417_v29  ;;  %v389_v31 = vpop.f32.mrf.mxu1 }
  0xc9   : > { %v464_v32 = vadd.f32 %v784_v20, %v439_v28  ;;  %v434_v33 = vmul.f32 %v779_v19, %v389_v31 }
  0xca   : > { %v470_v34 = vadd.f32 %v784_v20, %v445_v30 }
  0xcb   : > { %v485_v35 = vpack.c.bf16 %v464_v32, %v464_v32  ;;  %v459_v36 = vadd.f32 %v784_v20, %v434_v33 }
  0xcc   : > { %v491_v37 = vpack.c.bf16 %v470_v34, %v470_v34 }
  0xcd   : > { %507 = vst.msk [vmem:[%s794_s14 + $0x38] sm:$0xf] %vm492_vm1, %v485_v35  ;;  %v480_v38 = vpack.c.bf16 %v459_v36, %v459_v36 }
  0xce   : > { %513 = vst.msk [vmem:[%s794_s14 + $0x50] sm:$0xf] %vm492_vm1, %v491_v37  ;;  %v404_v39 = vpop.f32.mrf.mxu2 }
  0xcf   : > { %502 = vst.msk [vmem:[%s794_s14 + $0x24] sm:$0xf] %vm492_vm1, %v480_v38  ;;  %v440_v40 = vmul.f32 %v779_v19, %v404_v39  ;;  %v419_v41 = vpop.f32.mrf.mxu3 }
  0xd1   : > { %v465_v42 = vadd.f32 %v784_v20, %v440_v40 }
  0xd3   : > { %v486_v43 = vpack.c.bf16 %v465_v42, %v465_v42 }
  0xd5   : > { %508 = vst.msk [vmem:[%s794_s14 + $0x3c] sm:$0xf] %vm492_vm1, %v486_v43 }
  0xd6 PF: > { %s14_s15 = sadd.s32 1, %s704_s15  }
  0xd7   : > { %p11_p4 = scmp.ge.s32.totalorder %s14_s15, 5  }
  0xd9   :  { %13 = sbr.rel (!%p11_p4) target bundleno = 1 (0x1), region = 66 }

// kernel: _lambda_.48
= control target key start
LH: loop header
LB: loop body
LE: loop exit
PB: predicated region body
PF: predicated region fallthrough
CT: control target
= control target key end

     0   :  { %s891_s15 = smov 0   ;;  %s1107_s0 = inlined_call_operand.vmem [shape: bf16[512,96], index: 0, kind: input, shape index: {}]   ;;  %s1108_s1 = inlined_call_operand.vmem [shape: bf16[96,32], index: 1, kind: input, shape index: {}]   ;;  %s1109_s2 = inlined_call_operand.vmem [shape: f32[1,32], index: 2, kind: input, shape index: {}]   ;;  %s1110_s3 = inlined_call_operand.vmem [shape: f32[1,32], index: 3, kind: input, shape index: {}]   ;;  %s1111_s4 = inlined_call_operand.vmem [shape: bf16[512,32], index: 4, kind: output, shape index: {}]  }
   0x1 LB: > { %s693_s16 = sadd.s32 4294967295, %s864_s15   ;;  %p697_p0 = scmp.ge.s32.totalorder %s864_s15, 1  ;;  %s864_s15 = sphi %s891_s15, %s14_s15  }
   0x2   : > { %p163_p1 = scmp.lt.s32.totalorder %s864_s15, 3 }
   0x4   : > { %p164_p2 = pnand %p697_p0, %p163_p1 }
   0x5   : > { %s698_s21 = sshll.u32 (!%p164_p2), %s693_s16, 5 }
   0x6   : > { %167 = sbr.rel (%p164_p2) target bundleno = 232 (0xe8), region = 36  ;;  %p190_p3 = scmp.lt.s32.totalorder (!%p164_p2), %s698_s21, 63 }
   0xb   : > { %v829_v0 = vld [vmem:[%s1108_s1 + $0x28] sm:$0xff]  ;;  %v828_v1 = vld [vmem:[%s1108_s1 + $0x20] sm:$0xff]  ;;  %v827_v2 = vld [vmem:[%s1108_s1 + $0x18] sm:$0xff]  ;;  %s1113_s21 = smov (!%p190_p3, %s698_s21), 63  ;;  %vm362_vm0 = vcmask 785408   ;;  %vm604_vm1 = vcmask 257024  }
   0xc   : > { %413 = vmatpush.bf16.msra.mxu0 %v829_v0  ;;  %830 = vmatpush.bf16.msra.mxu1 %v829_v0  ;;  %v826_v3 = vld [vmem:[%s1108_s1 + $0x10] sm:$0xff]  ;;  %v825_v4 = vld [vmem:[%s1108_s1 + $0x8] sm:$0xff]  ;;  %s699_s28 = sshll.u32 %s1113_s21, 2  ;;  %v824_v5 = vld [vmem:[%s1108_s1] sm:$0xff] }
   0xd   : > { %831 = vmatpush.bf16.msra.mxu2 %v829_v0  ;;  %832 = vmatpush.bf16.msra.mxu3 %v829_v0  ;;  %s925_s7 = scalar_lea.vmem %s1107_s0, %s699_s28  ;;  %v962_v22 = vld [vmem:[%s1109_s2] ss:$0 sm:$0xff]  ;;  %s978_s14 = scalar_lea.vmem %s1111_s4, %s699_s28 }
   0xe   : > { %v808_v6 = vld [vmem:[%s925_s7] sm:$0xff]  ;;  %v809_v10 = vld [vmem:[%s925_s7 + $0x8] sm:$0xff]  ;;  %v810_v14 = vld [vmem:[%s925_s7 + $0x10] sm:$0xff] }
   0xf   : > { %v812_v7 = vld [vmem:[%s925_s7 + $0x20] sm:$0xff]  ;;  %v813_v11 = vld [vmem:[%s925_s7 + $0x28] sm:$0xff]  ;;  %v814_v15 = vld [vmem:[%s925_s7 + $0x30] sm:$0xff] }
  0x10   : > { %414 = vmatpush.bf16.msra.mxu0 %v828_v1  ;;  %833 = vmatpush.bf16.msra.mxu1 %v828_v1  ;;  %v816_v8 = vld [vmem:[%s925_s7 + $0x40] sm:$0xff]  ;;  %v817_v12 = vld [vmem:[%s925_s7 + $0x48] sm:$0xff]  ;;  %v818_v16 = vld [vmem:[%s925_s7 + $0x50] sm:$0xff] }
  0x11   : > { %834 = vmatpush.bf16.msra.mxu2 %v828_v1  ;;  %835 = vmatpush.bf16.msra.mxu3 %v828_v1  ;;  %v820_v9 = vld [vmem:[%s925_s7 + $0x60] sm:$0xff]  ;;  %v821_v13 = vld [vmem:[%s925_s7 + $0x68] sm:$0xff]  ;;  %v822_v17 = vld [vmem:[%s925_s7 + $0x70] sm:$0xff] }
  0x12   : > { %v811_v18 = vld [vmem:[%s925_s7 + $0x18] sm:$0xff]  ;;  %v967_v23 = vld [vmem:[%s1110_s3] ss:$0 sm:$0xff] }
  0x13   : > { %v815_v19 = vld [vmem:[%s925_s7 + $0x38] sm:$0xff] }
  0x14   : > { %415 = vmatpush.bf16.msra.mxu0 %v827_v2  ;;  %836 = vmatpush.bf16.msra.mxu1 %v827_v2  ;;  %v819_v20 = vld [vmem:[%s925_s7 + $0x58] sm:$0xff] }
  0x15   : > { %837 = vmatpush.bf16.msra.mxu2 %v827_v2  ;;  %838 = vmatpush.bf16.msra.mxu3 %v827_v2  ;;  %v823_v21 = vld [vmem:[%s925_s7 + $0x78] sm:$0xff] }
  0x18   : > { %416 = vmatpush.bf16.msra.mxu0 %v826_v3  ;;  %839 = vmatpush.bf16.msra.mxu1 %v826_v3 }
  0x19   : > { %840 = vmatpush.bf16.msra.mxu2 %v826_v3  ;;  %841 = vmatpush.bf16.msra.mxu3 %v826_v3 }
  0x1c   : > { %417 = vmatpush.bf16.msra.mxu0 %v825_v4  ;;  %842 = vmatpush.bf16.msra.mxu1 %v825_v4 }
  0x1d   : > { %843 = vmatpush.bf16.msra.mxu2 %v825_v4  ;;  %844 = vmatpush.bf16.msra.mxu3 %v825_v4 }
  0x20   : > { %418 = vmatpush.bf16.msra.mxu0 %v824_v5  ;;  %845 = vmatpush.bf16.msra.mxu1 %v824_v5 }
  0x21   : > { %846 = vmatpush.bf16.msra.mxu2 %v824_v5  ;;  %847 = vmatpush.bf16.msra.mxu3 %v824_v5 }
  0x23   : > { %790 = vmatmul.msk.bf16.vlgmr.msra.gmra.mxu0 %vm362_vm0, %v808_v6  ;;  %794 = vmatmul.msk.bf16.vlgmr.msra.gmra.mxu1 %vm362_vm0, %v812_v7 }
  0x24   : > { %798 = vmatmul.msk.bf16.vlgmr.msra.gmra.mxu2 %vm362_vm0, %v816_v8  ;;  %802 = vmatmul.msk.bf16.vlgmr.msra.gmra.mxu3 %vm362_vm0, %v820_v9 }
  0x33   : > { %791 = vmatmul.msk.bf16.gmra.mxu0 %vm362_vm0, %v809_v10  ;;  %795 = vmatmul.msk.bf16.gmra.mxu1 %vm362_vm0, %v813_v11 }
  0x34   : > { %799 = vmatmul.msk.bf16.gmra.mxu2 %vm362_vm0, %v817_v12  ;;  %803 = vmatmul.msk.bf16.gmra.mxu3 %vm362_vm0, %v821_v13 }
  0x43   : > { %792 = vmatmul.msk.bf16.gmra.mxu0 %vm362_vm0, %v810_v14  ;;  %796 = vmatmul.msk.bf16.gmra.mxu1 %vm362_vm0, %v814_v15 }
  0x44   : > { %800 = vmatmul.msk.bf16.gmra.mxu2 %vm362_vm0, %v818_v16  ;;  %804 = vmatmul.msk.bf16.gmra.mxu3 %vm362_vm0, %v822_v17 }
  0x53   : > { %793 = vmatmul.msk.bf16.gmra.mxu0 %vm362_vm0, %v811_v18  ;;  %797 = vmatmul.msk.bf16.gmra.mxu1 %vm362_vm0, %v815_v19 }
  0x54   : > { %801 = vmatmul.msk.bf16.gmra.mxu2 %vm362_vm0, %v819_v20  ;;  %805 = vmatmul.msk.bf16.gmra.mxu3 %vm362_vm0, %v823_v21 }
  0xa0   : > { %v420_v24 = vpop.f32.mrf.mxu0  ;;  %v440_v25 = vpop.f32.mrf.mxu1 }
  0xa1   : > { %v504_v26 = vmul.f32 %v962_v22, %v420_v24  ;;  %v512_v27 = vmul.f32 %v962_v22, %v440_v25 }
  0xa3   : > { %v540_v28 = vadd.f32 %v967_v23, %v504_v26  ;;  %v548_v29 = vadd.f32 %v967_v23, %v512_v27 }
  0xa5   : > { %v572_v30 = vpack.c.bf16 %v540_v28, %v540_v28  ;;  %v580_v31 = vpack.c.bf16 %v548_v29, %v548_v29 }
  0xa7   : > { %605 = vst.msk [vmem:[%s978_s14] sm:$0xf] %vm604_vm1, %v572_v30  ;;  %v460_v32 = vpop.f32.mrf.mxu2  ;;  %v480_v33 = vpop.f32.mrf.mxu3 }
  0xa8   : > { %613 = vst.msk [vmem:[%s978_s14 + $0x20] sm:$0xf] %vm604_vm1, %v580_v31  ;;  %v520_v34 = vmul.f32 %v962_v22, %v460_v32  ;;  %v528_v35 = vmul.f32 %v962_v22, %v480_v33  ;;  %v422_v36 = vpop.f32.mrf.mxu0  ;;  %v442_v37 = vpop.f32.mrf.mxu1 }
  0xa9   : > { %v505_v38 = vmul.f32 %v962_v22, %v422_v36  ;;  %v513_v39 = vmul.f32 %v962_v22, %v442_v37 }
  0xaa   : > { %v556_v40 = vadd.f32 %v967_v23, %v520_v34  ;;  %v564_v41 = vadd.f32 %v967_v23, %v528_v35 }
  0xab   : > { %v541_v42 = vadd.f32 %v967_v23, %v505_v38  ;;  %v549_v43 = vadd.f32 %v967_v23, %v513_v39 }
  0xac   : > { %v588_v44 = vpack.c.bf16 %v556_v40, %v556_v40  ;;  %v596_v45 = vpack.c.bf16 %v564_v41, %v564_v41 }
  0xad   : > { %v573_v46 = vpack.c.bf16 %v541_v42, %v541_v42  ;;  %v581_v47 = vpack.c.bf16 %v549_v43, %v549_v43 }
  0xae   : > { %621 = vst.msk [vmem:[%s978_s14 + $0x40] sm:$0xf] %vm604_vm1, %v588_v44 }
  0xaf   : > { %629 = vst.msk [vmem:[%s978_s14 + $0x60] sm:$0xf] %vm604_vm1, %v596_v45  ;;  %v462_v48 = vpop.f32.mrf.mxu2  ;;  %v482_v49 = vpop.f32.mrf.mxu3 }
  0xb0   : > { %606 = vst.msk [vmem:[%s978_s14 + $0x4] sm:$0xf] %vm604_vm1, %v573_v46  ;;  %v521_v50 = vmul.f32 %v962_v22, %v462_v48  ;;  %v529_v51 = vmul.f32 %v962_v22, %v482_v49  ;;  %v425_v52 = vpop.f32.mrf.mxu0  ;;  %v445_v53 = vpop.f32.mrf.mxu1 }
  0xb1   : > { %614 = vst.msk [vmem:[%s978_s14 + $0x24] sm:$0xf] %vm604_vm1, %v581_v47  ;;  %v506_v54 = vmul.f32 %v962_v22, %v425_v52  ;;  %v514_v55 = vmul.f32 %v962_v22, %v445_v53 }
  0xb2   : > { %v557_v56 = vadd.f32 %v967_v23, %v521_v50  ;;  %v565_v57 = vadd.f32 %v967_v23, %v529_v51 }
  0xb3   : > { %v542_v58 = vadd.f32 %v967_v23, %v506_v54  ;;  %v550_v59 = vadd.f32 %v967_v23, %v514_v55 }
  0xb4   : > { %v589_v60 = vpack.c.bf16 %v557_v56, %v557_v56  ;;  %v597_v61 = vpack.c.bf16 %v565_v57, %v565_v57 }
  0xb5   : > { %v574_v62 = vpack.c.bf16 %v542_v58, %v542_v58  ;;  %v582_v63 = vpack.c.bf16 %v550_v59, %v550_v59 }
  0xb6   : > { %622 = vst.msk [vmem:[%s978_s14 + $0x44] sm:$0xf] %vm604_vm1, %v589_v60 }
  0xb7   : > { %630 = vst.msk [vmem:[%s978_s14 + $0x64] sm:$0xf] %vm604_vm1, %v597_v61  ;;  %v465_v0 = vpop.f32.mrf.mxu2  ;;  %v485_v1 = vpop.f32.mrf.mxu3 }
  0xb8   : > { %607 = vst.msk [vmem:[%s978_s14 + $0x8] sm:$0xf] %vm604_vm1, %v574_v62  ;;  %v522_v2 = vmul.f32 %v962_v22, %v465_v0  ;;  %v530_v3 = vmul.f32 %v962_v22, %v485_v1  ;;  %v427_v4 = vpop.f32.mrf.mxu0  ;;  %v447_v5 = vpop.f32.mrf.mxu1 }
  0xb9   : > { %615 = vst.msk [vmem:[%s978_s14 + $0x28] sm:$0xf] %vm604_vm1, %v582_v63  ;;  %v507_v6 = vmul.f32 %v962_v22, %v427_v4  ;;  %v515_v7 = vmul.f32 %v962_v22, %v447_v5 }
  0xba   : > { %v558_v8 = vadd.f32 %v967_v23, %v522_v2  ;;  %v566_v9 = vadd.f32 %v967_v23, %v530_v3 }
  0xbb   : > { %v543_v10 = vadd.f32 %v967_v23, %v507_v6  ;;  %v551_v11 = vadd.f32 %v967_v23, %v515_v7 }
  0xbc   : > { %v590_v12 = vpack.c.bf16 %v558_v8, %v558_v8  ;;  %v598_v13 = vpack.c.bf16 %v566_v9, %v566_v9 }
  0xbd   : > { %v575_v14 = vpack.c.bf16 %v543_v10, %v543_v10  ;;  %v583_v15 = vpack.c.bf16 %v551_v11, %v551_v11 }
  0xbe   : > { %623 = vst.msk [vmem:[%s978_s14 + $0x48] sm:$0xf] %vm604_vm1, %v590_v12 }
  0xbf   : > { %631 = vst.msk [vmem:[%s978_s14 + $0x68] sm:$0xf] %vm604_vm1, %v598_v13  ;;  %v467_v16 = vpop.f32.mrf.mxu2  ;;  %v487_v17 = vpop.f32.mrf.mxu3 }
  0xc0   : > { %608 = vst.msk [vmem:[%s978_s14 + $0xc] sm:$0xf] %vm604_vm1, %v575_v14  ;;  %v523_v18 = vmul.f32 %v962_v22, %v467_v16  ;;  %v531_v19 = vmul.f32 %v962_v22, %v487_v17  ;;  %v430_v20 = vpop.f32.mrf.mxu0  ;;  %v450_v21 = vpop.f32.mrf.mxu1 }
  0xc1   : > { %616 = vst.msk [vmem:[%s978_s14 + $0x2c] sm:$0xf] %vm604_vm1, %v583_v15  ;;  %v508_v24 = vmul.f32 %v962_v22, %v430_v20  ;;  %v516_v25 = vmul.f32 %v962_v22, %v450_v21 }
  0xc2   : > { %v559_v26 = vadd.f32 %v967_v23, %v523_v18  ;;  %v567_v27 = vadd.f32 %v967_v23, %v531_v19 }
  0xc3   : > { %v544_v28 = vadd.f32 %v967_v23, %v508_v24  ;;  %v552_v29 = vadd.f32 %v967_v23, %v516_v25 }
  0xc4   : > { %v591_v30 = vpack.c.bf16 %v559_v26, %v559_v26  ;;  %v599_v31 = vpack.c.bf16 %v567_v27, %v567_v27 }
  0xc5   : > { %v576_v32 = vpack.c.bf16 %v544_v28, %v544_v28  ;;  %v584_v33 = vpack.c.bf16 %v552_v29, %v552_v29 }
  0xc6   : > { %624 = vst.msk [vmem:[%s978_s14 + $0x4c] sm:$0xf] %vm604_vm1, %v591_v30 }
  0xc7   : > { %632 = vst.msk [vmem:[%s978_s14 + $0x6c] sm:$0xf] %vm604_vm1, %v599_v31  ;;  %v470_v34 = vpop.f32.mrf.mxu2  ;;  %v490_v35 = vpop.f32.mrf.mxu3 }
  0xc8   : > { %609 = vst.msk [vmem:[%s978_s14 + $0x10] sm:$0xf] %vm604_vm1, %v576_v32  ;;  %v524_v36 = vmul.f32 %v962_v22, %v470_v34  ;;  %v532_v37 = vmul.f32 %v962_v22, %v490_v35  ;;  %v432_v38 = vpop.f32.mrf.mxu0  ;;  %v452_v39 = vpop.f32.mrf.mxu1 }
  0xc9   : > { %617 = vst.msk [vmem:[%s978_s14 + $0x30] sm:$0xf] %vm604_vm1, %v584_v33  ;;  %v509_v40 = vmul.f32 %v962_v22, %v432_v38  ;;  %v517_v41 = vmul.f32 %v962_v22, %v452_v39 }
  0xca   : > { %v560_v42 = vadd.f32 %v967_v23, %v524_v36  ;;  %v568_v43 = vadd.f32 %v967_v23, %v532_v37 }
  0xcb   : > { %v545_v44 = vadd.f32 %v967_v23, %v509_v40  ;;  %v553_v45 = vadd.f32 %v967_v23, %v517_v41 }
  0xcc   : > { %v592_v46 = vpack.c.bf16 %v560_v42, %v560_v42  ;;  %v600_v47 = vpack.c.bf16 %v568_v43, %v568_v43 }
  0xcd   : > { %v577_v48 = vpack.c.bf16 %v545_v44, %v545_v44  ;;  %v585_v49 = vpack.c.bf16 %v553_v45, %v553_v45 }
  0xce   : > { %625 = vst.msk [vmem:[%s978_s14 + $0x50] sm:$0xf] %vm604_vm1, %v592_v46 }
  0xcf   : > { %633 = vst.msk [vmem:[%s978_s14 + $0x70] sm:$0xf] %vm604_vm1, %v600_v47  ;;  %v472_v50 = vpop.f32.mrf.mxu2  ;;  %v492_v51 = vpop.f32.mrf.mxu3 }
  0xd0   : > { %610 = vst.msk [vmem:[%s978_s14 + $0x14] sm:$0xf] %vm604_vm1, %v577_v48  ;;  %v525_v52 = vmul.f32 %v962_v22, %v472_v50  ;;  %v533_v53 = vmul.f32 %v962_v22, %v492_v51  ;;  %v435_v54 = vpop.f32.mrf.mxu0  ;;  %v455_v55 = vpop.f32.mrf.mxu1 }
  0xd1   : > { %618 = vst.msk [vmem:[%s978_s14 + $0x34] sm:$0xf] %vm604_vm1, %v585_v49  ;;  %v510_v56 = vmul.f32 %v962_v22, %v435_v54  ;;  %v518_v57 = vmul.f32 %v962_v22, %v455_v55 }
  0xd2   : > { %v561_v58 = vadd.f32 %v967_v23, %v525_v52  ;;  %v569_v59 = vadd.f32 %v967_v23, %v533_v53 }
  0xd3   : > { %v546_v60 = vadd.f32 %v967_v23, %v510_v56  ;;  %v554_v61 = vadd.f32 %v967_v23, %v518_v57 }
  0xd4   : > { %v593_v62 = vpack.c.bf16 %v561_v58, %v561_v58  ;;  %v601_v63 = vpack.c.bf16 %v569_v59, %v569_v59 }
  0xd5   : > { %v578_v0 = vpack.c.bf16 %v546_v60, %v546_v60  ;;  %v586_v1 = vpack.c.bf16 %v554_v61, %v554_v61 }
  0xd6   : > { %626 = vst.msk [vmem:[%s978_s14 + $0x54] sm:$0xf] %vm604_vm1, %v593_v62 }
  0xd7   : > { %634 = vst.msk [vmem:[%s978_s14 + $0x74] sm:$0xf] %vm604_vm1, %v601_v63  ;;  %v475_v2 = vpop.f32.mrf.mxu2  ;;  %v495_v3 = vpop.f32.mrf.mxu3 }
  0xd8   : > { %611 = vst.msk [vmem:[%s978_s14 + $0x18] sm:$0xf] %vm604_vm1, %v578_v0  ;;  %v526_v4 = vmul.f32 %v962_v22, %v475_v2  ;;  %v534_v5 = vmul.f32 %v962_v22, %v495_v3  ;;  %v437_v6 = vpop.f32.mrf.mxu0  ;;  %v457_v7 = vpop.f32.mrf.mxu1 }
  0xd9   : > { %619 = vst.msk [vmem:[%s978_s14 + $0x38] sm:$0xf] %vm604_vm1, %v586_v1  ;;  %v511_v8 = vmul.f32 %v962_v22, %v437_v6  ;;  %v519_v9 = vmul.f32 %v962_v22, %v457_v7 }
  0xda   : > { %v562_v10 = vadd.f32 %v967_v23, %v526_v4  ;;  %v570_v11 = vadd.f32 %v967_v23, %v534_v5 }
  0xdb   : > { %v547_v12 = vadd.f32 %v967_v23, %v511_v8  ;;  %v555_v13 = vadd.f32 %v967_v23, %v519_v9 }
  0xdc   : > { %v594_v14 = vpack.c.bf16 %v562_v10, %v562_v10  ;;  %v602_v15 = vpack.c.bf16 %v570_v11, %v570_v11 }
  0xdd   : > { %v579_v16 = vpack.c.bf16 %v547_v12, %v547_v12  ;;  %v587_v17 = vpack.c.bf16 %v555_v13, %v555_v13 }
  0xde   : > { %627 = vst.msk [vmem:[%s978_s14 + $0x58] sm:$0xf] %vm604_vm1, %v594_v14 }
  0xdf   : > { %635 = vst.msk [vmem:[%s978_s14 + $0x78] sm:$0xf] %vm604_vm1, %v602_v15  ;;  %v477_v18 = vpop.f32.mrf.mxu2  ;;  %v497_v19 = vpop.f32.mrf.mxu3 }
  0xe0   : > { %612 = vst.msk [vmem:[%s978_s14 + $0x1c] sm:$0xf] %vm604_vm1, %v579_v16  ;;  %v527_v20 = vmul.f32 %v962_v22, %v477_v18  ;;  %v535_v21 = vmul.f32 %v962_v22, %v497_v19 }
  0xe1   : > { %620 = vst.msk [vmem:[%s978_s14 + $0x3c] sm:$0xf] %vm604_vm1, %v587_v17 }
  0xe2   : > { %v563_v24 = vadd.f32 %v967_v23, %v527_v20  ;;  %v571_v25 = vadd.f32 %v967_v23, %v535_v21 }
  0xe4   : > { %v595_v26 = vpack.c.bf16 %v563_v24, %v563_v24  ;;  %v603_v27 = vpack.c.bf16 %v571_v25, %v571_v25 }
  0xe6   : > { %628 = vst.msk [vmem:[%s978_s14 + $0x5c] sm:$0xf] %vm604_vm1, %v595_v26 }
  0xe7   : > { %636 = vst.msk [vmem:[%s978_s14 + $0x7c] sm:$0xf] %vm604_vm1, %v603_v27 }
  0xe8 PF: > { %s14_s15 = sadd.s32 1, %s864_s15  }
  0xe9   : > { %p11_p4 = scmp.ge.s32.totalorder %s14_s15, 4  }
  0xeb   :  { %13 = sbr.rel (!%p11_p4) target bundleno = 1 (0x1), region = 66 }

// kernel: _lambda_.56
= control target key start
LH: loop header
LB: loop body
LE: loop exit
PB: predicated region body
PF: predicated region fallthrough
CT: control target
= control target key end

     0   :  { %s1118_s18 = smov 0   ;;  %s1352_s0 = inlined_call_operand.vmem [shape: bf16[128,288], index: 0, kind: input, shape index: {}]   ;;  %s1353_s1 = inlined_call_operand.vmem [shape: bf16[288,64], index: 1, kind: input, shape index: {}]   ;;  %s1354_s2 = inlined_call_operand.vmem [shape: bf16[32,64], index: 2, kind: input, shape index: {}]   ;;  %s1355_s3 = inlined_call_operand.vmem [shape: f32[1,64], index: 3, kind: input, shape index: {}]   ;;  %s1356_s4 = inlined_call_operand.vmem [shape: f32[1,64], index: 4, kind: input, shape index: {}]   ;;  %s1357_s5 = inlined_call_operand.vmem [shape: bf16[128,64], index: 5, kind: output, shape index: {}]  }
   0x1 LB: > { %s886_s19 = sadd.s32 4294967295, %s1084_s18   ;;  %p890_p0 = scmp.ge.s32.totalorder %s1084_s18, 1  ;;  %s1084_s18 = sphi %s1118_s18, %s15_s18  }
   0x2   : > { %p189_p1 = scmp.lt.s32.totalorder %s1084_s18, 3 }
   0x4   : > { %p190_p2 = pnand %p890_p0, %p189_p1 }
   0x5   : > { %s891_s20 = sshll.u32 (!%p190_p2), %s886_s19, 3  ;;  %s1086_s25 = smov (!%p190_p2), 32  }
   0x6   : > { %193 = sbr.rel (%p190_p2) target bundleno = 346 (0x15a), region = 40  ;;  %p219_p3 = scmp.lt.s32.totalorder (!%p190_p2), %s891_s20, 15 }
   0x7   : > { %s1087_s26 = smov (!%p190_p2), 96  }
   0xb   : > { %s1359_s20 = smov (!%p219_p3, %s891_s20), 15  ;;  %v1060_v4 = vld [vmem:[%s1353_s1 + $0x78] sm:$0xff]  ;;  %v1059_v6 = vld [vmem:[%s1353_s1 + $0x70] sm:$0xff]  ;;  %v1058_v8 = vld [vmem:[%s1353_s1 + $0x68] sm:$0xff]  ;;  %vm480_vm0 = vcmask 261120   ;;  %vm821_vm1 = vcmask 519168  }
   0xc   : > { %s1065_s21 = smul.u32 12, %s1359_s20  ;;  %v1052_v5 = vld [vmem:[%s1353_s1 + $0x38] sm:$0xff]  ;;  %723 = vmatpush.bf16.msra.mxu2 %v1060_v4  ;;  %v1051_v7 = vld [vmem:[%s1353_s1 + $0x30] sm:$0xff]  ;;  %v1050_v9 = vld [vmem:[%s1353_s1 + $0x28] sm:$0xff]  ;;  %s894_s28 = sshll.u32 %s1359_s20, 2 }
   0xd   : > { %694 = vmatpush.bf16.msra.mxu1 %v1052_v5  ;;  %v1057_v11 = vld [vmem:[%s1353_s1 + $0x60] sm:$0xff]  ;;  %v1056_v14 = vld [vmem:[%s1353_s1 + $0x58] sm:$0xff]  ;;  %v1055_v16 = vld [vmem:[%s1353_s1 + $0x50] sm:$0xff]  ;;  %s1317_s6 = scalar_lea.vmem %s1357_s5, %s894_s28 }
   0xe   : > { %s1132_s24 = scalar_lea.vmem %s1352_s0, %s1065_s21  ;;  %v1049_v12 = vld [vmem:[%s1353_s1 + $0x20] sm:$0xff]  ;;  %v1048_v15 = vld [vmem:[%s1353_s1 + $0x18] sm:$0xff]  ;;  %v1047_v17 = vld [vmem:[%s1353_s1 + $0x10] sm:$0xff] }
   0xf   : > { %v1135_v0 = vld [vmem:[%s1132_s24] sm:$0xff]  ;;  %v1142_v1 = vld [vmem:[%s1132_s24 + $0x18] sm:$0xff]  ;;  %v1147_v2 = vld [vmem:[%s1132_s24 + $0xc] sm:$0xff] }
  0x10   : > { %372 = vrot.lane.b32.xlu1 %v1135_v0, %s1086_s25  ;;  %316 = vrot.lane.b32.xlu0 %v1135_v0, %s1087_s26  ;;  %v1150_v3 = vld [vmem:[%s1132_s24 + $0x24] sm:$0xff]  ;;  %v1181_v10 = vld [vmem:[%s1132_s24 + $0x30] sm:$0xff]  ;;  %v292_v50 = vrot.slane %v1135_v0, 4  ;;  %v293_v55 = vrot.slane %v1147_v2, 4 }
  0x11   : > { %320 = vrot.lane.b32.xlu2 %v1142_v1, %s1087_s26  ;;  %724 = vmatpush.bf16.msra.mxu2 %v1059_v6  ;;  %v1192_v13 = vld [vmem:[%s1132_s24 + $0x3c] sm:$0xff]  ;;  %v1213_v18 = vld [vmem:[%s1132_s24 + $0x48] sm:$0xff]  ;;  %v1216_v19 = vld [vmem:[%s1132_s24 + $0x54] sm:$0xff] }
  0x12   : > { %695 = vmatpush.bf16.msra.mxu1 %v1051_v7  ;;  %v1054_v20 = vld [vmem:[%s1353_s1 + $0x48] sm:$0xff]  ;;  %v1053_v23 = vld [vmem:[%s1353_s1 + $0x40] sm:$0xff]  ;;  %v911_v26 = vld [vmem:[%s1132_s24 + $0xc] sm:$0xf0]  ;;  %v308_v62 = vunpack.c.l.bf16 %v292_v50 }
  0x13   : > { %v1062_v21 = vld [vmem:[%s1353_s1 + $0x88] sm:$0xff]  ;;  %v1061_v24 = vld [vmem:[%s1353_s1 + $0x80] sm:$0xff]  ;;  %v1035_v30 = vld [vmem:[%s1132_s24 + $0x10] sm:$0xf0] }
  0x14   : > { %758 = vmatpush.bf16.msra.mxu3 %v1062_v21  ;;  %v1046_v22 = vld [vmem:[%s1353_s1 + $0x8] sm:$0xff]  ;;  %v1033_v25 = vld [vmem:[%s1132_s24 + $0x4] sm:$0xf]  ;;  %v909_v32 = vld [vmem:[%s1132_s24] sm:$0xf] }
  0x15   : > { %725 = vmatpush.bf16.msra.mxu2 %v1058_v8  ;;  %v914_v27 = vor.u32 %v1033_v25, %v911_v26  ;;  %v1045_v28 = vld [vmem:[%s1353_s1] sm:$0xff]  ;;  %v917_v29 = vld [vmem:[%s1132_s24 + $0x8] sm:$0xf]  ;;  %v1034_v33 = vld [vmem:[%s1132_s24 + $0x8] sm:$0xf0] }
  0x16   : > { %696 = vmatpush.bf16.msra.mxu1 %v1050_v9  ;;  %v918_v31 = vor.u32 %v1035_v30, %v917_v29  ;;  %v910_v34 = vor.u32 %v1034_v33, %v909_v32  ;;  %v1064_v35 = vld [vmem:[%s1354_s2 + $0x8] sm:$0xff]  ;;  %v1063_v36 = vld [vmem:[%s1354_s2] sm:$0xff]  ;;  %v1036_v38 = vld [vmem:[%s1132_s24 + $0x1c] sm:$0xf] }
  0x17   : > { %499 = vmatpush.bf16.msra.mxu0 %v1064_v35  ;;  %v923_v39 = vld [vmem:[%s1132_s24 + $0x24] sm:$0xf0]  ;;  %v929_v41 = vld [vmem:[%s1132_s24 + $0x20] sm:$0xf]  ;;  %v1038_v42 = vld [vmem:[%s1132_s24 + $0x28] sm:$0xf0] }
  0x18   : > { %374 = vrot.lane.b32.xlu1 %v1147_v2, %s1086_s25  ;;  %318 = vrot.lane.b32.xlu0 %v1147_v2, %s1087_s26  ;;  %v926_v40 = vor.u32 %v1036_v38, %v923_v39  ;;  %v930_v43 = vor.u32 %v1038_v42, %v929_v41  ;;  %v921_v44 = vld [vmem:[%s1132_s24 + $0x18] sm:$0xf]  ;;  %v1037_v45 = vld [vmem:[%s1132_s24 + $0x20] sm:$0xf0]  ;;  %v296_v42 = vrot.slane %v1181_v10, 4 }
  0x19   : > { %322 = vrot.lane.b32.xlu2 %v1150_v3, %s1087_s26  ;;  %726 = vmatpush.bf16.msra.mxu2 %v1057_v11  ;;  %v922_v46 = vor.u32 %v1037_v45, %v921_v44  ;;  %v1039_v53 = vld [vmem:[%s1132_s24 + $0x34] sm:$0xf]  ;;  %v935_v54 = vld [vmem:[%s1132_s24 + $0x3c] sm:$0xf0]  ;;  %v233_v56 = vld [vmem:[%s1132_s24 + $0x8] sm:$0xf] }
  0x1a   : > { %697 = vmatpush.bf16.msra.mxu1 %v1049_v12  ;;  %759 = vmatpush.bf16.msra.mxu3 %v1061_v24  ;;  %v938_v57 = vor.u32 %v1039_v53, %v935_v54  ;;  %v941_v59 = vld [vmem:[%s1132_s24 + $0x38] sm:$0xf]  ;;  %v1041_v60 = vld [vmem:[%s1132_s24 + $0x40] sm:$0xf0]  ;;  %v933_v61 = vld [vmem:[%s1132_s24 + $0x30] sm:$0xf]  ;;  %v412_v6 = vunpack.c.l.bf16 %v233_v56  ;;  %v309_v12 = vunpack.c.l.bf16 %v293_v55 }
  0x1b   : > { %500 = vmatpush.bf16.msra.mxu0 %v1063_v36  ;;  %v235_v63 = vld [vmem:[%s1132_s24 + $0x14] sm:$0xf]  ;;  %v942_v4 = vor.u32 %v1041_v60, %v941_v59  ;;  %v1040_v5 = vld [vmem:[%s1132_s24 + $0x38] sm:$0xf0]  ;;  %v243_v45 = vld [vmem:[%s1132_s24 + $0x44] sm:$0xf] }
  0x1c   : > { %v934_v8 = vor.u32 %v1040_v5, %v933_v61  ;;  %v413_v2 = vunpack.c.l.bf16 %v235_v63  ;;  %v953_v53 = vld [vmem:[%s1132_s24 + $0x50] sm:$0xf]  ;;  %v1044_v55 = vld [vmem:[%s1132_s24 + $0x58] sm:$0xf0]  ;;  %v1043_v56 = vld [vmem:[%s1132_s24 + $0x50] sm:$0xf0]  ;;  %v417_v61 = vunpack.c.l.bf16 %v243_v45 }
  0x1d   : > { %727 = vmatpush.bf16.msra.mxu2 %v1056_v14  ;;  %1027 = vmatmul.msk.bf16.vlgmr.msra.gmra.mxu3 %vm480_vm0, %v918_v31  ;;  %v237_v31 = vld [vmem:[%s1132_s24 + $0x20] sm:$0xf]  ;;  %v954_v59 = vor.u32 %v1044_v55, %v953_v53 }
  0x1e   : > { %698 = vmatpush.bf16.msra.mxu1 %v1048_v15  ;;  %v414_v39 = vunpack.c.l.bf16 %v237_v31  ;;  %v245_v31 = vld [vmem:[%s1132_s24 + $0x50] sm:$0xf] }
  0x20   : > { %378 = vrot.lane.b32.xlu1 %v1150_v3, %s1086_s25  ;;  %376 = vrot.lane.b32.xlu0 %v1142_v1, %s1086_s25 }
  0x21   : > { %324 = vrot.lane.b32.xlu2 %v1181_v10, %s1087_s26  ;;  %728 = vmatpush.bf16.msra.mxu2 %v1055_v16  ;;  %v295_v16 = vrot.slane %v1150_v3, 4 }
  0x22   : > { %699 = vmatpush.bf16.msra.mxu1 %v1047_v17  ;;  %v294_v17 = vrot.slane %v1142_v1, 4 }
  0x23   : > { %v311_v29 = vunpack.c.l.bf16 %v295_v16 }
  0x24   : > { %v310_v30 = vunpack.c.l.bf16 %v294_v17 }
  0x25   : > { %729 = vmatpush.bf16.msra.mxu2 %v1054_v20 }
  0x26   : > { %700 = vmatpush.bf16.msra.mxu1 %v1046_v22 }
  0x28   : > { %380 = vrot.lane.b32.xlu1 %v1181_v10, %s1086_s25  ;;  %326 = vrot.lane.b32.xlu0 %v1192_v13, %s1087_s26  ;;  %v945_v10 = vld [vmem:[%s1132_s24 + $0x48] sm:$0xf] }
  0x29   : > { %382 = vrot.lane.b32.xlu2 %v1192_v13, %s1086_s25  ;;  %730 = vmatpush.bf16.msra.mxu2 %v1053_v23 }
  0x2a   : > { %701 = vmatpush.bf16.msra.mxu1 %v1045_v28  ;;  %v239_v28 = vld [vmem:[%s1132_s24 + $0x2c] sm:$0xf] }
  0x2b   : > { %v415_v1 = vunpack.c.l.bf16 %v239_v28 }
  0x2c   : > { %731 = vmatmul.bf16.vlgmr.msra.gmra.mxu2 %v914_v27 }
  0x2d   : > { %702 = vmatmul.bf16.vlgmr.msra.gmra.mxu1 %v910_v34  ;;  %1028 = vmatmul.msk.bf16.gmra.mxu3 %vm480_vm0, %v930_v43  ;;  %v297_v43 = vrot.slane %v1192_v13, 4 }
  0x30   : > { %328 = vrot.lane.b32.xlu0 %v1213_v18, %s1087_s26  ;;  %330 = vrot.lane.b32.xlu1 %v1216_v19, %s1087_s26 }
  0x31   : > { %384 = vrot.lane.b32.xlu2 %v1213_v18, %s1086_s25 }
  0x38   : > { %386 = vrot.lane.b32.xlu0 %v1216_v19, %s1086_s25 }
  0x3c   : > { %736 = vmatmul.bf16.gmra.mxu2 %v926_v40 }
  0x3d   : > { %707 = vmatmul.bf16.gmra.mxu1 %v922_v46  ;;  %1029 = vmatmul.msk.bf16.gmra.mxu3 %vm480_vm0, %v942_v4 }
  0x4c   : > { %741 = vmatmul.bf16.gmra.mxu2 %v938_v57 }
  0x4d   : > { %712 = vmatmul.bf16.gmra.mxu1 %v934_v8  ;;  %1030 = vmatmul.msk.bf16.gmra.mxu3 %vm480_vm0, %v954_v59 }
  0x6b   : > { %v321_v37 = vpop.permute.xlu2 %320 }
  0x6c   : > { %v334_v20 = vrot.slane %v321_v37, 4 }
  0x6e   : > { %v350_v33 = vunpack.c.l.bf16 %v334_v20 }
  0x73   : > { %v323_v47 = vpop.permute.xlu2 %322 }
  0x74   : > { %v335_v21 = vrot.slane %v323_v47, 4  ;;  %v358_v47 = vmax.f32 %v310_v30, %v350_v33 }
  0x76   : > { %v351_v3 = vunpack.c.l.bf16 %v335_v21 }
  0x7b   : > { %v1269_v58 = vpop.permute.xlu2 %324 }
  0x7c   : > { %v336_v44 = vrot.slane %v1269_v58, 4  ;;  %v312_v58 = vunpack.c.l.bf16 %v296_v42 }
  0x7e   : > { %v352_v60 = vunpack.c.l.bf16 %v336_v44 }
  0x82   : > { %v373_v48 = vpop.permute.xlu1 %372  ;;  %v317_v49 = vpop.permute.xlu0 %316 }
  0x83   : > { %v388_v51 = vrot.slane %v373_v48, 4  ;;  %v332_v52 = vrot.slane %v317_v49, 4  ;;  %v383_v35 = vpop.permute.xlu2 %382  ;;  %v359_v48 = vmax.f32 %v311_v29, %v351_v3 }
  0x84   : > { %v393_v46 = vrot.slane %v383_v35, 4  ;;  %v418_v35 = vunpack.c.l.bf16 %v245_v31 }
  0x85   : > { %v404_v7 = vunpack.c.l.bf16 %v388_v51  ;;  %v348_v0 = vunpack.c.l.bf16 %v332_v52  ;;  %v1042_v51 = vld [vmem:[%s1132_s24 + $0x4c] sm:$0xf]  ;;  %v947_v52 = vld [vmem:[%s1132_s24 + $0x54] sm:$0xf0] }
  0x86   : > { %v950_v54 = vor.u32 %v1042_v51, %v947_v52  ;;  %v409_v5 = vunpack.c.l.bf16 %v393_v46 }
  0x87   : > { %v420_v22 = vmax.f32 %v404_v7, %v412_v6  ;;  %v356_v23 = vmax.f32 %v308_v62, %v348_v0  ;;  %v241_v62 = vld [vmem:[%s1132_s24 + $0x38] sm:$0xf]  ;;  %v946_v6 = vor.u32 %v1043_v56, %v945_v10  ;;  %v313_v7 = vunpack.c.l.bf16 %v297_v43  ;;  %v1304_v56 = vld [vmem:[%s1355_s3] ss:$0 sm:$0xff] }
  0x88   : > { %746 = vmatmul.bf16.gmra.mxu2 %v950_v54 }
  0x89   : > { %v452_v32 = vmax.f32 %v356_v23, %v420_v22  ;;  %717 = vmatmul.bf16.gmra.mxu1 %v946_v6 }
  0x8a   : > { %v375_v9 = vpop.permute.xlu1 %374  ;;  %v319_v11 = vpop.permute.xlu0 %318 }
  0x8b   : > { %v389_v14 = vrot.slane %v375_v9, 4  ;;  %v333_v15 = vrot.slane %v319_v11, 4  ;;  %v416_v9 = vunpack.c.l.bf16 %v241_v62  ;;  %v385_v22 = vpop.permute.xlu2 %384 }
  0x8c   : > { %v394_v29 = vrot.slane %v385_v22, 4 }
  0x8d   : > { %v405_v24 = vunpack.c.l.bf16 %v389_v14  ;;  %v349_v25 = vunpack.c.l.bf16 %v333_v15  ;;  %v360_v14 = vmax.f32 %v312_v58, %v352_v60  ;;  %v425_v15 = vmax.f32 %v409_v5, %v417_v61 }
  0x8f   : > { %v421_v26 = vmax.f32 %v405_v24, %v413_v2  ;;  %v357_v27 = vmax.f32 %v309_v12, %v349_v25 }
  0x91   : > { %v453_v34 = vmax.f32 %v357_v27, %v421_v26  ;;  %v298_v27 = vrot.slane %v1213_v18, 4 }
  0x92   : > { %v379_v36 = vpop.permute.xlu1 %378  ;;  %v377_v37 = vpop.permute.xlu0 %376 }
  0x93   : > { %v391_v38 = vrot.slane %v379_v36, 4  ;;  %v390_v40 = vrot.slane %v377_v37, 4  ;;  %v460_v41 = vpack.c.bf16 %v453_v34, %v452_v32  ;;  %v299_v32 = vrot.slane %v1216_v19, 4  ;;  %v247_v36 = vld [vmem:[%s1132_s24 + $0x5c] sm:$0xf] }
  0x94   : > { %v314_v34 = vunpack.c.l.bf16 %v298_v27  ;;  %v419_v18 = vunpack.c.l.bf16 %v247_v36 }
  0x95   : > { %v407_v49 = vunpack.c.l.bf16 %v391_v38  ;;  %v406_v50 = vunpack.c.l.bf16 %v390_v40  ;;  %903 = vmatmul.msk.bf16.vlgmr.msra.gmra.mxu0 %vm480_vm0, %v460_v41  ;;  %v315_v37 = vunpack.c.l.bf16 %v299_v32 }
  0x97   : > { %v423_v57 = vmax.f32 %v407_v49, %v415_v1  ;;  %v422_v13 = vmax.f32 %v406_v50, %v414_v39  ;;  %v410_v1 = vunpack.c.l.bf16 %v394_v29 }
  0x99   : > { %v455_v63 = vmax.f32 %v359_v48, %v423_v57  ;;  %v454_v4 = vmax.f32 %v358_v47, %v422_v13  ;;  %v426_v41 = vmax.f32 %v410_v1, %v418_v35  ;;  %v1309_v13 = vld [vmem:[%s1356_s4] ss:$0 sm:$0xff] }
  0x9a   : > { %v381_v0 = vpop.permute.xlu1 %380  ;;  %v327_v8 = vpop.permute.xlu0 %326 }
  0x9b   : > { %v392_v11 = vrot.slane %v381_v0, 4  ;;  %v337_v12 = vrot.slane %v327_v8, 4  ;;  %v461_v2 = vpack.c.bf16 %v455_v63, %v454_v4 }
  0x9d   : > { %v408_v16 = vunpack.c.l.bf16 %v392_v11  ;;  %v353_v17 = vunpack.c.l.bf16 %v337_v12 }
  0x9f   : > { %v424_v20 = vmax.f32 %v408_v16, %v416_v9  ;;  %v361_v21 = vmax.f32 %v313_v7, %v353_v17 }
  0xa0   : > { %v761_v50 = vpop.f32.mrf.mxu3 }
  0xa1   : > { %v456_v23 = vmax.f32 %v360_v14, %v424_v20  ;;  %v457_v24 = vmax.f32 %v361_v21, %v425_v15 }
  0xa2   : > { %v329_v25 = vpop.permute.xlu0 %328  ;;  %v331_v26 = vpop.permute.xlu1 %330 }
  0xa3   : > { %v338_v28 = vrot.slane %v329_v25, 4  ;;  %v462_v30 = vpack.c.bf16 %v457_v24, %v456_v23  ;;  %v339_v33 = vrot.slane %v331_v26, 4 }
  0xa5   : > { %904 = vmatmul.msk.bf16.gmra.mxu0 %vm480_vm0, %v461_v2  ;;  %v354_v3 = vunpack.c.l.bf16 %v338_v28  ;;  %v355_v38 = vunpack.c.l.bf16 %v339_v33 }
  0xa7   : > { %v362_v40 = vmax.f32 %v314_v34, %v354_v3  ;;  %v363_v43 = vmax.f32 %v315_v37, %v355_v38 }
  0xa8   : > { %v763_v54 = vpop.f32.mrf.mxu3 }
  0xa9   : > { %v458_v45 = vmax.f32 %v362_v40, %v426_v41 }
  0xaa   : > { %v387_v39 = vpop.permute.xlu0 %386  ;;  %v703_v48 = vpop.f32.mrf.mxu1 }
  0xab   : > { %v395_v42 = vrot.slane %v387_v39, 4 }
  0xad   : > { %v411_v44 = vunpack.c.l.bf16 %v395_v42 }
  0xaf   : > { %v427_v46 = vmax.f32 %v411_v44, %v419_v18  ;;  %v732_v49 = vpop.f32.mrf.mxu2 }
  0xb0   : > { %v766_v4 = vpop.f32.mrf.mxu3 }
  0xb1   : > { %v459_v19 = vmax.f32 %v363_v43, %v427_v46 }
  0xb2   : > { %v705_v51 = vpop.f32.mrf.mxu1 }
  0xb3   : > { %v463_v47 = vpack.c.bf16 %v459_v19, %v458_v45 }
  0xb5   : > { %905 = vmatmul.msk.bf16.gmra.mxu0 %vm480_vm0, %v462_v30 }
  0xb7   : > { %v734_v52 = vpop.f32.mrf.mxu2 }
  0xb8   : > { %v768_v17 = vpop.f32.mrf.mxu3 }
  0xba   : > { %v708_v59 = vpop.f32.mrf.mxu1 }
  0xbf   : > { %v737_v61 = vpop.f32.mrf.mxu2 }
  0xc0   : > { %v771_v32 = vpop.f32.mrf.mxu3 }
  0xc2   : > { %v710_v11 = vpop.f32.mrf.mxu1 }
  0xc5   : > { %906 = vmatmul.msk.bf16.gmra.mxu0 %vm480_vm0, %v463_v47 }
  0xc7   : > { %v739_v14 = vpop.f32.mrf.mxu2 }
  0xc8   : > { %v773_v18 = vpop.f32.mrf.mxu3 }
  0xca   : > { %v713_v26 = vpop.f32.mrf.mxu1 }
  0xcf   : > { %v742_v29 = vpop.f32.mrf.mxu2 }
  0xd2   : > { %v715_v37 = vpop.f32.mrf.mxu1 }
  0xd7   : > { %v744_v40 = vpop.f32.mrf.mxu2 }
 0x112   : > { %v502_v53 = vpop.f32.mrf.mxu0 }
 0x113   : > { %v704_v55 = vadd.f32 %v703_v48, %v502_v53  ;;  %v718_v48 = vpop.f32.mrf.mxu1 }
 0x115   : > { %v733_v10 = vadd.f32 %v732_v49, %v704_v55 }
 0x117   : > { %v762_v57 = vadd.f32 %v761_v50, %v733_v10  ;;  %v747_v50 = vpop.f32.mrf.mxu2 }
 0x119   : > { %v785_v58 = vmul.f32 %v1304_v56, %v762_v57 }
 0x11a   : > { %v504_v60 = vpop.f32.mrf.mxu0 }
 0x11b   : > { %v797_v62 = vadd.f32 %v1309_v13, %v785_v58  ;;  %v706_v63 = vadd.f32 %v705_v51, %v504_v60  ;;  %v720_v60 = vpop.f32.mrf.mxu1 }
 0x11d   : > { %v805_v5 = vmax.f32 %v797_v62, 0.0  ;;  %v735_v6 = vadd.f32 %v734_v52, %v706_v63 }
 0x11f   : > { %v813_v7 = vpack.c.bf16 %v805_v5, %v805_v5  ;;  %v764_v0 = vadd.f32 %v763_v54, %v735_v6  ;;  %v776_v54 = vpop.f32.mrf.mxu3 }
 0x121   : > { %822 = vst.msk [vmem:[%s1317_s6] sm:$0xf] %vm821_vm1, %v813_v7  ;;  %v786_v8 = vmul.f32 %v1304_v56, %v764_v0 }
 0x122   : > { %v507_v9 = vpop.f32.mrf.mxu0 }
 0x123   : > { %v798_v12 = vadd.f32 %v1309_v13, %v786_v8  ;;  %v709_v2 = vadd.f32 %v708_v59, %v507_v9 }
 0x125   : > { %v806_v15 = vmax.f32 %v798_v12, 0.0  ;;  %v738_v16 = vadd.f32 %v737_v61, %v709_v2 }
 0x127   : > { %v814_v20 = vpack.c.bf16 %v806_v15, %v806_v15  ;;  %v767_v21 = vadd.f32 %v766_v4, %v738_v16  ;;  %v749_v4 = vpop.f32.mrf.mxu2  ;;  %v778_v7 = vpop.f32.mrf.mxu3 }
 0x129   : > { %823 = vst.msk [vmem:[%s1317_s6 + $0x4] sm:$0xf] %vm821_vm1, %v814_v20  ;;  %v787_v22 = vmul.f32 %v1304_v56, %v767_v21 }
 0x12a   : > { %v509_v23 = vpop.f32.mrf.mxu0 }
 0x12b   : > { %v799_v24 = vadd.f32 %v1309_v13, %v787_v22  ;;  %v711_v25 = vadd.f32 %v710_v11, %v509_v23 }
 0x12d   : > { %v807_v27 = vmax.f32 %v799_v24, 0.0  ;;  %v740_v28 = vadd.f32 %v739_v14, %v711_v25 }
 0x12f   : > { %v815_v30 = vpack.c.bf16 %v807_v27, %v807_v27  ;;  %v769_v31 = vadd.f32 %v768_v17, %v740_v28 }
 0x131   : > { %824 = vst.msk [vmem:[%s1317_s6 + $0x8] sm:$0xf] %vm821_vm1, %v815_v30  ;;  %v788_v33 = vmul.f32 %v1304_v56, %v769_v31 }
 0x132   : > { %v512_v34 = vpop.f32.mrf.mxu0 }
 0x133   : > { %v800_v3 = vadd.f32 %v1309_v13, %v788_v33  ;;  %v714_v35 = vadd.f32 %v713_v26, %v512_v34 }
 0x135   : > { %v808_v1 = vmax.f32 %v800_v3, 0.0  ;;  %v743_v36 = vadd.f32 %v742_v29, %v714_v35 }
 0x137   : > { %v816_v38 = vpack.c.bf16 %v808_v1, %v808_v1  ;;  %v772_v39 = vadd.f32 %v771_v32, %v743_v36 }
 0x139   : > { %825 = vst.msk [vmem:[%s1317_s6 + $0xc] sm:$0xf] %vm821_vm1, %v816_v38  ;;  %v789_v41 = vmul.f32 %v1304_v56, %v772_v39 }
 0x13a   : > { %v514_v42 = vpop.f32.mrf.mxu0 }
 0x13b   : > { %v801_v43 = vadd.f32 %v1309_v13, %v789_v41  ;;  %v716_v44 = vadd.f32 %v715_v37, %v514_v42 }
 0x13d   : > { %v809_v45 = vmax.f32 %v801_v43, 0.0  ;;  %v745_v46 = vadd.f32 %v744_v40, %v716_v44 }
 0x13f   : > { %v817_v19 = vpack.c.bf16 %v809_v45, %v809_v45  ;;  %v774_v47 = vadd.f32 %v773_v18, %v745_v46 }
 0x141   : > { %826 = vst.msk [vmem:[%s1317_s6 + $0x10] sm:$0xf] %vm821_vm1, %v817_v19  ;;  %v790_v49 = vmul.f32 %v1304_v56, %v774_v47 }
 0x142   : > { %v517_v51 = vpop.f32.mrf.mxu0 }
 0x143   : > { %v802_v52 = vadd.f32 %v1309_v13, %v790_v49  ;;  %v719_v53 = vadd.f32 %v718_v48, %v517_v51 }
 0x145   : > { %v810_v55 = vmax.f32 %v802_v52, 0.0  ;;  %v748_v10 = vadd.f32 %v747_v50, %v719_v53 }
 0x147   : > { %v818_v57 = vpack.c.bf16 %v810_v55, %v810_v55  ;;  %v777_v59 = vadd.f32 %v776_v54, %v748_v10 }
 0x149   : > { %827 = vst.msk [vmem:[%s1317_s6 + $0x14] sm:$0xf] %vm821_vm1, %v818_v57  ;;  %v791_v58 = vmul.f32 %v1304_v56, %v777_v59 }
 0x14a   : > { %v519_v61 = vpop.f32.mrf.mxu0 }
 0x14b   : > { %v803_v62 = vadd.f32 %v1309_v13, %v791_v58  ;;  %v721_v63 = vadd.f32 %v720_v60, %v519_v61 }
 0x14d   : > { %v811_v5 = vmax.f32 %v803_v62, 0.0  ;;  %v750_v6 = vadd.f32 %v749_v4, %v721_v63 }
 0x14f   : > { %v819_v0 = vpack.c.bf16 %v811_v5, %v811_v5  ;;  %v779_v8 = vadd.f32 %v778_v7, %v750_v6 }
 0x151   : > { %828 = vst.msk [vmem:[%s1317_s6 + $0x18] sm:$0xf] %vm821_vm1, %v819_v0  ;;  %v792_v9 = vmul.f32 %v1304_v56, %v779_v8 }
 0x153   : > { %v804_v11 = vadd.f32 %v1309_v13, %v792_v9 }
 0x155   : > { %v812_v12 = vmax.f32 %v804_v11, 0.0 }
 0x157   : > { %v820_v2 = vpack.c.bf16 %v812_v12, %v812_v12 }
 0x159   : > { %829 = vst.msk [vmem:[%s1317_s6 + $0x1c] sm:$0xf] %vm821_vm1, %v820_v2 }
 0x15a PF: > { %s15_s18 = sadd.s32 1, %s1084_s18  }
 0x15b   : > { %p12_p4 = scmp.ge.s32.totalorder %s15_s18, 4  }
 0x15d   :  { %14 = sbr.rel (!%p12_p4) target bundleno = 1 (0x1), region = 70 }

// kernel: _lambda_.49
= control target key start
LH: loop header
LB: loop body
LE: loop exit
PB: predicated region body
PF: predicated region fallthrough
CT: control target
= control target key end

     0   :  { %s3243_s27 = smov 0   ;;  %s4674_s0 = inlined_call_operand.vmem [shape: bf16[2,18,18,32], index: 0, kind: input, shape index: {}]   ;;  %s4675_s1 = inlined_call_operand.vmem [shape: bf16[512,32], index: 1, kind: input, shape index: {}]   ;;  %s4676_s2 = inlined_call_operand.vmem [shape: f32[3,3,32], index: 2, kind: input, shape index: {}]   ;;  %s4677_s3 = inlined_call_operand.vmem [shape: bf16[32,32], index: 3, kind: input, shape index: {}]   ;;  %s4678_s4 = inlined_call_operand.vmem [shape: f32[1,32], index: 4, kind: input, shape index: {}]   ;;  %s4679_s5 = inlined_call_operand.vmem [shape: f32[1,32], index: 5, kind: input, shape index: {}]   ;;  %s4680_s6 = inlined_call_operand.vmem [shape: bf16[32,32], index: 6, kind: input, shape index: {}]   ;;  %s4681_s7 = inlined_call_operand.vmem [shape: bf16[32,32], index: 7, kind: input, shape index: {}]   ;;  %s4682_s8 = inlined_call_operand.vmem [shape: bf16[512,32], index: 8, kind: output, shape index: {}]  }
   0x1 LB: > { %s3249_s28 = sadd.s32 4294967295, %s3196_s27   ;;  %p2961_p0 = scmp.ge.s32.totalorder %s3196_s27, 1  ;;  %s3196_s27 = sphi %s3243_s27, %s18_s27  }
   0x2   : > { %p273_p1 = scmp.lt.s32.totalorder %s3196_s27, 3 }
   0x4   : > { %p274_p2 = pnand %p2961_p0, %p273_p1 }
   0x5   : > { %p312_p3 = scmp.lt.s32.totalorder (!%p274_p2), %s3249_s28, 1  ;;  %s2963_s24 = sshll.u32 (!%p274_p2), %s3249_s28, 5 }
   0x6   : > { %277 = sbr.rel (%p274_p2) target bundleno = 615 (0x267), region = 52  ;;  %p4087_p4 = scmp.lt.s32.totalorder (!%p274_p2), %s2963_s24, 63 }
   0xb   : > { %v3106_v0 = vld [vmem:[%s4677_s3 + $0x8] sm:$0xff]  ;;  %v3105_v1 = vld [vmem:[%s4677_s3] sm:$0xff]  ;;  %s313_s11 = scalar_select %p312_p3, %s3249_s28, 1  ;;  %vm597_vm0 = vcmask 1046528   ;;  %vm839_vm1 = vcmask 1045504   ;;  %vm2116_vm2 = vcmask 261120  }
   0xc   : > { %2171 = vmatpush.bf16.msra.mxu0 %v3106_v0  ;;  %v384_v2 = vld [vmem:[%s4676_s2] sm:$0x7]  ;;  %3171 = vmatpush.bf16.msra.mxu3 %v3106_v0  ;;  %v385_v3 = vld [vmem:[%s4676_s2 + $0x4] sm:$0x7]  ;;  %v386_v4 = vld [vmem:[%s4676_s2 + $0x8] sm:$0x7] }
   0xd   : > { %s3177_s18 = smul.u32 216, %s313_s11  ;;  %v3270_v5 = vperm.slane %v384_v2, 0  ;;  %v3272_v6 = vperm.slane %v384_v2, 1  ;;  %v3274_v7 = vperm.slane %v384_v2, 2  ;;  %v3281_v8 = vperm.slane %v385_v3, 0  ;;  %s4685_s24 = smov (!%p4087_p4, %s2963_s24), 63 }
   0xe   : > { %v3283_v9 = vperm.slane %v385_v3, 1  ;;  %v3285_v10 = vperm.slane %v385_v3, 2  ;;  %v3287_v11 = vperm.slane %v386_v4, 0  ;;  %v3292_v15 = vperm.slane %v386_v4, 1  ;;  %s2964_s26 = sshll.u32 %s4685_s24, 2 }
   0xf   : > { %s3279_s21 = scalar_lea.vmem %s4674_s0, %s3177_s18  ;;  %v3294_v16 = vperm.slane %v386_v4, 2  ;;  %s4158_s16 = scalar_lea.vmem %s4675_s1, %s2964_s26  ;;  %vm2856_vm3 = vcmask 257024  }
  0x10   : > { %2172 = vmatpush.bf16.msra.mxu0 %v3105_v1  ;;  %3172 = vmatpush.bf16.msra.mxu3 %v3105_v1  ;;  %v3128_v12 = vld [vmem:[%s3279_s21] sm:$0xff]   ;;  %v332_v13 = vld [vmem:[%s3279_s21 + $0x8] sm:$0x1]  ;;  %v333_v14 = vld [vmem:[%s3279_s21 + $0xc] sm:$0xff]  }
  0x11   : > { %v3129_v17 = vunpack.c.l.bf16 %v3128_v12  ;;  %v3130_v18 = vunpack.c.h.bf16 %v3128_v12  ;;  %v335_v19 = vld [vmem:[%s3279_s21 + $0x14] sm:$0x1]  ;;  %v3163_v20 = vld [vmem:[%s3279_s21 + $0x18] sm:$0xff]   ;;  %v338_v21 = vld [vmem:[%s3279_s21 + $0x20] sm:$0x1]  ;;  %v3299_v22 = vunpack.c.l.bf16 %v333_v14  ;;  %v3301_v23 = vunpack.c.h.bf16 %v333_v14 }
  0x12   : > { %v3303_v24 = vunpack.c.l.bf16 %v3163_v20  ;;  %v3305_v25 = vunpack.c.h.bf16 %v3163_v20  ;;  %v484_v26 = vunpack.c.l.bf16 %v332_v13  ;;  %v3307_v27 = vunpack.c.l.bf16 %v335_v19 }
  0x13   : > { %v420_v28 = vmul.f32 %v3129_v17, %v3270_v5  ;;  %v421_v29 = vmul.f32 %v3130_v18, %v3270_v5  ;;  %v3311_v30 = vunpack.c.l.bf16 %v338_v21  ;;  %v501_v31 = vmul.f32 %v3129_v17, %v3272_v6  ;;  %v339_v21 = vld [vmem:[%s3279_s21 + $0x24] sm:$0xff]  }
  0x14   : > { %v502_v32 = vmul.f32 %v3130_v18, %v3272_v6  ;;  %v503_v33 = vmul.f32 %v3272_v6, %v484_v26  ;;  %v743_v34 = vmul.f32 %v3129_v17, %v3274_v7  ;;  %v744_v35 = vmul.f32 %v3130_v18, %v3274_v7 }
  0x15   : > { %v598_v36 = vrot.slane %v501_v31, 1  ;;  %v745_v37 = vmul.f32 %v3274_v7, %v484_v26  ;;  %v987_v38 = vmul.f32 %v3281_v8, %v3299_v22  ;;  %v988_v39 = vmul.f32 %v3281_v8, %v3301_v23 }
  0x16   : > { %v599_v40 = vrot.slane %v502_v32, 1  ;;  %v601_v41 = vrot.slane %v503_v33, 1  ;;  %v840_v42 = vrot.slane %v743_v34, 2  ;;  %v841_v43 = vrot.slane %v744_v35, 2 }
  0x17   : > { %v843_v44 = vrot.slane %v745_v37, 2  ;;  %v1053_v45 = vmul.f32 %v3283_v9, %v3299_v22  ;;  %v1054_v46 = vmul.f32 %v3283_v9, %v3301_v23  ;;  %v1055_v47 = vmul.f32 %v3283_v9, %v3307_v27 }
  0x18   : > { %v600_v48 = vsel %vm597_vm0, %v598_v36, %v599_v40  ;;  %v602_v49 = vsel %vm597_vm0, %v599_v40, %v601_v41  ;;  %v842_v50 = vsel %vm839_vm1, %v840_v42, %v841_v43  ;;  %v1294_v51 = vmul.f32 %v3285_v10, %v3299_v22 }
  0x19   : > { %v710_v52 = vadd.f32 %v600_v48, %v420_v28  ;;  %v711_v53 = vadd.f32 %v602_v49, %v421_v29  ;;  %v844_v54 = vsel %vm839_vm1, %v841_v43, %v843_v44  ;;  %v1149_v55 = vrot.slane %v1053_v45, 1 }
  0x1a   : > { %v1150_v56 = vrot.slane %v1054_v46, 1  ;;  %v1152_v57 = vrot.slane %v1055_v47, 1  ;;  %v1295_v58 = vmul.f32 %v3285_v10, %v3301_v23  ;;  %v1296_v59 = vmul.f32 %v3285_v10, %v3307_v27 }
  0x1b   : > { %v952_v60 = vadd.f32 %v842_v50, %v710_v52  ;;  %v953_v61 = vadd.f32 %v844_v54, %v711_v53  ;;  %v1390_v62 = vrot.slane %v1294_v51, 2  ;;  %v1537_v63 = vmul.f32 %v3303_v24, %v3287_v11 }
  0x1c   : > { %v1151_v0 = vsel %vm597_vm0, %v1149_v55, %v1150_v56  ;;  %v1153_v1 = vsel %vm597_vm0, %v1150_v56, %v1152_v57  ;;  %v1391_v2 = vrot.slane %v1295_v58, 2  ;;  %v1393_v3 = vrot.slane %v1296_v59, 2 }
  0x1d   : > { %v1019_v4 = vadd.f32 %v987_v38, %v952_v60  ;;  %v1020_v12 = vadd.f32 %v988_v39, %v953_v61  ;;  %v1538_v13 = vmul.f32 %v3305_v25, %v3287_v11  ;;  %v1603_v14 = vmul.f32 %v3303_v24, %v3292_v15  ;;  %v341_v39 = vld [vmem:[%s3279_s21 + $0x2c] sm:$0x1] }
  0x1e   : > { %v1392_v17 = vsel %vm839_vm1, %v1390_v62, %v1391_v2  ;;  %v1394_v18 = vsel %vm839_vm1, %v1391_v2, %v1393_v3  ;;  %v1604_v19 = vmul.f32 %v3305_v25, %v3292_v15  ;;  %v1605_v20 = vmul.f32 %v3292_v15, %v3311_v30 }
  0x1f   : > { %v1261_v26 = vadd.f32 %v1151_v0, %v1019_v4  ;;  %v1262_v28 = vadd.f32 %v1153_v1, %v1020_v12  ;;  %v1699_v29 = vrot.slane %v1603_v14, 1  ;;  %v1844_v31 = vmul.f32 %v3303_v24, %v3294_v16 }
  0x20   : > { %v1700_v32 = vrot.slane %v1604_v19, 1  ;;  %v1702_v33 = vrot.slane %v1605_v20, 1  ;;  %v1845_v34 = vmul.f32 %v3305_v25, %v3294_v16  ;;  %v1846_v35 = vmul.f32 %v3294_v16, %v3311_v30 }
  0x21   : > { %v1502_v36 = vadd.f32 %v1392_v17, %v1261_v26  ;;  %v1503_v37 = vadd.f32 %v1394_v18, %v1262_v28  ;;  %v1940_v38 = vrot.slane %v1844_v31, 2  ;;  %v3361_v40 = vunpack.c.l.bf16 %v339_v21 }
  0x22   : > { %v1701_v41 = vsel %vm597_vm0, %v1699_v29, %v1700_v32  ;;  %v1703_v42 = vsel %vm597_vm0, %v1700_v32, %v1702_v33  ;;  %v1941_v43 = vrot.slane %v1845_v34, 2  ;;  %v1943_v44 = vrot.slane %v1846_v35, 2 }
  0x23   : > { %v1569_v45 = vadd.f32 %v1537_v63, %v1502_v36  ;;  %v1570_v46 = vadd.f32 %v1538_v13, %v1503_v37  ;;  %v3365_v47 = vunpack.c.h.bf16 %v339_v21  ;;  %v422_v48 = vmul.f32 %v3270_v5, %v3299_v22 }
  0x24   : > { %v1942_v49 = vsel %vm839_vm1, %v1940_v38, %v1941_v43  ;;  %v1944_v50 = vsel %vm839_vm1, %v1941_v43, %v1943_v44  ;;  %v423_v51 = vmul.f32 %v3270_v5, %v3301_v23  ;;  %v3373_v52 = vunpack.c.l.bf16 %v341_v39 }
  0x25   : > { %v1811_v53 = vadd.f32 %v1701_v41, %v1569_v45  ;;  %v1812_v54 = vadd.f32 %v1703_v42, %v1570_v46  ;;  %v504_v55 = vmul.f32 %v3272_v6, %v3299_v22  ;;  %v505_v56 = vmul.f32 %v3272_v6, %v3301_v23 }
  0x26   : > { %v506_v57 = vmul.f32 %v3272_v6, %v3307_v27  ;;  %v746_v58 = vmul.f32 %v3274_v7, %v3299_v22  ;;  %v747_v59 = vmul.f32 %v3274_v7, %v3301_v23  ;;  %v748_v60 = vmul.f32 %v3274_v7, %v3307_v27 }
  0x27   : > { %v2052_v61 = vadd.f32 %v1942_v49, %v1811_v53  ;;  %v2053_v62 = vadd.f32 %v1944_v50, %v1812_v54  ;;  %v603_v63 = vrot.slane %v504_v55, 1  ;;  %v604_v0 = vrot.slane %v505_v56, 1 }
  0x28   : > { %v606_v1 = vrot.slane %v506_v57, 1  ;;  %v845_v2 = vrot.slane %v746_v58, 2  ;;  %v846_v3 = vrot.slane %v747_v59, 2  ;;  %v848_v4 = vrot.slane %v748_v60, 2  ;;  %v3164_v60 = vld [vmem:[%s3279_s21 + $0x30] sm:$0xff]  }
  0x29   : > { %v2084_v12 = vpack.c.bf16 %v2053_v62, %v2052_v61  ;;  %v605_v13 = vsel %vm597_vm0, %v603_v63, %v604_v0  ;;  %v989_v22 = vmul.f32 %v3303_v24, %v3281_v8  ;;  %v990_v23 = vmul.f32 %v3305_v25, %v3281_v8 }
  0x2a   : > { %v607_v14 = vsel %vm597_vm0, %v604_v0, %v606_v1  ;;  %v712_v27 = vadd.f32 %v605_v13, %v422_v48  ;;  %v847_v17 = vsel %vm839_vm1, %v845_v2, %v846_v3  ;;  %v849_v18 = vsel %vm839_vm1, %v846_v3, %v848_v4 }
  0x2b   : > { %2975 = vmatmul.msk.bf16.vlgmr.msra.gmra.mxu0 %vm2116_vm2, %v2084_v12  ;;  %v713_v19 = vadd.f32 %v607_v14, %v423_v51  ;;  %v1056_v20 = vmul.f32 %v3303_v24, %v3283_v9  ;;  %v1057_v21 = vmul.f32 %v3305_v25, %v3283_v9  ;;  %v1058_v26 = vmul.f32 %v3283_v9, %v3311_v30  ;;  %v344_v12 = vld [vmem:[%s3279_s21 + $0x38] sm:$0x1] }
  0x2c   : > { %v954_v28 = vadd.f32 %v847_v17, %v712_v27  ;;  %v1297_v29 = vmul.f32 %v3303_v24, %v3285_v10  ;;  %v1298_v31 = vmul.f32 %v3305_v25, %v3285_v10  ;;  %v1299_v32 = vmul.f32 %v3285_v10, %v3311_v30 }
  0x2d   : > { %v955_v33 = vadd.f32 %v849_v18, %v713_v19  ;;  %v1154_v34 = vrot.slane %v1056_v20, 1  ;;  %v1155_v35 = vrot.slane %v1057_v21, 1  ;;  %v1157_v36 = vrot.slane %v1058_v26, 1 }
  0x2e   : > { %v1021_v37 = vadd.f32 %v989_v22, %v954_v28  ;;  %v1395_v38 = vrot.slane %v1297_v29, 2  ;;  %v1396_v39 = vrot.slane %v1298_v31, 2  ;;  %v1398_v41 = vrot.slane %v1299_v32, 2 }
  0x2f   : > { %v1022_v42 = vadd.f32 %v990_v23, %v955_v33  ;;  %v1156_v43 = vsel %vm597_vm0, %v1154_v34, %v1155_v35  ;;  %v1158_v44 = vsel %vm597_vm0, %v1155_v35, %v1157_v36  ;;  %v1539_v45 = vmul.f32 %v3287_v11, %v3361_v40 }
  0x30   : > { %v1263_v46 = vadd.f32 %v1156_v43, %v1021_v37  ;;  %v1397_v48 = vsel %vm839_vm1, %v1395_v38, %v1396_v39  ;;  %v1399_v49 = vsel %vm839_vm1, %v1396_v39, %v1398_v41  ;;  %v1540_v50 = vmul.f32 %v3287_v11, %v3365_v47 }
  0x31   : > { %v1264_v51 = vadd.f32 %v1158_v44, %v1022_v42  ;;  %v1606_v53 = vmul.f32 %v3292_v15, %v3361_v40  ;;  %v1607_v54 = vmul.f32 %v3292_v15, %v3365_v47  ;;  %v1608_v55 = vmul.f32 %v3292_v15, %v3373_v52 }
  0x32   : > { %v1504_v56 = vadd.f32 %v1397_v48, %v1263_v46  ;;  %v1847_v57 = vmul.f32 %v3294_v16, %v3361_v40  ;;  %v1848_v58 = vmul.f32 %v3294_v16, %v3365_v47  ;;  %v1849_v59 = vmul.f32 %v3294_v16, %v3373_v52 }
  0x33   : > { %v1505_v61 = vadd.f32 %v1399_v49, %v1264_v51  ;;  %v1704_v62 = vrot.slane %v1606_v53, 1  ;;  %v1705_v63 = vrot.slane %v1607_v54, 1  ;;  %v1707_v0 = vrot.slane %v1608_v55, 1 }
  0x34   : > { %v1571_v1 = vadd.f32 %v1539_v45, %v1504_v56  ;;  %v1945_v2 = vrot.slane %v1847_v57, 2  ;;  %v1946_v3 = vrot.slane %v1848_v58, 2  ;;  %v1948_v4 = vrot.slane %v1849_v59, 2 }
  0x35   : > { %v1572_v13 = vadd.f32 %v1540_v50, %v1505_v61  ;;  %v1706_v22 = vsel %vm597_vm0, %v1704_v62, %v1705_v63  ;;  %v1708_v23 = vsel %vm597_vm0, %v1705_v63, %v1707_v0  ;;  %v3432_v14 = vunpack.c.l.bf16 %v3164_v60 }
  0x36   : > { %v1813_v27 = vadd.f32 %v1706_v22, %v1571_v1  ;;  %v1947_v17 = vsel %vm839_vm1, %v1945_v2, %v1946_v3  ;;  %v1949_v18 = vsel %vm839_vm1, %v1946_v3, %v1948_v4  ;;  %v3436_v19 = vunpack.c.h.bf16 %v3164_v60 }
  0x37   : > { %v1814_v20 = vadd.f32 %v1708_v23, %v1572_v13  ;;  %v424_v21 = vmul.f32 %v3303_v24, %v3270_v5  ;;  %v425_v26 = vmul.f32 %v3305_v25, %v3270_v5  ;;  %v3442_v28 = vunpack.c.l.bf16 %v344_v12 }
  0x38   : > { %v2054_v29 = vadd.f32 %v1947_v17, %v1813_v27  ;;  %v507_v31 = vmul.f32 %v3303_v24, %v3272_v6  ;;  %v508_v32 = vmul.f32 %v3305_v25, %v3272_v6  ;;  %v509_v33 = vmul.f32 %v3272_v6, %v3311_v30 }
  0x39   : > { %v2055_v34 = vadd.f32 %v1949_v18, %v1814_v20  ;;  %v749_v35 = vmul.f32 %v3303_v24, %v3274_v7  ;;  %v750_v36 = vmul.f32 %v3305_v25, %v3274_v7  ;;  %v751_v37 = vmul.f32 %v3274_v7, %v3311_v30 }
  0x3a   : > { %v608_v38 = vrot.slane %v507_v31, 1  ;;  %v609_v39 = vrot.slane %v508_v32, 1  ;;  %v611_v41 = vrot.slane %v509_v33, 1  ;;  %v991_v42 = vmul.f32 %v3281_v8, %v3361_v40 }
  0x3b   : > { %v2085_v43 = vpack.c.bf16 %v2055_v34, %v2054_v29  ;;  %v850_v44 = vrot.slane %v749_v35, 2  ;;  %v851_v45 = vrot.slane %v750_v36, 2  ;;  %v853_v46 = vrot.slane %v751_v37, 2 }
  0x3c   : > { %v610_v48 = vsel %vm597_vm0, %v608_v38, %v609_v39  ;;  %v612_v24 = vsel %vm597_vm0, %v609_v39, %v611_v41  ;;  %v992_v25 = vmul.f32 %v3281_v8, %v3365_v47  ;;  %v1059_v30 = vmul.f32 %v3283_v9, %v3361_v40 }
  0x3d   : > { %2976 = vmatmul.msk.bf16.gmra.mxu0 %vm2116_vm2, %v2085_v43  ;;  %v714_v49 = vadd.f32 %v610_v48, %v424_v21  ;;  %v715_v50 = vadd.f32 %v612_v24, %v425_v26  ;;  %v852_v51 = vsel %vm839_vm1, %v850_v44, %v851_v45  ;;  %v854_v53 = vsel %vm839_vm1, %v851_v45, %v853_v46  ;;  %v345_v26 = vld [vmem:[%s3279_s21 + $0x3c] sm:$0xff]   ;;  %v347_v48 = vld [vmem:[%s3279_s21 + $0x44] sm:$0x1] }
  0x3e   : > { %v1060_v54 = vmul.f32 %v3283_v9, %v3365_v47  ;;  %v1061_v55 = vmul.f32 %v3283_v9, %v3373_v52  ;;  %v1159_v56 = vrot.slane %v1059_v30, 1  ;;  %v1300_v57 = vmul.f32 %v3285_v10, %v3361_v40 }
  0x3f   : > { %v956_v58 = vadd.f32 %v852_v51, %v714_v49  ;;  %v957_v59 = vadd.f32 %v854_v53, %v715_v50  ;;  %v1301_v60 = vmul.f32 %v3285_v10, %v3365_v47  ;;  %v1302_v61 = vmul.f32 %v3285_v10, %v3373_v52 }
  0x40   : > { %v1160_v62 = vrot.slane %v1060_v54, 1  ;;  %v1162_v63 = vrot.slane %v1061_v55, 1  ;;  %v1400_v0 = vrot.slane %v1300_v57, 2  ;;  %v1541_v1 = vmul.f32 %v3432_v14, %v3287_v11 }
  0x41   : > { %v1023_v2 = vadd.f32 %v991_v42, %v956_v58  ;;  %v1024_v3 = vadd.f32 %v992_v25, %v957_v59  ;;  %v1401_v4 = vrot.slane %v1301_v60, 2  ;;  %v1403_v12 = vrot.slane %v1302_v61, 2 }
  0x42   : > { %v1161_v13 = vsel %vm597_vm0, %v1159_v56, %v1160_v62  ;;  %v1163_v22 = vsel %vm597_vm0, %v1160_v62, %v1162_v63  ;;  %v1542_v23 = vmul.f32 %v3436_v19, %v3287_v11  ;;  %v1609_v27 = vmul.f32 %v3432_v14, %v3292_v15 }
  0x43   : > { %v1265_v17 = vadd.f32 %v1161_v13, %v1023_v2  ;;  %v1266_v18 = vadd.f32 %v1163_v22, %v1024_v3  ;;  %v1402_v20 = vsel %vm839_vm1, %v1400_v0, %v1401_v4  ;;  %v1404_v21 = vsel %vm839_vm1, %v1401_v4, %v1403_v12 }
  0x44   : > { %v1610_v29 = vmul.f32 %v3436_v19, %v3292_v15  ;;  %v1611_v31 = vmul.f32 %v3292_v15, %v3442_v28  ;;  %v1709_v32 = vrot.slane %v1609_v27, 1  ;;  %v1850_v33 = vmul.f32 %v3432_v14, %v3294_v16 }
  0x45   : > { %v1506_v34 = vadd.f32 %v1402_v20, %v1265_v17  ;;  %v1507_v35 = vadd.f32 %v1404_v21, %v1266_v18  ;;  %v1851_v36 = vmul.f32 %v3436_v19, %v3294_v16  ;;  %v1852_v37 = vmul.f32 %v3294_v16, %v3442_v28 }
  0x46   : > { %v1710_v38 = vrot.slane %v1610_v29, 1  ;;  %v1712_v39 = vrot.slane %v1611_v31, 1  ;;  %v1950_v41 = vrot.slane %v1850_v33, 2  ;;  %v3498_v42 = vunpack.c.l.bf16 %v345_v26 }
  0x47   : > { %v1573_v43 = vadd.f32 %v1541_v1, %v1506_v34  ;;  %v1574_v44 = vadd.f32 %v1542_v23, %v1507_v35  ;;  %v1951_v45 = vrot.slane %v1851_v36, 2  ;;  %v1953_v46 = vrot.slane %v1852_v37, 2 }
  0x48   : > { %v1711_v24 = vsel %vm597_vm0, %v1709_v32, %v1710_v38  ;;  %v1713_v25 = vsel %vm597_vm0, %v1710_v38, %v1712_v39  ;;  %v3503_v30 = vunpack.c.h.bf16 %v345_v26  ;;  %v426_v49 = vmul.f32 %v3270_v5, %v3361_v40 }
  0x49   : > { %v1815_v50 = vadd.f32 %v1711_v24, %v1573_v43  ;;  %v1816_v51 = vadd.f32 %v1713_v25, %v1574_v44  ;;  %v1952_v53 = vsel %vm839_vm1, %v1950_v41, %v1951_v45  ;;  %v1954_v54 = vsel %vm839_vm1, %v1951_v45, %v1953_v46 }
  0x4a   : > { %v427_v55 = vmul.f32 %v3270_v5, %v3365_v47  ;;  %v3511_v56 = vunpack.c.l.bf16 %v347_v48  ;;  %v510_v57 = vmul.f32 %v3272_v6, %v3361_v40  ;;  %v511_v58 = vmul.f32 %v3272_v6, %v3365_v47 }
  0x4b   : > { %v2056_v59 = vadd.f32 %v1952_v53, %v1815_v50  ;;  %v2057_v60 = vadd.f32 %v1954_v54, %v1816_v51  ;;  %v512_v61 = vmul.f32 %v3272_v6, %v3373_v52  ;;  %v752_v62 = vmul.f32 %v3274_v7, %v3361_v40 }
  0x4c   : > { %v613_v63 = vrot.slane %v510_v57, 1  ;;  %v614_v0 = vrot.slane %v511_v58, 1  ;;  %v753_v1 = vmul.f32 %v3274_v7, %v3365_v47  ;;  %v754_v2 = vmul.f32 %v3274_v7, %v3373_v52  ;;  %v3168_v58 = vld [vmem:[%s3279_s21 + $0x90] sm:$0xff]  }
  0x4d   : > { %v2086_v3 = vpack.c.bf16 %v2057_v60, %v2056_v59  ;;  %v616_v4 = vrot.slane %v512_v61, 1  ;;  %v855_v12 = vrot.slane %v752_v62, 2  ;;  %v993_v13 = vmul.f32 %v3432_v14, %v3281_v8 }
  0x4e   : > { %v615_v22 = vsel %vm597_vm0, %v613_v63, %v614_v0  ;;  %v856_v23 = vrot.slane %v753_v1, 2  ;;  %v858_v27 = vrot.slane %v754_v2, 2  ;;  %v994_v40 = vmul.f32 %v3436_v19, %v3281_v8 }
  0x4f   : > { %2977 = vmatmul.msk.bf16.gmra.mxu0 %vm2116_vm2, %v2086_v3  ;;  %v617_v47 = vsel %vm597_vm0, %v614_v0, %v616_v4  ;;  %v716_v17 = vadd.f32 %v615_v22, %v426_v49  ;;  %v1062_v52 = vmul.f32 %v3432_v14, %v3283_v9  ;;  %v1063_v18 = vmul.f32 %v3436_v19, %v3283_v9  ;;  %v3169_v3 = vld [vmem:[%s3279_s21 + $0xa8] sm:$0xff]  }
  0x50   : > { %v717_v20 = vadd.f32 %v617_v47, %v427_v55  ;;  %v857_v21 = vsel %vm839_vm1, %v855_v12, %v856_v23  ;;  %v859_v26 = vsel %vm839_vm1, %v856_v23, %v858_v27  ;;  %v1064_v29 = vmul.f32 %v3283_v9, %v3442_v28  ;;  %v369_v23 = vld [vmem:[%s3279_s21 + $0x9c] sm:$0xff]  }
  0x51   : > { %v958_v31 = vadd.f32 %v857_v21, %v716_v17  ;;  %v1164_v32 = vrot.slane %v1062_v52, 1  ;;  %v1165_v33 = vrot.slane %v1063_v18, 1  ;;  %v1303_v34 = vmul.f32 %v3432_v14, %v3285_v10  ;;  %v371_v21 = vld [vmem:[%s3279_s21 + $0xa4] sm:$0x1] }
  0x52   : > { %v959_v35 = vadd.f32 %v859_v26, %v717_v20  ;;  %v1167_v36 = vrot.slane %v1064_v29, 1  ;;  %v1304_v37 = vmul.f32 %v3436_v19, %v3285_v10  ;;  %v1305_v38 = vmul.f32 %v3285_v10, %v3442_v28  ;;  %v368_v20 = vld [vmem:[%s3279_s21 + $0x98] sm:$0x1] }
  0x53   : > { %v1025_v39 = vadd.f32 %v993_v13, %v958_v31  ;;  %v1166_v41 = vsel %vm597_vm0, %v1164_v32, %v1165_v33  ;;  %v1405_v43 = vrot.slane %v1303_v34, 2  ;;  %v1543_v44 = vmul.f32 %v3287_v11, %v3498_v42  ;;  %v374_v31 = vld [vmem:[%s3279_s21 + $0xb0] sm:$0x1] }
  0x54   : > { %v1026_v45 = vadd.f32 %v994_v40, %v959_v35  ;;  %v1168_v46 = vsel %vm597_vm0, %v1165_v33, %v1167_v36  ;;  %v1406_v48 = vrot.slane %v1304_v37, 2  ;;  %v1408_v24 = vrot.slane %v1305_v38, 2 }
  0x55   : > { %v1267_v25 = vadd.f32 %v1166_v41, %v1025_v39  ;;  %v1544_v49 = vmul.f32 %v3287_v11, %v3503_v30  ;;  %v1612_v50 = vmul.f32 %v3292_v15, %v3498_v42  ;;  %v1613_v51 = vmul.f32 %v3292_v15, %v3503_v30 }
  0x56   : > { %v1268_v53 = vadd.f32 %v1168_v46, %v1026_v45  ;;  %v1407_v54 = vsel %vm839_vm1, %v1405_v43, %v1406_v48  ;;  %v1409_v55 = vsel %vm839_vm1, %v1406_v48, %v1408_v24  ;;  %v1614_v57 = vmul.f32 %v3292_v15, %v3511_v56 }
  0x57   : > { %v1508_v59 = vadd.f32 %v1407_v54, %v1267_v25  ;;  %v1714_v60 = vrot.slane %v1612_v50, 1  ;;  %v1715_v61 = vrot.slane %v1613_v51, 1  ;;  %v1853_v62 = vmul.f32 %v3294_v16, %v3498_v42 }
  0x58   : > { %v1509_v63 = vadd.f32 %v1409_v55, %v1268_v53  ;;  %v1717_v0 = vrot.slane %v1614_v57, 1  ;;  %v1854_v1 = vmul.f32 %v3294_v16, %v3503_v30  ;;  %v1855_v2 = vmul.f32 %v3294_v16, %v3511_v56 }
  0x59   : > { %v1575_v4 = vadd.f32 %v1543_v44, %v1508_v59  ;;  %v1716_v12 = vsel %vm597_vm0, %v1714_v60, %v1715_v61  ;;  %v1955_v13 = vrot.slane %v1853_v62, 2  ;;  %v3569_v22 = vunpack.c.l.bf16 %v3168_v58 }
  0x5a   : > { %v1576_v27 = vadd.f32 %v1544_v49, %v1509_v63  ;;  %v1718_v40 = vsel %vm597_vm0, %v1715_v61, %v1717_v0  ;;  %v1956_v47 = vrot.slane %v1854_v1, 2  ;;  %v1958_v17 = vrot.slane %v1855_v2, 2 }
  0x5b   : > { %v1817_v52 = vadd.f32 %v1716_v12, %v1575_v4  ;;  %v3573_v18 = vunpack.c.h.bf16 %v3168_v58  ;;  %v3577_v26 = vunpack.c.l.bf16 %v3169_v3  ;;  %v3579_v29 = vunpack.c.h.bf16 %v3169_v3 }
  0x5c   : > { %v1818_v32 = vadd.f32 %v1718_v40, %v1576_v27  ;;  %v1957_v33 = vsel %vm839_vm1, %v1955_v13, %v1956_v47  ;;  %v1959_v34 = vsel %vm839_vm1, %v1956_v47, %v1958_v17  ;;  %v3584_v35 = vunpack.c.l.bf16 %v369_v23 }
  0x5d   : > { %v2058_v36 = vadd.f32 %v1957_v33, %v1817_v52  ;;  %v3586_v37 = vunpack.c.h.bf16 %v369_v23  ;;  %v444_v38 = vmul.f32 %v3569_v22, %v3270_v5  ;;  %v445_v39 = vmul.f32 %v3573_v18, %v3270_v5 }
  0x5e   : > { %v2059_v41 = vadd.f32 %v1959_v34, %v1818_v32  ;;  %v3592_v43 = vunpack.c.l.bf16 %v368_v20  ;;  %v3594_v44 = vunpack.c.l.bf16 %v371_v21  ;;  %v3596_v45 = vunpack.c.l.bf16 %v374_v31 }
  0x5f   : > { %v537_v46 = vmul.f32 %v3569_v22, %v3272_v6  ;;  %v538_v48 = vmul.f32 %v3573_v18, %v3272_v6  ;;  %v779_v24 = vmul.f32 %v3569_v22, %v3274_v7  ;;  %v780_v25 = vmul.f32 %v3573_v18, %v3274_v7 }
  0x60   : > { %v2087_v49 = vpack.c.bf16 %v2059_v41, %v2058_v36  ;;  %v539_v50 = vmul.f32 %v3272_v6, %v3592_v43  ;;  %v781_v51 = vmul.f32 %v3274_v7, %v3592_v43  ;;  %v1011_v53 = vmul.f32 %v3281_v8, %v3584_v35 }
  0x61   : > { %v658_v54 = vrot.slane %v537_v46, 1  ;;  %v659_v55 = vrot.slane %v538_v48, 1  ;;  %v900_v57 = vrot.slane %v779_v24, 2  ;;  %v901_v58 = vrot.slane %v780_v25, 2 }
  0x62   : > { %2978 = vmatmul.msk.bf16.gmra.mxu0 %vm2116_vm2, %v2087_v49  ;;  %v661_v59 = vrot.slane %v539_v50, 1  ;;  %v903_v60 = vrot.slane %v781_v51, 2  ;;  %v1012_v61 = vmul.f32 %v3281_v8, %v3586_v37  ;;  %v1089_v62 = vmul.f32 %v3283_v9, %v3584_v35 }
  0x63   : > { %v660_v63 = vsel %vm597_vm0, %v658_v54, %v659_v55  ;;  %v902_v0 = vsel %vm839_vm1, %v900_v57, %v901_v58  ;;  %v1090_v1 = vmul.f32 %v3283_v9, %v3586_v37  ;;  %v1091_v2 = vmul.f32 %v3283_v9, %v3594_v44  ;;  %v3165_v54 = vld [vmem:[%s3279_s21 + $0x48] sm:$0xff]  }
  0x64   : > { %v662_v3 = vsel %vm597_vm0, %v659_v55, %v661_v59  ;;  %v734_v4 = vadd.f32 %v660_v63, %v444_v38  ;;  %v904_v12 = vsel %vm839_vm1, %v901_v58, %v903_v60  ;;  %v1209_v13 = vrot.slane %v1089_v62, 1 }
  0x65   : > { %v735_v23 = vadd.f32 %v662_v3, %v445_v39  ;;  %v1210_v27 = vrot.slane %v1090_v1, 1  ;;  %v1212_v40 = vrot.slane %v1091_v2, 1  ;;  %v1330_v47 = vmul.f32 %v3285_v10, %v3584_v35 }
  0x66   : > { %v976_v17 = vadd.f32 %v902_v0, %v734_v4  ;;  %v1331_v52 = vmul.f32 %v3285_v10, %v3586_v37  ;;  %v1332_v20 = vmul.f32 %v3285_v10, %v3594_v44  ;;  %v1561_v21 = vmul.f32 %v3577_v26, %v3287_v11  ;;  %v350_v0 = vld [vmem:[%s3279_s21 + $0x50] sm:$0x1] }
  0x67   : > { %v977_v31 = vadd.f32 %v904_v12, %v735_v23  ;;  %v1211_v32 = vsel %vm597_vm0, %v1209_v13, %v1210_v27  ;;  %v1213_v33 = vsel %vm597_vm0, %v1210_v27, %v1212_v40  ;;  %v1450_v34 = vrot.slane %v1330_v47, 2 }
  0x68   : > { %v1043_v36 = vadd.f32 %v1011_v53, %v976_v17  ;;  %v1451_v38 = vrot.slane %v1331_v52, 2  ;;  %v1453_v39 = vrot.slane %v1332_v20, 2  ;;  %v1562_v41 = vmul.f32 %v3579_v29, %v3287_v11 }
  0x69   : > { %v1044_v46 = vadd.f32 %v1012_v61, %v977_v31  ;;  %v1639_v48 = vmul.f32 %v3577_v26, %v3292_v15  ;;  %v1640_v24 = vmul.f32 %v3579_v29, %v3292_v15  ;;  %v1641_v25 = vmul.f32 %v3292_v15, %v3596_v45 }
  0x6a   : > { %v1285_v49 = vadd.f32 %v1211_v32, %v1043_v36  ;;  %v1452_v50 = vsel %vm839_vm1, %v1450_v34, %v1451_v38  ;;  %v1454_v51 = vsel %vm839_vm1, %v1451_v38, %v1453_v39  ;;  %v1880_v53 = vmul.f32 %v3577_v26, %v3294_v16 }
  0x6b   : > { %v1286_v55 = vadd.f32 %v1213_v33, %v1044_v46  ;;  %v1759_v57 = vrot.slane %v1639_v48, 1  ;;  %v1760_v58 = vrot.slane %v1640_v24, 1  ;;  %v1762_v59 = vrot.slane %v1641_v25, 1 }
  0x6c   : > { %v1526_v60 = vadd.f32 %v1452_v50, %v1285_v49  ;;  %v1881_v61 = vmul.f32 %v3579_v29, %v3294_v16  ;;  %v1882_v62 = vmul.f32 %v3294_v16, %v3596_v45  ;;  %v2000_v63 = vrot.slane %v1880_v53, 2 }
  0x6d   : > { %v1527_v1 = vadd.f32 %v1454_v51, %v1286_v55  ;;  %v1761_v2 = vsel %vm597_vm0, %v1759_v57, %v1760_v58  ;;  %v1763_v3 = vsel %vm597_vm0, %v1760_v58, %v1762_v59  ;;  %v3655_v4 = vunpack.c.l.bf16 %v3165_v54 }
  0x6e   : > { %v1593_v12 = vadd.f32 %v1561_v21, %v1526_v60  ;;  %v2001_v13 = vrot.slane %v1881_v61, 2  ;;  %v2003_v23 = vrot.slane %v1882_v62, 2  ;;  %v3657_v27 = vunpack.c.h.bf16 %v3165_v54 }
  0x6f   : > { %v1594_v40 = vadd.f32 %v1562_v41, %v1527_v1  ;;  %v428_v47 = vmul.f32 %v3432_v14, %v3270_v5  ;;  %v429_v17 = vmul.f32 %v3436_v19, %v3270_v5  ;;  %v3663_v52 = vunpack.c.l.bf16 %v350_v0 }
  0x70   : > { %v1835_v20 = vadd.f32 %v1761_v2, %v1593_v12  ;;  %v2002_v31 = vsel %vm839_vm1, %v2000_v63, %v2001_v13  ;;  %v2004_v32 = vsel %vm839_vm1, %v2001_v13, %v2003_v23  ;;  %v513_v21 = vmul.f32 %v3432_v14, %v3272_v6 }
  0x71   : > { %v1836_v33 = vadd.f32 %v1763_v3, %v1594_v40  ;;  %v514_v34 = vmul.f32 %v3436_v19, %v3272_v6  ;;  %v515_v36 = vmul.f32 %v3272_v6, %v3442_v28  ;;  %v755_v38 = vmul.f32 %v3432_v14, %v3274_v7 }
  0x72   : > { %v2076_v39 = vadd.f32 %v2002_v31, %v1835_v20  ;;  %v618_v41 = vrot.slane %v513_v21, 1  ;;  %v756_v46 = vmul.f32 %v3436_v19, %v3274_v7  ;;  %v757_v48 = vmul.f32 %v3274_v7, %v3442_v28 }
  0x73   : > { %v2077_v24 = vadd.f32 %v2004_v32, %v1836_v33  ;;  %v619_v25 = vrot.slane %v514_v34, 1  ;;  %v621_v49 = vrot.slane %v515_v36, 1  ;;  %v860_v50 = vrot.slane %v755_v38, 2 }
  0x74   : > { %v861_v51 = vrot.slane %v756_v46, 2  ;;  %v863_v53 = vrot.slane %v757_v48, 2  ;;  %v995_v54 = vmul.f32 %v3281_v8, %v3498_v42  ;;  %v996_v14 = vmul.f32 %v3281_v8, %v3503_v30 }
  0x75   : > { %v2096_v55 = vpack.c.bf16 %v2077_v24, %v2076_v39  ;;  %v620_v57 = vsel %vm597_vm0, %v618_v41, %v619_v25  ;;  %v622_v19 = vsel %vm597_vm0, %v619_v25, %v621_v49  ;;  %v1065_v28 = vmul.f32 %v3283_v9, %v3498_v42  ;;  %v375_v24 = vld [vmem:[%s3279_s21 + $0xb4] sm:$0xff]  }
  0x76   : > { %v718_v58 = vadd.f32 %v620_v57, %v428_v47  ;;  %v719_v59 = vadd.f32 %v622_v19, %v429_v17  ;;  %v862_v60 = vsel %vm839_vm1, %v860_v50, %v861_v51  ;;  %v864_v61 = vsel %vm839_vm1, %v861_v51, %v863_v53 }
  0x77   : > { %2987 = vmatmul.msk.bf16.vlgmr.msra.gmra.mxu3 %vm2116_vm2, %v2096_v55  ;;  %v1066_v62 = vmul.f32 %v3283_v9, %v3503_v30  ;;  %v1067_v63 = vmul.f32 %v3283_v9, %v3511_v56  ;;  %v1169_v0 = vrot.slane %v1065_v28, 1  ;;  %v1306_v1 = vmul.f32 %v3285_v10, %v3498_v42 }
  0x78   : > { %v960_v2 = vadd.f32 %v862_v60, %v718_v58  ;;  %v961_v3 = vadd.f32 %v864_v61, %v719_v59  ;;  %v1307_v12 = vmul.f32 %v3285_v10, %v3503_v30  ;;  %v1308_v13 = vmul.f32 %v3285_v10, %v3511_v56 }
  0x79   : > { %v1170_v23 = vrot.slane %v1066_v62, 1  ;;  %v1172_v40 = vrot.slane %v1067_v63, 1  ;;  %v1410_v47 = vrot.slane %v1306_v1, 2  ;;  %v1545_v17 = vmul.f32 %v3655_v4, %v3287_v11  ;;  %v377_v63 = vld [vmem:[%s3279_s21 + $0xbc] sm:$0x1] }
  0x7a   : > { %v1027_v20 = vadd.f32 %v995_v54, %v960_v2  ;;  %v1028_v31 = vadd.f32 %v996_v14, %v961_v3  ;;  %v1411_v32 = vrot.slane %v1307_v12, 2  ;;  %v1413_v21 = vrot.slane %v1308_v13, 2 }
  0x7b   : > { %v1171_v33 = vsel %vm597_vm0, %v1169_v0, %v1170_v23  ;;  %v1173_v34 = vsel %vm597_vm0, %v1170_v23, %v1172_v40  ;;  %v1546_v36 = vmul.f32 %v3657_v27, %v3287_v11  ;;  %v1615_v38 = vmul.f32 %v3655_v4, %v3292_v15 }
  0x7c   : > { %v1269_v39 = vadd.f32 %v1171_v33, %v1027_v20  ;;  %v1270_v41 = vadd.f32 %v1173_v34, %v1028_v31  ;;  %v1412_v46 = vsel %vm839_vm1, %v1410_v47, %v1411_v32  ;;  %v1414_v48 = vsel %vm839_vm1, %v1411_v32, %v1413_v21 }
  0x7d   : > { %v1616_v25 = vmul.f32 %v3657_v27, %v3292_v15  ;;  %v1617_v49 = vmul.f32 %v3292_v15, %v3663_v52  ;;  %v1719_v50 = vrot.slane %v1615_v38, 1  ;;  %v1856_v51 = vmul.f32 %v3655_v4, %v3294_v16 }
  0x7e   : > { %v1510_v53 = vadd.f32 %v1412_v46, %v1269_v39  ;;  %v1511_v54 = vadd.f32 %v1414_v48, %v1270_v41  ;;  %v1857_v14 = vmul.f32 %v3657_v27, %v3294_v16  ;;  %v1858_v55 = vmul.f32 %v3294_v16, %v3663_v52 }
  0x7f   : > { %v1720_v57 = vrot.slane %v1616_v25, 1  ;;  %v1722_v19 = vrot.slane %v1617_v49, 1  ;;  %v1960_v28 = vrot.slane %v1856_v51, 2  ;;  %v3721_v58 = vunpack.c.l.bf16 %v375_v24 }
  0x80   : > { %v1577_v59 = vadd.f32 %v1545_v17, %v1510_v53  ;;  %v1578_v60 = vadd.f32 %v1546_v36, %v1511_v54  ;;  %v1961_v61 = vrot.slane %v1857_v14, 2  ;;  %v1963_v62 = vrot.slane %v1858_v55, 2 }
  0x81   : > { %v1721_v0 = vsel %vm597_vm0, %v1719_v50, %v1720_v57  ;;  %v1723_v1 = vsel %vm597_vm0, %v1720_v57, %v1722_v19  ;;  %v3726_v2 = vunpack.c.h.bf16 %v375_v24  ;;  %v446_v3 = vmul.f32 %v3270_v5, %v3584_v35 }
  0x82   : > { %v1819_v12 = vadd.f32 %v1721_v0, %v1577_v59  ;;  %v1820_v13 = vadd.f32 %v1723_v1, %v1578_v60  ;;  %v1962_v23 = vsel %vm839_vm1, %v1960_v28, %v1961_v61  ;;  %v1964_v40 = vsel %vm839_vm1, %v1961_v61, %v1963_v62 }
  0x83   : > { %v447_v47 = vmul.f32 %v3270_v5, %v3586_v37  ;;  %v3734_v17 = vunpack.c.l.bf16 %v377_v63  ;;  %v540_v20 = vmul.f32 %v3272_v6, %v3584_v35  ;;  %v541_v31 = vmul.f32 %v3272_v6, %v3586_v37 }
  0x84   : > { %v2060_v32 = vadd.f32 %v1962_v23, %v1819_v12  ;;  %v2061_v21 = vadd.f32 %v1964_v40, %v1820_v13  ;;  %v542_v33 = vmul.f32 %v3272_v6, %v3594_v44  ;;  %v782_v34 = vmul.f32 %v3274_v7, %v3584_v35 }
  0x85   : > { %v663_v36 = vrot.slane %v540_v20, 1  ;;  %v664_v38 = vrot.slane %v541_v31, 1  ;;  %v783_v39 = vmul.f32 %v3274_v7, %v3586_v37  ;;  %v784_v41 = vmul.f32 %v3274_v7, %v3594_v44 }
  0x86   : > { %v2088_v46 = vpack.c.bf16 %v2061_v21, %v2060_v32  ;;  %v666_v48 = vrot.slane %v542_v33, 1  ;;  %v905_v24 = vrot.slane %v782_v34, 2  ;;  %v1013_v25 = vmul.f32 %v3577_v26, %v3281_v8 }
  0x87   : > { %v665_v49 = vsel %vm597_vm0, %v663_v36, %v664_v38  ;;  %v906_v50 = vrot.slane %v783_v39, 2  ;;  %v908_v51 = vrot.slane %v784_v41, 2  ;;  %v1014_v53 = vmul.f32 %v3579_v29, %v3281_v8 }
  0x88   : > { %2979 = vmatmul.msk.bf16.gmra.mxu0 %vm2116_vm2, %v2088_v46  ;;  %v667_v54 = vsel %vm597_vm0, %v664_v38, %v666_v48  ;;  %v736_v14 = vadd.f32 %v665_v49, %v446_v3  ;;  %v1092_v55 = vmul.f32 %v3577_v26, %v3283_v9  ;;  %v1093_v57 = vmul.f32 %v3579_v29, %v3283_v9 }
  0x89   : > { %v737_v19 = vadd.f32 %v667_v54, %v447_v47  ;;  %v907_v28 = vsel %vm839_vm1, %v905_v24, %v906_v50  ;;  %v909_v59 = vsel %vm839_vm1, %v906_v50, %v908_v51  ;;  %v1094_v60 = vmul.f32 %v3283_v9, %v3596_v45 }
  0x8a   : > { %v978_v61 = vadd.f32 %v907_v28, %v736_v14  ;;  %v1214_v62 = vrot.slane %v1092_v55, 1  ;;  %v1215_v63 = vrot.slane %v1093_v57, 1  ;;  %v1333_v0 = vmul.f32 %v3577_v26, %v3285_v10 }
  0x8b   : > { %v979_v1 = vadd.f32 %v909_v59, %v737_v19  ;;  %v1217_v3 = vrot.slane %v1094_v60, 1  ;;  %v1334_v12 = vmul.f32 %v3579_v29, %v3285_v10  ;;  %v1335_v13 = vmul.f32 %v3285_v10, %v3596_v45  ;;  %v353_v60 = vld [vmem:[%s3279_s21 + $0x5c] sm:$0x1] }
  0x8c   : > { %v1045_v23 = vadd.f32 %v1013_v25, %v978_v61  ;;  %v1216_v40 = vsel %vm597_vm0, %v1214_v62, %v1215_v63  ;;  %v1455_v47 = vrot.slane %v1333_v0, 2  ;;  %v1563_v20 = vmul.f32 %v3287_v11, %v3721_v58  ;;  %v351_v25 = vld [vmem:[%s3279_s21 + $0x54] sm:$0xff]  }
  0x8d   : > { %v1046_v31 = vadd.f32 %v1014_v53, %v979_v1  ;;  %v1218_v32 = vsel %vm597_vm0, %v1215_v63, %v1217_v3  ;;  %v1456_v21 = vrot.slane %v1334_v12, 2  ;;  %v1458_v33 = vrot.slane %v1335_v13, 2 }
  0x8e   : > { %v1287_v34 = vadd.f32 %v1216_v40, %v1045_v23  ;;  %v1564_v36 = vmul.f32 %v3287_v11, %v3726_v2  ;;  %v1642_v38 = vmul.f32 %v3292_v15, %v3721_v58  ;;  %v1643_v39 = vmul.f32 %v3292_v15, %v3726_v2 }
  0x8f   : > { %v1288_v41 = vadd.f32 %v1218_v32, %v1046_v31  ;;  %v1457_v46 = vsel %vm839_vm1, %v1455_v47, %v1456_v21  ;;  %v1459_v48 = vsel %vm839_vm1, %v1456_v21, %v1458_v33  ;;  %v1644_v24 = vmul.f32 %v3292_v15, %v3734_v17 }
  0x90   : > { %v1528_v49 = vadd.f32 %v1457_v46, %v1287_v34  ;;  %v1764_v50 = vrot.slane %v1642_v38, 1  ;;  %v1765_v51 = vrot.slane %v1643_v39, 1  ;;  %v1883_v53 = vmul.f32 %v3294_v16, %v3721_v58 }
  0x91   : > { %v1529_v54 = vadd.f32 %v1459_v48, %v1288_v41  ;;  %v1767_v14 = vrot.slane %v1644_v24, 1  ;;  %v1884_v55 = vmul.f32 %v3294_v16, %v3726_v2  ;;  %v1885_v57 = vmul.f32 %v3294_v16, %v3734_v17 }
  0x92   : > { %v1595_v19 = vadd.f32 %v1563_v20, %v1528_v49  ;;  %v1766_v28 = vsel %vm597_vm0, %v1764_v50, %v1765_v51  ;;  %v2005_v59 = vrot.slane %v1883_v53, 2  ;;  %v3792_v61 = vunpack.c.l.bf16 %v351_v25 }
  0x93   : > { %v1596_v62 = vadd.f32 %v1564_v36, %v1529_v54  ;;  %v1768_v63 = vsel %vm597_vm0, %v1765_v51, %v1767_v14  ;;  %v2006_v0 = vrot.slane %v1884_v55, 2  ;;  %v2008_v1 = vrot.slane %v1885_v57, 2 }
  0x94   : > { %v1837_v3 = vadd.f32 %v1766_v28, %v1595_v19  ;;  %v3795_v12 = vunpack.c.h.bf16 %v351_v25  ;;  %v430_v13 = vmul.f32 %v3270_v5, %v3498_v42  ;;  %v431_v23 = vmul.f32 %v3270_v5, %v3503_v30 }
  0x95   : > { %v1838_v40 = vadd.f32 %v1768_v63, %v1596_v62  ;;  %v2007_v47 = vsel %vm839_vm1, %v2005_v59, %v2006_v0  ;;  %v2009_v20 = vsel %vm839_vm1, %v2006_v0, %v2008_v1  ;;  %v3803_v31 = vunpack.c.l.bf16 %v353_v60 }
  0x96   : > { %v2078_v32 = vadd.f32 %v2007_v47, %v1837_v3  ;;  %v516_v21 = vmul.f32 %v3272_v6, %v3498_v42  ;;  %v517_v33 = vmul.f32 %v3272_v6, %v3503_v30  ;;  %v518_v34 = vmul.f32 %v3272_v6, %v3511_v56 }
  0x97   : > { %v2079_v36 = vadd.f32 %v2009_v20, %v1838_v40  ;;  %v758_v38 = vmul.f32 %v3274_v7, %v3498_v42  ;;  %v759_v39 = vmul.f32 %v3274_v7, %v3503_v30  ;;  %v760_v41 = vmul.f32 %v3274_v7, %v3511_v56 }
  0x98   : > { %v623_v46 = vrot.slane %v516_v21, 1  ;;  %v624_v48 = vrot.slane %v517_v33, 1  ;;  %v626_v24 = vrot.slane %v518_v34, 1  ;;  %v997_v25 = vmul.f32 %v3655_v4, %v3281_v8 }
  0x99   : > { %v2097_v49 = vpack.c.bf16 %v2079_v36, %v2078_v32  ;;  %v865_v50 = vrot.slane %v758_v38, 2  ;;  %v866_v51 = vrot.slane %v759_v39, 2  ;;  %v868_v53 = vrot.slane %v760_v41, 2 }
  0x9a   : > { %v625_v54 = vsel %vm597_vm0, %v623_v46, %v624_v48  ;;  %v627_v42 = vsel %vm597_vm0, %v624_v48, %v626_v24  ;;  %v998_v30 = vmul.f32 %v3657_v27, %v3281_v8  ;;  %v1068_v56 = vmul.f32 %v3655_v4, %v3283_v9 }
  0x9b   : > { %2988 = vmatmul.msk.bf16.gmra.mxu3 %vm2116_vm2, %v2097_v49  ;;  %v720_v14 = vadd.f32 %v625_v54, %v430_v13  ;;  %v721_v55 = vadd.f32 %v627_v42, %v431_v23  ;;  %v867_v57 = vsel %vm839_vm1, %v865_v50, %v866_v51  ;;  %v869_v19 = vsel %vm839_vm1, %v866_v51, %v868_v53 }
  0x9c   : > { %v1069_v28 = vmul.f32 %v3657_v27, %v3283_v9  ;;  %v1070_v59 = vmul.f32 %v3283_v9, %v3663_v52  ;;  %v1174_v60 = vrot.slane %v1068_v56, 1  ;;  %v1309_v62 = vmul.f32 %v3655_v4, %v3285_v10 }
  0x9d   : > { %v962_v63 = vadd.f32 %v867_v57, %v720_v14  ;;  %v963_v0 = vadd.f32 %v869_v19, %v721_v55  ;;  %v1310_v1 = vmul.f32 %v3657_v27, %v3285_v10  ;;  %v1311_v3 = vmul.f32 %v3285_v10, %v3663_v52 }
  0x9e   : > { %v1175_v13 = vrot.slane %v1069_v28, 1  ;;  %v1177_v23 = vrot.slane %v1070_v59, 1  ;;  %v1415_v40 = vrot.slane %v1309_v62, 2  ;;  %v1547_v47 = vmul.f32 %v3287_v11, %v3792_v61 }
  0x9f   : > { %v1029_v20 = vadd.f32 %v997_v25, %v962_v63  ;;  %v1030_v32 = vadd.f32 %v998_v30, %v963_v0  ;;  %v1416_v21 = vrot.slane %v1310_v1, 2  ;;  %v1418_v33 = vrot.slane %v1311_v3, 2  ;;  %v3170_v25 = vld [vmem:[%s3279_s21 + $0xc0] sm:$0xff]  }
  0xa0   : > { %v1176_v34 = vsel %vm597_vm0, %v1174_v60, %v1175_v13  ;;  %v1178_v36 = vsel %vm597_vm0, %v1175_v13, %v1177_v23  ;;  %v1548_v38 = vmul.f32 %v3287_v11, %v3795_v12  ;;  %v1618_v39 = vmul.f32 %v3292_v15, %v3792_v61 }
  0xa1   : > { %v1271_v41 = vadd.f32 %v1176_v34, %v1029_v20  ;;  %v1272_v46 = vadd.f32 %v1178_v36, %v1030_v32  ;;  %v1417_v48 = vsel %vm839_vm1, %v1415_v40, %v1416_v21  ;;  %v1419_v24 = vsel %vm839_vm1, %v1416_v21, %v1418_v33 }
  0xa2   : > { %v1619_v49 = vmul.f32 %v3292_v15, %v3795_v12  ;;  %v1620_v50 = vmul.f32 %v3292_v15, %v3803_v31  ;;  %v1724_v51 = vrot.slane %v1618_v39, 1  ;;  %v1859_v53 = vmul.f32 %v3294_v16, %v3792_v61 }
  0xa3   : > { %v1512_v54 = vadd.f32 %v1417_v48, %v1271_v41  ;;  %v1513_v42 = vadd.f32 %v1419_v24, %v1272_v46  ;;  %v1860_v30 = vmul.f32 %v3294_v16, %v3795_v12  ;;  %v1861_v56 = vmul.f32 %v3294_v16, %v3803_v31  ;;  %v380_v41 = vld [vmem:[%s3279_s21 + $0xc8] sm:$0x1] }
  0xa4   : > { %v1725_v14 = vrot.slane %v1619_v49, 1  ;;  %v1727_v55 = vrot.slane %v1620_v50, 1  ;;  %v1965_v57 = vrot.slane %v1859_v53, 2  ;;  %v3859_v19 = vunpack.c.l.bf16 %v3170_v25 }
  0xa5   : > { %v1579_v28 = vadd.f32 %v1547_v47, %v1512_v54  ;;  %v1580_v59 = vadd.f32 %v1548_v38, %v1513_v42  ;;  %v1966_v60 = vrot.slane %v1860_v30, 2  ;;  %v1968_v62 = vrot.slane %v1861_v56, 2 }
  0xa6   : > { %v1726_v63 = vsel %vm597_vm0, %v1724_v51, %v1725_v14  ;;  %v1728_v0 = vsel %vm597_vm0, %v1725_v14, %v1727_v55  ;;  %v3863_v1 = vunpack.c.h.bf16 %v3170_v25  ;;  %v448_v3 = vmul.f32 %v3577_v26, %v3270_v5 }
  0xa7   : > { %v1821_v13 = vadd.f32 %v1726_v63, %v1579_v28  ;;  %v1822_v23 = vadd.f32 %v1728_v0, %v1580_v59  ;;  %v1967_v40 = vsel %vm839_vm1, %v1965_v57, %v1966_v60  ;;  %v1969_v20 = vsel %vm839_vm1, %v1966_v60, %v1968_v62 }
  0xa8   : > { %v449_v47 = vmul.f32 %v3579_v29, %v3270_v5  ;;  %v543_v32 = vmul.f32 %v3577_v26, %v3272_v6  ;;  %v544_v21 = vmul.f32 %v3579_v29, %v3272_v6  ;;  %v545_v33 = vmul.f32 %v3272_v6, %v3596_v45 }
  0xa9   : > { %v2062_v34 = vadd.f32 %v1967_v40, %v1821_v13  ;;  %v2063_v36 = vadd.f32 %v1969_v20, %v1822_v23  ;;  %v785_v38 = vmul.f32 %v3577_v26, %v3274_v7  ;;  %v786_v39 = vmul.f32 %v3579_v29, %v3274_v7 }
  0xaa   : > { %v668_v46 = vrot.slane %v543_v32, 1  ;;  %v669_v48 = vrot.slane %v544_v21, 1  ;;  %v671_v24 = vrot.slane %v545_v33, 1  ;;  %v787_v25 = vmul.f32 %v3274_v7, %v3596_v45 }
  0xab   : > { %v2089_v49 = vpack.c.bf16 %v2063_v36, %v2062_v34  ;;  %v910_v50 = vrot.slane %v785_v38, 2  ;;  %v911_v51 = vrot.slane %v786_v39, 2  ;;  %v1015_v53 = vmul.f32 %v3281_v8, %v3721_v58 }
  0xac   : > { %v670_v54 = vsel %vm597_vm0, %v668_v46, %v669_v48  ;;  %v672_v26 = vsel %vm597_vm0, %v669_v48, %v671_v24  ;;  %v913_v42 = vrot.slane %v787_v25, 2  ;;  %v1016_v29 = vmul.f32 %v3281_v8, %v3726_v2 }
  0xad   : > { %2980 = vmatmul.msk.bf16.gmra.mxu0 %vm2116_vm2, %v2089_v49  ;;  %v738_v30 = vadd.f32 %v670_v54, %v448_v3  ;;  %v739_v56 = vadd.f32 %v672_v26, %v449_v47  ;;  %v912_v45 = vsel %vm839_vm1, %v910_v50, %v911_v51  ;;  %v3892_v14 = vunpack.c.l.bf16 %v380_v41 }
  0xae   : > { %v914_v55 = vsel %vm839_vm1, %v911_v51, %v913_v42  ;;  %v1095_v57 = vmul.f32 %v3283_v9, %v3721_v58  ;;  %v1096_v28 = vmul.f32 %v3283_v9, %v3726_v2  ;;  %v1097_v59 = vmul.f32 %v3283_v9, %v3734_v17  ;;  %v3166_v42 = vld [vmem:[%s3279_s21 + $0x60] sm:$0xff]  }
  0xaf   : > { %v980_v60 = vadd.f32 %v912_v45, %v738_v30  ;;  %v981_v62 = vadd.f32 %v914_v55, %v739_v56  ;;  %v1336_v63 = vmul.f32 %v3285_v10, %v3721_v58  ;;  %v1337_v0 = vmul.f32 %v3285_v10, %v3726_v2 }
  0xb0   : > { %v1219_v3 = vrot.slane %v1095_v57, 1  ;;  %v1220_v13 = vrot.slane %v1096_v28, 1  ;;  %v1222_v23 = vrot.slane %v1097_v59, 1  ;;  %v1338_v40 = vmul.f32 %v3285_v10, %v3734_v17 }
  0xb1   : > { %v1047_v20 = vadd.f32 %v1015_v53, %v980_v60  ;;  %v1048_v47 = vadd.f32 %v1016_v29, %v981_v62  ;;  %v1460_v32 = vrot.slane %v1336_v63, 2  ;;  %v1461_v21 = vrot.slane %v1337_v0, 2  ;;  %v356_v60 = vld [vmem:[%s3279_s21 + $0x68] sm:$0x1] }
  0xb2   : > { %v1221_v33 = vsel %vm597_vm0, %v1219_v3, %v1220_v13  ;;  %v1223_v34 = vsel %vm597_vm0, %v1220_v13, %v1222_v23  ;;  %v1463_v36 = vrot.slane %v1338_v40, 2  ;;  %v1565_v38 = vmul.f32 %v3859_v19, %v3287_v11 }
  0xb3   : > { %v1289_v39 = vadd.f32 %v1221_v33, %v1047_v20  ;;  %v1290_v41 = vadd.f32 %v1223_v34, %v1048_v47  ;;  %v1462_v46 = vsel %vm839_vm1, %v1460_v32, %v1461_v21  ;;  %v1566_v48 = vmul.f32 %v3863_v1, %v3287_v11 }
  0xb4   : > { %v1464_v24 = vsel %vm839_vm1, %v1461_v21, %v1463_v36  ;;  %v1645_v25 = vmul.f32 %v3859_v19, %v3292_v15  ;;  %v1646_v49 = vmul.f32 %v3863_v1, %v3292_v15  ;;  %v1647_v50 = vmul.f32 %v3292_v15, %v3892_v14 }
  0xb5   : > { %v1530_v51 = vadd.f32 %v1462_v46, %v1289_v39  ;;  %v1531_v53 = vadd.f32 %v1464_v24, %v1290_v41  ;;  %v1886_v54 = vmul.f32 %v3859_v19, %v3294_v16  ;;  %v1887_v26 = vmul.f32 %v3863_v1, %v3294_v16 }
  0xb6   : > { %v1769_v29 = vrot.slane %v1645_v25, 1  ;;  %v1770_v30 = vrot.slane %v1646_v49, 1  ;;  %v1772_v56 = vrot.slane %v1647_v50, 1  ;;  %v1888_v45 = vmul.f32 %v3294_v16, %v3892_v14 }
  0xb7   : > { %v1597_v55 = vadd.f32 %v1565_v38, %v1530_v51  ;;  %v1598_v57 = vadd.f32 %v1566_v48, %v1531_v53  ;;  %v2010_v28 = vrot.slane %v1886_v54, 2  ;;  %v2011_v59 = vrot.slane %v1887_v26, 2 }
  0xb8   : > { %v1771_v62 = vsel %vm597_vm0, %v1769_v29, %v1770_v30  ;;  %v1773_v63 = vsel %vm597_vm0, %v1770_v30, %v1772_v56  ;;  %v2013_v0 = vrot.slane %v1888_v45, 2  ;;  %v3931_v3 = vunpack.c.l.bf16 %v3166_v42 }
  0xb9   : > { %v1839_v13 = vadd.f32 %v1771_v62, %v1597_v55  ;;  %v1840_v23 = vadd.f32 %v1773_v63, %v1598_v57  ;;  %v2012_v40 = vsel %vm839_vm1, %v2010_v28, %v2011_v59  ;;  %v3934_v20 = vunpack.c.h.bf16 %v3166_v42 }
  0xba   : > { %v2014_v47 = vsel %vm839_vm1, %v2011_v59, %v2013_v0  ;;  %v432_v32 = vmul.f32 %v3655_v4, %v3270_v5  ;;  %v433_v21 = vmul.f32 %v3657_v27, %v3270_v5  ;;  %v3941_v33 = vunpack.c.l.bf16 %v356_v60 }
  0xbb   : > { %v2080_v34 = vadd.f32 %v2012_v40, %v1839_v13  ;;  %v2081_v36 = vadd.f32 %v2014_v47, %v1840_v23  ;;  %v519_v38 = vmul.f32 %v3655_v4, %v3272_v6  ;;  %v520_v39 = vmul.f32 %v3657_v27, %v3272_v6 }
  0xbc   : > { %v521_v41 = vmul.f32 %v3272_v6, %v3663_v52  ;;  %v761_v46 = vmul.f32 %v3655_v4, %v3274_v7  ;;  %v762_v48 = vmul.f32 %v3657_v27, %v3274_v7  ;;  %v763_v24 = vmul.f32 %v3274_v7, %v3663_v52 }
  0xbd   : > { %v2098_v25 = vpack.c.bf16 %v2081_v36, %v2080_v34  ;;  %v628_v49 = vrot.slane %v519_v38, 1  ;;  %v629_v50 = vrot.slane %v520_v39, 1  ;;  %v999_v51 = vmul.f32 %v3281_v8, %v3792_v61 }
  0xbe   : > { %v631_v53 = vrot.slane %v521_v41, 1  ;;  %v870_v54 = vrot.slane %v761_v46, 2  ;;  %v871_v26 = vrot.slane %v762_v48, 2  ;;  %v873_v42 = vrot.slane %v763_v24, 2 }
  0xbf   : > { %2989 = vmatmul.msk.bf16.gmra.mxu3 %vm2116_vm2, %v2098_v25  ;;  %v630_v4 = vsel %vm597_vm0, %v628_v49, %v629_v50  ;;  %v1000_v27 = vmul.f32 %v3281_v8, %v3795_v12  ;;  %v1071_v52 = vmul.f32 %v3283_v9, %v3792_v61  ;;  %v1072_v29 = vmul.f32 %v3283_v9, %v3795_v12 }
  0xc0   : > { %v632_v30 = vsel %vm597_vm0, %v629_v50, %v631_v53  ;;  %v722_v56 = vadd.f32 %v630_v4, %v432_v32  ;;  %v872_v45 = vsel %vm839_vm1, %v870_v54, %v871_v26  ;;  %v874_v55 = vsel %vm839_vm1, %v871_v26, %v873_v42 }
  0xc1   : > { %v723_v57 = vadd.f32 %v632_v30, %v433_v21  ;;  %v1073_v28 = vmul.f32 %v3283_v9, %v3803_v31  ;;  %v1179_v59 = vrot.slane %v1071_v52, 1  ;;  %v1180_v60 = vrot.slane %v1072_v29, 1 }
  0xc2   : > { %v964_v62 = vadd.f32 %v872_v45, %v722_v56  ;;  %v1312_v63 = vmul.f32 %v3285_v10, %v3792_v61  ;;  %v1313_v0 = vmul.f32 %v3285_v10, %v3795_v12  ;;  %v1314_v13 = vmul.f32 %v3285_v10, %v3803_v31 }
  0xc3   : > { %v965_v23 = vadd.f32 %v874_v55, %v723_v57  ;;  %v1181_v40 = vsel %vm597_vm0, %v1179_v59, %v1180_v60  ;;  %v1182_v47 = vrot.slane %v1073_v28, 1  ;;  %v1549_v32 = vmul.f32 %v3931_v3, %v3287_v11 }
  0xc4   : > { %v1031_v21 = vadd.f32 %v999_v51, %v964_v62  ;;  %v1420_v34 = vrot.slane %v1312_v63, 2  ;;  %v1421_v36 = vrot.slane %v1313_v0, 2  ;;  %v1423_v38 = vrot.slane %v1314_v13, 2 }
  0xc5   : > { %v1032_v39 = vadd.f32 %v1000_v27, %v965_v23  ;;  %v1183_v41 = vsel %vm597_vm0, %v1180_v60, %v1182_v47  ;;  %v1550_v46 = vmul.f32 %v3934_v20, %v3287_v11  ;;  %v1621_v48 = vmul.f32 %v3931_v3, %v3292_v15 }
  0xc6   : > { %v1273_v24 = vadd.f32 %v1181_v40, %v1031_v21  ;;  %v1422_v25 = vsel %vm839_vm1, %v1420_v34, %v1421_v36  ;;  %v1424_v49 = vsel %vm839_vm1, %v1421_v36, %v1423_v38  ;;  %v1622_v50 = vmul.f32 %v3934_v20, %v3292_v15 }
  0xc7   : > { %v1274_v51 = vadd.f32 %v1183_v41, %v1032_v39  ;;  %v1623_v53 = vmul.f32 %v3292_v15, %v3941_v33  ;;  %v1729_v54 = vrot.slane %v1621_v48, 1  ;;  %v1862_v26 = vmul.f32 %v3931_v3, %v3294_v16 }
  0xc8   : > { %v1514_v42 = vadd.f32 %v1422_v25, %v1273_v24  ;;  %v1730_v4 = vrot.slane %v1622_v50, 1  ;;  %v1863_v27 = vmul.f32 %v3934_v20, %v3294_v16  ;;  %v1864_v52 = vmul.f32 %v3294_v16, %v3941_v33 }
  0xc9   : > { %v1515_v29 = vadd.f32 %v1424_v49, %v1274_v51  ;;  %v1732_v30 = vrot.slane %v1623_v53, 1  ;;  %v1970_v56 = vrot.slane %v1862_v26, 2  ;;  %v450_v45 = vmul.f32 %v3270_v5, %v3721_v58 }
  0xca   : > { %v1581_v55 = vadd.f32 %v1549_v32, %v1514_v42  ;;  %v1731_v57 = vsel %vm597_vm0, %v1729_v54, %v1730_v4  ;;  %v1971_v28 = vrot.slane %v1863_v27, 2  ;;  %v1973_v59 = vrot.slane %v1864_v52, 2  ;;  %v381_v42 = vld [vmem:[%s3279_s21 + $0xcc] sm:$0xff]  }
  0xcb   : > { %v1582_v60 = vadd.f32 %v1550_v46, %v1515_v29  ;;  %v1733_v62 = vsel %vm597_vm0, %v1730_v4, %v1732_v30  ;;  %v451_v63 = vmul.f32 %v3270_v5, %v3726_v2  ;;  %v546_v0 = vmul.f32 %v3272_v6, %v3721_v58 }
  0xcc   : > { %v1823_v13 = vadd.f32 %v1731_v57, %v1581_v55  ;;  %v1972_v23 = vsel %vm839_vm1, %v1970_v56, %v1971_v28  ;;  %v1974_v40 = vsel %vm839_vm1, %v1971_v28, %v1973_v59  ;;  %v547_v47 = vmul.f32 %v3272_v6, %v3726_v2 }
  0xcd   : > { %v1824_v32 = vadd.f32 %v1733_v62, %v1582_v60  ;;  %v548_v21 = vmul.f32 %v3272_v6, %v3734_v17  ;;  %v673_v34 = vrot.slane %v546_v0, 1  ;;  %v788_v36 = vmul.f32 %v3274_v7, %v3721_v58  ;;  %v383_v62 = vld [vmem:[%s3279_s21 + $0xd4] sm:$0x1] }
  0xce   : > { %v2064_v38 = vadd.f32 %v1972_v23, %v1823_v13  ;;  %v674_v39 = vrot.slane %v547_v47, 1  ;;  %v789_v41 = vmul.f32 %v3274_v7, %v3726_v2  ;;  %v790_v46 = vmul.f32 %v3274_v7, %v3734_v17 }
  0xcf   : > { %v2065_v48 = vadd.f32 %v1974_v40, %v1824_v32  ;;  %v676_v24 = vrot.slane %v548_v21, 1  ;;  %v915_v25 = vrot.slane %v788_v36, 2  ;;  %v1017_v49 = vmul.f32 %v3859_v19, %v3281_v8 }
  0xd0   : > { %v675_v50 = vsel %vm597_vm0, %v673_v34, %v674_v39  ;;  %v916_v51 = vrot.slane %v789_v41, 2  ;;  %v918_v53 = vrot.slane %v790_v46, 2  ;;  %v1018_v58 = vmul.f32 %v3863_v1, %v3281_v8 }
  0xd1   : > { %v2090_v54 = vpack.c.bf16 %v2065_v48, %v2064_v38  ;;  %v677_v26 = vsel %vm597_vm0, %v674_v39, %v676_v24  ;;  %v740_v2 = vadd.f32 %v675_v50, %v450_v45  ;;  %v1098_v17 = vmul.f32 %v3859_v19, %v3283_v9 }
  0xd2   : > { %v741_v4 = vadd.f32 %v677_v26, %v451_v63  ;;  %v917_v27 = vsel %vm839_vm1, %v915_v25, %v916_v51  ;;  %v919_v52 = vsel %vm839_vm1, %v916_v51, %v918_v53  ;;  %v1099_v29 = vmul.f32 %v3863_v1, %v3283_v9 }
  0xd3   : > { %2981 = vmatmul.msk.bf16.gmra.mxu0 %vm2116_vm2, %v2090_v54  ;;  %v982_v30 = vadd.f32 %v917_v27, %v740_v2  ;;  %v1100_v56 = vmul.f32 %v3283_v9, %v3892_v14  ;;  %v1224_v45 = vrot.slane %v1098_v17, 1  ;;  %v1339_v55 = vmul.f32 %v3859_v19, %v3285_v10  ;;  %v357_v54 = vld [vmem:[%s3279_s21 + $0x6c] sm:$0xff]  }
  0xd4   : > { %v983_v57 = vadd.f32 %v919_v52, %v741_v4  ;;  %v1225_v28 = vrot.slane %v1099_v29, 1  ;;  %v1340_v59 = vmul.f32 %v3863_v1, %v3285_v10  ;;  %v1341_v60 = vmul.f32 %v3285_v10, %v3892_v14  ;;  %v3126_v14 = vld [vmem:[%s4681_s7 + $0x8] sm:$0xff] }
  0xd5   : > { %v1049_v63 = vadd.f32 %v1017_v49, %v982_v30  ;;  %v1227_v0 = vrot.slane %v1100_v56, 1  ;;  %v1465_v13 = vrot.slane %v1339_v55, 2  ;;  %v1534_v23 = vunpack.c.l.bf16 %v381_v42  ;;  %3173 = vmatpush.bf16.msrb.mxu3 %v3126_v14  ;;  %2560 = vmatpush.bf16.msra.mxu1 %v3126_v14  ;;  %v359_v30 = vld [vmem:[%s3279_s21 + $0x74] sm:$0x1]  ;;  %v4083_v14 = vpop.f32.mrf.mxu0 }
  0xd6   : > { %v1050_v40 = vadd.f32 %v1018_v58, %v983_v57  ;;  %v1226_v47 = vsel %vm597_vm0, %v1224_v45, %v1225_v28  ;;  %v1466_v32 = vrot.slane %v1340_v59, 2  ;;  %v1468_v21 = vrot.slane %v1341_v60, 2 }
  0xd7   : > { %v1228_v19 = vsel %vm597_vm0, %v1225_v28, %v1227_v0  ;;  %v1291_v34 = vadd.f32 %v1226_v47, %v1049_v63  ;;  %v1535_v36 = vunpack.c.h.bf16 %v381_v42  ;;  %v1567_v1 = vmul.f32 %v3287_v11, %v1534_v23 }
  0xd8   : > { %v1292_v38 = vadd.f32 %v1228_v19, %v1050_v40  ;;  %v1467_v39 = vsel %vm839_vm1, %v1465_v13, %v1466_v32  ;;  %v1469_v41 = vsel %vm839_vm1, %v1466_v32, %v1468_v21  ;;  %v1601_v46 = vunpack.c.l.bf16 %v383_v62 }
  0xd9   : > { %v1532_v48 = vadd.f32 %v1467_v39, %v1291_v34  ;;  %v1568_v24 = vmul.f32 %v3287_v11, %v1535_v36  ;;  %v1648_v25 = vmul.f32 %v3292_v15, %v1534_v23  ;;  %v1649_v49 = vmul.f32 %v3292_v15, %v1535_v36 }
  0xda   : > { %v1533_v50 = vadd.f32 %v1469_v41, %v1292_v38  ;;  %v1650_v51 = vmul.f32 %v3292_v15, %v1601_v46  ;;  %v1889_v53 = vmul.f32 %v3294_v16, %v1534_v23  ;;  %v1890_v58 = vmul.f32 %v3294_v16, %v1535_v36 }
  0xdb   : > { %v1599_v26 = vadd.f32 %v1567_v1, %v1532_v48  ;;  %v1774_v2 = vrot.slane %v1648_v25, 1  ;;  %v1775_v17 = vrot.slane %v1649_v49, 1  ;;  %v1891_v42 = vmul.f32 %v3294_v16, %v1601_v46 }
  0xdc   : > { %v1600_v4 = vadd.f32 %v1568_v24, %v1533_v50  ;;  %v1777_v27 = vrot.slane %v1650_v51, 1  ;;  %v2015_v52 = vrot.slane %v1889_v53, 2  ;;  %v2016_v29 = vrot.slane %v1890_v58, 2 }
  0xdd   : > { %v1776_v56 = vsel %vm597_vm0, %v1774_v2, %v1775_v17  ;;  %v2018_v45 = vrot.slane %v1891_v42, 2  ;;  %v4057_v55 = vunpack.c.l.bf16 %v357_v54  ;;  %v4059_v57 = vunpack.c.h.bf16 %v357_v54 }
  0xde   : > { %v1778_v28 = vsel %vm597_vm0, %v1775_v17, %v1777_v27  ;;  %v1841_v59 = vadd.f32 %v1776_v56, %v1599_v26  ;;  %v2017_v60 = vsel %vm839_vm1, %v2015_v52, %v2016_v29  ;;  %v434_v62 = vmul.f32 %v3270_v5, %v3792_v61 }
  0xdf   : > { %v1842_v63 = vadd.f32 %v1778_v28, %v1600_v4  ;;  %v2019_v0 = vsel %vm839_vm1, %v2016_v29, %v2018_v45  ;;  %v435_v13 = vmul.f32 %v3270_v5, %v3795_v12  ;;  %v4069_v23 = vunpack.c.l.bf16 %v359_v30 }
  0xe0   : > { %v2082_v40 = vadd.f32 %v2017_v60, %v1841_v59  ;;  %v522_v47 = vmul.f32 %v3272_v6, %v3792_v61  ;;  %v523_v32 = vmul.f32 %v3272_v6, %v3795_v12  ;;  %v524_v21 = vmul.f32 %v3272_v6, %v3803_v31 }
  0xe1   : > { %v2083_v19 = vadd.f32 %v2019_v0, %v1842_v63  ;;  %v764_v34 = vmul.f32 %v3274_v7, %v3792_v61  ;;  %v765_v36 = vmul.f32 %v3274_v7, %v3795_v12  ;;  %v766_v1 = vmul.f32 %v3274_v7, %v3803_v31 }
  0xe2   : > { %v633_v38 = vrot.slane %v522_v47, 1  ;;  %v634_v39 = vrot.slane %v523_v32, 1  ;;  %v636_v41 = vrot.slane %v524_v21, 1  ;;  %v1001_v61 = vmul.f32 %v3931_v3, %v3281_v8  ;;  %v4130_v32 = vld [vmem:[%s4678_s4] ss:$0 sm:$0xff] }
  0xe3   : > { %v2099_v46 = vpack.c.bf16 %v2083_v19, %v2082_v40  ;;  %v875_v12 = vrot.slane %v764_v34, 2  ;;  %v876_v48 = vrot.slane %v765_v36, 2  ;;  %v878_v24 = vrot.slane %v766_v1, 2  ;;  %v3125_v1 = vld [vmem:[%s4681_s7] sm:$0xff] }
  0xe4   : > { %v635_v31 = vsel %vm597_vm0, %v633_v38, %v634_v39  ;;  %v637_v25 = vsel %vm597_vm0, %v634_v39, %v636_v41  ;;  %v1002_v49 = vmul.f32 %v3934_v20, %v3281_v8  ;;  %v1074_v50 = vmul.f32 %v3931_v3, %v3283_v9  ;;  %v4137_v38 = vpop.f32.mrf.mxu0  ;;  %v3108_v39 = vld [vmem:[%s4680_s6 + $0x8] sm:$0xff]  ;;  %3174 = vmatpush.bf16.msrb.mxu3 %v3125_v1 }
  0xe5   : > { %2990 = vmatmul.msk.bf16.gmra.mxu3 %vm2116_vm2, %v2099_v46  ;;  %v724_v51 = vadd.f32 %v635_v31, %v434_v62  ;;  %v725_v53 = vadd.f32 %v637_v25, %v435_v13  ;;  %v877_v58 = vsel %vm839_vm1, %v875_v12, %v876_v48  ;;  %v879_v54 = vsel %vm839_vm1, %v876_v48, %v878_v24  ;;  %v4151_v48 = vld [vmem:[%s4679_s5] ss:$0 sm:$0xff] }
  0xe6   : > { %v1075_v26 = vmul.f32 %v3934_v20, %v3283_v9  ;;  %v1076_v2 = vmul.f32 %v3283_v9, %v3941_v33  ;;  %v1184_v17 = vrot.slane %v1074_v50, 1  ;;  %v1315_v42 = vmul.f32 %v3931_v3, %v3285_v10  ;;  %v3109_v50 = vld [vmem:[%s4158_s16] sm:$0xff]  ;;  %2709 = vmatpush.bf16.msra.mxu2 %v3108_v39  ;;  %2561 = vmatpush.bf16.msra.mxu1 %v3125_v1 }
  0xe7   : > { %v966_v4 = vadd.f32 %v877_v58, %v724_v51  ;;  %v967_v27 = vadd.f32 %v879_v54, %v725_v53  ;;  %v1316_v52 = vmul.f32 %v3934_v20, %v3285_v10  ;;  %v1317_v29 = vmul.f32 %v3285_v10, %v3941_v33 }
  0xe8   : > { %v1185_v30 = vrot.slane %v1075_v26, 1  ;;  %v1187_v56 = vrot.slane %v1076_v2, 1  ;;  %v1425_v45 = vrot.slane %v1315_v42, 2  ;;  %v1551_v28 = vmul.f32 %v3287_v11, %v4057_v55  ;;  %v3107_v26 = vld [vmem:[%s4680_s6] sm:$0xff]  ;;  %3175 = vmatpush.bf16.msra.mxu3 %v3108_v39 }
  0xe9   : > { %v1033_v59 = vadd.f32 %v1001_v61, %v966_v4  ;;  %v1034_v60 = vadd.f32 %v1002_v49, %v967_v27  ;;  %v1426_v62 = vrot.slane %v1316_v52, 2  ;;  %v1428_v63 = vrot.slane %v1317_v29, 2  ;;  %v3167_v27 = vld [vmem:[%s3279_s21 + $0x78] sm:$0xff]   ;;  %3063 = vmatmul.msk.bf16.vlgmr.msra.gmra.mxu1 %vm2116_vm2, %v3109_v50 }
  0xea   : > { %v1186_v0 = vsel %vm597_vm0, %v1184_v17, %v1185_v30  ;;  %v1188_v13 = vsel %vm597_vm0, %v1185_v30, %v1187_v56  ;;  %v1552_v40 = vmul.f32 %v3287_v11, %v4059_v57  ;;  %v1624_v47 = vmul.f32 %v3292_v15, %v4057_v55  ;;  %2710 = vmatpush.bf16.msra.mxu2 %v3107_v26 }
  0xeb   : > { %v1275_v21 = vadd.f32 %v1186_v0, %v1033_v59  ;;  %v1276_v19 = vadd.f32 %v1188_v13, %v1034_v60  ;;  %v1427_v34 = vsel %vm839_vm1, %v1425_v45, %v1426_v62  ;;  %v1429_v36 = vsel %vm839_vm1, %v1426_v62, %v1428_v63 }
  0xec   : > { %v1625_v41 = vmul.f32 %v3292_v15, %v4059_v57  ;;  %v1626_v61 = vmul.f32 %v3292_v15, %v4069_v23  ;;  %v1734_v46 = vrot.slane %v1624_v47, 1  ;;  %v1865_v12 = vmul.f32 %v3294_v16, %v4057_v55  ;;  %3176 = vmatpush.bf16.msra.mxu3 %v3107_v26 }
  0xed   : > { %v1516_v24 = vadd.f32 %v1427_v34, %v1275_v21  ;;  %v1517_v31 = vadd.f32 %v1429_v36, %v1276_v19  ;;  %v1866_v25 = vmul.f32 %v3294_v16, %v4059_v57  ;;  %v1867_v49 = vmul.f32 %v3294_v16, %v4069_v23 }
  0xee   : > { %v1735_v51 = vrot.slane %v1625_v41, 1  ;;  %v1737_v53 = vrot.slane %v1626_v61, 1  ;;  %v1975_v58 = vrot.slane %v1865_v12, 2  ;;  %v2258_v54 = vmul.f32 %v4130_v32, %v4083_v14  ;;  %v362_v14 = vld [vmem:[%s3279_s21 + $0x80] sm:$0x1] }
  0xef   : > { %v1583_v2 = vadd.f32 %v1551_v28, %v1516_v24  ;;  %v1584_v17 = vadd.f32 %v1552_v40, %v1517_v31  ;;  %v1976_v42 = vrot.slane %v1866_v25, 2  ;;  %v1978_v4 = vrot.slane %v1867_v49, 2  ;;  %v3121_v28 = vld [vmem:[%s4158_s16 + $0x60] sm:$0xff]  ;;  %v2179_v24 = vpop.f32.mrf.mxu0 }
  0xf0   : > { %v1736_v52 = vsel %vm597_vm0, %v1734_v46, %v1735_v51  ;;  %v1738_v29 = vsel %vm597_vm0, %v1735_v51, %v1737_v53  ;;  %v4174_v30 = vadd.f32 %v4151_v48, %v2258_v54  ;;  %v4181_v62 = vunpack.c.l.bf16 %v3167_v27 }
  0xf1   : > { %v1825_v56 = vadd.f32 %v1736_v52, %v1583_v2  ;;  %v1826_v45 = vadd.f32 %v1738_v29, %v1584_v17  ;;  %v1977_v59 = vsel %vm839_vm1, %v1975_v58, %v1976_v42  ;;  %v1979_v60 = vsel %vm839_vm1, %v1976_v42, %v1978_v4 }
  0xf2   : > { %v4183_v63 = vunpack.c.h.bf16 %v3167_v27  ;;  %v436_v0 = vmul.f32 %v3931_v3, %v3270_v5  ;;  %v437_v13 = vmul.f32 %v3934_v20, %v3270_v5  ;;  %v4189_v21 = vunpack.c.l.bf16 %v362_v14 }
  0xf3   : > { %v2066_v40 = vadd.f32 %v1977_v59, %v1825_v56  ;;  %v2067_v47 = vadd.f32 %v1979_v60, %v1826_v45  ;;  %v525_v19 = vmul.f32 %v3931_v3, %v3272_v6  ;;  %v526_v34 = vmul.f32 %v3934_v20, %v3272_v6 }
  0xf4   : > { %v527_v36 = vmul.f32 %v3272_v6, %v3941_v33  ;;  %v767_v1 = vmul.f32 %v3931_v3, %v3274_v7  ;;  %v768_v39 = vmul.f32 %v3934_v20, %v3274_v7  ;;  %v769_v46 = vmul.f32 %v3274_v7, %v3941_v33 }
  0xf5   : > { %v2091_v41 = vpack.c.bf16 %v2067_v47, %v2066_v40  ;;  %v638_v61 = vrot.slane %v525_v19, 1  ;;  %v1003_v12 = vmul.f32 %v3281_v8, %v4057_v55  ;;  %3075 = vmatmul.msk.bf16.vlgmr.msrb.gmra.mxu3 %vm2116_vm2, %v3121_v28  ;;  %v639_v31 = vrot.slane %v526_v34, 1 }
  0xf6   : > { %v641_v25 = vrot.slane %v527_v36, 1  ;;  %v880_v49 = vrot.slane %v767_v1, 2  ;;  %v881_v50 = vrot.slane %v768_v39, 2  ;;  %v883_v3 = vrot.slane %v769_v46, 2 }
  0xf7   : > { %2982 = vmatmul.msk.bf16.gmra.mxu0 %vm2116_vm2, %v2091_v41  ;;  %v1004_v20 = vmul.f32 %v3281_v8, %v4059_v57  ;;  %v1077_v51 = vmul.f32 %v3283_v9, %v4057_v55  ;;  %v1078_v33 = vmul.f32 %v3283_v9, %v4059_v57  ;;  %v640_v53 = vsel %vm597_vm0, %v638_v61, %v639_v31 }
  0xf8   : > { %v642_v58 = vsel %vm597_vm0, %v639_v31, %v641_v25  ;;  %v882_v54 = vsel %vm839_vm1, %v880_v49, %v881_v50  ;;  %v1079_v26 = vmul.f32 %v3283_v9, %v4069_v23  ;;  %v726_v2 = vadd.f32 %v640_v53, %v436_v0  ;;  %v4241_v49 = vpop.f32.mrf.mxu0 }
  0xf9   : > { %v727_v17 = vadd.f32 %v642_v58, %v437_v13  ;;  %v884_v42 = vsel %vm839_vm1, %v881_v50, %v883_v3  ;;  %v1189_v4 = vrot.slane %v1077_v51, 1  ;;  %v1190_v27 = vrot.slane %v1078_v33, 1  ;;  %v3110_v50 = vld [vmem:[%s4158_s16 + $0x8] sm:$0xff] }
  0xfa   : > { %v1192_v52 = vrot.slane %v1079_v26, 1  ;;  %v1318_v29 = vmul.f32 %v3285_v10, %v4057_v55  ;;  %v1319_v14 = vmul.f32 %v3285_v10, %v4059_v57  ;;  %v968_v56 = vadd.f32 %v882_v54, %v726_v2  ;;  %v363_v2 = vld [vmem:[%s3279_s21 + $0x84] sm:$0xff]   ;;  %3064 = vmatmul.msk.bf16.gmra.mxu1 %vm2116_vm2, %v3110_v50 }
  0xfb   : > { %v969_v45 = vadd.f32 %v884_v42, %v727_v17  ;;  %v1320_v59 = vmul.f32 %v3285_v10, %v4069_v23  ;;  %v1553_v60 = vmul.f32 %v4181_v62, %v3287_v11  ;;  %v1191_v28 = vsel %vm597_vm0, %v1189_v4, %v1190_v27  ;;  %v3122_v17 = vld [vmem:[%s4158_s16 + $0x68] sm:$0xff] }
  0xfc   : > { %v1193_v0 = vsel %vm597_vm0, %v1190_v27, %v1192_v52  ;;  %v1430_v13 = vrot.slane %v1318_v29, 2  ;;  %v1431_v40 = vrot.slane %v1319_v14, 2  ;;  %v1035_v47 = vadd.f32 %v1003_v12, %v968_v56 }
  0xfd   : > { %v1036_v19 = vadd.f32 %v1004_v20, %v969_v45  ;;  %v1433_v34 = vrot.slane %v1320_v59, 2  ;;  %v1554_v36 = vmul.f32 %v4183_v63, %v3287_v11  ;;  %v1627_v39 = vmul.f32 %v4181_v62, %v3292_v15 }
  0xfe   : > { %v1432_v1 = vsel %vm839_vm1, %v1430_v13, %v1431_v40  ;;  %v1628_v41 = vmul.f32 %v4183_v63, %v3292_v15  ;;  %v1629_v61 = vmul.f32 %v3292_v15, %v4189_v21  ;;  %v1277_v46 = vadd.f32 %v1191_v28, %v1035_v47  ;;  %v365_v13 = vld [vmem:[%s3279_s21 + $0x8c] sm:$0x1]  ;;  %s4572_s21 = scalar_lea.vmem %s4682_s8, %s2964_s26 }
  0xff   : > { %v1278_v12 = vadd.f32 %v1193_v0, %v1036_v19  ;;  %v1434_v31 = vsel %vm839_vm1, %v1431_v40, %v1433_v34  ;;  %v1868_v25 = vmul.f32 %v4181_v62, %v3294_v16  ;;  %v1739_v3 = vrot.slane %v1627_v39, 1 }
 0x100   : > { %v1740_v20 = vrot.slane %v1628_v41, 1  ;;  %v1742_v51 = vrot.slane %v1629_v61, 1  ;;  %v1869_v33 = vmul.f32 %v4183_v63, %v3294_v16  ;;  %v1518_v53 = vadd.f32 %v1432_v1, %v1277_v46  ;;  %v4283_v50 = vpop.f32.mrf.mxu0 }
 0x101   : > { %v1519_v58 = vadd.f32 %v1434_v31, %v1278_v12  ;;  %v1870_v54 = vmul.f32 %v3294_v16, %v4189_v21  ;;  %v1980_v26 = vrot.slane %v1868_v25, 2  ;;  %v2259_v52 = vmul.f32 %v4130_v32, %v4137_v38 }
 0x102   : > { %v1741_v42 = vsel %vm597_vm0, %v1739_v3, %v1740_v20  ;;  %v1743_v4 = vsel %vm597_vm0, %v1740_v20, %v1742_v51  ;;  %v1981_v27 = vrot.slane %v1869_v33, 2  ;;  %v1585_v29 = vadd.f32 %v1553_v60, %v1518_v53 }
 0x103   : > { %v1586_v14 = vadd.f32 %v1554_v36, %v1519_v58  ;;  %v1983_v56 = vrot.slane %v1870_v54, 2  ;;  %v2260_v45 = vmul.f32 %v4130_v32, %v2179_v24  ;;  %v2326_v59 = vmax.f32 %v4174_v30, 0.0 }
 0x104   : > { %v1982_v28 = vsel %vm839_vm1, %v1980_v26, %v1981_v27  ;;  %v2295_v0 = vadd.f32 %v4151_v48, %v2259_v52  ;;  %v4260_v40 = vunpack.c.l.bf16 %v363_v2  ;;  %v1827_v47 = vadd.f32 %v1741_v42, %v1585_v29 }
 0x105   : > { %v1828_v19 = vadd.f32 %v1743_v4, %v1586_v14  ;;  %v1984_v34 = vsel %vm839_vm1, %v1981_v27, %v1983_v56  ;;  %v4263_v1 = vunpack.c.h.bf16 %v363_v2  ;;  %3076 = vmatmul.msk.bf16.gmra.mxu3 %vm2116_vm2, %v3122_v17  ;;  %v4267_v24 = vadd.f32 %v4151_v48, %v2260_v45 }
 0x106   : > { %v2327_v38 = vmax.f32 %v2295_v0, 0.0  ;;  %v438_v30 = vmul.f32 %v3270_v5, %v4057_v55  ;;  %v439_v60 = vmul.f32 %v3270_v5, %v4059_v57  ;;  %v2068_v36 = vadd.f32 %v1982_v28, %v1827_v47 }
 0x107   : > { %v2069_v39 = vadd.f32 %v1984_v34, %v1828_v19  ;;  %v4273_v41 = vunpack.c.l.bf16 %v365_v13  ;;  %v528_v61 = vmul.f32 %v3272_v6, %v4057_v55  ;;  %v529_v12 = vmul.f32 %v3272_v6, %v4059_v57 }
 0x108   : > { %v2358_v46 = vpack.c.bf16 %v2327_v38, %v2326_v59  ;;  %v530_v31 = vmul.f32 %v3272_v6, %v4069_v23  ;;  %v770_v25 = vmul.f32 %v3274_v7, %v4057_v55  ;;  %v771_v51 = vmul.f32 %v3274_v7, %v4059_v57 }
 0x109   : > { %v2092_v3 = vpack.c.bf16 %v2069_v39, %v2068_v36  ;;  %v643_v20 = vrot.slane %v528_v61, 1  ;;  %v772_v33 = vmul.f32 %v3274_v7, %v4069_v23  ;;  %v644_v53 = vrot.slane %v529_v12, 1 }
 0x10a   : > { %3087 = vmatmul.msk.bf16.vlgmr.msra.gmra.mxu2 %vm2116_vm2, %v2358_v46  ;;  %v646_v58 = vrot.slane %v530_v31, 1  ;;  %v885_v54 = vrot.slane %v770_v25, 2  ;;  %v1005_v26 = vmul.f32 %v4181_v62, %v3281_v8  ;;  %v886_v55 = vrot.slane %v771_v51, 2  ;;  %v4323_v51 = vpop.f32.mrf.mxu0 }
 0x10b   : > { %2983 = vmatmul.msk.bf16.gmra.mxu0 %vm2116_vm2, %v2092_v3  ;;  %v888_v2 = vrot.slane %v772_v33, 2  ;;  %v1006_v17 = vmul.f32 %v4183_v63, %v3281_v8  ;;  %v1080_v57 = vmul.f32 %v4181_v62, %v3283_v9  ;;  %v645_v23 = vsel %vm597_vm0, %v643_v20, %v644_v53  ;;  %v3123_v33 = vld [vmem:[%s4158_s16 + $0x70] sm:$0xff] }
 0x10c   : > { %v647_v42 = vsel %vm597_vm0, %v644_v53, %v646_v58  ;;  %v1081_v4 = vmul.f32 %v4183_v63, %v3283_v9  ;;  %v1082_v27 = vmul.f32 %v3283_v9, %v4189_v21  ;;  %v728_v52 = vadd.f32 %v645_v23, %v438_v30  ;;  %v3111_v53 = vld [vmem:[%s4158_s16 + $0x10] sm:$0xff] }
 0x10d   : > { %v729_v29 = vadd.f32 %v647_v42, %v439_v60  ;;  %v887_v14 = vsel %vm839_vm1, %v885_v54, %v886_v55  ;;  %v889_v56 = vsel %vm839_vm1, %v886_v55, %v888_v2  ;;  %v1194_v45 = vrot.slane %v1080_v57, 1  ;;  %3065 = vmatmul.msk.bf16.gmra.mxu1 %vm2116_vm2, %v3111_v53 }
 0x10e   : > { %v1195_v59 = vrot.slane %v1081_v4, 1  ;;  %v1197_v28 = vrot.slane %v1082_v27, 1  ;;  %v1321_v0 = vmul.f32 %v4181_v62, %v3285_v10  ;;  %v970_v13 = vadd.f32 %v887_v14, %v728_v52 }
 0x10f   : > { %v971_v47 = vadd.f32 %v889_v56, %v729_v29  ;;  %v1322_v19 = vmul.f32 %v4183_v63, %v3285_v10  ;;  %v1323_v34 = vmul.f32 %v3285_v10, %v4189_v21  ;;  %v1555_v36 = vmul.f32 %v3287_v11, %v4260_v40 }
 0x110   : > { %v1196_v38 = vsel %vm597_vm0, %v1194_v45, %v1195_v59  ;;  %v1198_v30 = vsel %vm597_vm0, %v1195_v59, %v1197_v28  ;;  %v1435_v60 = vrot.slane %v1321_v0, 2  ;;  %v1037_v39 = vadd.f32 %v1005_v26, %v970_v13 }
 0x111   : > { %v1038_v61 = vadd.f32 %v1006_v17, %v971_v47  ;;  %v1436_v46 = vrot.slane %v1322_v19, 2  ;;  %v1438_v12 = vrot.slane %v1323_v34, 2  ;;  %v1556_v31 = vmul.f32 %v3287_v11, %v4263_v1 }
 0x112   : > { %v1630_v25 = vmul.f32 %v3292_v15, %v4260_v40  ;;  %v1631_v3 = vmul.f32 %v3292_v15, %v4263_v1  ;;  %v1632_v20 = vmul.f32 %v3292_v15, %v4273_v41  ;;  %v1279_v58 = vadd.f32 %v1196_v38, %v1037_v39 }
 0x113   : > { %v1280_v54 = vadd.f32 %v1198_v30, %v1038_v61  ;;  %v1437_v26 = vsel %vm839_vm1, %v1435_v60, %v1436_v46  ;;  %v1439_v55 = vsel %vm839_vm1, %v1436_v46, %v1438_v12  ;;  %v1871_v23 = vmul.f32 %v3294_v16, %v4260_v40 }
 0x114   : > { %v1744_v2 = vrot.slane %v1630_v25, 1  ;;  %v1745_v17 = vrot.slane %v1631_v3, 1  ;;  %v1747_v57 = vrot.slane %v1632_v20, 1  ;;  %v1520_v42 = vadd.f32 %v1437_v26, %v1279_v58  ;;  %v4362_v58 = vpop.f32.mrf.mxu0 }
 0x115   : > { %v1521_v4 = vadd.f32 %v1439_v55, %v1280_v54  ;;  %v1872_v27 = vmul.f32 %v3294_v16, %v4263_v1  ;;  %v1873_v52 = vmul.f32 %v3294_v16, %v4273_v41  ;;  %3077 = vmatmul.msk.bf16.gmra.mxu3 %vm2116_vm2, %v3123_v33  ;;  %v1985_v56 = vrot.slane %v1871_v23, 2 }
 0x116   : > { %v1746_v29 = vsel %vm597_vm0, %v1744_v2, %v1745_v17  ;;  %v1748_v14 = vsel %vm597_vm0, %v1745_v17, %v1747_v57  ;;  %v2261_v45 = vmul.f32 %v4130_v32, %v4241_v49  ;;  %v1587_v59 = vadd.f32 %v1555_v36, %v1520_v42 }
 0x117   : > { %v1588_v28 = vadd.f32 %v1556_v31, %v1521_v4  ;;  %v1986_v0 = vrot.slane %v1872_v27, 2  ;;  %v1988_v13 = vrot.slane %v1873_v52, 2  ;;  %v2328_v47 = vmax.f32 %v4267_v24, 0.0 }
 0x118   : > { %v2297_v19 = vadd.f32 %v4151_v48, %v2261_v45  ;;  %v2262_v34 = vmul.f32 %v4130_v32, %v4283_v50  ;;  %v440_v38 = vmul.f32 %v4181_v62, %v3270_v5  ;;  %v1829_v30 = vadd.f32 %v1746_v29, %v1587_v59 }
 0x119   : > { %v1830_v60 = vadd.f32 %v1748_v14, %v1588_v28  ;;  %v1987_v39 = vsel %vm839_vm1, %v1985_v56, %v1986_v0  ;;  %v1989_v49 = vsel %vm839_vm1, %v1986_v0, %v1988_v13  ;;  %v441_v61 = vmul.f32 %v4183_v63, %v3270_v5 }
 0x11a   : > { %v2329_v36 = vmax.f32 %v2297_v19, 0.0  ;;  %v531_v24 = vmul.f32 %v4181_v62, %v3272_v6  ;;  %v532_v46 = vmul.f32 %v4183_v63, %v3272_v6  ;;  %v2070_v50 = vadd.f32 %v1987_v39, %v1829_v30 }
 0x11b   : > { %v2071_v12 = vadd.f32 %v1989_v49, %v1830_v60  ;;  %v533_v31 = vmul.f32 %v3272_v6, %v4189_v21  ;;  %v773_v25 = vmul.f32 %v4181_v62, %v3274_v7  ;;  %v4360_v3 = vadd.f32 %v4151_v48, %v2262_v34 }
 0x11c   : > { %v2359_v20 = vpack.c.bf16 %v2329_v36, %v2328_v47  ;;  %v648_v33 = vrot.slane %v531_v24, 1  ;;  %v649_v53 = vrot.slane %v532_v46, 1  ;;  %v774_v55 = vmul.f32 %v4183_v63, %v3274_v7 }
 0x11d   : > { %v2093_v54 = vpack.c.bf16 %v2071_v12, %v2070_v50  ;;  %v651_v26 = vrot.slane %v533_v31, 1  ;;  %v775_v2 = vmul.f32 %v3274_v7, %v4189_v21  ;;  %v890_v17 = vrot.slane %v773_v25, 2 }
 0x11e   : > { %3088 = vmatmul.msk.bf16.gmra.mxu2 %vm2116_vm2, %v2359_v20  ;;  %v650_v62 = vsel %vm597_vm0, %v648_v33, %v649_v53  ;;  %v1007_v57 = vmul.f32 %v3281_v8, %v4260_v40  ;;  %v1008_v23 = vmul.f32 %v3281_v8, %v4263_v1  ;;  %v891_v63 = vrot.slane %v774_v55, 2  ;;  %v3112_v55 = vld [vmem:[%s4158_s16 + $0x18] sm:$0xff] }
 0x11f   : > { %2984 = vmatmul.msk.bf16.gmra.mxu0 %vm2116_vm2, %v2093_v54  ;;  %v652_v42 = vsel %vm597_vm0, %v649_v53, %v651_v26  ;;  %v730_v4 = vadd.f32 %v650_v62, %v440_v38  ;;  %v893_v27 = vrot.slane %v775_v2, 2  ;;  %v1083_v21 = vmul.f32 %v3283_v9, %v4260_v40  ;;  %v4401_v53 = vpop.f32.mrf.mxu0  ;;  %v4403_v54 = vpop.f32.mrf.mxu3  ;;  %v3124_v26 = vld [vmem:[%s4158_s16 + $0x78] sm:$0xff]  ;;  %3066 = vmatmul.msk.bf16.gmra.mxu1 %vm2116_vm2, %v3112_v55 }
 0x120   : > { %v731_v52 = vadd.f32 %v652_v42, %v441_v61  ;;  %v1084_v29 = vmul.f32 %v3283_v9, %v4263_v1  ;;  %v1085_v14 = vmul.f32 %v3283_v9, %v4273_v41  ;;  %v892_v56 = vsel %vm839_vm1, %v890_v17, %v891_v63 }
 0x121   : > { %v894_v45 = vsel %vm839_vm1, %v891_v63, %v893_v27  ;;  %v1324_v59 = vmul.f32 %v3285_v10, %v4260_v40  ;;  %v1325_v28 = vmul.f32 %v3285_v10, %v4263_v1  ;;  %v972_v0 = vadd.f32 %v892_v56, %v730_v4 }
 0x122   : > { %v973_v13 = vadd.f32 %v894_v45, %v731_v52  ;;  %v1199_v47 = vrot.slane %v1083_v21, 1  ;;  %v1200_v19 = vrot.slane %v1084_v29, 1  ;;  %v1202_v34 = vrot.slane %v1085_v14, 1 }
 0x123   : > { %v1326_v38 = vmul.f32 %v3285_v10, %v4273_v41  ;;  %v1440_v30 = vrot.slane %v1324_v59, 2  ;;  %v1441_v60 = vrot.slane %v1325_v28, 2  ;;  %v1039_v39 = vadd.f32 %v1007_v57, %v972_v0 }
 0x124   : > { %v1040_v49 = vadd.f32 %v1008_v23, %v973_v13  ;;  %v1201_v36 = vsel %vm597_vm0, %v1199_v47, %v1200_v19  ;;  %v1557_v61 = vmul.f32 %v3569_v22, %v3287_v11  ;;  %v1203_v24 = vsel %vm597_vm0, %v1200_v19, %v1202_v34 }
 0x125   : > { %v1442_v46 = vsel %vm839_vm1, %v1440_v30, %v1441_v60  ;;  %v1443_v50 = vrot.slane %v1326_v38, 2  ;;  %v1558_v12 = vmul.f32 %v3573_v18, %v3287_v11  ;;  %v1281_v31 = vadd.f32 %v1201_v36, %v1039_v39  ;;  %3078 = vmatmul.msk.bf16.gmra.mxu3 %vm2116_vm2, %v3124_v26 }
 0x126   : > { %v1282_v25 = vadd.f32 %v1203_v24, %v1040_v49  ;;  %v1633_v20 = vmul.f32 %v3569_v22, %v3292_v15  ;;  %v1634_v33 = vmul.f32 %v3573_v18, %v3292_v15  ;;  %v1635_v62 = vmul.f32 %v3292_v15, %v3592_v43 }
 0x127   : > { %v1444_v2 = vsel %vm839_vm1, %v1441_v60, %v1443_v50  ;;  %v1874_v17 = vmul.f32 %v3569_v22, %v3294_v16  ;;  %v1875_v57 = vmul.f32 %v3573_v18, %v3294_v16  ;;  %v1522_v23 = vadd.f32 %v1442_v46, %v1281_v31  ;;  %v4437_v24 = vpop.f32.mrf.mxu3  ;;  %v4447_v55 = vpop.f32.mrf.mxu0 }
 0x128   : > { %v1523_v42 = vadd.f32 %v1444_v2, %v1282_v25  ;;  %v1749_v4 = vrot.slane %v1633_v20, 1  ;;  %v1750_v63 = vrot.slane %v1634_v33, 1  ;;  %v1752_v27 = vrot.slane %v1635_v62, 1 }
 0x129   : > { %v1876_v52 = vmul.f32 %v3294_v16, %v3592_v43  ;;  %v1990_v21 = vrot.slane %v1874_v17, 2  ;;  %v1991_v29 = vrot.slane %v1875_v57, 2  ;;  %v1589_v14 = vadd.f32 %v1557_v61, %v1522_v23 }
 0x12a   : > { %v1590_v56 = vadd.f32 %v1558_v12, %v1523_v42  ;;  %v1751_v45 = vsel %vm597_vm0, %v1749_v4, %v1750_v63  ;;  %v2263_v59 = vmul.f32 %v4130_v32, %v4323_v51  ;;  %v1753_v28 = vsel %vm597_vm0, %v1750_v63, %v1752_v27 }
 0x12b   : > { %v1992_v0 = vsel %vm839_vm1, %v1990_v21, %v1991_v29  ;;  %v1993_v13 = vrot.slane %v1876_v52, 2  ;;  %v2264_v47 = vmul.f32 %v4130_v32, %v4362_v58  ;;  %v2330_v19 = vmax.f32 %v4360_v3, 0.0  ;;  %v3113_v21 = vld [vmem:[%s4158_s16 + $0x20] sm:$0xff] }
 0x12c   : > { %v1831_v34 = vadd.f32 %v1751_v45, %v1589_v14  ;;  %v1832_v38 = vadd.f32 %v1753_v28, %v1590_v56  ;;  %v2299_v30 = vadd.f32 %v4151_v48, %v2263_v59  ;;  %v442_v51 = vmul.f32 %v3270_v5, %v4260_v40 }
 0x12d   : > { %v1994_v60 = vsel %vm839_vm1, %v1991_v29, %v1993_v13  ;;  %v4429_v39 = vadd.f32 %v4151_v48, %v2264_v47  ;;  %v534_v49 = vmul.f32 %v3272_v6, %v4260_v40  ;;  %v535_v3 = vmul.f32 %v3272_v6, %v4263_v1 }
 0x12e   : > { %v2072_v36 = vadd.f32 %v1992_v0, %v1831_v34  ;;  %v2073_v61 = vadd.f32 %v1994_v60, %v1832_v38  ;;  %v2331_v58 = vmax.f32 %v2299_v30, 0.0  ;;  %v443_v46 = vmul.f32 %v3270_v5, %v4263_v1 }
 0x12f   : > { %v536_v50 = vmul.f32 %v3272_v6, %v4273_v41  ;;  %v653_v12 = vrot.slane %v534_v49, 1  ;;  %v776_v31 = vmul.f32 %v3274_v7, %v4260_v40  ;;  %v654_v33 = vrot.slane %v535_v3, 1  ;;  %v2239_v34 = vpop.f32.mrf.mxu3  ;;  %3067 = vmatmul.msk.bf16.gmra.mxu1 %vm2116_vm2, %v3113_v21  ;;  %v2196_v3 = vpop.f32.mrf.mxu0 }
 0x130   : > { %v2094_v25 = vpack.c.bf16 %v2073_v61, %v2072_v36  ;;  %v2360_v20 = vpack.c.bf16 %v2331_v58, %v2330_v19  ;;  %v777_v26 = vmul.f32 %v3274_v7, %v4263_v1  ;;  %v778_v62 = vmul.f32 %v3274_v7, %v4273_v41 }
 0x131   : > { %v656_v2 = vrot.slane %v536_v50, 1  ;;  %v895_v5 = vrot.slane %v776_v31, 2  ;;  %v1009_v6 = vmul.f32 %v3569_v22, %v3281_v8  ;;  %v655_v40 = vsel %vm597_vm0, %v653_v12, %v654_v33 }
 0x132   : > { %2985 = vmatmul.msk.bf16.gmra.mxu0 %vm2116_vm2, %v2094_v25  ;;  %3089 = vmatmul.msk.bf16.gmra.mxu2 %vm2116_vm2, %v2360_v20  ;;  %v896_v17 = vrot.slane %v777_v26, 2  ;;  %v1010_v1 = vmul.f32 %v3573_v18, %v3281_v8  ;;  %v1086_v57 = vmul.f32 %v3569_v22, %v3283_v9  ;;  %v732_v41 = vadd.f32 %v655_v40, %v442_v51 }
 0x133   : > { %v657_v7 = vsel %vm597_vm0, %v654_v33, %v656_v2  ;;  %v898_v23 = vrot.slane %v778_v62, 2  ;;  %v1087_v42 = vmul.f32 %v3573_v18, %v3283_v9  ;;  %v1088_v27 = vmul.f32 %v3283_v9, %v3592_v43 }
 0x134   : > { %v733_v4 = vadd.f32 %v657_v7, %v443_v46  ;;  %v897_v63 = vsel %vm839_vm1, %v895_v5, %v896_v17  ;;  %v1204_v52 = vrot.slane %v1086_v57, 1  ;;  %v1327_v56 = vmul.f32 %v3569_v22, %v3285_v10 }
 0x135   : > { %v899_v8 = vsel %vm839_vm1, %v896_v17, %v898_v23  ;;  %v974_v29 = vadd.f32 %v897_v63, %v732_v41  ;;  %v1205_v14 = vrot.slane %v1087_v42, 1  ;;  %v1207_v59 = vrot.slane %v1088_v27, 1 }
 0x136   : > { %v975_v45 = vadd.f32 %v899_v8, %v733_v4  ;;  %v1328_v28 = vmul.f32 %v3573_v18, %v3285_v10  ;;  %v1329_v0 = vmul.f32 %v3285_v10, %v3592_v43  ;;  %v1445_v47 = vrot.slane %v1327_v56, 2 }
 0x137   : > { %v1041_v13 = vadd.f32 %v1009_v6, %v974_v29  ;;  %v1206_v9 = vsel %vm597_vm0, %v1204_v52, %v1205_v14  ;;  %v1559_v19 = vmul.f32 %v3287_v11, %v3584_v35  ;;  %v1208_v30 = vsel %vm597_vm0, %v1205_v14, %v1207_v59  ;;  %v2241_v4 = vpop.f32.mrf.mxu3  ;;  %v2199_v29 = vpop.f32.mrf.mxu0  ;;  %v3114_v14 = vld [vmem:[%s4158_s16 + $0x28] sm:$0xff] }
 0x138   : > { %v1042_v38 = vadd.f32 %v1010_v1, %v975_v45  ;;  %v1446_v22 = vrot.slane %v1328_v28, 2  ;;  %v1448_v60 = vrot.slane %v1329_v0, 2  ;;  %v1560_v18 = vmul.f32 %v3287_v11, %v3586_v37 }
 0x139   : > { %v1283_v51 = vadd.f32 %v1206_v9, %v1041_v13  ;;  %v1636_v10 = vmul.f32 %v3292_v15, %v3584_v35  ;;  %v1637_v43 = vmul.f32 %v3292_v15, %v3586_v37  ;;  %v1638_v58 = vmul.f32 %v3292_v15, %v3594_v44 }
 0x13a   : > { %v1284_v49 = vadd.f32 %v1208_v30, %v1042_v38  ;;  %v1447_v36 = vsel %vm839_vm1, %v1445_v47, %v1446_v22  ;;  %v1449_v61 = vsel %vm839_vm1, %v1446_v22, %v1448_v60  ;;  %v1877_v11 = vmul.f32 %v3294_v16, %v3584_v35 }
 0x13b   : > { %v1524_v46 = vadd.f32 %v1447_v36, %v1283_v51  ;;  %v1754_v50 = vrot.slane %v1636_v10, 1  ;;  %v1755_v12 = vrot.slane %v1637_v43, 1  ;;  %v1757_v25 = vrot.slane %v1638_v58, 1  ;;  %v3115_v51 = vld [vmem:[%s4158_s16 + $0x30] sm:$0xff] }
 0x13c   : > { %v1525_v31 = vadd.f32 %v1449_v61, %v1284_v49  ;;  %v1878_v20 = vmul.f32 %v3294_v16, %v3586_v37  ;;  %v1879_v33 = vmul.f32 %v3294_v16, %v3594_v44  ;;  %v1995_v62 = vrot.slane %v1877_v11, 2 }
 0x13d   : > { %v1591_v26 = vadd.f32 %v1559_v19, %v1524_v46  ;;  %v1756_v2 = vsel %vm597_vm0, %v1754_v50, %v1755_v12  ;;  %v2265_v15 = vmul.f32 %v4130_v32, %v4401_v53  ;;  %v1758_v6 = vsel %vm597_vm0, %v1755_v12, %v1757_v25 }
 0x13e   : > { %v1592_v5 = vadd.f32 %v1560_v18, %v1525_v31  ;;  %v1996_v40 = vrot.slane %v1878_v20, 2  ;;  %v1998_v35 = vrot.slane %v1879_v33, 2  ;;  %v2282_v37 = vmul.f32 %v4130_v32, %v4403_v54 }
 0x13f   : > { %v1833_v17 = vadd.f32 %v1756_v2, %v1591_v26  ;;  %v2301_v1 = vadd.f32 %v4151_v48, %v2265_v15  ;;  %v2283_v53 = vmul.f32 %v4130_v32, %v4437_v24  ;;  %v2332_v7 = vmax.f32 %v4429_v39, 0.0  ;;  %3068 = vmatmul.msk.bf16.gmra.mxu1 %vm2116_vm2, %v3114_v14  ;;  %v3116_v2 = vld [vmem:[%s4158_s16 + $0x38] sm:$0xff] }
 0x140   : > { %v1834_v57 = vadd.f32 %v1758_v6, %v1592_v5  ;;  %v1997_v16 = vsel %vm839_vm1, %v1995_v62, %v1996_v40  ;;  %v1999_v44 = vsel %vm839_vm1, %v1996_v40, %v1998_v35  ;;  %v2318_v42 = vadd.f32 %v4151_v48, %v2282_v37 }
 0x141   : > { %v2074_v41 = vadd.f32 %v1997_v16, %v1833_v17  ;;  %v2333_v23 = vmax.f32 %v2301_v1, 0.0  ;;  %v2319_v27 = vadd.f32 %v4151_v48, %v2283_v53  ;;  %v2267_v24 = vmul.f32 %v4130_v32, %v2196_v3 }
 0x142   : > { %v2075_v63 = vadd.f32 %v1999_v44, %v1834_v57  ;;  %v2350_v54 = vmax.f32 %v2318_v42, 0.0  ;;  %v2266_v56 = vmul.f32 %v4130_v32, %v4447_v55  ;;  %v2284_v45 = vmul.f32 %v4130_v32, %v2239_v34  ;;  %v2244_v13 = vpop.f32.mrf.mxu3  ;;  %v2201_v55 = vpop.f32.mrf.mxu0  ;;  %v3117_v42 = vld [vmem:[%s4158_s16 + $0x40] sm:$0xff] }
 0x143   : > { %v2361_v52 = vpack.c.bf16 %v2333_v23, %v2332_v7  ;;  %v2351_v8 = vmax.f32 %v2319_v27, 0.0  ;;  %v2285_v59 = vmul.f32 %v4130_v32, %v2241_v4  ;;  %v2303_v28 = vadd.f32 %v4151_v48, %v2267_v24 }
 0x144   : > { %v2095_v21 = vpack.c.bf16 %v2075_v63, %v2074_v41  ;;  %v2302_v0 = vadd.f32 %v4151_v48, %v2266_v56  ;;  %v2320_v9 = vadd.f32 %v4151_v48, %v2284_v45  ;;  %v2269_v18 = vmul.f32 %v4130_v32, %v2201_v55 }
 0x145   : > { %3090 = vmatmul.msk.bf16.gmra.mxu2 %vm2116_vm2, %v2361_v52  ;;  %v2370_v39 = vpack.c.bf16 %v2351_v8, %v2350_v54  ;;  %v2321_v47 = vadd.f32 %v4151_v48, %v2285_v59  ;;  %v2335_v19 = vmax.f32 %v2303_v28, 0.0  ;;  %v2268_v43 = vmul.f32 %v4130_v32, %v2199_v29  ;;  %v3118_v28 = vld [vmem:[%s4158_s16 + $0x48] sm:$0xff] }
 0x146   : > { %2986 = vmatmul.msk.bf16.gmra.mxu0 %vm2116_vm2, %v2095_v21  ;;  %v2334_v38 = vmax.f32 %v2302_v0, 0.0  ;;  %v2352_v34 = vmax.f32 %v2320_v9, 0.0  ;;  %v2286_v49 = vmul.f32 %v4130_v32, %v2244_v13  ;;  %v2305_v58 = vadd.f32 %v4151_v48, %v2269_v18 }
 0x147   : > { %3099 = vmatmul.msk.bf16.vlgmr.msra.gmra.mxu3 %vm2116_vm2, %v2370_v39  ;;  %v2353_v30 = vmax.f32 %v2321_v47, 0.0  ;;  %v2304_v3 = vadd.f32 %v4151_v48, %v2268_v43 }
 0x148   : > { %v2362_v22 = vpack.c.bf16 %v2335_v19, %v2334_v38  ;;  %v2322_v46 = vadd.f32 %v4151_v48, %v2286_v49  ;;  %v2337_v12 = vmax.f32 %v2305_v58, 0.0 }
 0x149   : > { %v2371_v60 = vpack.c.bf16 %v2353_v30, %v2352_v34  ;;  %v2336_v11 = vmax.f32 %v2304_v3, 0.0 }
 0x14a   : > { %v2246_v10 = vpop.f32.mrf.mxu3  ;;  %v2354_v31 = vmax.f32 %v2322_v46, 0.0  ;;  %v3119_v46 = vld [vmem:[%s4158_s16 + $0x50] sm:$0xff] }
 0x14b   : > { %v2287_v61 = vmul.f32 %v4130_v32, %v2246_v10  ;;  %v2363_v20 = vpack.c.bf16 %v2337_v12, %v2336_v11 }
 0x14d   : > { %v2323_v50 = vadd.f32 %v4151_v48, %v2287_v61 }
 0x14f   : > { %3069 = vmatmul.msk.bf16.gmra.mxu1 %vm2116_vm2, %v3115_v51  ;;  %v2355_v25 = vmax.f32 %v2323_v50, 0.0 }
 0x150   : > { %v2204_v36 = vpop.f32.mrf.mxu0 }
 0x151   : > { %v2372_v26 = vpack.c.bf16 %v2355_v25, %v2354_v31  ;;  %v2270_v15 = vmul.f32 %v4130_v32, %v2204_v36 }
 0x153   : > { %v2306_v40 = vadd.f32 %v4151_v48, %v2270_v15 }
 0x155   : > { %3091 = vmatmul.msk.bf16.gmra.mxu2 %vm2116_vm2, %v2362_v22  ;;  %v2338_v1 = vmax.f32 %v2306_v40, 0.0 }
 0x157   : > { %3100 = vmatmul.msk.bf16.gmra.mxu3 %vm2116_vm2, %v2371_v60 }
 0x158   : > { %v2206_v33 = vpop.f32.mrf.mxu0 }
 0x159   : > { %v2271_v62 = vmul.f32 %v4130_v32, %v2206_v33 }
 0x15b   : > { %v2307_v6 = vadd.f32 %v4151_v48, %v2271_v62 }
 0x15d   : > { %v2339_v17 = vmax.f32 %v2307_v6, 0.0 }
 0x15f   : > { %3070 = vmatmul.msk.bf16.gmra.mxu1 %vm2116_vm2, %v3116_v2  ;;  %v2364_v44 = vpack.c.bf16 %v2339_v17, %v2338_v1 }
 0x165   : > { %3092 = vmatmul.msk.bf16.gmra.mxu2 %vm2116_vm2, %v2363_v20 }
 0x166   : > { %v2563_v27 = vpop.f32.mrf.mxu1 }
 0x167   : > { %3101 = vmatmul.msk.bf16.gmra.mxu3 %vm2116_vm2, %v2372_v26  ;;  %v3189_v26 = vld [vmem:[%s4679_s5] ss:$0 sm:$0xff] }
 0x168   : > { %v2249_v5 = vpop.f32.mrf.mxu3 }
 0x169   : > { %v2288_v35 = vmul.f32 %v4130_v32, %v2249_v5 }
 0x16b   : > { %v2324_v37 = vadd.f32 %v4151_v48, %v2288_v35 }
 0x16d   : > { %v2356_v53 = vmax.f32 %v2324_v37, 0.0 }
 0x16e   : > { %v2565_v56 = vpop.f32.mrf.mxu1 }
 0x16f   : > { %3071 = vmatmul.msk.bf16.gmra.mxu1 %vm2116_vm2, %v3117_v42 }
 0x170   : > { %v2251_v57 = vpop.f32.mrf.mxu3 }
 0x171   : > { %v2289_v16 = vmul.f32 %v4130_v32, %v2251_v57 }
 0x173   : > { %v2325_v7 = vadd.f32 %v4151_v48, %v2289_v16 }
 0x174   : > { %v2209_v41 = vpop.f32.mrf.mxu0 }
 0x175   : > { %v2357_v23 = vmax.f32 %v2325_v7, 0.0  ;;  %3093 = vmatmul.msk.bf16.gmra.mxu2 %vm2116_vm2, %v2364_v44  ;;  %v2272_v63 = vmul.f32 %v4130_v32, %v2209_v41  ;;  %v3120_v7 = vld [vmem:[%s4158_s16 + $0x58] sm:$0xff] }
 0x177   : > { %v2373_v4 = vpack.c.bf16 %v2357_v23, %v2356_v53  ;;  %v2308_v21 = vadd.f32 %v4151_v48, %v2272_v63  ;;  %v2568_v9 = vpop.f32.mrf.mxu1 }
 0x178   : > { %v4552_v54 = vpop.f32.mrf.mxu3 }
 0x179   : > { %3102 = vmatmul.msk.bf16.gmra.mxu3 %vm2116_vm2, %v2373_v4  ;;  %v2340_v14 = vmax.f32 %v2308_v21, 0.0 }
 0x17c   : > { %v2211_v52 = vpop.f32.mrf.mxu0 }
 0x17d   : > { %v2273_v8 = vmul.f32 %v4130_v32, %v2211_v52 }
 0x17f   : > { %v2309_v29 = vadd.f32 %v4151_v48, %v2273_v8  ;;  %3072 = vmatmul.msk.bf16.gmra.mxu1 %vm2116_vm2, %v3118_v28  ;;  %v2570_v49 = vpop.f32.mrf.mxu1 }
 0x180   : > { %v4558_v45 = vpop.f32.mrf.mxu3 }
 0x181   : > { %v2341_v24 = vmax.f32 %v2309_v29, 0.0 }
 0x183   : > { %v2365_v39 = vpack.c.bf16 %v2341_v24, %v2340_v14 }
 0x185   : > { %3094 = vmatmul.msk.bf16.gmra.mxu2 %vm2116_vm2, %v2365_v39 }
 0x188   : > { %v2214_v59 = vpop.f32.mrf.mxu0  ;;  %v4563_v19 = vpop.f32.mrf.mxu3 }
 0x189   : > { %v2274_v0 = vmul.f32 %v4130_v32, %v2214_v59 }
 0x18a   : > { %v2573_v11 = vpop.f32.mrf.mxu1 }
 0x18b   : > { %v2310_v34 = vadd.f32 %v4151_v48, %v2274_v0 }
 0x18d   : > { %v2712_v13 = vpop.f32.mrf.mxu2  ;;  %v2342_v51 = vmax.f32 %v2310_v34, 0.0 }
 0x18e   : > { %v2713_v47 = vadd.f32 %v2712_v13, %v2563_v27 }
 0x18f   : > { %3073 = vmatmul.msk.bf16.gmra.mxu1 %vm2116_vm2, %v3119_v46 }
 0x190   : > { %v2216_v55 = vpop.f32.mrf.mxu0  ;;  %v2792_v38 = vmax.f32 %v2713_v47, 0.0  ;;  %v4578_v61 = vpop.f32.mrf.mxu3 }
 0x191   : > { %v2275_v30 = vmul.f32 %v4130_v32, %v2216_v55 }
 0x192   : > { %v2824_v22 = vpack.c.bf16 %v2792_v38, %v2792_v38  ;;  %v2575_v37 = vpop.f32.mrf.mxu1 }
 0x193   : > { %v2311_v60 = vadd.f32 %v4151_v48, %v2275_v30  ;;  %v3188_v48 = vld [vmem:[%s4678_s4] ss:$0 sm:$0xff] }
 0x194   : > { %2857 = vst.msk [vmem:[%s4572_s21] sm:$0xf] %vm2856_vm3, %v2824_v22 }
 0x195   : > { %v2343_v18 = vmax.f32 %v2311_v60, 0.0  ;;  %v2714_v10 = vpop.f32.mrf.mxu2 }
 0x196   : > { %v2715_v43 = vadd.f32 %v2714_v10, %v2565_v56 }
 0x197   : > { %v2366_v32 = vpack.c.bf16 %v2343_v18, %v2342_v51 }
 0x198   : > { %v2793_v36 = vmax.f32 %v2715_v43, 0.0  ;;  %v4587_v25 = vpop.f32.mrf.mxu3 }
 0x199   : > { %3095 = vmatmul.msk.bf16.gmra.mxu2 %vm2116_vm2, %v2366_v32 }
 0x19a   : > { %v2825_v58 = vpack.c.bf16 %v2793_v36, %v2793_v36 }
 0x19c   : > { %v2219_v3 = vpop.f32.mrf.mxu0  ;;  %2858 = vst.msk [vmem:[%s4572_s21 + $0x4] sm:$0xf] %vm2856_vm3, %v2825_v58  ;;  %v2578_v42 = vpop.f32.mrf.mxu1 }
 0x19d   : > { %v2276_v50 = vmul.f32 %v3188_v48, %v2219_v3 }
 0x19f   : > { %v2312_v2 = vadd.f32 %v3189_v26, %v2276_v50  ;;  %3074 = vmatmul.msk.bf16.gmra.mxu1 %vm2116_vm2, %v3120_v7 }
 0x1a0   : > { %v4595_v16 = vpop.f32.mrf.mxu3 }
 0x1a1   : > { %v2717_v12 = vpop.f32.mrf.mxu2  ;;  %v2344_v6 = vmax.f32 %v2312_v2, 0.0 }
 0x1a2   : > { %v2718_v31 = vadd.f32 %v2717_v12, %v2568_v9 }
 0x1a4   : > { %v2221_v20 = vpop.f32.mrf.mxu0  ;;  %v2794_v33 = vmax.f32 %v2718_v31, 0.0  ;;  %v2580_v0 = vpop.f32.mrf.mxu1 }
 0x1a5   : > { %v2277_v62 = vmul.f32 %v3188_v48, %v2221_v20 }
 0x1a6   : > { %v2826_v15 = vpack.c.bf16 %v2794_v33, %v2794_v33 }
 0x1a7   : > { %v2313_v5 = vadd.f32 %v3189_v26, %v2277_v62 }
 0x1a8   : > { %2859 = vst.msk [vmem:[%s4572_s21 + $0x8] sm:$0xf] %vm2856_vm3, %v2826_v15  ;;  %v4601_v27 = vpop.f32.mrf.mxu3 }
 0x1a9   : > { %v2345_v40 = vmax.f32 %v2313_v5, 0.0  ;;  %v2719_v35 = vpop.f32.mrf.mxu2 }
 0x1aa   : > { %v2720_v17 = vadd.f32 %v2719_v35, %v2570_v49 }
 0x1ab   : > { %v2367_v1 = vpack.c.bf16 %v2345_v40, %v2344_v6 }
 0x1ac   : > { %v2795_v57 = vmax.f32 %v2720_v17, 0.0  ;;  %v2583_v22 = vpop.f32.mrf.mxu1 }
 0x1ad   : > { %3096 = vmatmul.msk.bf16.gmra.mxu2 %vm2116_vm2, %v2367_v1 }
 0x1ae   : > { %v2827_v44 = vpack.c.bf16 %v2795_v57, %v2795_v57 }
 0x1af   : > { %v2224_v53 = vpop.f32.mrf.mxu0 }
 0x1b0   : > { %2860 = vst.msk [vmem:[%s4572_s21 + $0xc] sm:$0xf] %vm2856_vm3, %v2827_v44  ;;  %v2278_v41 = vmul.f32 %v3188_v48, %v2224_v53  ;;  %v4606_v9 = vpop.f32.mrf.mxu3 }
 0x1b2   : > { %v2314_v52 = vadd.f32 %v3189_v26, %v2278_v41 }
 0x1b4   : > { %v2346_v24 = vmax.f32 %v2314_v52, 0.0  ;;  %v2585_v33 = vpop.f32.mrf.mxu1 }
 0x1b5   : > { %v2722_v23 = vpop.f32.mrf.mxu2 }
 0x1b6   : > { %v2723_v4 = vadd.f32 %v2722_v23, %v2573_v11 }
 0x1b7   : > { %v2226_v63 = vpop.f32.mrf.mxu0 }
 0x1b8   : > { %v2279_v21 = vmul.f32 %v3188_v48, %v2226_v63  ;;  %v2796_v8 = vmax.f32 %v2723_v4, 0.0 }
 0x1ba   : > { %v2315_v29 = vadd.f32 %v3189_v26, %v2279_v21  ;;  %v2828_v14 = vpack.c.bf16 %v2796_v8, %v2796_v8 }
 0x1bc   : > { %v2347_v39 = vmax.f32 %v2315_v29, 0.0  ;;  %2861 = vst.msk [vmem:[%s4572_s21 + $0x10] sm:$0xf] %vm2856_vm3, %v2828_v14  ;;  %v2588_v1 = vpop.f32.mrf.mxu1 }
 0x1bd   : > { %v2724_v56 = vpop.f32.mrf.mxu2 }
 0x1be   : > { %v2368_v59 = vpack.c.bf16 %v2347_v39, %v2346_v24  ;;  %v2725_v28 = vadd.f32 %v2724_v56, %v2575_v37 }
 0x1c0   : > { %3097 = vmatmul.msk.bf16.gmra.mxu2 %vm2116_vm2, %v2368_v59  ;;  %v2797_v13 = vmax.f32 %v2725_v28, 0.0 }
 0x1c2   : > { %v2829_v47 = vpack.c.bf16 %v2797_v13, %v2797_v13 }
 0x1c3   : > { %v2229_v55 = vpop.f32.mrf.mxu0 }
 0x1c4   : > { %2862 = vst.msk [vmem:[%s4572_s21 + $0x14] sm:$0xf] %vm2856_vm3, %v2829_v47  ;;  %v2280_v38 = vmul.f32 %v3188_v48, %v2229_v55 }
 0x1c6   : > { %v2316_v10 = vadd.f32 %v3189_v26, %v2280_v38 }
 0x1c8   : > { %v2727_v34 = vpop.f32.mrf.mxu2  ;;  %v2348_v3 = vmax.f32 %v2316_v10, 0.0 }
 0x1c9   : > { %v2728_v30 = vadd.f32 %v2727_v34, %v2578_v42 }
 0x1ca   : > { %v2772_v18 = vpop.f32.mrf.mxu3 }
 0x1cb   : > { %v2231_v60 = vpop.f32.mrf.mxu0  ;;  %v2798_v51 = vmax.f32 %v2728_v30, 0.0  ;;  %v2773_v32 = vadd.f32 %v2772_v18, %v4552_v54 }
 0x1cc   : > { %v2281_v43 = vmul.f32 %v3188_v48, %v2231_v60 }
 0x1cd   : > { %v2830_v49 = vpack.c.bf16 %v2798_v51, %v2798_v51  ;;  %v2816_v58 = vmax.f32 %v2773_v32, 0.0 }
 0x1ce   : > { %v2317_v36 = vadd.f32 %v3189_v26, %v2281_v43 }
 0x1cf   : > { %2863 = vst.msk [vmem:[%s4572_s21 + $0x18] sm:$0xf] %vm2856_vm3, %v2830_v49  ;;  %v2848_v12 = vpack.c.bf16 %v2816_v58, %v2816_v58 }
 0x1d0   : > { %v2349_v46 = vmax.f32 %v2317_v36, 0.0  ;;  %v2729_v50 = vpop.f32.mrf.mxu2 }
 0x1d1   : > { %v2730_v11 = vadd.f32 %v2729_v50, %v2580_v0  ;;  %2881 = vst.msk [vmem:[%s4572_s21 + $0x60] sm:$0xf] %vm2856_vm3, %v2848_v12 }
 0x1d2   : > { %v2369_v31 = vpack.c.bf16 %v2349_v46, %v2348_v3  ;;  %v2774_v48 = vpop.f32.mrf.mxu3 }
 0x1d3   : > { %v2799_v20 = vmax.f32 %v2730_v11, 0.0  ;;  %v2775_v54 = vadd.f32 %v2774_v48, %v4558_v45 }
 0x1d4   : > { %3098 = vmatmul.msk.bf16.gmra.mxu2 %vm2116_vm2, %v2369_v31 }
 0x1d5   : > { %v2831_v26 = vpack.c.bf16 %v2799_v20, %v2799_v20  ;;  %v2817_v2 = vmax.f32 %v2775_v54, 0.0 }
 0x1d7   : > { %2864 = vst.msk [vmem:[%s4572_s21 + $0x1c] sm:$0xf] %vm2856_vm3, %v2831_v26  ;;  %v2849_v15 = vpack.c.bf16 %v2817_v2, %v2817_v2 }
 0x1d8   : > { %v2732_v62 = vpop.f32.mrf.mxu2 }
 0x1d9   : > { %v2733_v5 = vadd.f32 %v2732_v62, %v2583_v22  ;;  %2882 = vst.msk [vmem:[%s4572_s21 + $0x64] sm:$0xf] %vm2856_vm3, %v2849_v15 }
 0x1da   : > { %v2777_v40 = vpop.f32.mrf.mxu3 }
 0x1db   : > { %v2800_v6 = vmax.f32 %v2733_v5, 0.0  ;;  %v2778_v35 = vadd.f32 %v2777_v40, %v4563_v19  ;;  %v2590_v19 = vpop.f32.mrf.mxu1 }
 0x1dd   : > { %v2832_v17 = vpack.c.bf16 %v2800_v6, %v2800_v6  ;;  %v2818_v37 = vmax.f32 %v2778_v35, 0.0 }
 0x1df   : > { %2865 = vst.msk [vmem:[%s4572_s21 + $0x20] sm:$0xf] %vm2856_vm3, %v2832_v17  ;;  %v2850_v57 = vpack.c.bf16 %v2818_v37, %v2818_v37 }
 0x1e0   : > { %v2734_v45 = vpop.f32.mrf.mxu2 }
 0x1e1   : > { %v2735_v44 = vadd.f32 %v2734_v45, %v2585_v33  ;;  %2883 = vst.msk [vmem:[%s4572_s21 + $0x68] sm:$0xf] %vm2856_vm3, %v2850_v57 }
 0x1e2   : > { %v2779_v7 = vpop.f32.mrf.mxu3 }
 0x1e3   : > { %v2801_v53 = vmax.f32 %v2735_v44, 0.0  ;;  %v2780_v41 = vadd.f32 %v2779_v7, %v4578_v61  ;;  %v2593_v56 = vpop.f32.mrf.mxu1 }
 0x1e5   : > { %v2833_v23 = vpack.c.bf16 %v2801_v53, %v2801_v53  ;;  %v2819_v42 = vmax.f32 %v2780_v41, 0.0 }
 0x1e7   : > { %2866 = vst.msk [vmem:[%s4572_s21 + $0x24] sm:$0xf] %vm2856_vm3, %v2833_v23  ;;  %v2851_v63 = vpack.c.bf16 %v2819_v42, %v2819_v42 }
 0x1e8   : > { %v2737_v4 = vpop.f32.mrf.mxu2 }
 0x1e9   : > { %v2738_v52 = vadd.f32 %v2737_v4, %v2588_v1  ;;  %2884 = vst.msk [vmem:[%s4572_s21 + $0x6c] sm:$0xf] %vm2856_vm3, %v2851_v63 }
 0x1ea   : > { %v2782_v8 = vpop.f32.mrf.mxu3 }
 0x1eb   : > { %v2802_v21 = vmax.f32 %v2738_v52, 0.0  ;;  %v2783_v29 = vadd.f32 %v2782_v8, %v4587_v25  ;;  %v2595_v30 = vpop.f32.mrf.mxu1 }
 0x1ed   : > { %v2834_v14 = vpack.c.bf16 %v2802_v21, %v2802_v21  ;;  %v2820_v24 = vmax.f32 %v2783_v29, 0.0 }
 0x1ef   : > { %2867 = vst.msk [vmem:[%s4572_s21 + $0x28] sm:$0xf] %vm2856_vm3, %v2834_v14  ;;  %v2852_v39 = vpack.c.bf16 %v2820_v24, %v2820_v24 }
 0x1f0   : > { %v2739_v61 = vpop.f32.mrf.mxu2 }
 0x1f1   : > { %v2740_v59 = vadd.f32 %v2739_v61, %v2590_v19  ;;  %2885 = vst.msk [vmem:[%s4572_s21 + $0x70] sm:$0xf] %vm2856_vm3, %v2852_v39 }
 0x1f2   : > { %v2784_v0 = vpop.f32.mrf.mxu3 }
 0x1f3   : > { %v2803_v28 = vmax.f32 %v2740_v59, 0.0  ;;  %v2785_v13 = vadd.f32 %v2784_v0, %v4595_v16  ;;  %v2598_v58 = vpop.f32.mrf.mxu1 }
 0x1f5   : > { %v2835_v47 = vpack.c.bf16 %v2803_v28, %v2803_v28  ;;  %v2821_v55 = vmax.f32 %v2785_v13, 0.0 }
 0x1f7   : > { %2868 = vst.msk [vmem:[%s4572_s21 + $0x2c] sm:$0xf] %vm2856_vm3, %v2835_v47  ;;  %v2853_v38 = vpack.c.bf16 %v2821_v55, %v2821_v55 }
 0x1f8   : > { %v2742_v25 = vpop.f32.mrf.mxu2 }
 0x1f9   : > { %v2743_v34 = vadd.f32 %v2742_v25, %v2593_v56  ;;  %2886 = vst.msk [vmem:[%s4572_s21 + $0x74] sm:$0xf] %vm2856_vm3, %v2853_v38 }
 0x1fb   : > { %v2804_v22 = vmax.f32 %v2743_v34, 0.0  ;;  %v2600_v33 = vpop.f32.mrf.mxu1 }
 0x1fc   : > { %v2787_v60 = vpop.f32.mrf.mxu3 }
 0x1fd   : > { %v2836_v51 = vpack.c.bf16 %v2804_v22, %v2804_v22  ;;  %v2788_v18 = vadd.f32 %v2787_v60, %v4601_v27 }
 0x1ff   : > { %2869 = vst.msk [vmem:[%s4572_s21 + $0x30] sm:$0xf] %vm2856_vm3, %v2836_v51  ;;  %v2822_v16 = vmax.f32 %v2788_v18, 0.0 }
 0x200   : > { %v2744_v10 = vpop.f32.mrf.mxu2 }
 0x201   : > { %v2745_v43 = vadd.f32 %v2744_v10, %v2595_v30  ;;  %v2854_v32 = vpack.c.bf16 %v2822_v16, %v2822_v16 }
 0x203   : > { %v2805_v49 = vmax.f32 %v2745_v43, 0.0  ;;  %2887 = vst.msk [vmem:[%s4572_s21 + $0x78] sm:$0xf] %vm2856_vm3, %v2854_v32 }
 0x204   : > { %v2789_v36 = vpop.f32.mrf.mxu3 }
 0x205   : > { %v2837_v3 = vpack.c.bf16 %v2805_v49, %v2805_v49  ;;  %v2790_v46 = vadd.f32 %v2789_v36, %v4606_v9  ;;  %v2603_v9 = vpop.f32.mrf.mxu1 }
 0x207   : > { %2870 = vst.msk [vmem:[%s4572_s21 + $0x34] sm:$0xf] %vm2856_vm3, %v2837_v3  ;;  %v2823_v27 = vmax.f32 %v2790_v46, 0.0 }
 0x208   : > { %v2747_v50 = vpop.f32.mrf.mxu2 }
 0x209   : > { %v2748_v12 = vadd.f32 %v2747_v50, %v2598_v58  ;;  %v2855_v11 = vpack.c.bf16 %v2823_v27, %v2823_v27 }
 0x20b   : > { %v2806_v31 = vmax.f32 %v2748_v12, 0.0  ;;  %2888 = vst.msk [vmem:[%s4572_s21 + $0x7c] sm:$0xf] %vm2856_vm3, %v2855_v11 }
 0x20d   : > { %v2838_v20 = vpack.c.bf16 %v2806_v31, %v2806_v31  ;;  %v2605_v40 = vpop.f32.mrf.mxu1 }
 0x20f   : > { %2871 = vst.msk [vmem:[%s4572_s21 + $0x38] sm:$0xf] %vm2856_vm3, %v2838_v20 }
 0x210   : > { %v2749_v48 = vpop.f32.mrf.mxu2 }
 0x211   : > { %v2750_v54 = vadd.f32 %v2749_v48, %v2600_v33 }
 0x213   : > { %v2807_v26 = vmax.f32 %v2750_v54, 0.0 }
 0x215   : > { %v2839_v2 = vpack.c.bf16 %v2807_v26, %v2807_v26  ;;  %v2608_v45 = vpop.f32.mrf.mxu1 }
 0x217   : > { %2872 = vst.msk [vmem:[%s4572_s21 + $0x3c] sm:$0xf] %vm2856_vm3, %v2839_v2 }
 0x21c   : > { %v2752_v62 = vpop.f32.mrf.mxu2 }
 0x21d   : > { %v2753_v15 = vadd.f32 %v2752_v62, %v2603_v9  ;;  %v2610_v41 = vpop.f32.mrf.mxu1 }
 0x21f   : > { %v2808_v5 = vmax.f32 %v2753_v15, 0.0 }
 0x221   : > { %v2840_v6 = vpack.c.bf16 %v2808_v5, %v2808_v5 }
 0x223   : > { %2873 = vst.msk [vmem:[%s4572_s21 + $0x40] sm:$0xf] %vm2856_vm3, %v2840_v6 }
 0x224   : > { %v2754_v35 = vpop.f32.mrf.mxu2 }
 0x225   : > { %v2755_v17 = vadd.f32 %v2754_v35, %v2605_v40  ;;  %v2613_v63 = vpop.f32.mrf.mxu1 }
 0x227   : > { %v2809_v1 = vmax.f32 %v2755_v17, 0.0 }
 0x229   : > { %v2841_v37 = vpack.c.bf16 %v2809_v1, %v2809_v1 }
 0x22b   : > { %2874 = vst.msk [vmem:[%s4572_s21 + $0x44] sm:$0xf] %vm2856_vm3, %v2841_v37 }
 0x22d   : > { %v2615_v14 = vpop.f32.mrf.mxu1 }
 0x230   : > { %v2757_v57 = vpop.f32.mrf.mxu2 }
 0x231   : > { %v2758_v44 = vadd.f32 %v2757_v57, %v2608_v45 }
 0x233   : > { %v2810_v53 = vmax.f32 %v2758_v44, 0.0 }
 0x235   : > { %v2842_v7 = vpack.c.bf16 %v2810_v53, %v2810_v53  ;;  %v2618_v59 = vpop.f32.mrf.mxu1 }
 0x237   : > { %2875 = vst.msk [vmem:[%s4572_s21 + $0x48] sm:$0xf] %vm2856_vm3, %v2842_v7 }
 0x238   : > { %v2759_v23 = vpop.f32.mrf.mxu2 }
 0x239   : > { %v2760_v42 = vadd.f32 %v2759_v23, %v2610_v41 }
 0x23b   : > { %v2811_v19 = vmax.f32 %v2760_v42, 0.0 }
 0x23d   : > { %v2843_v4 = vpack.c.bf16 %v2811_v19, %v2811_v19  ;;  %v2620_v55 = vpop.f32.mrf.mxu1 }
 0x23f   : > { %2876 = vst.msk [vmem:[%s4572_s21 + $0x4c] sm:$0xf] %vm2856_vm3, %v2843_v4 }
 0x243   : > { %v2762_v52 = vpop.f32.mrf.mxu2 }
 0x244   : > { %v2763_v21 = vadd.f32 %v2762_v52, %v2613_v63 }
 0x246   : > { %v2812_v8 = vmax.f32 %v2763_v21, 0.0 }
 0x248   : > { %v2844_v29 = vpack.c.bf16 %v2812_v8, %v2812_v8 }
 0x24a   : > { %2877 = vst.msk [vmem:[%s4572_s21 + $0x50] sm:$0xf] %vm2856_vm3, %v2844_v29 }
 0x24b   : > { %v2764_v24 = vpop.f32.mrf.mxu2 }
 0x24c   : > { %v2765_v61 = vadd.f32 %v2764_v24, %v2615_v14 }
 0x24e   : > { %v2813_v39 = vmax.f32 %v2765_v61, 0.0 }
 0x250   : > { %v2845_v56 = vpack.c.bf16 %v2813_v39, %v2813_v39 }
 0x252   : > { %2878 = vst.msk [vmem:[%s4572_s21 + $0x54] sm:$0xf] %vm2856_vm3, %v2845_v56 }
 0x257   : > { %v2767_v28 = vpop.f32.mrf.mxu2 }
 0x258   : > { %v2768_v0 = vadd.f32 %v2767_v28, %v2618_v59 }
 0x25a   : > { %v2814_v13 = vmax.f32 %v2768_v0, 0.0 }
 0x25c   : > { %v2846_v47 = vpack.c.bf16 %v2814_v13, %v2814_v13 }
 0x25e   : > { %2879 = vst.msk [vmem:[%s4572_s21 + $0x58] sm:$0xf] %vm2856_vm3, %v2846_v47 }
 0x25f   : > { %v2769_v25 = vpop.f32.mrf.mxu2 }
 0x260   : > { %v2770_v38 = vadd.f32 %v2769_v25, %v2620_v55 }
 0x262   : > { %v2815_v34 = vmax.f32 %v2770_v38, 0.0 }
 0x264   : > { %v2847_v30 = vpack.c.bf16 %v2815_v34, %v2815_v34 }
 0x266   : > { %2880 = vst.msk [vmem:[%s4572_s21 + $0x5c] sm:$0xf] %vm2856_vm3, %v2847_v30 }
 0x267 PF: > { %s18_s27 = sadd.s32 1, %s3196_s27  }
 0x268   : > { %p15_p5 = scmp.ge.s32.totalorder %s18_s27, 4  }
 0x26a   :  { %17 = sbr.rel (!%p15_p5) target bundleno = 1 (0x1), region = 85 }

// kernel: _lambda_.57
= control target key start
LH: loop header
LB: loop body
LE: loop exit
PB: predicated region body
PF: predicated region fallthrough
CT: control target
= control target key end

     0   :  { %s620_s15 = smov 0   ;;  %s702_s0 = inlined_call_operand.vmem [shape: bf16[120,192], index: 0, kind: input, shape index: {}]   ;;  %s703_s1 = inlined_call_operand.vmem [shape: bf16[192,64], index: 1, kind: input, shape index: {}]   ;;  %s704_s2 = inlined_call_operand.vmem [shape: f32[1,64], index: 2, kind: input, shape index: {}]   ;;  %s705_s3 = inlined_call_operand.vmem [shape: f32[1,64], index: 3, kind: input, shape index: {}]   ;;  %s706_s4 = inlined_call_operand.vmem [shape: bf16[120,64], index: 4, kind: output, shape index: {}]  }
   0x1 LB: > { %s471_s16 = sadd.s32 4294967295, %s593_s15   ;;  %p475_p0 = scmp.ge.s32.totalorder %s593_s15, 1  ;;  %s593_s15 = sphi %s620_s15, %s14_s15  }
   0x2   : > { %p164_p1 = scmp.lt.s32.totalorder %s593_s15, 4 }
   0x4   : > { %p165_p2 = pnand %p475_p0, %p164_p1 }
   0x5   : > { %s191_s19 = smul.u32 (!%p165_p2), 5, %s471_s16 }
   0x6   : > { %168 = sbr.rel (%p165_p2) target bundleno = 200 (0xc8), region = 36 }
   0x7   : > { %p192_p3 = scmp.lt.s32.totalorder (!%p165_p2), %s191_s19, 14 }
   0xb   : > { %v560_v0 = vld [vmem:[%s703_s1 + $0x38] sm:$0xff]  ;;  %v559_v2 = vld [vmem:[%s703_s1 + $0x30] sm:$0xff]  ;;  %s708_s19 = smov (!%p192_p3, %s191_s19), 14  ;;  %v558_v4 = vld [vmem:[%s703_s1 + $0x28] sm:$0xff]  ;;  %vm330_vm0 = vcmask 523264   ;;  %vm409_vm1 = vcmask 519168  }
   0xc   : > { %v564_v1 = vld [vmem:[%s703_s1 + $0x58] sm:$0xff]  ;;  %565 = vmatpush.bf16.msra.mxu2 %v560_v0  ;;  %340 = vmatpush.bf16.msra.mxu0 %v560_v0  ;;  %v563_v3 = vld [vmem:[%s703_s1 + $0x50] sm:$0xff]  ;;  %s548_s28 = sshll.u32 %s708_s19, 3  ;;  %v562_v5 = vld [vmem:[%s703_s1 + $0x48] sm:$0xff]  ;;  %s478_s26 = sshll.u32 %s708_s19, 2 }
   0xd   : > { %573 = vmatpush.bf16.msra.mxu3 %v564_v1  ;;  %367 = vmatpush.bf16.msra.mxu1 %v564_v1  ;;  %s652_s7 = scalar_lea.vmem %s702_s0, %s548_s28  ;;  %v557_v6 = vld [vmem:[%s703_s1 + $0x20] sm:$0xff]  ;;  %v556_v12 = vld [vmem:[%s703_s1 + $0x18] sm:$0xff]  ;;  %v555_v15 = vld [vmem:[%s703_s1 + $0x10] sm:$0xff]  ;;  %s202_s29 = scalar_lea.vmem %s706_s4, %s478_s26 }
   0xe   : > { %v561_v7 = vld [vmem:[%s703_s1 + $0x40] sm:$0xff]  ;;  %v551_v8 = vld [vmem:[%s652_s7 + $0x14] sm:$0xf]  ;;  %v491_v9 = vld [vmem:[%s652_s7 + $0x18] sm:$0xf0] }
   0xf   : > { %v549_v10 = vld [vmem:[%s652_s7 + $0x4] sm:$0xf]  ;;  %v483_v11 = vld [vmem:[%s652_s7 + $0x8] sm:$0xf0]  ;;  %v494_v13 = vor.u32 %v551_v8, %v491_v9  ;;  %v489_v19 = vld [vmem:[%s652_s7 + $0x10] sm:$0xf] }
  0x10   : > { %566 = vmatpush.bf16.msra.mxu2 %v559_v2  ;;  %341 = vmatpush.bf16.msra.mxu0 %v559_v2  ;;  %v486_v14 = vor.u32 %v549_v10, %v483_v11  ;;  %v554_v16 = vld [vmem:[%s703_s1 + $0x8] sm:$0xff]  ;;  %v209_v17 = vld [vmem:[%s652_s7 + $0x20] sm:$0xff]  ;;  %v552_v20 = vld [vmem:[%s652_s7 + $0x14] sm:$0xf0] }
  0x11   : > { %574 = vmatpush.bf16.msra.mxu3 %v563_v3  ;;  %368 = vmatpush.bf16.msra.mxu1 %v563_v3  ;;  %v553_v18 = vld [vmem:[%s703_s1] sm:$0xff]  ;;  %v550_v22 = vld [vmem:[%s652_s7 + $0x4] sm:$0xf0]  ;;  %v248_v23 = vunpack.c.h.b16 %v209_v17  ;;  %v490_v24 = vor.u32 %v552_v20, %v489_v19  ;;  %v247_v27 = vunpack.c.l.b16 %v209_v17 }
  0x12   : > { %v481_v21 = vld [vmem:[%s652_s7] sm:$0xf] }
  0x13   : > { %v482_v25 = vor.u32 %v550_v22, %v481_v21  ;;  %v254_v26 = vpack.c.b16 %v248_v23, %v248_v23  ;;  %v253_v28 = vpack.c.b16 %v247_v27, %v247_v27  ;;  %v585_v33 = vld [vmem:[%s704_s2] ss:$0 sm:$0xff] }
  0x14   : > { %567 = vmatpush.bf16.msra.mxu2 %v558_v4  ;;  %342 = vmatpush.bf16.msra.mxu0 %v558_v4  ;;  %v586_v35 = vld [vmem:[%s705_s3] ss:$0 sm:$0xff] }
  0x15   : > { %575 = vmatpush.bf16.msra.mxu3 %v562_v5  ;;  %369 = vmatpush.bf16.msra.mxu1 %v562_v5 }
  0x18   : > { %568 = vmatpush.bf16.msra.mxu2 %v557_v6  ;;  %343 = vmatpush.bf16.msra.mxu0 %v557_v6 }
  0x19   : > { %576 = vmatpush.bf16.msra.mxu3 %v561_v7  ;;  %370 = vmatpush.bf16.msra.mxu1 %v561_v7 }
  0x1c   : > { %569 = vmatpush.bf16.msra.mxu2 %v556_v12  ;;  %344 = vmatpush.bf16.msra.mxu0 %v556_v12 }
  0x1d   : > { %544 = vmatmul.msk.bf16.vlgmr.msra.gmra.mxu3 %vm330_vm0, %v494_v13  ;;  %543 = vmatmul.msk.bf16.vlgmr.msra.gmra.mxu1 %vm330_vm0, %v486_v14 }
  0x20   : > { %570 = vmatpush.bf16.msra.mxu2 %v555_v15  ;;  %345 = vmatpush.bf16.msra.mxu0 %v555_v15 }
  0x24   : > { %571 = vmatpush.bf16.msra.mxu2 %v554_v16  ;;  %346 = vmatpush.bf16.msra.mxu0 %v554_v16 }
  0x28   : > { %572 = vmatpush.bf16.msra.mxu2 %v553_v18  ;;  %347 = vmatpush.bf16.msra.mxu0 %v553_v18 }
  0x2b   : > { %353 = vmatmul.bf16.vlgmr.msra.gmra.mxu2 %v490_v24  ;;  %348 = vmatmul.bf16.vlgmr.msra.gmra.mxu0 %v482_v25 }
  0x2d   : > { %545 = vmatmul.msk.bf16.gmra.mxu3 %vm330_vm0, %v254_v26 }
  0x3b   : > { %358 = vmatmul.bf16.gmra.mxu2 %v253_v28 }
  0x9a   : > { %v372_v30 = vpop.f32.mrf.mxu1 }
  0xa0   : > { %v377_v29 = vpop.f32.mrf.mxu3 }
  0xa2   : > { %v374_v39 = vpop.f32.mrf.mxu1 }
  0xa8   : > { %v349_v31 = vpop.f32.mrf.mxu0  ;;  %v379_v32 = vpop.f32.mrf.mxu3 }
  0xa9   : > { %v373_v34 = vadd.f32 %v372_v30, %v349_v31 }
  0xab   : > { %v390_v36 = vmul.f32 %v585_v33, %v373_v34 }
  0xad   : > { %v399_v37 = vadd.f32 %v586_v35, %v390_v36 }
  0xae   : > { %v354_v38 = vpop.f32.mrf.mxu2 }
  0xaf   : > { %v378_v40 = vadd.f32 %v377_v29, %v354_v38  ;;  %v404_v41 = vpack.c.bf16 %v399_v37, %v399_v37 }
  0xb0   : > { %v351_v42 = vpop.f32.mrf.mxu0  ;;  %v382_v43 = vpop.f32.mrf.mxu3 }
  0xb1   : > { %v392_v44 = vmul.f32 %v585_v33, %v378_v40  ;;  %410 = vst.msk [vmem:[%s202_s29] sm:$0xf] %vm409_vm1, %v404_v41  ;;  %v375_v45 = vadd.f32 %v374_v39, %v351_v42 }
  0xb3   : > { %v401_v46 = vadd.f32 %v586_v35, %v392_v44  ;;  %v391_v47 = vmul.f32 %v585_v33, %v375_v45 }
  0xb5   : > { %v406_v48 = vpack.c.bf16 %v401_v46, %v401_v46  ;;  %v400_v49 = vadd.f32 %v586_v35, %v391_v47 }
  0xb6   : > { %v356_v50 = vpop.f32.mrf.mxu2 }
  0xb7   : > { %412 = vst.msk [vmem:[%s202_s29 + $0x8] sm:$0xf] %vm409_vm1, %v406_v48  ;;  %v380_v51 = vadd.f32 %v379_v32, %v356_v50  ;;  %v405_v52 = vpack.c.bf16 %v400_v49, %v400_v49 }
  0xb8   : > { %v384_v53 = vpop.f32.mrf.mxu3 }
  0xb9   : > { %v393_v54 = vmul.f32 %v585_v33, %v380_v51  ;;  %411 = vst.msk [vmem:[%s202_s29 + $0x4] sm:$0xf] %vm409_vm1, %v405_v52 }
  0xbb   : > { %v402_v55 = vadd.f32 %v586_v35, %v393_v54 }
  0xbd   : > { %v407_v56 = vpack.c.bf16 %v402_v55, %v402_v55 }
  0xbe   : > { %v359_v57 = vpop.f32.mrf.mxu2 }
  0xbf   : > { %413 = vst.msk [vmem:[%s202_s29 + $0xc] sm:$0xf] %vm409_vm1, %v407_v56  ;;  %v383_v58 = vadd.f32 %v382_v43, %v359_v57 }
  0xc1   : > { %v394_v59 = vmul.f32 %v585_v33, %v383_v58 }
  0xc3   : > { %v403_v60 = vadd.f32 %v586_v35, %v394_v59 }
  0xc5   : > { %v408_v61 = vpack.c.bf16 %v403_v60, %v403_v60 }
  0xc6   : > { %v361_v62 = vpop.f32.mrf.mxu2 }
  0xc7   : > { %414 = vst.msk [vmem:[%s202_s29 + $0x10] sm:$0xf] %vm409_vm1, %v408_v61 }
  0xc8 PF: > { %s14_s15 = sadd.s32 1, %s593_s15  }
  0xc9   : > { %p11_p4 = scmp.ge.s32.totalorder %s14_s15, 5  }
  0xcb   :  { %13 = sbr.rel (!%p11_p4) target bundleno = 1 (0x1), region = 66 }

// kernel: _lambda_.58
= control target key start
LH: loop header
LB: loop body
LE: loop exit
PB: predicated region body
PF: predicated region fallthrough
CT: control target
= control target key end

     0   :  { %s685_s15 = smov 0   ;;  %s788_s0 = inlined_call_operand.vmem [shape: bf16[128,192], index: 0, kind: input, shape index: {}]   ;;  %s789_s1 = inlined_call_operand.vmem [shape: bf16[192,64], index: 1, kind: input, shape index: {}]   ;;  %s790_s2 = inlined_call_operand.vmem [shape: f32[1,64], index: 2, kind: input, shape index: {}]   ;;  %s791_s3 = inlined_call_operand.vmem [shape: f32[1,64], index: 3, kind: input, shape index: {}]   ;;  %s792_s4 = inlined_call_operand.vmem [shape: bf16[128,64], index: 4, kind: output, shape index: {}]  }
   0x1 LB: > { %s513_s16 = sadd.s32 4294967295, %s658_s15   ;;  %p517_p0 = scmp.ge.s32.totalorder %s658_s15, 1  ;;  %s658_s15 = sphi %s685_s15, %s14_s15  }
   0x2   : > { %p164_p1 = scmp.lt.s32.totalorder %s658_s15, 3 }
   0x4   : > { %p165_p2 = pnand %p517_p0, %p164_p1 }
   0x5   : > { %s518_s21 = sshll.u32 (!%p165_p2), %s513_s16, 3 }
   0x6   : > { %168 = sbr.rel (%p165_p2) target bundleno = 209 (0xd1), region = 36  ;;  %p192_p3 = scmp.lt.s32.totalorder (!%p165_p2), %s518_s21, 15 }
   0xb   : > { %v625_v0 = vld [vmem:[%s789_s1 + $0x38] sm:$0xff]  ;;  %v624_v2 = vld [vmem:[%s789_s1 + $0x30] sm:$0xff]  ;;  %s794_s21 = smov (!%p192_p3, %s518_s21), 15  ;;  %v623_v4 = vld [vmem:[%s789_s1 + $0x28] sm:$0xff]  ;;  %vm345_vm0 = vcmask 523264   ;;  %vm448_vm1 = vcmask 519168  }
   0xc   : > { %v629_v1 = vld [vmem:[%s789_s1 + $0x58] sm:$0xff]  ;;  %358 = vmatpush.bf16.msra.mxu0 %v625_v0  ;;  %630 = vmatpush.bf16.msra.mxu2 %v625_v0  ;;  %v628_v3 = vld [vmem:[%s789_s1 + $0x50] sm:$0xff]  ;;  %s609_s26 = sshll.u32 %s794_s21, 3  ;;  %v627_v5 = vld [vmem:[%s789_s1 + $0x48] sm:$0xff] }
   0xd   : > { %638 = vmatpush.bf16.msra.mxu3 %v629_v1  ;;  %391 = vmatpush.bf16.msra.mxu1 %v629_v1  ;;  %s717_s7 = scalar_lea.vmem %s788_s0, %s609_s26  ;;  %v622_v6 = vld [vmem:[%s789_s1 + $0x20] sm:$0xff]  ;;  %v621_v13 = vld [vmem:[%s789_s1 + $0x18] sm:$0xff]  ;;  %v620_v15 = vld [vmem:[%s789_s1 + $0x10] sm:$0xff]  ;;  %s522_s26 = sshll.u32 %s794_s21, 2 }
   0xe   : > { %v626_v7 = vld [vmem:[%s789_s1 + $0x40] sm:$0xff]  ;;  %v612_v8 = vld [vmem:[%s717_s7 + $0x14] sm:$0xf]  ;;  %v535_v9 = vld [vmem:[%s717_s7 + $0x18] sm:$0xf0]  ;;  %s767_s29 = scalar_lea.vmem %s792_s4, %s522_s26 }
   0xf   : > { %v610_v10 = vld [vmem:[%s717_s7 + $0x4] sm:$0xf]  ;;  %v527_v11 = vld [vmem:[%s717_s7 + $0x8] sm:$0xf0]  ;;  %v538_v12 = vor.u32 %v612_v8, %v535_v9  ;;  %v525_v18 = vld [vmem:[%s717_s7] sm:$0xf] }
  0x10   : > { %359 = vmatpush.bf16.msra.mxu0 %v624_v2  ;;  %631 = vmatpush.bf16.msra.mxu2 %v624_v2  ;;  %v530_v14 = vor.u32 %v610_v10, %v527_v11  ;;  %v619_v16 = vld [vmem:[%s789_s1 + $0x8] sm:$0xff]  ;;  %v618_v17 = vld [vmem:[%s789_s1] sm:$0xff]  ;;  %v533_v27 = vld [vmem:[%s717_s7 + $0x10] sm:$0xf] }
  0x11   : > { %639 = vmatpush.bf16.msra.mxu3 %v628_v3  ;;  %392 = vmatpush.bf16.msra.mxu1 %v628_v3  ;;  %v611_v19 = vld [vmem:[%s717_s7 + $0x4] sm:$0xf0]  ;;  %v541_v20 = vld [vmem:[%s717_s7 + $0x20] sm:$0xf]  ;;  %v614_v22 = vld [vmem:[%s717_s7 + $0x24] sm:$0xf] }
  0x12   : > { %v615_v21 = vld [vmem:[%s717_s7 + $0x24] sm:$0xf0]  ;;  %v543_v23 = vld [vmem:[%s717_s7 + $0x28] sm:$0xf0]  ;;  %v526_v24 = vor.u32 %v611_v19, %v525_v18  ;;  %v613_v28 = vld [vmem:[%s717_s7 + $0x14] sm:$0xf0] }
  0x13   : > { %v542_v25 = vor.u32 %v615_v21, %v541_v20  ;;  %v546_v26 = vor.u32 %v614_v22, %v543_v23  ;;  %v549_v29 = vld [vmem:[%s717_s7 + $0x30] sm:$0xf]  ;;  %v617_v30 = vld [vmem:[%s717_s7 + $0x34] sm:$0xf0]  ;;  %v616_v31 = vld [vmem:[%s717_s7 + $0x34] sm:$0xf]  ;;  %v534_v33 = vor.u32 %v613_v28, %v533_v27 }
  0x14   : > { %360 = vmatpush.bf16.msra.mxu0 %v623_v4  ;;  %632 = vmatpush.bf16.msra.mxu2 %v623_v4  ;;  %v551_v32 = vld [vmem:[%s717_s7 + $0x38] sm:$0xf0]  ;;  %v550_v34 = vor.u32 %v617_v30, %v549_v29  ;;  %v650_v39 = vld [vmem:[%s790_s2] ss:$0 sm:$0xff] }
  0x15   : > { %640 = vmatpush.bf16.msra.mxu3 %v627_v5  ;;  %393 = vmatpush.bf16.msra.mxu1 %v627_v5  ;;  %v554_v35 = vor.u32 %v616_v31, %v551_v32  ;;  %v651_v42 = vld [vmem:[%s791_s3] ss:$0 sm:$0xff] }
  0x18   : > { %361 = vmatpush.bf16.msra.mxu0 %v622_v6  ;;  %633 = vmatpush.bf16.msra.mxu2 %v622_v6 }
  0x19   : > { %641 = vmatpush.bf16.msra.mxu3 %v626_v7  ;;  %394 = vmatpush.bf16.msra.mxu1 %v626_v7 }
  0x1c   : > { %604 = vmatmul.msk.bf16.vlgmr.msra.gmra.mxu3 %vm345_vm0, %v538_v12  ;;  %362 = vmatpush.bf16.msra.mxu0 %v621_v13 }
  0x1d   : > { %634 = vmatpush.bf16.msra.mxu2 %v621_v13  ;;  %603 = vmatmul.msk.bf16.vlgmr.msra.gmra.mxu1 %vm345_vm0, %v530_v14 }
  0x20   : > { %363 = vmatpush.bf16.msra.mxu0 %v620_v15 }
  0x21   : > { %635 = vmatpush.bf16.msra.mxu2 %v620_v15 }
  0x24   : > { %364 = vmatpush.bf16.msra.mxu0 %v619_v16 }
  0x25   : > { %636 = vmatpush.bf16.msra.mxu2 %v619_v16 }
  0x28   : > { %365 = vmatpush.bf16.msra.mxu0 %v618_v17 }
  0x29   : > { %637 = vmatpush.bf16.msra.mxu2 %v618_v17 }
  0x2b   : > { %366 = vmatmul.bf16.vlgmr.msra.gmra.mxu0 %v526_v24 }
  0x2c   : > { %376 = vmatmul.bf16.vlgmr.msra.gmra.mxu2 %v542_v25  ;;  %605 = vmatmul.msk.bf16.gmra.mxu3 %vm345_vm0, %v546_v26 }
  0x3b   : > { %371 = vmatmul.bf16.gmra.mxu0 %v534_v33 }
  0x3c   : > { %381 = vmatmul.bf16.gmra.mxu2 %v550_v34  ;;  %606 = vmatmul.msk.bf16.gmra.mxu3 %vm345_vm0, %v554_v35 }
  0x9a   : > { %v396_v37 = vpop.f32.mrf.mxu1 }
  0x9f   : > { %v401_v36 = vpop.f32.mrf.mxu3 }
  0xa2   : > { %v398_v45 = vpop.f32.mrf.mxu1 }
  0xa7   : > { %v403_v38 = vpop.f32.mrf.mxu3 }
  0xa8   : > { %v367_v40 = vpop.f32.mrf.mxu0 }
  0xa9   : > { %v397_v41 = vadd.f32 %v396_v37, %v367_v40 }
  0xab   : > { %v420_v43 = vmul.f32 %v650_v39, %v397_v41 }
  0xad   : > { %v432_v44 = vadd.f32 %v651_v42, %v420_v43 }
  0xaf   : > { %v440_v46 = vpack.c.bf16 %v432_v44, %v432_v44  ;;  %v377_v47 = vpop.f32.mrf.mxu2  ;;  %v406_v48 = vpop.f32.mrf.mxu3 }
  0xb0   : > { %v407_v49 = vadd.f32 %v406_v48, %v377_v47  ;;  %v369_v50 = vpop.f32.mrf.mxu0 }
  0xb1   : > { %449 = vst.msk [vmem:[%s767_s29] sm:$0xf] %vm448_vm1, %v440_v46  ;;  %v399_v51 = vadd.f32 %v398_v45, %v369_v50 }
  0xb2   : > { %v424_v52 = vmul.f32 %v650_v39, %v407_v49 }
  0xb3   : > { %v421_v53 = vmul.f32 %v650_v39, %v399_v51 }
  0xb4   : > { %v436_v54 = vadd.f32 %v651_v42, %v424_v52 }
  0xb5   : > { %v433_v55 = vadd.f32 %v651_v42, %v421_v53 }
  0xb6   : > { %v444_v56 = vpack.c.bf16 %v436_v54, %v436_v54 }
  0xb7   : > { %v441_v57 = vpack.c.bf16 %v433_v55, %v433_v55  ;;  %v379_v58 = vpop.f32.mrf.mxu2  ;;  %v408_v59 = vpop.f32.mrf.mxu3 }
  0xb8   : > { %453 = vst.msk [vmem:[%s767_s29 + $0x10] sm:$0xf] %vm448_vm1, %v444_v56  ;;  %v409_v60 = vadd.f32 %v408_v59, %v379_v58  ;;  %v372_v61 = vpop.f32.mrf.mxu0 }
  0xb9   : > { %450 = vst.msk [vmem:[%s767_s29 + $0x4] sm:$0xf] %vm448_vm1, %v441_v57  ;;  %v402_v62 = vadd.f32 %v401_v36, %v372_v61 }
  0xba   : > { %v425_v63 = vmul.f32 %v650_v39, %v409_v60 }
  0xbb   : > { %v422_v0 = vmul.f32 %v650_v39, %v402_v62 }
  0xbc   : > { %v437_v1 = vadd.f32 %v651_v42, %v425_v63 }
  0xbd   : > { %v434_v2 = vadd.f32 %v651_v42, %v422_v0 }
  0xbe   : > { %v445_v3 = vpack.c.bf16 %v437_v1, %v437_v1 }
  0xbf   : > { %v442_v4 = vpack.c.bf16 %v434_v2, %v434_v2  ;;  %v382_v5 = vpop.f32.mrf.mxu2  ;;  %v411_v6 = vpop.f32.mrf.mxu3 }
  0xc0   : > { %454 = vst.msk [vmem:[%s767_s29 + $0x14] sm:$0xf] %vm448_vm1, %v445_v3  ;;  %v412_v7 = vadd.f32 %v411_v6, %v382_v5  ;;  %v374_v8 = vpop.f32.mrf.mxu0 }
  0xc1   : > { %451 = vst.msk [vmem:[%s767_s29 + $0x8] sm:$0xf] %vm448_vm1, %v442_v4  ;;  %v404_v9 = vadd.f32 %v403_v38, %v374_v8 }
  0xc2   : > { %v426_v10 = vmul.f32 %v650_v39, %v412_v7 }
  0xc3   : > { %v423_v11 = vmul.f32 %v650_v39, %v404_v9 }
  0xc4   : > { %v438_v12 = vadd.f32 %v651_v42, %v426_v10 }
  0xc5   : > { %v435_v13 = vadd.f32 %v651_v42, %v423_v11 }
  0xc6   : > { %v446_v14 = vpack.c.bf16 %v438_v12, %v438_v12 }
  0xc7   : > { %v443_v15 = vpack.c.bf16 %v435_v13, %v435_v13  ;;  %v384_v16 = vpop.f32.mrf.mxu2  ;;  %v413_v17 = vpop.f32.mrf.mxu3 }
  0xc8   : > { %455 = vst.msk [vmem:[%s767_s29 + $0x18] sm:$0xf] %vm448_vm1, %v446_v14  ;;  %v414_v18 = vadd.f32 %v413_v17, %v384_v16 }
  0xc9   : > { %452 = vst.msk [vmem:[%s767_s29 + $0xc] sm:$0xf] %vm448_vm1, %v443_v15 }
  0xca   : > { %v427_v19 = vmul.f32 %v650_v39, %v414_v18 }
  0xcc   : > { %v439_v20 = vadd.f32 %v651_v42, %v427_v19 }
  0xce   : > { %v447_v21 = vpack.c.bf16 %v439_v20, %v439_v20 }
  0xd0   : > { %456 = vst.msk [vmem:[%s767_s29 + $0x1c] sm:$0xf] %vm448_vm1, %v447_v21 }
  0xd1 PF: > { %s14_s15 = sadd.s32 1, %s658_s15  }
  0xd2   : > { %p11_p4 = scmp.ge.s32.totalorder %s14_s15, 4  }
  0xd4   :  { %13 = sbr.rel (!%p11_p4) target bundleno = 1 (0x1), region = 66 }

// kernel: _lambda_.59
= control target key start
LH: loop header
LB: loop body
LE: loop exit
PB: predicated region body
PF: predicated region fallthrough
CT: control target
= control target key end

     0   :  { %s1425_s27 = smov 0   ;;  %s1866_s0 = inlined_call_operand.vmem [shape: bf16[2,10,10,64], index: 0, kind: input, shape index: {}]   ;;  %s1867_s1 = inlined_call_operand.vmem [shape: bf16[128,64], index: 1, kind: input, shape index: {}]   ;;  %s1868_s2 = inlined_call_operand.vmem [shape: f32[3,3,64], index: 2, kind: input, shape index: {}]   ;;  %s1869_s3 = inlined_call_operand.vmem [shape: bf16[64,64], index: 3, kind: input, shape index: {}]   ;;  %s1870_s4 = inlined_call_operand.vmem [shape: f32[1,64], index: 4, kind: input, shape index: {}]   ;;  %s1871_s5 = inlined_call_operand.vmem [shape: f32[1,64], index: 5, kind: input, shape index: {}]   ;;  %s1872_s6 = inlined_call_operand.vmem [shape: bf16[64,64], index: 6, kind: input, shape index: {}]   ;;  %s1873_s7 = inlined_call_operand.vmem [shape: bf16[64,64], index: 7, kind: input, shape index: {}]   ;;  %s1874_s8 = inlined_call_operand.vmem [shape: bf16[128,64], index: 8, kind: output, shape index: {}]  }
   0x1 LB: > { %s1431_s28 = sadd.s32 4294967295, %s1378_s27   ;;  %p1249_p0 = scmp.ge.s32.totalorder %s1378_s27, 1  ;;  %s1378_s27 = sphi %s1425_s27, %s18_s27  }
   0x2   : > { %p273_p1 = scmp.lt.s32.totalorder %s1378_s27, 3 }
   0x4   : > { %p274_p2 = pnand %p1249_p0, %p273_p1 }
   0x5   : > { %p312_p3 = scmp.lt.s32.totalorder (!%p274_p2), %s1431_s28, 1  ;;  %s1251_s20 = sshll.u32 (!%p274_p2), %s1431_s28, 3 }
   0x6   : > { %277 = sbr.rel (%p274_p2) target bundleno = 407 (0x197), region = 52  ;;  %p318_p4 = scmp.lt.s32.totalorder (!%p274_p2), %s1251_s20, 15 }
   0xb   : > { %v1336_v0 = vld [vmem:[%s1869_s3 + $0x18] sm:$0xff]  ;;  %v1335_v1 = vld [vmem:[%s1869_s3 + $0x10] sm:$0xff]  ;;  %s313_s11 = scalar_select %p312_p3, %s1431_s28, 1  ;;  %v350_v2 = vld [vmem:[%s1868_s2] sm:$0x7]  ;;  %vm419_vm0 = vcmask 1046528  }
   0xc   : > { %1349 = vmatpush.bf16.msra.mxu3 %v1336_v0  ;;  %v351_v3 = vld [vmem:[%s1868_s2 + $0x4] sm:$0x7]  ;;  %917 = vmatpush.bf16.msra.mxu0 %v1336_v0  ;;  %v352_v4 = vld [vmem:[%s1868_s2 + $0x8] sm:$0x7]  ;;  %v1452_v5 = vperm.slane %v350_v2, 0  ;;  %v1454_v6 = vperm.slane %v350_v2, 1 }
   0xd   : > { %s1361_s18 = smul.u32 80, %s313_s11  ;;  %v1456_v7 = vperm.slane %v350_v2, 2  ;;  %vm493_vm1 = vcmask 1045504   ;;  %v1458_v8 = vperm.slane %v351_v3, 0  ;;  %v1334_v9 = vld [vmem:[%s1869_s3 + $0x8] sm:$0xff]  ;;  %v1468_v10 = vperm.slane %v351_v3, 1 }
   0xe   : > { %v1470_v11 = vperm.slane %v351_v3, 2  ;;  %v1472_v12 = vperm.slane %v352_v4, 0  ;;  %v1474_v13 = vperm.slane %v352_v4, 1  ;;  %v1496_v28 = vperm.slane %v352_v4, 2  ;;  %v1333_v29 = vld [vmem:[%s1869_s3] sm:$0xff]  ;;  %s1876_s20 = smov (!%p318_p4, %s1251_s20), 15 }
   0xf   : > { %s1466_s23 = scalar_lea.vmem %s1866_s0, %s1361_s18  ;;  %vm900_vm2 = vcmask 523264   ;;  %s1252_s25 = sshll.u32 %s1876_s20, 2  ;;  %vm1168_vm3 = vcmask 519168  }
  0x10   : > { %1350 = vmatpush.bf16.msra.mxu3 %v1335_v1  ;;  %918 = vmatpush.bf16.msra.mxu0 %v1335_v1  ;;  %v334_v14 = vld [vmem:[%s1466_s23 + $0x10] sm:$0xf]  ;;  %v335_v15 = vld [vmem:[%s1466_s23 + $0x14] sm:$0x1]  ;;  %v336_v16 = vld [vmem:[%s1466_s23 + $0x18] sm:$0xf]  ;;  %s1823_s29 = scalar_lea.vmem %s1867_s1, %s1252_s25  ;;  %s1845_s12 = scalar_lea.vmem %s1874_s8, %s1252_s25 }
  0x11   : > { %v337_v17 = vld [vmem:[%s1466_s23 + $0x1c] sm:$0x1]  ;;  %v338_v18 = vld [vmem:[%s1466_s23 + $0x20] sm:$0xf]  ;;  %v339_v19 = vld [vmem:[%s1466_s23 + $0x24] sm:$0x1]  ;;  %v1482_v20 = vunpack.c.l.bf16 %v334_v14  ;;  %v1484_v21 = vunpack.c.l.bf16 %v336_v16  ;;  %v1486_v22 = vunpack.c.l.bf16 %v335_v15 }
  0x12   : > { %v340_v23 = vld [vmem:[%s1466_s23 + $0x28] sm:$0xf]  ;;  %v341_v24 = vld [vmem:[%s1466_s23 + $0x2c] sm:$0x1]  ;;  %v1490_v25 = vunpack.c.l.bf16 %v338_v18  ;;  %v1492_v26 = vunpack.c.l.bf16 %v337_v17  ;;  %v1494_v27 = vunpack.c.l.bf16 %v339_v19 }
  0x13   : > { %v1501_v30 = vunpack.c.l.bf16 %v340_v23  ;;  %v364_v31 = vmul.f32 %v1452_v5, %v1482_v20  ;;  %v365_v32 = vmul.f32 %v1452_v5, %v1484_v21  ;;  %v1507_v33 = vunpack.c.l.bf16 %v341_v24 }
  0x14   : > { %1351 = vmatpush.bf16.msra.mxu3 %v1334_v9  ;;  %919 = vmatpush.bf16.msra.mxu0 %v1334_v9  ;;  %v391_v34 = vmul.f32 %v1454_v6, %v1482_v20  ;;  %v392_v35 = vmul.f32 %v1454_v6, %v1486_v22  ;;  %v393_v36 = vmul.f32 %v1454_v6, %v1484_v21 }
  0x15   : > { %v394_v37 = vmul.f32 %v1454_v6, %v1492_v26  ;;  %v465_v38 = vmul.f32 %v1456_v7, %v1482_v20  ;;  %v466_v39 = vmul.f32 %v1456_v7, %v1486_v22  ;;  %v467_v40 = vmul.f32 %v1456_v7, %v1484_v21 }
  0x16   : > { %v468_v41 = vmul.f32 %v1456_v7, %v1492_v26  ;;  %v426_v42 = vrot.slane %v391_v34, 1  ;;  %v427_v43 = vrot.slane %v392_v35, 1  ;;  %v429_v44 = vrot.slane %v393_v36, 1 }
  0x17   : > { %v430_v45 = vrot.slane %v394_v37, 1  ;;  %v500_v46 = vrot.slane %v465_v38, 2  ;;  %v501_v47 = vrot.slane %v466_v39, 2  ;;  %v503_v48 = vrot.slane %v467_v40, 2 }
  0x18   : > { %1352 = vmatpush.bf16.msra.mxu3 %v1333_v29  ;;  %v504_v49 = vrot.slane %v468_v41, 2  ;;  %920 = vmatpush.bf16.msra.mxu0 %v1333_v29  ;;  %v428_v50 = vsel %vm419_vm0, %v426_v42, %v427_v43  ;;  %v538_v52 = vmul.f32 %v1458_v8, %v1484_v21  ;;  %v539_v53 = vmul.f32 %v1458_v8, %v1490_v25 }
  0x19   : > { %v431_v51 = vsel %vm419_vm0, %v429_v44, %v430_v45  ;;  %v454_v54 = vadd.f32 %v428_v50, %v364_v31  ;;  %v502_v56 = vsel %vm493_vm1, %v500_v46, %v501_v47  ;;  %v558_v58 = vmul.f32 %v1468_v10, %v1484_v21  ;;  %v342_v47 = vld [vmem:[%s1466_s23 + $0x30] sm:$0xf] }
  0x1a   : > { %v455_v55 = vadd.f32 %v431_v51, %v365_v32  ;;  %v505_v57 = vsel %vm493_vm1, %v503_v48, %v504_v49  ;;  %v559_v59 = vmul.f32 %v1468_v10, %v1492_v26  ;;  %v560_v60 = vmul.f32 %v1468_v10, %v1490_v25 }
  0x1b   : > { %v561_v61 = vmul.f32 %v1468_v10, %v1494_v27  ;;  %v528_v62 = vadd.f32 %v502_v56, %v454_v54  ;;  %v631_v0 = vmul.f32 %v1470_v11, %v1484_v21  ;;  %v632_v1 = vmul.f32 %v1470_v11, %v1492_v26  ;;  %v344_v56 = vld [vmem:[%s1466_s23 + $0x38] sm:$0xf] }
  0x1c   : > { %v529_v63 = vadd.f32 %v505_v57, %v455_v55  ;;  %v592_v2 = vrot.slane %v558_v58, 1  ;;  %v593_v3 = vrot.slane %v559_v59, 1  ;;  %v595_v4 = vrot.slane %v560_v60, 1  ;;  %v343_v60 = vld [vmem:[%s1466_s23 + $0x34] sm:$0x1] }
  0x1d   : > { %v596_v9 = vrot.slane %v561_v61, 1  ;;  %v546_v14 = vadd.f32 %v538_v52, %v528_v62  ;;  %v633_v16 = vmul.f32 %v1470_v11, %v1490_v25  ;;  %v634_v17 = vmul.f32 %v1470_v11, %v1494_v27 }
  0x1e   : > { %v547_v15 = vadd.f32 %v539_v53, %v529_v63  ;;  %v594_v18 = vsel %vm419_vm0, %v592_v2, %v593_v3  ;;  %v665_v23 = vrot.slane %v631_v0, 2  ;;  %v666_v24 = vrot.slane %v632_v1, 2  ;;  %v345_v2 = vld [vmem:[%s1466_s23 + $0x3c] sm:$0x1] }
  0x1f   : > { %v597_v19 = vsel %vm419_vm0, %v595_v4, %v596_v9  ;;  %v620_v29 = vadd.f32 %v594_v18, %v546_v14  ;;  %v668_v32 = vrot.slane %v633_v16, 2  ;;  %v669_v34 = vrot.slane %v634_v17, 2 }
  0x20   : > { %v621_v31 = vadd.f32 %v597_v19, %v547_v15  ;;  %v667_v35 = vsel %vm493_vm1, %v665_v23, %v666_v24  ;;  %v703_v36 = vmul.f32 %v1472_v12, %v1490_v25  ;;  %v704_v37 = vmul.f32 %v1472_v12, %v1501_v30 }
  0x21   : > { %v723_v38 = vmul.f32 %v1474_v13, %v1490_v25  ;;  %v670_v39 = vsel %vm493_vm1, %v668_v32, %v669_v34  ;;  %v693_v40 = vadd.f32 %v667_v35, %v620_v29  ;;  %v724_v41 = vmul.f32 %v1474_v13, %v1494_v27 }
  0x22   : > { %v725_v42 = vmul.f32 %v1474_v13, %v1501_v30  ;;  %v694_v43 = vadd.f32 %v670_v39, %v621_v31  ;;  %v726_v44 = vmul.f32 %v1474_v13, %v1507_v33  ;;  %v796_v46 = vmul.f32 %v1496_v28, %v1490_v25 }
  0x23   : > { %v757_v45 = vrot.slane %v723_v38, 1  ;;  %v711_v48 = vadd.f32 %v703_v36, %v693_v40  ;;  %v758_v49 = vrot.slane %v724_v41, 1  ;;  %v797_v51 = vmul.f32 %v1496_v28, %v1494_v27 }
  0x24   : > { %v760_v50 = vrot.slane %v725_v42, 1  ;;  %v712_v52 = vadd.f32 %v704_v37, %v694_v43  ;;  %v761_v53 = vrot.slane %v726_v44, 1  ;;  %v798_v54 = vmul.f32 %v1496_v28, %v1501_v30 }
  0x25   : > { %v799_v55 = vmul.f32 %v1496_v28, %v1507_v33  ;;  %v759_v57 = vsel %vm419_vm0, %v757_v45, %v758_v49  ;;  %v830_v58 = vrot.slane %v796_v46, 2  ;;  %v831_v59 = vrot.slane %v797_v51, 2 }
  0x26   : > { %v1577_v61 = vunpack.c.l.bf16 %v342_v47  ;;  %v762_v62 = vsel %vm419_vm0, %v760_v50, %v761_v53  ;;  %v785_v63 = vadd.f32 %v759_v57, %v711_v48  ;;  %v833_v0 = vrot.slane %v798_v54, 2 }
  0x27   : > { %v834_v1 = vrot.slane %v799_v55, 2  ;;  %v786_v3 = vadd.f32 %v762_v62, %v712_v52  ;;  %v832_v4 = vsel %vm493_vm1, %v830_v58, %v831_v59  ;;  %v1582_v9 = vunpack.c.l.bf16 %v344_v56 }
  0x28   : > { %v366_v14 = vmul.f32 %v1452_v5, %v1490_v25  ;;  %v858_v16 = vadd.f32 %v832_v4, %v785_v63  ;;  %v367_v17 = vmul.f32 %v1452_v5, %v1501_v30  ;;  %v1589_v18 = vunpack.c.l.bf16 %v343_v60 }
  0x29   : > { %v835_v15 = vsel %vm493_vm1, %v833_v0, %v834_v1  ;;  %v1591_v23 = vunpack.c.l.bf16 %v345_v2  ;;  %v395_v24 = vmul.f32 %v1454_v6, %v1490_v25  ;;  %v396_v29 = vmul.f32 %v1454_v6, %v1494_v27 }
  0x2a   : > { %v859_v19 = vadd.f32 %v835_v15, %v786_v3  ;;  %v397_v31 = vmul.f32 %v1454_v6, %v1501_v30  ;;  %v398_v32 = vmul.f32 %v1454_v6, %v1507_v33  ;;  %v469_v34 = vmul.f32 %v1456_v7, %v1490_v25 }
  0x2b   : > { %v470_v35 = vmul.f32 %v1456_v7, %v1494_v27  ;;  %v432_v37 = vrot.slane %v395_v24, 1  ;;  %v433_v38 = vrot.slane %v396_v29, 1  ;;  %v471_v39 = vmul.f32 %v1456_v7, %v1501_v30 }
  0x2c   : > { %v865_v36 = vpack.c.bf16 %v859_v19, %v858_v16  ;;  %v435_v40 = vrot.slane %v397_v31, 1  ;;  %v436_v41 = vrot.slane %v398_v32, 1  ;;  %v472_v42 = vmul.f32 %v1456_v7, %v1507_v33 }
  0x2d   : > { %v506_v43 = vrot.slane %v469_v34, 2  ;;  %v434_v44 = vsel %vm419_vm0, %v432_v37, %v433_v38  ;;  %v507_v25 = vrot.slane %v470_v35, 2  ;;  %v509_v45 = vrot.slane %v471_v39, 2 }
  0x2e   : > { %1272 = vmatmul.msk.bf16.vlgmr.msra.gmra.mxu3 %vm900_vm2, %v865_v36  ;;  %v540_v27 = vmul.f32 %v1458_v8, %v1501_v30  ;;  %v437_v46 = vsel %vm419_vm0, %v435_v40, %v436_v41  ;;  %v456_v47 = vadd.f32 %v434_v44, %v366_v14  ;;  %v510_v48 = vrot.slane %v472_v42, 2 }
  0x2f   : > { %v541_v49 = vmul.f32 %v1458_v8, %v1577_v61  ;;  %v457_v50 = vadd.f32 %v437_v46, %v367_v17  ;;  %v508_v51 = vsel %vm493_vm1, %v506_v43, %v507_v25  ;;  %v562_v52 = vmul.f32 %v1468_v10, %v1501_v30 }
  0x30   : > { %v563_v53 = vmul.f32 %v1468_v10, %v1507_v33  ;;  %v511_v54 = vsel %vm493_vm1, %v509_v45, %v510_v48  ;;  %v530_v55 = vadd.f32 %v508_v51, %v456_v47  ;;  %v564_v56 = vmul.f32 %v1468_v10, %v1577_v61  ;;  %v330_v47 = vld [vmem:[%s1466_s23] sm:$0xf] }
  0x31   : > { %v565_v57 = vmul.f32 %v1468_v10, %v1589_v18  ;;  %v531_v58 = vadd.f32 %v511_v54, %v457_v50  ;;  %v598_v59 = vrot.slane %v562_v52, 1  ;;  %v635_v62 = vmul.f32 %v1470_v11, %v1501_v30  ;;  %v331_v52 = vld [vmem:[%s1466_s23 + $0x4] sm:$0x1]  ;;  %v333_v54 = vld [vmem:[%s1466_s23 + $0xc] sm:$0x1] }
  0x32   : > { %v599_v60 = vrot.slane %v563_v53, 1  ;;  %v548_v63 = vadd.f32 %v540_v27, %v530_v55  ;;  %v601_v0 = vrot.slane %v564_v56, 1  ;;  %v636_v2 = vmul.f32 %v1470_v11, %v1507_v33  ;;  %v332_v53 = vld [vmem:[%s1466_s23 + $0x8] sm:$0xf] }
  0x33   : > { %v602_v1 = vrot.slane %v565_v57, 1  ;;  %v549_v3 = vadd.f32 %v541_v49, %v531_v58  ;;  %v637_v14 = vmul.f32 %v1470_v11, %v1577_v61  ;;  %v638_v15 = vmul.f32 %v1470_v11, %v1589_v18 }
  0x34   : > { %v600_v4 = vsel %vm419_vm0, %v598_v59, %v599_v60  ;;  %v671_v19 = vrot.slane %v635_v62, 2  ;;  %v672_v30 = vrot.slane %v636_v2, 2  ;;  %v705_v33 = vmul.f32 %v1472_v12, %v1577_v61 }
  0x35   : > { %v603_v16 = vsel %vm419_vm0, %v601_v0, %v602_v1  ;;  %v622_v17 = vadd.f32 %v600_v4, %v548_v63  ;;  %v674_v29 = vrot.slane %v637_v14, 2  ;;  %v675_v31 = vrot.slane %v638_v15, 2 }
  0x36   : > { %v623_v24 = vadd.f32 %v603_v16, %v549_v3  ;;  %v673_v32 = vsel %vm493_vm1, %v671_v19, %v672_v30  ;;  %v706_v34 = vmul.f32 %v1472_v12, %v1582_v9  ;;  %v727_v35 = vmul.f32 %v1474_v13, %v1577_v61 }
  0x37   : > { %v728_v36 = vmul.f32 %v1474_v13, %v1589_v18  ;;  %v676_v37 = vsel %vm493_vm1, %v674_v29, %v675_v31  ;;  %v695_v38 = vadd.f32 %v673_v32, %v622_v17  ;;  %v729_v39 = vmul.f32 %v1474_v13, %v1582_v9 }
  0x38   : > { %v730_v40 = vmul.f32 %v1474_v13, %v1591_v23  ;;  %v696_v41 = vadd.f32 %v676_v37, %v623_v24  ;;  %v763_v42 = vrot.slane %v727_v35, 1  ;;  %v800_v44 = vmul.f32 %v1496_v28, %v1577_v61 }
  0x39   : > { %v764_v43 = vrot.slane %v728_v36, 1  ;;  %v713_v25 = vadd.f32 %v705_v33, %v695_v38  ;;  %v766_v45 = vrot.slane %v729_v39, 1  ;;  %v801_v46 = vmul.f32 %v1496_v28, %v1589_v18 }
  0x3a   : > { %v767_v27 = vrot.slane %v730_v40, 1  ;;  %v714_v48 = vadd.f32 %v706_v34, %v696_v41  ;;  %v802_v50 = vmul.f32 %v1496_v28, %v1582_v9  ;;  %v803_v51 = vmul.f32 %v1496_v28, %v1591_v23 }
  0x3b   : > { %v765_v49 = vsel %vm419_vm0, %v763_v42, %v764_v43  ;;  %v836_v57 = vrot.slane %v800_v44, 2  ;;  %v837_v58 = vrot.slane %v801_v46, 2  ;;  %v353_v63 = vunpack.c.l.bf16 %v330_v47 }
  0x3c   : > { %v768_v55 = vsel %vm419_vm0, %v766_v45, %v767_v27  ;;  %v787_v56 = vadd.f32 %v765_v49, %v713_v25  ;;  %v839_v60 = vrot.slane %v802_v50, 2  ;;  %v840_v62 = vrot.slane %v803_v51, 2 }
  0x3d   : > { %v788_v59 = vadd.f32 %v768_v55, %v714_v48  ;;  %v838_v0 = vsel %vm493_vm1, %v836_v57, %v837_v58  ;;  %v354_v1 = vunpack.c.l.bf16 %v332_v53  ;;  %v378_v2 = vunpack.c.l.bf16 %v331_v52 }
  0x3e   : > { %v379_v3 = vunpack.c.l.bf16 %v333_v54  ;;  %v841_v4 = vsel %vm493_vm1, %v839_v60, %v840_v62  ;;  %v860_v14 = vadd.f32 %v838_v0, %v787_v56  ;;  %v362_v15 = vmul.f32 %v1452_v5, %v353_v63 }
  0x3f   : > { %v387_v16 = vmul.f32 %v1454_v6, %v353_v63  ;;  %v861_v17 = vadd.f32 %v841_v4, %v788_v59  ;;  %v363_v19 = vmul.f32 %v1452_v5, %v354_v1  ;;  %v388_v30 = vmul.f32 %v1454_v6, %v378_v2 }
  0x40   : > { %v389_v24 = vmul.f32 %v1454_v6, %v354_v1  ;;  %v390_v29 = vmul.f32 %v1454_v6, %v379_v3  ;;  %v461_v33 = vmul.f32 %v1456_v7, %v353_v63  ;;  %v462_v32 = vmul.f32 %v1456_v7, %v378_v2 }
  0x41   : > { %v420_v31 = vrot.slane %v387_v16, 1  ;;  %v866_v34 = vpack.c.bf16 %v861_v17, %v860_v14  ;;  %v421_v35 = vrot.slane %v388_v30, 1  ;;  %v463_v37 = vmul.f32 %v1456_v7, %v354_v1 }
  0x42   : > { %v423_v36 = vrot.slane %v389_v24, 1  ;;  %v424_v38 = vrot.slane %v390_v29, 1  ;;  %v464_v39 = vmul.f32 %v1456_v7, %v379_v3  ;;  %v494_v40 = vrot.slane %v461_v33, 2 }
  0x43   : > { %v495_v41 = vrot.slane %v462_v32, 2  ;;  %1273 = vmatmul.msk.bf16.gmra.mxu3 %vm900_vm2, %v866_v34  ;;  %v422_v42 = vsel %vm419_vm0, %v420_v31, %v421_v35  ;;  %v497_v43 = vrot.slane %v463_v37, 2  ;;  %v536_v44 = vmul.f32 %v1458_v8, %v354_v1 }
  0x44   : > { %v537_v25 = vmul.f32 %v1458_v8, %v1482_v20  ;;  %v425_v45 = vsel %vm419_vm0, %v423_v36, %v424_v38  ;;  %v452_v27 = vadd.f32 %v422_v42, %v362_v15  ;;  %v498_v47 = vrot.slane %v464_v39, 2 }
  0x45   : > { %v496_v46 = vsel %vm493_vm1, %v494_v40, %v495_v41  ;;  %v453_v48 = vadd.f32 %v425_v45, %v363_v19  ;;  %v554_v49 = vmul.f32 %v1468_v10, %v354_v1  ;;  %v555_v50 = vmul.f32 %v1468_v10, %v379_v3 }
  0x46   : > { %v556_v51 = vmul.f32 %v1468_v10, %v1482_v20  ;;  %v499_v52 = vsel %vm493_vm1, %v497_v43, %v498_v47  ;;  %v526_v53 = vadd.f32 %v496_v46, %v452_v27  ;;  %v557_v54 = vmul.f32 %v1468_v10, %v1486_v22 }
  0x47   : > { %v627_v55 = vmul.f32 %v1470_v11, %v354_v1  ;;  %v527_v56 = vadd.f32 %v499_v52, %v453_v48  ;;  %v586_v57 = vrot.slane %v554_v49, 1  ;;  %v587_v58 = vrot.slane %v555_v50, 1 }
  0x48   : > { %v589_v59 = vrot.slane %v556_v51, 1  ;;  %v544_v60 = vadd.f32 %v536_v44, %v526_v53  ;;  %v590_v62 = vrot.slane %v557_v54, 1  ;;  %v628_v63 = vmul.f32 %v1470_v11, %v379_v3 }
  0x49   : > { %v629_v0 = vmul.f32 %v1470_v11, %v1482_v20  ;;  %v545_v2 = vadd.f32 %v537_v25, %v527_v56  ;;  %v588_v4 = vsel %vm419_vm0, %v586_v57, %v587_v58  ;;  %v630_v14 = vmul.f32 %v1470_v11, %v1486_v22 }
  0x4a   : > { %v659_v15 = vrot.slane %v627_v55, 2  ;;  %v591_v1 = vsel %vm419_vm0, %v589_v59, %v590_v62  ;;  %v618_v16 = vadd.f32 %v588_v4, %v544_v60  ;;  %v660_v17 = vrot.slane %v628_v63, 2  ;;  %v346_v59 = vld [vmem:[%s1466_s23 + $0x40] sm:$0xf] }
  0x4b   : > { %v662_v19 = vrot.slane %v629_v0, 2  ;;  %v619_v30 = vadd.f32 %v591_v1, %v545_v2  ;;  %v663_v24 = vrot.slane %v630_v14, 2  ;;  %v701_v3 = vmul.f32 %v1472_v12, %v1482_v20 }
  0x4c   : > { %v702_v29 = vmul.f32 %v1472_v12, %v1484_v21  ;;  %v661_v31 = vsel %vm493_vm1, %v659_v15, %v660_v17  ;;  %v719_v33 = vmul.f32 %v1474_v13, %v1482_v20  ;;  %v720_v32 = vmul.f32 %v1474_v13, %v1486_v22  ;;  %v347_v17 = vld [vmem:[%s1466_s23 + $0x44] sm:$0x1] }
  0x4d   : > { %v721_v34 = vmul.f32 %v1474_v13, %v1484_v21  ;;  %v664_v35 = vsel %vm493_vm1, %v662_v19, %v663_v24  ;;  %v691_v36 = vadd.f32 %v661_v31, %v618_v16  ;;  %v722_v37 = vmul.f32 %v1474_v13, %v1492_v26 }
  0x4e   : > { %v792_v38 = vmul.f32 %v1496_v28, %v1482_v20  ;;  %v692_v39 = vadd.f32 %v664_v35, %v619_v30  ;;  %v751_v40 = vrot.slane %v719_v33, 1  ;;  %v752_v41 = vrot.slane %v720_v32, 1 }
  0x4f   : > { %v754_v42 = vrot.slane %v721_v34, 1  ;;  %v709_v43 = vadd.f32 %v701_v3, %v691_v36  ;;  %v755_v44 = vrot.slane %v722_v37, 1  ;;  %v793_v25 = vmul.f32 %v1496_v28, %v1486_v22 }
  0x50   : > { %v794_v45 = vmul.f32 %v1496_v28, %v1484_v21  ;;  %v710_v27 = vadd.f32 %v702_v29, %v692_v39  ;;  %v753_v46 = vsel %vm419_vm0, %v751_v40, %v752_v41  ;;  %v795_v47 = vmul.f32 %v1496_v28, %v1492_v26 }
  0x51   : > { %v824_v20 = vrot.slane %v792_v38, 2  ;;  %v756_v48 = vsel %vm419_vm0, %v754_v42, %v755_v44  ;;  %v783_v49 = vadd.f32 %v753_v46, %v709_v43  ;;  %v825_v50 = vrot.slane %v793_v25, 2  ;;  %v348_v44 = vld [vmem:[%s1466_s23 + $0x48] sm:$0xf] }
  0x52   : > { %v827_v51 = vrot.slane %v794_v45, 2  ;;  %v784_v52 = vadd.f32 %v756_v48, %v710_v27  ;;  %v828_v53 = vrot.slane %v795_v47, 2  ;;  %v368_v22 = vmul.f32 %v1452_v5, %v1577_v61  ;;  %v349_v47 = vld [vmem:[%s1466_s23 + $0x4c] sm:$0x1] }
  0x53   : > { %v369_v21 = vmul.f32 %v1452_v5, %v1582_v9  ;;  %v826_v54 = vsel %vm493_vm1, %v824_v20, %v825_v50  ;;  %v399_v26 = vmul.f32 %v1454_v6, %v1577_v61  ;;  %v400_v55 = vmul.f32 %v1454_v6, %v1589_v18 }
  0x54   : > { %v401_v56 = vmul.f32 %v1454_v6, %v1582_v9  ;;  %v829_v57 = vsel %vm493_vm1, %v827_v51, %v828_v53  ;;  %v856_v58 = vadd.f32 %v826_v54, %v783_v49  ;;  %v402_v60 = vmul.f32 %v1454_v6, %v1591_v23 }
  0x55   : > { %v473_v5 = vmul.f32 %v1456_v7, %v1577_v61  ;;  %v857_v62 = vadd.f32 %v829_v57, %v784_v52  ;;  %v438_v63 = vrot.slane %v399_v26, 1  ;;  %v439_v0 = vrot.slane %v400_v55, 1 }
  0x56   : > { %v441_v2 = vrot.slane %v401_v56, 1  ;;  %v442_v4 = vrot.slane %v402_v60, 1  ;;  %v474_v14 = vmul.f32 %v1456_v7, %v1589_v18  ;;  %v475_v15 = vmul.f32 %v1456_v7, %v1582_v9 }
  0x57   : > { %v476_v1 = vmul.f32 %v1456_v7, %v1591_v23  ;;  %v864_v16 = vpack.c.bf16 %v857_v62, %v856_v58  ;;  %v440_v6 = vsel %vm419_vm0, %v438_v63, %v439_v0  ;;  %v512_v19 = vrot.slane %v473_v5, 2 }
  0x58   : > { %v534_v61 = vunpack.c.l.bf16 %v346_v59  ;;  %v443_v30 = vsel %vm419_vm0, %v441_v2, %v442_v4  ;;  %v458_v24 = vadd.f32 %v440_v6, %v368_v22  ;;  %v513_v3 = vrot.slane %v474_v14, 2 }
  0x59   : > { %v515_v29 = vrot.slane %v475_v15, 2  ;;  %1271 = vmatmul.msk.bf16.vlgmr.msra.gmra.mxu0 %vm900_vm2, %v864_v16  ;;  %v459_v18 = vadd.f32 %v443_v30, %v369_v21  ;;  %v516_v31 = vrot.slane %v476_v1, 2  ;;  %v542_v33 = vmul.f32 %v1458_v8, %v1582_v9 }
  0x5a   : > { %v543_v7 = vmul.f32 %v1458_v8, %v534_v61  ;;  %v514_v32 = vsel %vm493_vm1, %v512_v19, %v513_v3  ;;  %v552_v34 = vunpack.c.l.bf16 %v347_v17  ;;  %v566_v35 = vmul.f32 %v1468_v10, %v1582_v9 }
  0x5b   : > { %v567_v36 = vmul.f32 %v1468_v10, %v1591_v23  ;;  %v517_v37 = vsel %vm493_vm1, %v515_v29, %v516_v31  ;;  %v532_v38 = vadd.f32 %v514_v32, %v458_v24  ;;  %v568_v39 = vmul.f32 %v1468_v10, %v534_v61 }
  0x5c   : > { %v639_v40 = vmul.f32 %v1470_v11, %v1582_v9  ;;  %v533_v41 = vadd.f32 %v517_v37, %v459_v18  ;;  %v569_v8 = vmul.f32 %v1468_v10, %v552_v34  ;;  %v604_v42 = vrot.slane %v566_v35, 1  ;;  %v1347_v35 = vld [vmem:[%s1873_s7 + $0x10] sm:$0xff]  ;;  %v1346_v37 = vld [vmem:[%s1873_s7 + $0x8] sm:$0xff] }
  0x5d   : > { %v605_v43 = vrot.slane %v567_v36, 1  ;;  %v550_v25 = vadd.f32 %v542_v33, %v532_v38  ;;  %v607_v45 = vrot.slane %v568_v39, 1  ;;  %v640_v27 = vmul.f32 %v1470_v11, %v1591_v23  ;;  %v1339_v36 = vld [vmem:[%s1872_s6 + $0x10] sm:$0xff]  ;;  %v1338_v38 = vld [vmem:[%s1872_s6 + $0x8] sm:$0xff]  ;;  %v1345_v39 = vld [vmem:[%s1873_s7] sm:$0xff] }
  0x5e   : > { %v641_v46 = vmul.f32 %v1470_v11, %v534_v61  ;;  %v551_v20 = vadd.f32 %v543_v7, %v533_v41  ;;  %v608_v49 = vrot.slane %v569_v8, 1  ;;  %v642_v9 = vmul.f32 %v1470_v11, %v552_v34  ;;  %v1370_v41 = vld [vmem:[%s1870_s4] ss:$0 sm:$0xff] }
  0x5f   : > { %v606_v48 = vsel %vm419_vm0, %v604_v42, %v605_v43  ;;  %v677_v51 = vrot.slane %v639_v40, 2  ;;  %v678_v10 = vrot.slane %v640_v27, 2  ;;  %v699_v21 = vunpack.c.l.bf16 %v348_v44  ;;  %v1371_v42 = vld [vmem:[%s1871_s5] ss:$0 sm:$0xff] }
  0x60   : > { %v624_v50 = vadd.f32 %v606_v48, %v550_v25  ;;  %v680_v52 = vrot.slane %v641_v46, 2  ;;  %v609_v53 = vsel %vm419_vm0, %v607_v45, %v608_v49  ;;  %v681_v22 = vrot.slane %v642_v9, 2  ;;  %v1337_v27 = vld [vmem:[%s1872_s6] sm:$0xff] }
  0x61   : > { %v707_v54 = vmul.f32 %v1472_v12, %v534_v61  ;;  %v625_v23 = vadd.f32 %v609_v53, %v551_v20  ;;  %v679_v26 = vsel %vm493_vm1, %v677_v51, %v678_v10  ;;  %v717_v55 = vunpack.c.l.bf16 %v349_v47  ;;  %v1341_v46 = vld [vmem:[%s1823_s29] sm:$0xff]  ;;  %v1342_v47 = vld [vmem:[%s1823_s29 + $0x8] sm:$0xff] }
  0x62   : > { %v731_v56 = vmul.f32 %v1474_v13, %v534_v61  ;;  %v682_v57 = vsel %vm493_vm1, %v680_v52, %v681_v22  ;;  %v697_v58 = vadd.f32 %v679_v26, %v624_v50  ;;  %v708_v11 = vmul.f32 %v1472_v12, %v699_v21  ;;  %v1343_v50 = vld [vmem:[%s1823_s29 + $0x10] sm:$0xff] }
  0x63   : > { %v732_v59 = vmul.f32 %v1474_v13, %v552_v34  ;;  %v698_v60 = vadd.f32 %v682_v57, %v625_v23  ;;  %v733_v5 = vmul.f32 %v1474_v13, %v699_v21  ;;  %v734_v62 = vmul.f32 %v1474_v13, %v717_v55 }
  0x64   : > { %v769_v63 = vrot.slane %v731_v56, 1  ;;  %v715_v0 = vadd.f32 %v707_v54, %v697_v58  ;;  %v804_v4 = vmul.f32 %v1496_v28, %v534_v61  ;;  %v805_v14 = vmul.f32 %v1496_v28, %v552_v34  ;;  %v1340_v34 = vld [vmem:[%s1872_s6 + $0x18] sm:$0xff] }
  0x65   : > { %v770_v2 = vrot.slane %v732_v59, 1  ;;  %v716_v15 = vadd.f32 %v708_v11, %v698_v60  ;;  %v772_v1 = vrot.slane %v733_v5, 1  ;;  %v773_v16 = vrot.slane %v734_v62, 1  ;;  %1357 = vmatpush.bf16.msra.mxu2 %v1340_v34  ;;  %v1344_v11 = vld [vmem:[%s1823_s29 + $0x18] sm:$0xff] }
  0x66   : > { %v806_v17 = vmul.f32 %v1496_v28, %v699_v21  ;;  %v807_v6 = vmul.f32 %v1496_v28, %v717_v55  ;;  %v842_v19 = vrot.slane %v804_v4, 2  ;;  %v843_v30 = vrot.slane %v805_v14, 2  ;;  %v1348_v28 = vld [vmem:[%s1873_s7 + $0x18] sm:$0xff] }
  0x67   : > { %v771_v12 = vsel %vm419_vm0, %v769_v63, %v770_v2  ;;  %v774_v13 = vsel %vm419_vm0, %v772_v1, %v773_v16  ;;  %1062 = vmatpush.bf16.msrb.mxu0 %v1348_v28  ;;  %1353 = vmatpush.bf16.msra.mxu1 %v1348_v28 }
  0x68   : > { %v789_v24 = vadd.f32 %v771_v12, %v715_v0  ;;  %v845_v3 = vrot.slane %v806_v17, 2  ;;  %v790_v29 = vadd.f32 %v774_v13, %v716_v15  ;;  %v844_v61 = vsel %vm493_vm1, %v842_v19, %v843_v30 }
  0x69   : > { %v846_v18 = vrot.slane %v807_v6, 2  ;;  %1358 = vmatpush.bf16.msra.mxu2 %v1339_v36 }
  0x6a   : > { %v862_v31 = vadd.f32 %v844_v61, %v789_v24 }
  0x6b   : > { %v847_v33 = vsel %vm493_vm1, %v845_v3, %v846_v18  ;;  %1063 = vmatpush.bf16.msrb.mxu0 %v1347_v35  ;;  %1354 = vmatpush.bf16.msra.mxu1 %v1347_v35 }
  0x6c   : > { %v863_v7 = vadd.f32 %v847_v33, %v790_v29 }
  0x6d   : > { %1359 = vmatpush.bf16.msra.mxu2 %v1338_v38 }
  0x6e   : > { %v867_v32 = vpack.c.bf16 %v863_v7, %v862_v31 }
  0x6f   : > { %1064 = vmatpush.bf16.msrb.mxu0 %v1346_v37  ;;  %1355 = vmatpush.bf16.msra.mxu1 %v1346_v37 }
  0x70   : > { %1274 = vmatmul.msk.bf16.gmra.mxu3 %vm900_vm2, %v867_v32 }
  0x71   : > { %1360 = vmatpush.bf16.msra.mxu2 %v1337_v27 }
  0x73   : > { %1065 = vmatpush.bf16.msrb.mxu0 %v1345_v39  ;;  %1356 = vmatpush.bf16.msra.mxu1 %v1345_v39 }
  0x76   : > { %1307 = vmatmul.msk.bf16.vlgmr.msrb.gmra.mxu0 %vm900_vm2, %v1341_v46  ;;  %1308 = vmatmul.msk.bf16.vlgmr.msra.gmra.mxu1 %vm900_vm2, %v1342_v47 }
  0x77   : > { %1127 = vmatpush.bf16.msra.mxu0 %v1340_v34 }
  0x7b   : > { %1128 = vmatpush.bf16.msra.mxu0 %v1339_v36 }
  0x7f   : > { %1129 = vmatpush.bf16.msra.mxu0 %v1338_v38 }
  0x83   : > { %1130 = vmatpush.bf16.msra.mxu0 %v1337_v27 }
  0x86   : > { %1309 = vmatmul.msk.bf16.gmra.mxu1 %vm900_vm2, %v1343_v50 }
  0x96   : > { %1310 = vmatmul.msk.bf16.gmra.mxu1 %vm900_vm2, %v1344_v11 }
  0xb1   : > { %v927_v40 = vpop.f32.mrf.mxu3 }
  0xb2   : > { %v948_v8 = vmul.f32 %v1370_v41, %v927_v40 }
  0xb4   : > { %v960_v44 = vadd.f32 %v1371_v42, %v948_v8 }
  0xb6   : > { %v968_v20 = vmax.f32 %v960_v44, 0.0 }
  0xb9   : > { %v929_v43 = vpop.f32.mrf.mxu3 }
  0xba   : > { %v949_v25 = vmul.f32 %v1370_v41, %v929_v43 }
  0xbc   : > { %v961_v45 = vadd.f32 %v1371_v42, %v949_v25 }
  0xbe   : > { %v969_v48 = vmax.f32 %v961_v45, 0.0 }
  0xc0   : > { %v975_v49 = vpack.c.bf16 %v969_v48, %v968_v20 }
  0xc2   : > { %1328 = vmatmul.msk.bf16.vlgmr.msra.gmra.mxu2 %vm900_vm2, %v975_v49 }
  0xc6   : > { %v932_v9 = vpop.f32.mrf.mxu3 }
  0xc7   : > { %v950_v51 = vmul.f32 %v1370_v41, %v932_v9 }
  0xc9   : > { %v962_v52 = vadd.f32 %v1371_v42, %v950_v51 }
  0xcb   : > { %v970_v21 = vmax.f32 %v962_v52, 0.0 }
  0xce   : > { %v934_v10 = vpop.f32.mrf.mxu3 }
  0xcf   : > { %v951_v53 = vmul.f32 %v1370_v41, %v934_v10 }
  0xd1   : > { %v963_v22 = vadd.f32 %v1371_v42, %v951_v53 }
  0xd3   : > { %v971_v54 = vmax.f32 %v963_v22, 0.0 }
  0xd5   : > { %v976_v23 = vpack.c.bf16 %v971_v54, %v970_v21 }
  0xd6   : > { %v922_v26 = vpop.f32.mrf.mxu0 }
  0xd7   : > { %1329 = vmatmul.msk.bf16.gmra.mxu2 %vm900_vm2, %v976_v23  ;;  %v946_v55 = vmul.f32 %v1370_v41, %v922_v26 }
  0xd9   : > { %v958_v56 = vadd.f32 %v1371_v42, %v946_v55 }
  0xdb   : > { %v966_v59 = vmax.f32 %v958_v56, 0.0 }
  0xde   : > { %v924_v57 = vpop.f32.mrf.mxu0 }
  0xdf   : > { %v947_v58 = vmul.f32 %v1370_v41, %v924_v57 }
  0xe1   : > { %v959_v60 = vadd.f32 %v1371_v42, %v947_v58 }
  0xe3   : > { %v967_v5 = vmax.f32 %v959_v60, 0.0 }
  0xe5   : > { %v974_v62 = vpack.c.bf16 %v967_v5, %v966_v59 }
  0xe7   : > { %1327 = vmatmul.msk.bf16.vlgmr.msra.gmra.mxu0 %vm900_vm2, %v974_v62 }
  0xf3   : > { %v937_v63 = vpop.f32.mrf.mxu3  ;;  %v1072_v12 = vpop.f32.mrf.mxu1 }
  0xf4   : > { %v952_v0 = vmul.f32 %v1370_v41, %v937_v63  ;;  %v1067_v18 = vpop.f32.mrf.mxu0 }
  0xf6   : > { %v964_v4 = vadd.f32 %v1371_v42, %v952_v0 }
  0xf8   : > { %v972_v1 = vmax.f32 %v964_v4, 0.0 }
  0xfb   : > { %v939_v2 = vpop.f32.mrf.mxu3  ;;  %v1074_v24 = vpop.f32.mrf.mxu1 }
  0xfc   : > { %v953_v14 = vmul.f32 %v1370_v41, %v939_v2  ;;  %v1069_v7 = vpop.f32.mrf.mxu0 }
  0xfe   : > { %v965_v15 = vadd.f32 %v1371_v42, %v953_v14 }
 0x100   : > { %v973_v16 = vmax.f32 %v965_v15, 0.0 }
 0x102   : > { %v977_v17 = vpack.c.bf16 %v973_v16, %v972_v1 }
 0x103   : > { %v1077_v33 = vpop.f32.mrf.mxu1 }
 0x104   : > { %1330 = vmatmul.msk.bf16.gmra.mxu2 %vm900_vm2, %v977_v17 }
 0x10b   : > { %v1079_v36 = vpop.f32.mrf.mxu1 }
 0x113   : > { %v1082_v46 = vpop.f32.mrf.mxu1 }
 0x11b   : > { %v1084_v9 = vpop.f32.mrf.mxu1 }
 0x145   : > { %v1137_v6 = vpop.f32.mrf.mxu2 }
 0x146   : > { %v1138_v19 = vadd.f32 %v1137_v6, %v1072_v12 }
 0x148   : > { %v1154_v30 = vmax.f32 %v1138_v19, 0.0 }
 0x14a   : > { %v1162_v13 = vpack.c.bf16 %v1154_v30, %v1154_v30 }
 0x14c   : > { %1171 = vst.msk [vmem:[%s1845_s12 + $0x8] sm:$0xf] %vm1168_vm3, %v1162_v13 }
 0x14d   : > { %v1139_v3 = vpop.f32.mrf.mxu2 }
 0x14e   : > { %v1140_v29 = vadd.f32 %v1139_v3, %v1074_v24 }
 0x150   : > { %v1155_v61 = vmax.f32 %v1140_v29, 0.0 }
 0x152   : > { %v1163_v31 = vpack.c.bf16 %v1155_v61, %v1155_v61 }
 0x154   : > { %1172 = vst.msk [vmem:[%s1845_s12 + $0xc] sm:$0xf] %vm1168_vm3, %v1163_v31 }
 0x15a   : > { %v1142_v32 = vpop.f32.mrf.mxu2 }
 0x15b   : > { %v1143_v28 = vadd.f32 %v1142_v32, %v1077_v33 }
 0x15d   : > { %v1156_v34 = vmax.f32 %v1143_v28, 0.0 }
 0x15f   : > { %v1164_v35 = vpack.c.bf16 %v1156_v34, %v1156_v34 }
 0x161   : > { %1173 = vst.msk [vmem:[%s1845_s12 + $0x10] sm:$0xf] %vm1168_vm3, %v1164_v35 }
 0x162   : > { %v1144_v37 = vpop.f32.mrf.mxu2 }
 0x163   : > { %v1145_v38 = vadd.f32 %v1144_v37, %v1079_v36 }
 0x164   : > { %v1132_v39 = vpop.f32.mrf.mxu0 }
 0x165   : > { %v1133_v40 = vadd.f32 %v1132_v39, %v1067_v18  ;;  %v1157_v41 = vmax.f32 %v1145_v38, 0.0 }
 0x167   : > { %v1152_v8 = vmax.f32 %v1133_v40, 0.0  ;;  %v1165_v42 = vpack.c.bf16 %v1157_v41, %v1157_v41 }
 0x169   : > { %v1160_v43 = vpack.c.bf16 %v1152_v8, %v1152_v8  ;;  %1174 = vst.msk [vmem:[%s1845_s12 + $0x14] sm:$0xf] %vm1168_vm3, %v1165_v42 }
 0x16b   : > { %1169 = vst.msk [vmem:[%s1845_s12] sm:$0xf] %vm1168_vm3, %v1160_v43 }
 0x16c   : > { %v1134_v44 = vpop.f32.mrf.mxu0 }
 0x16d   : > { %v1135_v25 = vadd.f32 %v1134_v44, %v1069_v7 }
 0x16f   : > { %v1153_v45 = vmax.f32 %v1135_v25, 0.0 }
 0x171   : > { %v1161_v27 = vpack.c.bf16 %v1153_v45, %v1153_v45 }
 0x173   : > { %1170 = vst.msk [vmem:[%s1845_s12 + $0x4] sm:$0xf] %vm1168_vm3, %v1161_v27 }
 0x187   : > { %v1147_v47 = vpop.f32.mrf.mxu2 }
 0x188   : > { %v1148_v20 = vadd.f32 %v1147_v47, %v1082_v46 }
 0x18a   : > { %v1158_v48 = vmax.f32 %v1148_v20, 0.0 }
 0x18c   : > { %v1166_v49 = vpack.c.bf16 %v1158_v48, %v1158_v48 }
 0x18e   : > { %1175 = vst.msk [vmem:[%s1845_s12 + $0x18] sm:$0xf] %vm1168_vm3, %v1166_v49 }
 0x18f   : > { %v1149_v50 = vpop.f32.mrf.mxu2 }
 0x190   : > { %v1150_v51 = vadd.f32 %v1149_v50, %v1084_v9 }
 0x192   : > { %v1159_v10 = vmax.f32 %v1150_v51, 0.0 }
 0x194   : > { %v1167_v52 = vpack.c.bf16 %v1159_v10, %v1159_v10 }
 0x196   : > { %1176 = vst.msk [vmem:[%s1845_s12 + $0x1c] sm:$0xf] %vm1168_vm3, %v1167_v52 }
 0x197 PF: > { %s18_s27 = sadd.s32 1, %s1378_s27  }
 0x198   : > { %p15_p5 = scmp.ge.s32.totalorder %s18_s27, 4  }
 0x19a   :  { %17 = sbr.rel (!%p15_p5) target bundleno = 1 (0x1), region = 85 }

// kernel: _lambda_.63
= control target key start
LH: loop header
LB: loop body
LE: loop exit
PB: predicated region body
PF: predicated region fallthrough
CT: control target
= control target key end

     0   :  { %s1084_s18 = smov 0   ;;  %s1265_s0 = inlined_call_operand.vmem [shape: bf16[32,576], index: 0, kind: input, shape index: {}]   ;;  %s1266_s1 = inlined_call_operand.vmem [shape: bf16[576,128], index: 1, kind: input, shape index: {}]   ;;  %s1267_s2 = inlined_call_operand.vmem [shape: bf16[64,128], index: 2, kind: input, shape index: {}]   ;;  %s1268_s3 = inlined_call_operand.vmem [shape: f32[1,128], index: 3, kind: input, shape index: {}]   ;;  %s1269_s4 = inlined_call_operand.vmem [shape: f32[1,128], index: 4, kind: input, shape index: {}]   ;;  %s1270_s5 = inlined_call_operand.vmem [shape: bf16[32,128], index: 5, kind: output, shape index: {}]  }
   0x1 LB: > { %s785_s19 = sadd.s32 4294967295, %s1051_s18   ;;  %p789_p0 = scmp.ge.s32.totalorder %s1051_s18, 1  ;;  %s1051_s18 = sphi %s1084_s18, %s15_s18  }
   0x2   : > { %p189_p1 = scmp.lt.s32.totalorder %s1051_s18, 3 }
   0x4   : > { %p190_p2 = pnand %p789_p0, %p189_p1 }
   0x5   : > { %s790_s20 = sshll.u32 (!%p190_p2), %s785_s19, 1  ;;  %s1053_s26 = smov (!%p190_p2), 64  }
   0x6   : > { %193 = sbr.rel (%p190_p2) target bundleno = 312 (0x138), region = 40  ;;  %p219_p3 = scmp.lt.s32.totalorder (!%p190_p2), %s790_s20, 3 }
   0xb   : > { %v990_v0 = vld [vmem:[%s1266_s1 + $0x38] sm:$0xff]  ;;  %v989_v3 = vld [vmem:[%s1266_s1 + $0x30] sm:$0xff]  ;;  %s1272_s20 = smov (!%p219_p3, %s790_s20), 3  ;;  %v988_v8 = vld [vmem:[%s1266_s1 + $0x28] sm:$0xff]  ;;  %vm381_vm0 = vcmask 523264  }
   0xc   : > { %v998_v1 = vld [vmem:[%s1266_s1 + $0x78] sm:$0xff]  ;;  %641 = vmatpush.bf16.msra.mxu1 %v990_v0  ;;  %v997_v4 = vld [vmem:[%s1266_s1 + $0x70] sm:$0xff]  ;;  %s1028_s12 = smul.u32 20, %s1272_s20  ;;  %v996_v9 = vld [vmem:[%s1266_s1 + $0x68] sm:$0xff]  ;;  %s793_s17 = sshll.u32 %s1272_s20, 2 }
   0xd   : > { %v1006_v2 = vld [vmem:[%s1266_s1 + $0xb8] sm:$0xff]  ;;  %655 = vmatpush.bf16.msra.mxu2 %v998_v1  ;;  %v1005_v6 = vld [vmem:[%s1266_s1 + $0xb0] sm:$0xff]  ;;  %v1004_v10 = vld [vmem:[%s1266_s1 + $0xa8] sm:$0xff]  ;;  %s229_s23 = scalar_lea.vmem %s1270_s5, %s793_s17 }
   0xe   : > { %v1022_v5 = vld [vmem:[%s1267_s2 + $0x18] sm:$0xff]  ;;  %669 = vmatpush.bf16.msra.mxu3 %v1006_v2  ;;  %v1021_v7 = vld [vmem:[%s1267_s2 + $0x10] sm:$0xff]  ;;  %s1128_s21 = scalar_lea.vmem %s1265_s0, %s1028_s12  ;;  %v1020_v13 = vld [vmem:[%s1267_s2 + $0x8] sm:$0xff] }
   0xf   : > { %389 = vmatpush.bf16.msra.mxu0 %v1022_v5  ;;  %v1134_v11 = vld [vmem:[%s1128_s21 + $0x8] sm:$0xff]  ;;  %v1137_v12 = vld [vmem:[%s1128_s21 + $0x1c] sm:$0xff]  ;;  %v985_v22 = vld [vmem:[%s1266_s1 + $0x10] sm:$0xff] }
  0x10   : > { %642 = vmatpush.bf16.msra.mxu1 %v989_v3  ;;  %326 = vrot.lane.b32.xlu0 %v1134_v11, %s1053_s26  ;;  %v310_v14 = vunpack.c.l.bf16 %v1134_v11  ;;  %v311_v15 = vunpack.c.l.bf16 %v1137_v12  ;;  %v987_v16 = vld [vmem:[%s1266_s1 + $0x20] sm:$0xff]  ;;  %v986_v20 = vld [vmem:[%s1266_s1 + $0x18] sm:$0xff]  ;;  %v993_v25 = vld [vmem:[%s1266_s1 + $0x50] sm:$0xff] }
  0x11   : > { %656 = vmatpush.bf16.msra.mxu2 %v997_v4  ;;  %v995_v17 = vld [vmem:[%s1266_s1 + $0x60] sm:$0xff]  ;;  %v994_v21 = vld [vmem:[%s1266_s1 + $0x58] sm:$0xff]  ;;  %v984_v27 = vld [vmem:[%s1266_s1 + $0x8] sm:$0xff] }
  0x12   : > { %670 = vmatpush.bf16.msra.mxu3 %v1005_v6  ;;  %v1038_v18 = vpack.i.bf16 %v311_v15, %v310_v14  ;;  %v1003_v19 = vld [vmem:[%s1266_s1 + $0xa0] sm:$0xff]  ;;  %v1002_v23 = vld [vmem:[%s1266_s1 + $0x98] sm:$0xff]  ;;  %v1001_v28 = vld [vmem:[%s1266_s1 + $0x90] sm:$0xff] }
  0x13   : > { %390 = vmatpush.bf16.msra.mxu0 %v1021_v7  ;;  %v1019_v24 = vld [vmem:[%s1267_s2] sm:$0xff]  ;;  %v1014_v26 = vld [vmem:[%s1266_s1 + $0xf8] sm:$0xff]  ;;  %v992_v29 = vld [vmem:[%s1266_s1 + $0x48] sm:$0xff] }
  0x14   : > { %643 = vmatpush.bf16.msra.mxu1 %v988_v8  ;;  %1039 = vrot.lane.b32.xlu1 %v1038_v18, %s1053_s26  ;;  %v1013_v30 = vld [vmem:[%s1266_s1 + $0xf0] sm:$0xff]  ;;  %v983_v31 = vld [vmem:[%s1266_s1] sm:$0xff]  ;;  %v1000_v32 = vld [vmem:[%s1266_s1 + $0x88] sm:$0xff] }
  0x15   : > { %657 = vmatpush.bf16.msra.mxu2 %v996_v9  ;;  %v991_v33 = vld [vmem:[%s1266_s1 + $0x40] sm:$0xff]  ;;  %v1012_v34 = vld [vmem:[%s1266_s1 + $0xe8] sm:$0xff]  ;;  %v980_v36 = vld [vmem:[%s1128_s21 + $0x10] sm:$0xf0] }
  0x16   : > { %671 = vmatpush.bf16.msra.mxu3 %v1004_v10  ;;  %v813_v35 = vld [vmem:[%s1128_s21] sm:$0xf]  ;;  %v1018_v39 = vld [vmem:[%s1266_s1 + $0x118] sm:$0xff]  ;;  %v978_v40 = vld [vmem:[%s1128_s21 + $0x4] sm:$0xf] }
  0x17   : > { %391 = vmatpush.bf16.msra.mxu0 %v1020_v13  ;;  %v814_v37 = vor.u32 %v980_v36, %v813_v35  ;;  %v999_v38 = vld [vmem:[%s1266_s1 + $0x80] sm:$0xff]  ;;  %v815_v41 = vld [vmem:[%s1128_s21 + $0x14] sm:$0xf0]  ;;  %v821_v44 = vld [vmem:[%s1128_s21 + $0x8] sm:$0xf] }
  0x18   : > { %644 = vmatpush.bf16.msra.mxu1 %v987_v16  ;;  %328 = vrot.lane.b32.xlu0 %v1137_v12, %s1053_s26  ;;  %v818_v42 = vor.u32 %v978_v40, %v815_v41  ;;  %v1011_v43 = vld [vmem:[%s1266_s1 + $0xe0] sm:$0xff]  ;;  %v981_v45 = vld [vmem:[%s1128_s21 + $0x18] sm:$0xf0]  ;;  %v1017_v47 = vld [vmem:[%s1266_s1 + $0x110] sm:$0xff] }
  0x19   : > { %658 = vmatpush.bf16.msra.mxu2 %v995_v17  ;;  %v822_v46 = vor.u32 %v981_v45, %v821_v44  ;;  %v1010_v48 = vld [vmem:[%s1266_s1 + $0xd8] sm:$0xff]  ;;  %v1016_v49 = vld [vmem:[%s1266_s1 + $0x108] sm:$0xff]  ;;  %v1009_v50 = vld [vmem:[%s1266_s1 + $0xd0] sm:$0xff] }
  0x1a   : > { %672 = vmatpush.bf16.msra.mxu3 %v1003_v19  ;;  %v1015_v51 = vld [vmem:[%s1266_s1 + $0x100] sm:$0xff]  ;;  %v829_v52 = vld [vmem:[%s1128_s21 + $0x10] sm:$0xf]  ;;  %v1008_v54 = vld [vmem:[%s1266_s1 + $0xc8] sm:$0xff] }
  0x1b   : > { %392 = vmatpush.bf16.msra.mxu0 %v1019_v24  ;;  %v982_v53 = vld [vmem:[%s1128_s21 + $0x20] sm:$0xf0]  ;;  %v234_v60 = vld [vmem:[%s1128_s21 + $0x10] sm:$0xf]  ;;  %v979_v17 = vld [vmem:[%s1128_s21 + $0xc] sm:$0xf] }
  0x1c   : > { %645 = vmatpush.bf16.msra.mxu1 %v986_v20  ;;  %v830_v55 = vor.u32 %v982_v53, %v829_v52  ;;  %v1007_v56 = vld [vmem:[%s1266_s1 + $0xc0] sm:$0xff]  ;;  %v336_v1 = vunpack.c.l.bf16 %v234_v60 }
  0x1d   : > { %659 = vmatpush.bf16.msra.mxu2 %v994_v21  ;;  %v237_v61 = vld [vmem:[%s1128_s21 + $0x24] sm:$0xf]  ;;  %v823_v18 = vld [vmem:[%s1128_s21 + $0x1c] sm:$0xf0] }
  0x1e   : > { %673 = vmatpush.bf16.msra.mxu3 %v1002_v23  ;;  %v337_v3 = vunpack.c.l.bf16 %v237_v61  ;;  %v826_v19 = vor.u32 %v979_v17, %v823_v18 }
  0x1f   : > { %683 = vmatpush.bf16.msrb.mxu0 %v1014_v26 }
  0x20   : > { %646 = vmatpush.bf16.msra.mxu1 %v985_v22 }
  0x21   : > { %660 = vmatpush.bf16.msra.mxu2 %v993_v25 }
  0x22   : > { %674 = vmatpush.bf16.msra.mxu3 %v1001_v28 }
  0x23   : > { %684 = vmatpush.bf16.msrb.mxu0 %v1013_v30 }
  0x24   : > { %647 = vmatpush.bf16.msra.mxu1 %v984_v27 }
  0x25   : > { %661 = vmatpush.bf16.msra.mxu2 %v992_v29 }
  0x26   : > { %675 = vmatpush.bf16.msra.mxu3 %v1000_v32 }
  0x27   : > { %685 = vmatpush.bf16.msrb.mxu0 %v1012_v34 }
  0x28   : > { %648 = vmatpush.bf16.msra.mxu1 %v983_v31 }
  0x29   : > { %662 = vmatpush.bf16.msra.mxu2 %v991_v33  ;;  %v1043_v33 = vld [vmem:[%s1268_s3] ss:$0 sm:$0xff] }
  0x2a   : > { %676 = vmatpush.bf16.msra.mxu3 %v999_v38 }
  0x2b   : > { %649 = vmatmul.bf16.vlgmr.msra.gmra.mxu1 %v814_v37  ;;  %686 = vmatpush.bf16.msrb.mxu0 %v1011_v43  ;;  %v1044_v37 = vld [vmem:[%s1269_s4] ss:$0 sm:$0xff] }
  0x2c   : > { %701 = vmatpush.bf16.msrb.mxu1 %v1018_v39  ;;  %663 = vmatmul.bf16.vlgmr.msra.gmra.mxu2 %v818_v42 }
  0x2d   : > { %677 = vmatmul.bf16.vlgmr.msra.gmra.mxu3 %v822_v46 }
  0x2f   : > { %687 = vmatpush.bf16.msrb.mxu0 %v1010_v48 }
  0x30   : > { %702 = vmatpush.bf16.msrb.mxu1 %v1017_v47 }
  0x33   : > { %688 = vmatpush.bf16.msrb.mxu0 %v1009_v50 }
  0x34   : > { %703 = vmatpush.bf16.msrb.mxu1 %v1016_v49 }
  0x37   : > { %689 = vmatpush.bf16.msrb.mxu0 %v1008_v54 }
  0x38   : > { %704 = vmatpush.bf16.msrb.mxu1 %v1015_v51 }
  0x3b   : > { %975 = vmatmul.msk.bf16.vlgmr.msrb.gmra.mxu1 %vm381_vm0, %v830_v55  ;;  %690 = vmatpush.bf16.msrb.mxu0 %v1007_v56 }
  0x82   : > { %v327_v57 = vpop.permute.xlu0 %326 }
  0x83   : > { %v330_v59 = vrot.slane %v327_v57, 4 }
  0x85   : > { %v334_v2 = vunpack.c.l.bf16 %v330_v59 }
  0x86   : > { %v1040_v58 = vpop.permute.xlu1 %1039 }
  0x87   : > { %v1042_v62 = vunpack.i.h.bf16 %v1040_v58  ;;  %v1041_v63 = vunpack.i.l.bf16 %v1040_v58  ;;  %v338_v8 = vmax.f32 %v334_v2, %v336_v1 }
  0x89   : > { %v321_v5 = vmax.f32 %v311_v15, %v1042_v62  ;;  %v320_v6 = vmax.f32 %v310_v14, %v1041_v63 }
  0x8a   : > { %v329_v0 = vpop.permute.xlu0 %328 }
  0x8b   : > { %v331_v4 = vrot.slane %v329_v0, 4  ;;  %v346_v10 = vmax.f32 %v320_v6, %v338_v8 }
  0x8d   : > { %v335_v7 = vunpack.c.l.bf16 %v331_v4 }
  0x8f   : > { %v339_v9 = vmax.f32 %v335_v7, %v337_v3 }
  0x91   : > { %v347_v13 = vmax.f32 %v321_v5, %v339_v9 }
  0x93   : > { %v348_v16 = vpack.c.bf16 %v347_v13, %v346_v10 }
  0x95   : > { %810 = vmatmul.msk.bf16.vlgmr.msra.gmra.mxu0 %vm381_vm0, %v348_v16 }
  0xa5   : > { %691 = vmatmul.bf16.vlgmr.msrb.gmra.mxu0 %v826_v19 }
  0xa8   : > { %v650_v20 = vpop.f32.mrf.mxu1 }
  0xaf   : > { %v664_v22 = vpop.f32.mrf.mxu2 }
  0xb0   : > { %v652_v12 = vpop.f32.mrf.mxu1  ;;  %v678_v11 = vpop.f32.mrf.mxu3 }
  0xb7   : > { %v666_v26 = vpop.f32.mrf.mxu2 }
  0xb8   : > { %v706_v27 = vpop.f32.mrf.mxu1  ;;  %v680_v31 = vpop.f32.mrf.mxu3 }
  0xc0   : > { %v708_v39 = vpop.f32.mrf.mxu1 }
 0x112   : > { %v394_v21 = vpop.f32.mrf.mxu0 }
 0x113   : > { %v651_v15 = vadd.f32 %v650_v20, %v394_v21 }
 0x115   : > { %v665_v14 = vadd.f32 %v664_v22, %v651_v15 }
 0x117   : > { %v679_v24 = vadd.f32 %v678_v11, %v665_v14 }
 0x11a   : > { %v396_v23 = vpop.f32.mrf.mxu0 }
 0x11b   : > { %v653_v25 = vadd.f32 %v652_v12, %v396_v23 }
 0x11d   : > { %v667_v30 = vadd.f32 %v666_v26, %v653_v25 }
 0x11f   : > { %v681_v34 = vadd.f32 %v680_v31, %v667_v30 }
 0x122   : > { %v692_v28 = vpop.f32.mrf.mxu0 }
 0x123   : > { %v693_v29 = vadd.f32 %v692_v28, %v679_v24 }
 0x125   : > { %v707_v32 = vadd.f32 %v706_v27, %v693_v29 }
 0x127   : > { %v715_v36 = vmul.f32 %v1043_v33, %v707_v32 }
 0x129   : > { %v721_v41 = vadd.f32 %v1044_v37, %v715_v36 }
 0x12a   : > { %v694_v35 = vpop.f32.mrf.mxu0 }
 0x12b   : > { %v695_v38 = vadd.f32 %v694_v35, %v681_v34  ;;  %v723_v44 = vmax.f32 %v721_v41, 0.0 }
 0x12d   : > { %v709_v40 = vadd.f32 %v708_v39, %v695_v38 }
 0x12f   : > { %v716_v42 = vmul.f32 %v1043_v33, %v709_v40 }
 0x131   : > { %v722_v43 = vadd.f32 %v1044_v37, %v716_v42 }
 0x133   : > { %v724_v45 = vmax.f32 %v722_v43, 0.0 }
 0x135   : > { %v1026_v46 = vpack.c.bf16 %v724_v45, %v723_v44 }
 0x137   : > { %1027 = vst [vmem:[%s229_s23] sm:$0xff] %v1026_v46  }
 0x138 PF: > { %s15_s18 = sadd.s32 1, %s1051_s18  }
 0x139   : > { %p12_p4 = scmp.ge.s32.totalorder %s15_s18, 4  }
 0x13b   :  { %14 = sbr.rel (!%p12_p4) target bundleno = 1 (0x1), region = 70 }

// kernel: _lambda_.64
= control target key start
LH: loop header
LB: loop body
LE: loop exit
PB: predicated region body
PF: predicated region fallthrough
CT: control target
= control target key end

     0   :  { %s678_s15 = smov 0   ;;  %s777_s0 = inlined_call_operand.vmem [shape: bf16[24,384], index: 0, kind: input, shape index: {}]   ;;  %s778_s1 = inlined_call_operand.vmem [shape: bf16[384,128], index: 1, kind: input, shape index: {}]   ;;  %s779_s2 = inlined_call_operand.vmem [shape: f32[1,128], index: 2, kind: input, shape index: {}]   ;;  %s780_s3 = inlined_call_operand.vmem [shape: f32[1,128], index: 3, kind: input, shape index: {}]   ;;  %s781_s4 = inlined_call_operand.vmem [shape: bf16[24,128], index: 4, kind: output, shape index: {}]  }
   0x1 LB: > { %s505_s16 = sadd.s32 4294967295, %s651_s15   ;;  %p509_p0 = scmp.ge.s32.totalorder %s651_s15, 1  ;;  %s651_s15 = sphi %s678_s15, %s14_s15  }
   0x2   : > { %p162_p1 = scmp.lt.s32.totalorder %s651_s15, 4 }
   0x4   : > { %p163_p2 = pnand %p509_p0, %p162_p1 }
   0x5   : > { %p187_p3 = scmp.lt.s32.totalorder (!%p163_p2), %s505_s16, 2 }
   0x6   : > { %166 = sbr.rel (%p163_p2) target bundleno = 186 (0xba), region = 36 }
   0xb   : > { %v617_v0 = vld [vmem:[%s778_s1 + $0x38] sm:$0xff]  ;;  %v616_v3 = vld [vmem:[%s778_s1 + $0x30] sm:$0xff]  ;;  %v615_v6 = vld [vmem:[%s778_s1 + $0x28] sm:$0xff]  ;;  %s783_s16 = smov (!%p187_p3, %s505_s16), 2 }
   0xc   : > { %v625_v1 = vld [vmem:[%s778_s1 + $0x78] sm:$0xff]  ;;  %401 = vmatpush.bf16.msra.mxu0 %v617_v0  ;;  %v624_v4 = vld [vmem:[%s778_s1 + $0x70] sm:$0xff]  ;;  %v623_v7 = vld [vmem:[%s778_s1 + $0x68] sm:$0xff]  ;;  %s634_s23 = smul.u32 12, %s783_s16  ;;  %s511_s25 = sshll.u32 %s783_s16, 2 }
   0xd   : > { %v633_v2 = vld [vmem:[%s778_s1 + $0xb8] sm:$0xff]  ;;  %414 = vmatpush.bf16.msra.mxu1 %v625_v1  ;;  %v632_v5 = vld [vmem:[%s778_s1 + $0xb0] sm:$0xff]  ;;  %v631_v8 = vld [vmem:[%s778_s1 + $0xa8] sm:$0xff]  ;;  %s195_s28 = scalar_lea.vmem %s781_s4, %s511_s25 }
   0xe   : > { %427 = vmatpush.bf16.msra.mxu2 %v633_v2  ;;  %v614_v9 = vld [vmem:[%s778_s1 + $0x20] sm:$0xff]  ;;  %v613_v12 = vld [vmem:[%s778_s1 + $0x18] sm:$0xff]  ;;  %v612_v15 = vld [vmem:[%s778_s1 + $0x10] sm:$0xff]  ;;  %s191_s6 = scalar_lea.vmem %s777_s0, %s634_s23 }
   0xf   : > { %v622_v10 = vld [vmem:[%s778_s1 + $0x60] sm:$0xff]  ;;  %v621_v13 = vld [vmem:[%s778_s1 + $0x58] sm:$0xff]  ;;  %v620_v16 = vld [vmem:[%s778_s1 + $0x50] sm:$0xff] }
  0x10   : > { %402 = vmatpush.bf16.msra.mxu0 %v616_v3  ;;  %v630_v11 = vld [vmem:[%s778_s1 + $0xa0] sm:$0xff]  ;;  %v629_v14 = vld [vmem:[%s778_s1 + $0x98] sm:$0xff]  ;;  %v628_v17 = vld [vmem:[%s778_s1 + $0x90] sm:$0xff] }
  0x11   : > { %415 = vmatpush.bf16.msra.mxu1 %v624_v4  ;;  %v611_v18 = vld [vmem:[%s778_s1 + $0x8] sm:$0xff]  ;;  %v196_v20 = vld [vmem:[%s191_s6] sm:$0xff] }
  0x12   : > { %428 = vmatpush.bf16.msra.mxu2 %v632_v5  ;;  %v619_v19 = vld [vmem:[%s778_s1 + $0x48] sm:$0xff]  ;;  %v248_v23 = vunpack.c.l.b16 %v196_v20  ;;  %v249_v24 = vunpack.c.h.b16 %v196_v20  ;;  %v610_v25 = vld [vmem:[%s778_s1] sm:$0xff] }
  0x13   : > { %v627_v21 = vld [vmem:[%s778_s1 + $0x88] sm:$0xff]  ;;  %v618_v26 = vld [vmem:[%s778_s1 + $0x40] sm:$0xff] }
  0x14   : > { %403 = vmatpush.bf16.msra.mxu0 %v615_v6  ;;  %v197_v22 = vld [vmem:[%s191_s6 + $0x8] sm:$0xf]  ;;  %v626_v28 = vld [vmem:[%s778_s1 + $0x80] sm:$0xff]  ;;  %v251_v29 = vpack.c.b16 %v248_v23, %v248_v23  ;;  %v252_v30 = vpack.c.b16 %v249_v24, %v249_v24 }
  0x15   : > { %416 = vmatpush.bf16.msra.mxu1 %v623_v7  ;;  %v250_v27 = vunpack.c.l.b16 %v197_v22  ;;  %v643_v35 = vld [vmem:[%s779_s2] ss:$0 sm:$0xff] }
  0x16   : > { %429 = vmatpush.bf16.msra.mxu2 %v631_v8  ;;  %v644_v38 = vld [vmem:[%s780_s3] ss:$0 sm:$0xff] }
  0x17   : > { %v253_v31 = vpack.c.b16 %v250_v27, %v250_v27 }
  0x18   : > { %404 = vmatpush.bf16.msra.mxu0 %v614_v9 }
  0x19   : > { %417 = vmatpush.bf16.msra.mxu1 %v622_v10 }
  0x1a   : > { %430 = vmatpush.bf16.msra.mxu2 %v630_v11 }
  0x1c   : > { %405 = vmatpush.bf16.msra.mxu0 %v613_v12 }
  0x1d   : > { %418 = vmatpush.bf16.msra.mxu1 %v621_v13 }
  0x1e   : > { %431 = vmatpush.bf16.msra.mxu2 %v629_v14 }
  0x20   : > { %406 = vmatpush.bf16.msra.mxu0 %v612_v15 }
  0x21   : > { %419 = vmatpush.bf16.msra.mxu1 %v620_v16 }
  0x22   : > { %432 = vmatpush.bf16.msra.mxu2 %v628_v17 }
  0x24   : > { %407 = vmatpush.bf16.msra.mxu0 %v611_v18 }
  0x25   : > { %420 = vmatpush.bf16.msra.mxu1 %v619_v19 }
  0x26   : > { %433 = vmatpush.bf16.msra.mxu2 %v627_v21 }
  0x28   : > { %408 = vmatpush.bf16.msra.mxu0 %v610_v25 }
  0x29   : > { %421 = vmatpush.bf16.msra.mxu1 %v618_v26 }
  0x2a   : > { %434 = vmatpush.bf16.msra.mxu2 %v626_v28 }
  0x2b   : > { %409 = vmatmul.bf16.vlgmr.msra.gmra.mxu0 %v251_v29 }
  0x2c   : > { %422 = vmatmul.bf16.vlgmr.msra.gmra.mxu1 %v252_v30 }
  0x2d   : > { %435 = vmatmul.bf16.vlgmr.msra.gmra.mxu2 %v253_v31 }
  0xa8   : > { %v410_v32 = vpop.f32.mrf.mxu0 }
  0xa9   : > { %v423_v33 = vpop.f32.mrf.mxu1 }
  0xaa   : > { %v424_v34 = vadd.f32 %v423_v33, %v410_v32 }
  0xb0   : > { %v436_v36 = vpop.f32.mrf.mxu2  ;;  %v412_v39 = vpop.f32.mrf.mxu0 }
  0xb1   : > { %v437_v37 = vadd.f32 %v436_v36, %v424_v34  ;;  %v425_v40 = vpop.f32.mrf.mxu1 }
  0xb3   : > { %v444_v41 = vmul.f32 %v643_v35, %v437_v37 }
  0xb5   : > { %v449_v42 = vadd.f32 %v644_v38, %v444_v41 }
  0xb7   : > { %v450_v43 = vpack.c.bf16 %v449_v42, %v449_v42 }
  0xb8   : > { %v438_v44 = vpop.f32.mrf.mxu2 }
  0xb9   : > { %451 = vst [vmem:[%s195_s28] sm:$0xf] %v450_v43 }
  0xba PF: > { %s14_s15 = sadd.s32 1, %s651_s15  }
  0xbb   : > { %p11_p4 = scmp.ge.s32.totalorder %s14_s15, 5  }
  0xbd   :  { %13 = sbr.rel (!%p11_p4) target bundleno = 1 (0x1), region = 66 }

// kernel: _lambda_.65
= control target key start
LH: loop header
LB: loop body
LE: loop exit
PB: predicated region body
PF: predicated region fallthrough
CT: control target
= control target key end

     0   :  { %s725_s15 = smov 0   ;;  %s824_s0 = inlined_call_operand.vmem [shape: bf16[32,384], index: 0, kind: input, shape index: {}]   ;;  %s825_s1 = inlined_call_operand.vmem [shape: bf16[384,128], index: 1, kind: input, shape index: {}]   ;;  %s826_s2 = inlined_call_operand.vmem [shape: f32[1,128], index: 2, kind: input, shape index: {}]   ;;  %s827_s3 = inlined_call_operand.vmem [shape: f32[1,128], index: 3, kind: input, shape index: {}]   ;;  %s828_s4 = inlined_call_operand.vmem [shape: bf16[32,128], index: 4, kind: output, shape index: {}]  }
   0x1 LB: > { %s530_s16 = sadd.s32 4294967295, %s698_s15   ;;  %p534_p0 = scmp.ge.s32.totalorder %s698_s15, 1  ;;  %s698_s15 = sphi %s725_s15, %s14_s15  }
   0x2   : > { %p164_p1 = scmp.lt.s32.totalorder %s698_s15, 3 }
   0x4   : > { %p165_p2 = pnand %p534_p0, %p164_p1 }
   0x5   : > { %s535_s9 = sshll.u32 (!%p165_p2), %s530_s16, 1 }
   0x6   : > { %168 = sbr.rel (%p165_p2) target bundleno = 194 (0xc2), region = 36  ;;  %p192_p3 = scmp.lt.s32.totalorder (!%p165_p2), %s535_s9, 3 }
   0xb   : > { %v659_v0 = vld [vmem:[%s825_s1 + $0x38] sm:$0xff]  ;;  %v658_v3 = vld [vmem:[%s825_s1 + $0x30] sm:$0xff]  ;;  %v657_v6 = vld [vmem:[%s825_s1 + $0x28] sm:$0xff]  ;;  %s830_s9 = smov (!%p192_p3, %s535_s9), 3 }
   0xc   : > { %v667_v1 = vld [vmem:[%s825_s1 + $0x78] sm:$0xff]  ;;  %416 = vmatpush.bf16.msra.mxu0 %v659_v0  ;;  %v666_v4 = vld [vmem:[%s825_s1 + $0x70] sm:$0xff]  ;;  %v665_v7 = vld [vmem:[%s825_s1 + $0x68] sm:$0xff]  ;;  %s681_s27 = smul.u32 12, %s830_s9  ;;  %s538_s25 = sshll.u32 %s830_s9, 2 }
   0xd   : > { %v675_v2 = vld [vmem:[%s825_s1 + $0xb8] sm:$0xff]  ;;  %430 = vmatpush.bf16.msra.mxu1 %v667_v1  ;;  %v674_v5 = vld [vmem:[%s825_s1 + $0xb0] sm:$0xff]  ;;  %v673_v8 = vld [vmem:[%s825_s1 + $0xa8] sm:$0xff]  ;;  %s202_s28 = scalar_lea.vmem %s828_s4, %s538_s25 }
   0xe   : > { %444 = vmatpush.bf16.msra.mxu2 %v675_v2  ;;  %v656_v9 = vld [vmem:[%s825_s1 + $0x20] sm:$0xff]  ;;  %v655_v12 = vld [vmem:[%s825_s1 + $0x18] sm:$0xff]  ;;  %v654_v15 = vld [vmem:[%s825_s1 + $0x10] sm:$0xff]  ;;  %s196_s11 = scalar_lea.vmem %s824_s0, %s681_s27 }
   0xf   : > { %v664_v10 = vld [vmem:[%s825_s1 + $0x60] sm:$0xff]  ;;  %v663_v13 = vld [vmem:[%s825_s1 + $0x58] sm:$0xff]  ;;  %v662_v16 = vld [vmem:[%s825_s1 + $0x50] sm:$0xff] }
  0x10   : > { %417 = vmatpush.bf16.msra.mxu0 %v658_v3  ;;  %v672_v11 = vld [vmem:[%s825_s1 + $0xa0] sm:$0xff]  ;;  %v671_v14 = vld [vmem:[%s825_s1 + $0x98] sm:$0xff]  ;;  %v670_v17 = vld [vmem:[%s825_s1 + $0x90] sm:$0xff] }
  0x11   : > { %431 = vmatpush.bf16.msra.mxu1 %v666_v4  ;;  %v653_v18 = vld [vmem:[%s825_s1 + $0x8] sm:$0xff]  ;;  %v652_v21 = vld [vmem:[%s825_s1] sm:$0xff]  ;;  %v543_v26 = vld [vmem:[%s196_s11 + $0xc] sm:$0xf0] }
  0x12   : > { %445 = vmatpush.bf16.msra.mxu2 %v674_v5  ;;  %v661_v19 = vld [vmem:[%s825_s1 + $0x48] sm:$0xff]  ;;  %v660_v22 = vld [vmem:[%s825_s1 + $0x40] sm:$0xff]  ;;  %v651_v29 = vld [vmem:[%s196_s11 + $0x10] sm:$0xf0] }
  0x13   : > { %v669_v20 = vld [vmem:[%s825_s1 + $0x88] sm:$0xff]  ;;  %v541_v23 = vld [vmem:[%s196_s11] sm:$0xf]  ;;  %v649_v25 = vld [vmem:[%s196_s11 + $0x4] sm:$0xf] }
  0x14   : > { %418 = vmatpush.bf16.msra.mxu0 %v657_v6  ;;  %v650_v24 = vld [vmem:[%s196_s11 + $0x8] sm:$0xf0]  ;;  %v668_v27 = vld [vmem:[%s825_s1 + $0x80] sm:$0xff]  ;;  %v549_v28 = vld [vmem:[%s196_s11 + $0x8] sm:$0xf]  ;;  %v546_v31 = vor.u32 %v649_v25, %v543_v26 }
  0x15   : > { %432 = vmatpush.bf16.msra.mxu1 %v665_v7  ;;  %v542_v30 = vor.u32 %v650_v24, %v541_v23  ;;  %v550_v32 = vor.u32 %v651_v29, %v549_v28  ;;  %v690_v40 = vld [vmem:[%s826_s2] ss:$0 sm:$0xff] }
  0x16   : > { %446 = vmatpush.bf16.msra.mxu2 %v673_v8  ;;  %v691_v44 = vld [vmem:[%s827_s3] ss:$0 sm:$0xff] }
  0x18   : > { %419 = vmatpush.bf16.msra.mxu0 %v656_v9 }
  0x19   : > { %433 = vmatpush.bf16.msra.mxu1 %v664_v10 }
  0x1a   : > { %447 = vmatpush.bf16.msra.mxu2 %v672_v11 }
  0x1c   : > { %420 = vmatpush.bf16.msra.mxu0 %v655_v12 }
  0x1d   : > { %434 = vmatpush.bf16.msra.mxu1 %v663_v13 }
  0x1e   : > { %448 = vmatpush.bf16.msra.mxu2 %v671_v14 }
  0x20   : > { %421 = vmatpush.bf16.msra.mxu0 %v654_v15 }
  0x21   : > { %435 = vmatpush.bf16.msra.mxu1 %v662_v16 }
  0x22   : > { %449 = vmatpush.bf16.msra.mxu2 %v670_v17 }
  0x24   : > { %422 = vmatpush.bf16.msra.mxu0 %v653_v18 }
  0x25   : > { %436 = vmatpush.bf16.msra.mxu1 %v661_v19 }
  0x26   : > { %450 = vmatpush.bf16.msra.mxu2 %v669_v20 }
  0x28   : > { %423 = vmatpush.bf16.msra.mxu0 %v652_v21 }
  0x29   : > { %437 = vmatpush.bf16.msra.mxu1 %v660_v22 }
  0x2a   : > { %451 = vmatpush.bf16.msra.mxu2 %v668_v27 }
  0x2b   : > { %424 = vmatmul.bf16.vlgmr.msra.gmra.mxu0 %v542_v30 }
  0x2c   : > { %438 = vmatmul.bf16.vlgmr.msra.gmra.mxu1 %v546_v31 }
  0x2d   : > { %452 = vmatmul.bf16.vlgmr.msra.gmra.mxu2 %v550_v32 }
  0xa8   : > { %v425_v33 = vpop.f32.mrf.mxu0 }
  0xa9   : > { %v439_v34 = vpop.f32.mrf.mxu1 }
  0xaa   : > { %v440_v36 = vadd.f32 %v439_v34, %v425_v33 }
  0xb0   : > { %v453_v35 = vpop.f32.mrf.mxu2  ;;  %v427_v37 = vpop.f32.mrf.mxu0 }
  0xb1   : > { %v441_v38 = vpop.f32.mrf.mxu1  ;;  %v454_v39 = vadd.f32 %v453_v35, %v440_v36 }
  0xb2   : > { %v442_v41 = vadd.f32 %v441_v38, %v427_v37 }
  0xb3   : > { %v462_v43 = vmul.f32 %v690_v40, %v454_v39 }
  0xb5   : > { %v468_v47 = vadd.f32 %v691_v44, %v462_v43 }
  0xb8   : > { %v455_v42 = vpop.f32.mrf.mxu2 }
  0xb9   : > { %v456_v45 = vadd.f32 %v455_v42, %v442_v41 }
  0xbb   : > { %v463_v46 = vmul.f32 %v690_v40, %v456_v45 }
  0xbd   : > { %v469_v48 = vadd.f32 %v691_v44, %v463_v46 }
  0xbf   : > { %v679_v49 = vpack.c.bf16 %v469_v48, %v468_v47 }
  0xc1   : > { %680 = vst [vmem:[%s202_s28] sm:$0xff] %v679_v49  }
  0xc2 PF: > { %s14_s15 = sadd.s32 1, %s698_s15  }
  0xc3   : > { %p11_p4 = scmp.ge.s32.totalorder %s14_s15, 4  }
  0xc5   :  { %13 = sbr.rel (!%p11_p4) target bundleno = 1 (0x1), region = 66 }

// kernel: _lambda_.72
= control target key start
LH: loop header
LB: loop body
LE: loop exit
PB: predicated region body
PF: predicated region fallthrough
CT: control target
= control target key end

     0   :  { %s849_s24 = smov 0   ;;  %s952_s0 = inlined_call_operand.vmem [shape: bf16[32,128], index: 0, kind: input, shape index: {}]   ;;  %s953_s1 = inlined_call_operand.vmem [shape: bf16[32,128], index: 1, kind: input, shape index: {}]   ;;  %s954_s2 = inlined_call_operand.vmem [shape: bf16[128,128], index: 2, kind: input, shape index: {}]   ;;  %s955_s3 = inlined_call_operand.vmem [shape: f32[1,128], index: 3, kind: input, shape index: {}]   ;;  %s956_s4 = inlined_call_operand.vmem [shape: f32[1,128], index: 4, kind: input, shape index: {}]   ;;  %s957_s5 = inlined_call_operand.vmem [shape: bf16[128,128], index: 5, kind: input, shape index: {}]   ;;  %s958_s6 = inlined_call_operand.vmem [shape: bf16[128,128], index: 6, kind: input, shape index: {}]   ;;  %s959_s7 = inlined_call_operand.vmem [shape: bf16[32,128], index: 7, kind: output, shape index: {}]  }
   0x1 LB: > { %s643_s25 = sadd.s32 4294967295, %s807_s24   ;;  %p647_p0 = scmp.ge.s32.totalorder %s807_s24, 1  ;;  %s807_s24 = sphi %s849_s24, %s17_s24  }
   0x2   : > { %p249_p1 = scmp.lt.s32.totalorder %s807_s24, 3 }
   0x4   : > { %p250_p2 = pnand %p647_p0, %p249_p1 }
   0x5   : > { %s648_s23 = sshll.u32 (!%p250_p2), %s643_s25, 1 }
   0x6   : > { %253 = sbr.rel (%p250_p2) target bundleno = 332 (0x14c), region = 48  ;;  %p287_p3 = scmp.lt.s32.totalorder (!%p250_p2), %s648_s23, 3 }
   0xb   : > { %v768_v0 = vld [vmem:[%s954_s2 + $0x38] sm:$0xff]  ;;  %v767_v1 = vld [vmem:[%s954_s2 + $0x30] sm:$0xff]  ;;  %v766_v6 = vld [vmem:[%s954_s2 + $0x28] sm:$0xff]  ;;  %s961_s23 = smov (!%p287_p3, %s648_s23), 3 }
   0xc   : > { %376 = vmatpush.bf16.msra.mxu0 %v768_v0  ;;  %v785_v2 = vld [vmem:[%s958_s6 + $0x38] sm:$0xff]  ;;  %v784_v4 = vld [vmem:[%s958_s6 + $0x30] sm:$0xff]  ;;  %v783_v7 = vld [vmem:[%s958_s6 + $0x28] sm:$0xff]  ;;  %s902_s12 = sshll.u32 %s961_s23, 2 }
   0xd   : > { %v776_v3 = vld [vmem:[%s957_s5 + $0x38] sm:$0xff]  ;;  %493 = vmatpush.bf16.msra.mxu1 %v785_v2  ;;  %v775_v5 = vld [vmem:[%s957_s5 + $0x30] sm:$0xff]  ;;  %v774_v8 = vld [vmem:[%s957_s5 + $0x28] sm:$0xff]  ;;  %s290_s17 = scalar_lea.vmem %s952_s0, %s902_s12  ;;  %s296_s13 = scalar_lea.vmem %s953_s1, %s902_s12 }
   0xe   : > { %555 = vmatpush.bf16.msra.mxu2 %v776_v3  ;;  %v765_v9 = vld [vmem:[%s954_s2 + $0x20] sm:$0xff]  ;;  %v764_v12 = vld [vmem:[%s954_s2 + $0x18] sm:$0xff]  ;;  %v763_v13 = vld [vmem:[%s954_s2 + $0x10] sm:$0xff]  ;;  %s302_s22 = scalar_lea.vmem %s959_s7, %s902_s12 }
   0xf   : > { %v782_v10 = vld [vmem:[%s958_s6 + $0x20] sm:$0xff]  ;;  %v762_v14 = vld [vmem:[%s954_s2 + $0x8] sm:$0xff]  ;;  %v781_v17 = vld [vmem:[%s958_s6 + $0x18] sm:$0xff] }
  0x10   : > { %377 = vmatpush.bf16.msra.mxu0 %v767_v1  ;;  %v773_v11 = vld [vmem:[%s957_s5 + $0x20] sm:$0xff]  ;;  %v772_v18 = vld [vmem:[%s957_s5 + $0x18] sm:$0xff]  ;;  %v780_v19 = vld [vmem:[%s958_s6 + $0x10] sm:$0xff] }
  0x11   : > { %494 = vmatpush.bf16.msra.mxu1 %v784_v4  ;;  %v761_v15 = vld [vmem:[%s954_s2] sm:$0xff]  ;;  %v771_v20 = vld [vmem:[%s957_s5 + $0x10] sm:$0xff]  ;;  %v779_v21 = vld [vmem:[%s958_s6 + $0x8] sm:$0xff] }
  0x12   : > { %556 = vmatpush.bf16.msra.mxu2 %v775_v5  ;;  %v760_v16 = vld [vmem:[%s290_s17] sm:$0xff]  ;;  %v770_v22 = vld [vmem:[%s957_s5 + $0x8] sm:$0xff] }
  0x13   : > { %v778_v23 = vld [vmem:[%s958_s6] sm:$0xff] }
  0x14   : > { %378 = vmatpush.bf16.msra.mxu0 %v766_v6  ;;  %v769_v24 = vld [vmem:[%s957_s5] sm:$0xff] }
  0x15   : > { %495 = vmatpush.bf16.msra.mxu1 %v783_v7  ;;  %v777_v25 = vld [vmem:[%s296_s13] sm:$0xff] }
  0x16   : > { %557 = vmatpush.bf16.msra.mxu2 %v774_v8  ;;  %v799_v27 = vld [vmem:[%s955_s3] ss:$0 sm:$0xff] }
  0x17   : > { %v800_v29 = vld [vmem:[%s956_s4] ss:$0 sm:$0xff] }
  0x18   : > { %379 = vmatpush.bf16.msra.mxu0 %v765_v9 }
  0x19   : > { %496 = vmatpush.bf16.msra.mxu1 %v782_v10 }
  0x1a   : > { %558 = vmatpush.bf16.msra.mxu2 %v773_v11 }
  0x1c   : > { %380 = vmatpush.bf16.msra.mxu0 %v764_v12 }
  0x1d   : > { %497 = vmatpush.bf16.msra.mxu1 %v781_v17 }
  0x1e   : > { %559 = vmatpush.bf16.msra.mxu2 %v772_v18 }
  0x20   : > { %381 = vmatpush.bf16.msra.mxu0 %v763_v13 }
  0x21   : > { %498 = vmatpush.bf16.msra.mxu1 %v780_v19 }
  0x22   : > { %560 = vmatpush.bf16.msra.mxu2 %v771_v20 }
  0x24   : > { %382 = vmatpush.bf16.msra.mxu0 %v762_v14 }
  0x25   : > { %499 = vmatpush.bf16.msra.mxu1 %v779_v21 }
  0x26   : > { %561 = vmatpush.bf16.msra.mxu2 %v770_v22 }
  0x28   : > { %383 = vmatpush.bf16.msra.mxu0 %v761_v15 }
  0x29   : > { %500 = vmatpush.bf16.msra.mxu1 %v778_v23 }
  0x2a   : > { %562 = vmatpush.bf16.msra.mxu2 %v769_v24 }
  0x2b   : > { %384 = vmatmul.bf16.vlgmr.msra.gmra.mxu0 %v760_v16 }
  0x2c   : > { %501 = vmatmul.bf16.vlgmr.msra.gmra.mxu1 %v777_v25 }
  0xa8   : > { %v385_v26 = vpop.f32.mrf.mxu0 }
  0xa9   : > { %v394_v28 = vmul.f32 %v799_v27, %v385_v26  ;;  %v502_v37 = vpop.f32.mrf.mxu1 }
  0xab   : > { %v400_v31 = vadd.f32 %v800_v29, %v394_v28 }
  0xad   : > { %v402_v34 = vmax.f32 %v400_v31, 0.0 }
  0xb0   : > { %v387_v30 = vpop.f32.mrf.mxu0 }
  0xb1   : > { %v395_v32 = vmul.f32 %v799_v27, %v387_v30  ;;  %v504_v40 = vpop.f32.mrf.mxu1 }
  0xb3   : > { %v401_v33 = vadd.f32 %v800_v29, %v395_v32 }
  0xb5   : > { %v403_v35 = vmax.f32 %v401_v33, 0.0 }
  0xb7   : > { %v404_v36 = vpack.c.bf16 %v403_v35, %v402_v34 }
  0xb9   : > { %563 = vmatmul.bf16.vlgmr.msra.gmra.mxu2 %v404_v36 }
 0x13c   : > { %v564_v38 = vpop.f32.mrf.mxu2 }
 0x13d   : > { %v565_v39 = vadd.f32 %v564_v38, %v502_v37 }
 0x13f   : > { %v569_v43 = vmax.f32 %v565_v39, 0.0 }
 0x144   : > { %v566_v41 = vpop.f32.mrf.mxu2 }
 0x145   : > { %v567_v42 = vadd.f32 %v566_v41, %v504_v40 }
 0x147   : > { %v570_v44 = vmax.f32 %v567_v42, 0.0 }
 0x149   : > { %v789_v45 = vpack.c.bf16 %v570_v44, %v569_v43 }
 0x14b   : > { %790 = vst [vmem:[%s302_s22] sm:$0xff] %v789_v45  }
 0x14c PF: > { %s17_s24 = sadd.s32 1, %s807_s24  }
 0x14d   : > { %p14_p4 = scmp.ge.s32.totalorder %s17_s24, 4  }
 0x14f   :  { %16 = sbr.rel (!%p14_p4) target bundleno = 1 (0x1), region = 81 }

// kernel: _lambda_.69
= control target key start
LH: loop header
LB: loop body
LE: loop exit
PB: predicated region body
PF: predicated region fallthrough
CT: control target
= control target key end

     0   :  { %s1074_s27 = smov 0   ;;  %s1259_s0 = inlined_call_operand.vmem [shape: bf16[2,8,8,128], index: 0, kind: input, shape index: {}]   ;;  %s1260_s1 = inlined_call_operand.vmem [shape: bf16[32,128], index: 1, kind: input, shape index: {}]   ;;  %s1261_s2 = inlined_call_operand.vmem [shape: f32[3,3,128], index: 2, kind: input, shape index: {}]   ;;  %s1262_s3 = inlined_call_operand.vmem [shape: bf16[128,128], index: 3, kind: input, shape index: {}]   ;;  %s1263_s4 = inlined_call_operand.vmem [shape: f32[1,128], index: 4, kind: input, shape index: {}]   ;;  %s1264_s5 = inlined_call_operand.vmem [shape: f32[1,128], index: 5, kind: input, shape index: {}]   ;;  %s1265_s6 = inlined_call_operand.vmem [shape: bf16[128,128], index: 6, kind: input, shape index: {}]   ;;  %s1266_s7 = inlined_call_operand.vmem [shape: bf16[128,128], index: 7, kind: input, shape index: {}]   ;;  %s1267_s8 = inlined_call_operand.vmem [shape: bf16[32,128], index: 8, kind: output, shape index: {}]  }
   0x1 LB: > { %s1080_s28 = sadd.s32 4294967295, %s1027_s27   ;;  %p852_p0 = scmp.ge.s32.totalorder %s1027_s27, 1  ;;  %s1027_s27 = sphi %s1074_s27, %s18_s27  }
   0x2   : > { %p273_p1 = scmp.lt.s32.totalorder %s1027_s27, 3 }
   0x4   : > { %p274_p2 = pnand %p852_p0, %p273_p1 }
   0x5   : > { %p312_p3 = scmp.lt.s32.totalorder (!%p274_p2), %s1080_s28, 1  ;;  %s855_s10 = sshll.u32 (!%p274_p2), %s1080_s28, 1 }
   0x6   : > { %277 = sbr.rel (%p274_p2) target bundleno = 345 (0x159), region = 52  ;;  %p318_p4 = scmp.lt.s32.totalorder (!%p274_p2), %s855_s10, 3 }
   0xb   : > { %v969_v0 = vld [vmem:[%s1262_s3 + $0x38] sm:$0xff]  ;;  %v968_v1 = vld [vmem:[%s1262_s3 + $0x30] sm:$0xff]  ;;  %s313_s11 = scalar_select %p312_p3, %s1080_s28, 1  ;;  %v337_v2 = vld [vmem:[%s1261_s2] sm:$0x7] }
   0xc   : > { %581 = vmatpush.bf16.msra.mxu0 %v969_v0  ;;  %v338_v3 = vld [vmem:[%s1261_s2 + $0x4] sm:$0x7]  ;;  %v339_v4 = vld [vmem:[%s1261_s2 + $0x8] sm:$0x7]  ;;  %v344_v6 = vperm.slane %v337_v2, 0  ;;  %v353_v7 = vperm.slane %v337_v2, 1 }
   0xd   : > { %v967_v5 = vld [vmem:[%s1262_s3 + $0x28] sm:$0xff]  ;;  %s961_s20 = sshll.u32 %s313_s11, 5  ;;  %v374_v8 = vperm.slane %v337_v2, 2  ;;  %v397_v9 = vperm.slane %v338_v3, 0  ;;  %v406_v10 = vperm.slane %v338_v3, 1  ;;  %v1107_v11 = vperm.slane %v338_v3, 2 }
   0xe   : > { %s316_s23 = scalar_lea.vmem %s1259_s0, %s961_s20  ;;  %v1109_v15 = vperm.slane %v339_v4, 0  ;;  %v1111_v16 = vperm.slane %v339_v4, 1  ;;  %v1113_v17 = vperm.slane %v339_v4, 2  ;;  %v966_v31 = vld [vmem:[%s1262_s3 + $0x20] sm:$0xff]  ;;  %v965_v48 = vld [vmem:[%s1262_s3 + $0x18] sm:$0xff]  ;;  %v985_v3 = vld [vmem:[%s1266_s7 + $0x30] sm:$0xff] }
   0xf   : > { %v988_v12 = vld [vmem:[%s316_s23] sm:$0xff]   ;;  %v1008_v13 = vld [vmem:[%s316_s23 + $0x8] sm:$0xff]   ;;  %v1009_v14 = vld [vmem:[%s316_s23 + $0x10] sm:$0xff]   ;;  %s1269_s10 = smov (!%p318_p4, %s855_s10), 3 }
  0x10   : > { %582 = vmatpush.bf16.msra.mxu0 %v968_v1  ;;  %v989_v18 = vunpack.c.l.bf16 %v988_v12  ;;  %v990_v19 = vunpack.c.h.bf16 %v988_v12  ;;  %v1115_v20 = vunpack.c.l.bf16 %v1008_v13  ;;  %v1117_v21 = vunpack.c.h.bf16 %v1008_v13  ;;  %v1010_v22 = vld [vmem:[%s316_s23 + $0x18] sm:$0xff]   ;;  %v964_v4 = vld [vmem:[%s1262_s3 + $0x10] sm:$0xff]  ;;  %s856_s20 = sshll.u32 %s1269_s10, 2 }
  0x11   : > { %v1119_v23 = vunpack.c.l.bf16 %v1009_v14  ;;  %v1121_v24 = vunpack.c.h.bf16 %v1009_v14  ;;  %v1123_v25 = vunpack.c.l.bf16 %v1010_v22  ;;  %v1125_v26 = vunpack.c.h.bf16 %v1010_v22  ;;  %v986_v57 = vld [vmem:[%s1266_s7 + $0x38] sm:$0xff]  ;;  %s321_s29 = scalar_lea.vmem %s1260_s1, %s856_s20  ;;  %s327_s28 = scalar_lea.vmem %s1267_s8, %s856_s20 }
  0x12   : > { %v345_v27 = vmul.f32 %v989_v18, %v344_v6  ;;  %v346_v28 = vmul.f32 %v990_v19, %v344_v6  ;;  %v347_v29 = vmul.f32 %v1115_v20, %v344_v6  ;;  %v348_v30 = vmul.f32 %v1117_v21, %v344_v6  ;;  %v977_v58 = vld [vmem:[%s1265_s6 + $0x38] sm:$0xff]  ;;  %698 = vmatpush.bf16.msra.mxu1 %v986_v57 }
  0x13   : > { %v354_v32 = vmul.f32 %v989_v18, %v353_v7  ;;  %v355_v33 = vmul.f32 %v990_v19, %v353_v7  ;;  %v356_v34 = vmul.f32 %v1115_v20, %v353_v7  ;;  %v357_v35 = vmul.f32 %v1117_v21, %v353_v7  ;;  %760 = vmatpush.bf16.msra.mxu2 %v977_v58 }
  0x14   : > { %583 = vmatpush.bf16.msra.mxu0 %v967_v5  ;;  %v375_v36 = vmul.f32 %v989_v18, %v374_v8  ;;  %v376_v37 = vmul.f32 %v990_v19, %v374_v8  ;;  %v377_v38 = vmul.f32 %v1115_v20, %v374_v8  ;;  %v378_v39 = vmul.f32 %v1117_v21, %v374_v8 }
  0x15   : > { %v362_v40 = vrot.slane %v354_v32, 2  ;;  %v363_v41 = vrot.slane %v355_v33, 2  ;;  %v364_v42 = vrot.slane %v356_v34, 2  ;;  %v365_v43 = vrot.slane %v357_v35, 2  ;;  %v984_v32 = vld [vmem:[%s1266_s7 + $0x28] sm:$0xff] }
  0x16   : > { %v383_v44 = vrot.slane %v375_v36, 4  ;;  %v384_v45 = vrot.slane %v376_v37, 4  ;;  %v385_v46 = vrot.slane %v377_v38, 4  ;;  %v386_v47 = vrot.slane %v378_v39, 4  ;;  %699 = vmatpush.bf16.msra.mxu1 %v985_v3  ;;  %v975_v39 = vld [vmem:[%s1265_s6 + $0x28] sm:$0xff] }
  0x17   : > { %v370_v49 = vadd.f32 %v362_v40, %v345_v27  ;;  %v371_v50 = vadd.f32 %v363_v41, %v346_v28  ;;  %v372_v51 = vadd.f32 %v364_v42, %v347_v29  ;;  %v373_v52 = vadd.f32 %v365_v43, %v348_v30 }
  0x18   : > { %584 = vmatpush.bf16.msra.mxu0 %v966_v31  ;;  %v398_v53 = vmul.f32 %v1115_v20, %v397_v9  ;;  %v399_v54 = vmul.f32 %v1117_v21, %v397_v9  ;;  %v400_v55 = vmul.f32 %v1119_v23, %v397_v9  ;;  %v401_v56 = vmul.f32 %v1121_v24, %v397_v9 }
  0x19   : > { %v391_v59 = vadd.f32 %v383_v44, %v370_v49  ;;  %v392_v60 = vadd.f32 %v384_v45, %v371_v50  ;;  %v393_v61 = vadd.f32 %v385_v46, %v372_v51  ;;  %v394_v62 = vadd.f32 %v386_v47, %v373_v52  ;;  %v983_v47 = vld [vmem:[%s1266_s7 + $0x20] sm:$0xff] }
  0x1a   : > { %v407_v63 = vmul.f32 %v1115_v20, %v406_v10  ;;  %v408_v0 = vmul.f32 %v1117_v21, %v406_v10  ;;  %v409_v1 = vmul.f32 %v1119_v23, %v406_v10  ;;  %v410_v2 = vmul.f32 %v1121_v24, %v406_v10  ;;  %v976_v10 = vld [vmem:[%s1265_s6 + $0x30] sm:$0xff]  ;;  %700 = vmatpush.bf16.msra.mxu1 %v984_v32 }
  0x1b   : > { %v402_v5 = vadd.f32 %v398_v53, %v391_v59  ;;  %v403_v6 = vadd.f32 %v399_v54, %v392_v60  ;;  %v404_v7 = vadd.f32 %v400_v55, %v393_v61  ;;  %v405_v8 = vadd.f32 %v401_v56, %v394_v62  ;;  %761 = vmatpush.bf16.msra.mxu2 %v976_v10  ;;  %v979_v10 = vld [vmem:[%s1266_s7] sm:$0xff] }
  0x1c   : > { %585 = vmatpush.bf16.msra.mxu0 %v965_v48  ;;  %v415_v9 = vrot.slane %v407_v63, 2  ;;  %v416_v12 = vrot.slane %v408_v0, 2  ;;  %v417_v13 = vrot.slane %v409_v1, 2  ;;  %v418_v14 = vrot.slane %v410_v2, 2  ;;  %v962_v48 = vld [vmem:[%s1262_s3] sm:$0xff] }
  0x1d   : > { %v428_v18 = vmul.f32 %v1115_v20, %v1107_v11  ;;  %v429_v19 = vmul.f32 %v1117_v21, %v1107_v11  ;;  %v430_v22 = vmul.f32 %v1119_v23, %v1107_v11  ;;  %v431_v27 = vmul.f32 %v1121_v24, %v1107_v11  ;;  %v963_v20 = vld [vmem:[%s1262_s3 + $0x8] sm:$0xff] }
  0x1e   : > { %v423_v28 = vadd.f32 %v415_v9, %v402_v5  ;;  %v424_v29 = vadd.f32 %v416_v12, %v403_v6  ;;  %v425_v30 = vadd.f32 %v417_v13, %v404_v7  ;;  %v426_v31 = vadd.f32 %v418_v14, %v405_v8  ;;  %701 = vmatpush.bf16.msra.mxu1 %v983_v47  ;;  %v982_v7 = vld [vmem:[%s1266_s7 + $0x18] sm:$0xff]  ;;  %v981_v9 = vld [vmem:[%s1266_s7 + $0x10] sm:$0xff]  ;;  %v980_v13 = vld [vmem:[%s1266_s7 + $0x8] sm:$0xff] }
  0x1f   : > { %v436_v21 = vrot.slane %v428_v18, 4  ;;  %v437_v33 = vrot.slane %v429_v19, 4  ;;  %v438_v34 = vrot.slane %v430_v22, 4  ;;  %v439_v35 = vrot.slane %v431_v27, 4  ;;  %762 = vmatpush.bf16.msra.mxu2 %v975_v39  ;;  %v973_v8 = vld [vmem:[%s1265_s6 + $0x18] sm:$0xff]  ;;  %v972_v12 = vld [vmem:[%s1265_s6 + $0x10] sm:$0xff] }
  0x20   : > { %586 = vmatpush.bf16.msra.mxu0 %v964_v4  ;;  %v451_v11 = vmul.f32 %v1119_v23, %v1109_v15  ;;  %v452_v36 = vmul.f32 %v1121_v24, %v1109_v15  ;;  %v453_v37 = vmul.f32 %v1123_v25, %v1109_v15  ;;  %v454_v38 = vmul.f32 %v1125_v26, %v1109_v15  ;;  %v971_v14 = vld [vmem:[%s1265_s6 + $0x8] sm:$0xff]  ;;  %v970_v18 = vld [vmem:[%s1265_s6] sm:$0xff] }
  0x21   : > { %v444_v40 = vadd.f32 %v436_v21, %v423_v28  ;;  %v445_v41 = vadd.f32 %v437_v33, %v424_v29  ;;  %v446_v42 = vadd.f32 %v438_v34, %v425_v30  ;;  %v447_v43 = vadd.f32 %v439_v35, %v426_v31  ;;  %v978_v19 = vld [vmem:[%s321_s29] sm:$0xff] }
  0x22   : > { %v460_v44 = vmul.f32 %v1119_v23, %v1111_v16  ;;  %v461_v45 = vmul.f32 %v1121_v24, %v1111_v16  ;;  %v462_v46 = vmul.f32 %v1123_v25, %v1111_v16  ;;  %v463_v15 = vmul.f32 %v1125_v26, %v1111_v16  ;;  %v974_v16 = vld [vmem:[%s1265_s6 + $0x20] sm:$0xff]  ;;  %702 = vmatpush.bf16.msra.mxu1 %v982_v7 }
  0x23   : > { %v455_v49 = vadd.f32 %v451_v11, %v444_v40  ;;  %v456_v50 = vadd.f32 %v452_v36, %v445_v41  ;;  %v457_v51 = vadd.f32 %v453_v37, %v446_v42  ;;  %v458_v52 = vadd.f32 %v454_v38, %v447_v43  ;;  %763 = vmatpush.bf16.msra.mxu2 %v974_v16  ;;  %v1019_v27 = vld [vmem:[%s1263_s4] ss:$0 sm:$0xff] }
  0x24   : > { %587 = vmatpush.bf16.msra.mxu0 %v963_v20  ;;  %v468_v53 = vrot.slane %v460_v44, 2  ;;  %v469_v54 = vrot.slane %v461_v45, 2  ;;  %v470_v55 = vrot.slane %v462_v46, 2  ;;  %v471_v56 = vrot.slane %v463_v15, 2  ;;  %v1020_v29 = vld [vmem:[%s1264_s5] ss:$0 sm:$0xff] }
  0x25   : > { %v481_v57 = vmul.f32 %v1119_v23, %v1113_v17  ;;  %v482_v58 = vmul.f32 %v1121_v24, %v1113_v17  ;;  %v483_v59 = vmul.f32 %v1123_v25, %v1113_v17  ;;  %v484_v60 = vmul.f32 %v1125_v26, %v1113_v17 }
  0x26   : > { %v476_v61 = vadd.f32 %v468_v53, %v455_v49  ;;  %v477_v62 = vadd.f32 %v469_v54, %v456_v50  ;;  %v478_v63 = vadd.f32 %v470_v55, %v457_v51  ;;  %v479_v0 = vadd.f32 %v471_v56, %v458_v52  ;;  %703 = vmatpush.bf16.msra.mxu1 %v981_v9 }
  0x27   : > { %v489_v1 = vrot.slane %v481_v57, 4  ;;  %v490_v2 = vrot.slane %v482_v58, 4  ;;  %v491_v3 = vrot.slane %v483_v59, 4  ;;  %v492_v23 = vrot.slane %v484_v60, 4  ;;  %764 = vmatpush.bf16.msra.mxu2 %v973_v8 }
  0x28   : > { %588 = vmatpush.bf16.msra.mxu0 %v962_v48 }
  0x29   : > { %v497_v4 = vadd.f32 %v489_v1, %v476_v61  ;;  %v498_v24 = vadd.f32 %v490_v2, %v477_v62  ;;  %v499_v5 = vadd.f32 %v491_v3, %v478_v63  ;;  %v500_v6 = vadd.f32 %v492_v23, %v479_v0 }
  0x2a   : > { %704 = vmatpush.bf16.msra.mxu1 %v980_v13 }
  0x2b   : > { %505 = vst [vmem:[#allocation1] ss:$2 sm:$0xff] %v497_v4  ;;  %765 = vmatpush.bf16.msra.mxu2 %v972_v12 }
  0x2c   : > { %507 = vst [vmem:[#allocation1 + $0x1] ss:$2 sm:$0xff] %v498_v24 }
  0x2d   : > { %509 = vst [vmem:[#allocation1 + $0x10] ss:$2 sm:$0xff] %v499_v5 }
  0x2e   : > { %511 = vst [vmem:[#allocation1 + $0x11] ss:$2 sm:$0xff] %v500_v6  ;;  %705 = vmatpush.bf16.msra.mxu1 %v979_v10 }
  0x2f   : > { %766 = vmatpush.bf16.msra.mxu2 %v971_v14 }
  0x31   : > { %706 = vmatmul.bf16.vlgmr.msra.gmra.mxu1 %v978_v19 }
  0x33   : > { %v512_v17 = vld.sshfl [vmem:[#allocation1] sm:$0xff pattern:$0x75316420]  ;;  %767 = vmatpush.bf16.msra.mxu2 %v970_v18 }
  0x35   : > { %v513_v25 = vld.sshfl [vmem:[#allocation1 + $0x10] sm:$0xff pattern:$0x75316420] }
  0x36   : > { %v516_v26 = vpack.c.bf16 %v513_v25, %v512_v17 }
  0x38   : > { %589 = vmatmul.bf16.vlgmr.msra.gmra.mxu0 %v516_v26 }
  0xae   : > { %v707_v35 = vpop.f32.mrf.mxu1 }
  0xb5   : > { %v590_v22 = vpop.f32.mrf.mxu0 }
  0xb6   : > { %v599_v28 = vmul.f32 %v1019_v27, %v590_v22  ;;  %v709_v37 = vpop.f32.mrf.mxu1 }
  0xb8   : > { %v605_v31 = vadd.f32 %v1020_v29, %v599_v28 }
  0xba   : > { %v607_v21 = vmax.f32 %v605_v31, 0.0 }
  0xbd   : > { %v592_v30 = vpop.f32.mrf.mxu0 }
  0xbe   : > { %v600_v32 = vmul.f32 %v1019_v27, %v592_v30 }
  0xc0   : > { %v606_v20 = vadd.f32 %v1020_v29, %v600_v32 }
  0xc2   : > { %v608_v33 = vmax.f32 %v606_v20, 0.0 }
  0xc4   : > { %v609_v34 = vpack.c.bf16 %v608_v33, %v607_v21 }
  0xc6   : > { %768 = vmatmul.bf16.vlgmr.msra.gmra.mxu2 %v609_v34 }
 0x149   : > { %v769_v11 = vpop.f32.mrf.mxu2 }
 0x14a   : > { %v770_v36 = vadd.f32 %v769_v11, %v707_v35 }
 0x14c   : > { %v774_v40 = vmax.f32 %v770_v36, 0.0 }
 0x151   : > { %v771_v38 = vpop.f32.mrf.mxu2 }
 0x152   : > { %v772_v39 = vadd.f32 %v771_v38, %v709_v37 }
 0x154   : > { %v775_v41 = vmax.f32 %v772_v39, 0.0 }
 0x156   : > { %v1006_v42 = vpack.c.bf16 %v775_v41, %v774_v40 }
 0x158   : > { %1007 = vst [vmem:[%s327_s28] sm:$0xff] %v1006_v42  }
 0x159 PF: > { %s18_s27 = sadd.s32 1, %s1027_s27  }
 0x15a   : > { %p15_p5 = scmp.ge.s32.totalorder %s18_s27, 4  }
 0x15c   :  { %17 = sbr.rel (!%p15_p5) target bundleno = 1 (0x1), region = 88 }

// kernel: _lambda_.66
= control target key start
LH: loop header
LB: loop body
LE: loop exit
PB: predicated region body
PF: predicated region fallthrough
CT: control target
= control target key end

     0   :  { %s1050_s27 = smov 0   ;;  %s1234_s0 = inlined_call_operand.vmem [shape: bf16[2,6,6,128], index: 0, kind: input, shape index: {}]   ;;  %s1235_s1 = inlined_call_operand.vmem [shape: bf16[32,128], index: 1, kind: input, shape index: {}]   ;;  %s1236_s2 = inlined_call_operand.vmem [shape: f32[3,3,128], index: 2, kind: input, shape index: {}]   ;;  %s1237_s3 = inlined_call_operand.vmem [shape: bf16[128,128], index: 3, kind: input, shape index: {}]   ;;  %s1238_s4 = inlined_call_operand.vmem [shape: f32[1,128], index: 4, kind: input, shape index: {}]   ;;  %s1239_s5 = inlined_call_operand.vmem [shape: f32[1,128], index: 5, kind: input, shape index: {}]   ;;  %s1240_s6 = inlined_call_operand.vmem [shape: bf16[128,128], index: 6, kind: input, shape index: {}]   ;;  %s1241_s7 = inlined_call_operand.vmem [shape: bf16[128,128], index: 7, kind: input, shape index: {}]   ;;  %s1242_s8 = inlined_call_operand.vmem [shape: bf16[32,128], index: 8, kind: output, shape index: {}]  }
   0x1 LB: > { %s1056_s28 = sadd.s32 4294967295, %s1003_s27   ;;  %p848_p0 = scmp.ge.s32.totalorder %s1003_s27, 1  ;;  %s1003_s27 = sphi %s1050_s27, %s18_s27  }
   0x2   : > { %p273_p1 = scmp.lt.s32.totalorder %s1003_s27, 3 }
   0x4   : > { %p274_p2 = pnand %p848_p0, %p273_p1 }
   0x5   : > { %p312_p3 = scmp.lt.s32.totalorder (!%p274_p2), %s1056_s28, 1  ;;  %s850_s10 = sshll.u32 (!%p274_p2), %s1056_s28, 1 }
   0x6   : > { %277 = sbr.rel (%p274_p2) target bundleno = 345 (0x159), region = 52  ;;  %p318_p4 = scmp.lt.s32.totalorder (!%p274_p2), %s850_s10, 3 }
   0xb   : > { %v963_v0 = vld [vmem:[%s1237_s3 + $0x38] sm:$0xff]  ;;  %v962_v1 = vld [vmem:[%s1237_s3 + $0x30] sm:$0xff]  ;;  %s313_s11 = scalar_select %p312_p3, %s1056_s28, 1  ;;  %v335_v2 = vld [vmem:[%s1236_s2] sm:$0x7] }
   0xc   : > { %577 = vmatpush.bf16.msra.mxu0 %v963_v0  ;;  %v336_v3 = vld [vmem:[%s1236_s2 + $0x4] sm:$0x7]  ;;  %v337_v4 = vld [vmem:[%s1236_s2 + $0x8] sm:$0x7]  ;;  %v342_v6 = vperm.slane %v335_v2, 0  ;;  %v351_v7 = vperm.slane %v335_v2, 1 }
   0xd   : > { %v961_v5 = vld [vmem:[%s1237_s3 + $0x28] sm:$0xff]  ;;  %s986_s20 = smul.u32 24, %s313_s11  ;;  %v372_v8 = vperm.slane %v335_v2, 2  ;;  %v394_v9 = vperm.slane %v336_v3, 0  ;;  %v1083_v10 = vperm.slane %v336_v3, 1  ;;  %v1085_v11 = vperm.slane %v336_v3, 2 }
   0xe   : > { %v1087_v12 = vperm.slane %v337_v4, 0  ;;  %v1089_v13 = vperm.slane %v337_v4, 1  ;;  %v1099_v26 = vperm.slane %v337_v4, 2  ;;  %v960_v27 = vld [vmem:[%s1237_s3 + $0x20] sm:$0xff]  ;;  %v959_v44 = vld [vmem:[%s1237_s3 + $0x18] sm:$0xff]  ;;  %v979_v63 = vld [vmem:[%s1241_s7 + $0x30] sm:$0xff] }
   0xf   : > { %s316_s23 = scalar_lea.vmem %s1234_s0, %s986_s20  ;;  %v980_v53 = vld [vmem:[%s1241_s7 + $0x38] sm:$0xff]  ;;  %v958_v0 = vld [vmem:[%s1237_s3 + $0x10] sm:$0xff]  ;;  %s1244_s10 = smov (!%p318_p4, %s850_s10), 3 }
  0x10   : > { %578 = vmatpush.bf16.msra.mxu0 %v962_v1  ;;  %v329_v14 = vld [vmem:[%s316_s23] sm:$0x7]  ;;  %v330_v15 = vld [vmem:[%s316_s23 + $0x4] sm:$0x7]  ;;  %v331_v16 = vld [vmem:[%s316_s23 + $0x8] sm:$0x7]  ;;  %694 = vmatpush.bf16.msra.mxu1 %v980_v53 }
  0x11   : > { %v332_v17 = vld [vmem:[%s316_s23 + $0xc] sm:$0x7]  ;;  %v333_v18 = vld [vmem:[%s316_s23 + $0x10] sm:$0x7]  ;;  %v334_v19 = vld [vmem:[%s316_s23 + $0x14] sm:$0x7]  ;;  %v338_v20 = vunpack.c.l.bf16 %v329_v14  ;;  %v339_v21 = vunpack.c.l.bf16 %v330_v15  ;;  %v1091_v22 = vunpack.c.l.bf16 %v331_v16 }
  0x12   : > { %v1093_v23 = vunpack.c.l.bf16 %v332_v17  ;;  %v1095_v24 = vunpack.c.l.bf16 %v333_v18  ;;  %v1097_v25 = vunpack.c.l.bf16 %v334_v19  ;;  %v971_v54 = vld [vmem:[%s1240_s6 + $0x38] sm:$0xff]  ;;  %v968_v53 = vld [vmem:[%s1240_s6 + $0x20] sm:$0xff]  ;;  %s851_s20 = sshll.u32 %s1244_s10, 2 }
  0x13   : > { %v343_v28 = vmul.f32 %v342_v6, %v338_v20  ;;  %v344_v29 = vmul.f32 %v342_v6, %v339_v21  ;;  %v345_v30 = vmul.f32 %v342_v6, %v1091_v22  ;;  %v352_v31 = vmul.f32 %v351_v7, %v338_v20  ;;  %756 = vmatpush.bf16.msra.mxu2 %v971_v54  ;;  %s321_s29 = scalar_lea.vmem %s1235_s1, %s851_s20  ;;  %s327_s28 = scalar_lea.vmem %s1242_s8, %s851_s20 }
  0x14   : > { %579 = vmatpush.bf16.msra.mxu0 %v961_v5  ;;  %v346_v32 = vmul.f32 %v342_v6, %v1093_v23  ;;  %v353_v33 = vmul.f32 %v351_v7, %v339_v21  ;;  %v354_v34 = vmul.f32 %v351_v7, %v1091_v22  ;;  %v355_v35 = vmul.f32 %v351_v7, %v1093_v23 }
  0x15   : > { %v360_v36 = vrot.slane %v352_v31, 1  ;;  %v373_v37 = vmul.f32 %v372_v8, %v338_v20  ;;  %v374_v38 = vmul.f32 %v372_v8, %v339_v21  ;;  %v375_v39 = vmul.f32 %v372_v8, %v1091_v22  ;;  %695 = vmatpush.bf16.msra.mxu1 %v979_v63 }
  0x16   : > { %v361_v40 = vrot.slane %v353_v33, 1  ;;  %v362_v41 = vrot.slane %v354_v34, 1  ;;  %v363_v42 = vrot.slane %v355_v35, 1  ;;  %v376_v43 = vmul.f32 %v372_v8, %v1093_v23 }
  0x17   : > { %v368_v45 = vadd.f32 %v360_v36, %v343_v28  ;;  %v381_v46 = vrot.slane %v373_v37, 2  ;;  %v382_v47 = vrot.slane %v374_v38, 2  ;;  %v383_v48 = vrot.slane %v375_v39, 2 }
  0x18   : > { %580 = vmatpush.bf16.msra.mxu0 %v960_v27  ;;  %v369_v49 = vadd.f32 %v361_v40, %v344_v29  ;;  %v370_v50 = vadd.f32 %v362_v41, %v345_v30  ;;  %v371_v51 = vadd.f32 %v363_v42, %v346_v32  ;;  %v384_v52 = vrot.slane %v376_v43, 2  ;;  %v978_v27 = vld [vmem:[%s1241_s7 + $0x28] sm:$0xff] }
  0x19   : > { %v389_v55 = vadd.f32 %v381_v46, %v368_v45  ;;  %v395_v56 = vmul.f32 %v394_v9, %v339_v21  ;;  %v396_v57 = vmul.f32 %v394_v9, %v1091_v22  ;;  %v397_v58 = vmul.f32 %v394_v9, %v1093_v23  ;;  %696 = vmatpush.bf16.msra.mxu1 %v978_v27  ;;  %v956_v45 = vld [vmem:[%s1237_s3] sm:$0xff] }
  0x1a   : > { %v390_v59 = vadd.f32 %v382_v47, %v369_v49  ;;  %v391_v60 = vadd.f32 %v383_v48, %v370_v50  ;;  %v392_v61 = vadd.f32 %v384_v52, %v371_v51  ;;  %v398_v62 = vmul.f32 %v394_v9, %v1095_v24  ;;  %v970_v9 = vld [vmem:[%s1240_s6 + $0x30] sm:$0xff] }
  0x1b   : > { %v399_v1 = vadd.f32 %v395_v56, %v389_v55  ;;  %v404_v2 = vmul.f32 %v1083_v10, %v339_v21  ;;  %v405_v3 = vmul.f32 %v1083_v10, %v1091_v22  ;;  %v406_v4 = vmul.f32 %v1083_v10, %v1093_v23  ;;  %757 = vmatpush.bf16.msra.mxu2 %v970_v9  ;;  %v975_v9 = vld [vmem:[%s1241_s7 + $0x10] sm:$0xff] }
  0x1c   : > { %581 = vmatpush.bf16.msra.mxu0 %v959_v44  ;;  %v400_v5 = vadd.f32 %v396_v57, %v390_v59  ;;  %v401_v6 = vadd.f32 %v397_v58, %v391_v60  ;;  %v402_v7 = vadd.f32 %v398_v62, %v392_v61  ;;  %v407_v8 = vmul.f32 %v1083_v10, %v1095_v24  ;;  %v977_v44 = vld [vmem:[%s1241_s7 + $0x20] sm:$0xff] }
  0x1d   : > { %v412_v14 = vrot.slane %v404_v2, 1  ;;  %v413_v15 = vrot.slane %v405_v3, 1  ;;  %v414_v16 = vrot.slane %v406_v4, 1  ;;  %v425_v17 = vmul.f32 %v1085_v11, %v339_v21  ;;  %v957_v21 = vld [vmem:[%s1237_s3 + $0x8] sm:$0xff]  ;;  %697 = vmatpush.bf16.msra.mxu1 %v977_v44 }
  0x1e   : > { %v415_v18 = vrot.slane %v407_v8, 1  ;;  %v426_v19 = vmul.f32 %v1085_v11, %v1091_v22  ;;  %v427_v20 = vmul.f32 %v1085_v11, %v1093_v23  ;;  %v428_v10 = vmul.f32 %v1085_v11, %v1095_v24  ;;  %v969_v11 = vld [vmem:[%s1240_s6 + $0x28] sm:$0xff]  ;;  %v967_v8 = vld [vmem:[%s1240_s6 + $0x18] sm:$0xff] }
  0x1f   : > { %v420_v28 = vadd.f32 %v412_v14, %v399_v1  ;;  %v421_v29 = vadd.f32 %v413_v15, %v400_v5  ;;  %v422_v30 = vadd.f32 %v414_v16, %v401_v6  ;;  %v433_v31 = vrot.slane %v425_v17, 2  ;;  %758 = vmatpush.bf16.msra.mxu2 %v969_v11  ;;  %v966_v14 = vld [vmem:[%s1240_s6 + $0x10] sm:$0xff]  ;;  %v974_v15 = vld [vmem:[%s1241_s7 + $0x8] sm:$0xff]  ;;  %v973_v17 = vld [vmem:[%s1241_s7] sm:$0xff] }
  0x20   : > { %582 = vmatpush.bf16.msra.mxu0 %v958_v0  ;;  %v423_v32 = vadd.f32 %v415_v18, %v402_v7  ;;  %v434_v33 = vrot.slane %v426_v19, 2  ;;  %v435_v34 = vrot.slane %v427_v20, 2  ;;  %v436_v35 = vrot.slane %v428_v10, 2  ;;  %v976_v7 = vld [vmem:[%s1241_s7 + $0x18] sm:$0xff]  ;;  %v965_v16 = vld [vmem:[%s1240_s6 + $0x8] sm:$0xff]  ;;  %v964_v18 = vld [vmem:[%s1240_s6] sm:$0xff] }
  0x21   : > { %v441_v36 = vadd.f32 %v433_v31, %v420_v28  ;;  %v447_v37 = vmul.f32 %v1087_v12, %v1091_v22  ;;  %v448_v38 = vmul.f32 %v1087_v12, %v1093_v23  ;;  %v449_v39 = vmul.f32 %v1087_v12, %v1095_v24  ;;  %698 = vmatpush.bf16.msra.mxu1 %v976_v7  ;;  %v972_v19 = vld [vmem:[%s321_s29] sm:$0xff] }
  0x22   : > { %v442_v40 = vadd.f32 %v434_v33, %v421_v29  ;;  %v443_v41 = vadd.f32 %v435_v34, %v422_v30  ;;  %v444_v42 = vadd.f32 %v436_v35, %v423_v32  ;;  %v450_v43 = vmul.f32 %v1087_v12, %v1097_v25  ;;  %v995_v10 = vld [vmem:[%s1238_s4] ss:$0 sm:$0xff] }
  0x23   : > { %v451_v46 = vadd.f32 %v447_v37, %v441_v36  ;;  %v456_v47 = vmul.f32 %v1089_v13, %v1091_v22  ;;  %v457_v48 = vmul.f32 %v1089_v13, %v1093_v23  ;;  %v458_v12 = vmul.f32 %v1089_v13, %v1095_v24  ;;  %759 = vmatpush.bf16.msra.mxu2 %v968_v53 }
  0x24   : > { %583 = vmatpush.bf16.msra.mxu0 %v957_v21  ;;  %v452_v49 = vadd.f32 %v448_v38, %v442_v40  ;;  %v453_v50 = vadd.f32 %v449_v39, %v443_v41  ;;  %v454_v51 = vadd.f32 %v450_v43, %v444_v42  ;;  %v459_v52 = vmul.f32 %v1089_v13, %v1097_v25  ;;  %v996_v21 = vld [vmem:[%s1239_s5] ss:$0 sm:$0xff] }
  0x25   : > { %v464_v54 = vrot.slane %v456_v47, 1  ;;  %v465_v55 = vrot.slane %v457_v48, 1  ;;  %v466_v56 = vrot.slane %v458_v12, 1  ;;  %v477_v57 = vmul.f32 %v1099_v26, %v1091_v22  ;;  %699 = vmatpush.bf16.msra.mxu1 %v975_v9 }
  0x26   : > { %v467_v58 = vrot.slane %v459_v52, 1  ;;  %v478_v59 = vmul.f32 %v1099_v26, %v1093_v23  ;;  %v479_v60 = vmul.f32 %v1099_v26, %v1095_v24  ;;  %v480_v13 = vmul.f32 %v1099_v26, %v1097_v25 }
  0x27   : > { %v472_v61 = vadd.f32 %v464_v54, %v451_v46  ;;  %v473_v62 = vadd.f32 %v465_v55, %v452_v49  ;;  %v474_v63 = vadd.f32 %v466_v56, %v453_v50  ;;  %v485_v0 = vrot.slane %v477_v57, 2  ;;  %760 = vmatpush.bf16.msra.mxu2 %v967_v8 }
  0x28   : > { %584 = vmatpush.bf16.msra.mxu0 %v956_v45  ;;  %v475_v1 = vadd.f32 %v467_v58, %v454_v51  ;;  %v486_v2 = vrot.slane %v478_v59, 2  ;;  %v487_v22 = vrot.slane %v479_v60, 2  ;;  %v488_v3 = vrot.slane %v480_v13, 2 }
  0x29   : > { %v493_v4 = vadd.f32 %v485_v0, %v472_v61  ;;  %700 = vmatpush.bf16.msra.mxu1 %v974_v15 }
  0x2a   : > { %v494_v23 = vadd.f32 %v486_v2, %v473_v62  ;;  %v495_v5 = vadd.f32 %v487_v22, %v474_v63  ;;  %v496_v6 = vadd.f32 %v488_v3, %v475_v1 }
  0x2b   : > { %501 = vst [vmem:[#allocation1] ss:$2 sm:$0xff] %v493_v4  ;;  %761 = vmatpush.bf16.msra.mxu2 %v966_v14 }
  0x2c   : > { %503 = vst [vmem:[#allocation1 + $0x1] ss:$2 sm:$0xff] %v494_v23 }
  0x2d   : > { %505 = vst [vmem:[#allocation1 + $0x10] ss:$2 sm:$0xff] %v495_v5  ;;  %701 = vmatpush.bf16.msra.mxu1 %v973_v17 }
  0x2e   : > { %507 = vst [vmem:[#allocation1 + $0x11] ss:$2 sm:$0xff] %v496_v6 }
  0x2f   : > { %762 = vmatpush.bf16.msra.mxu2 %v965_v16 }
  0x30   : > { %702 = vmatmul.bf16.vlgmr.msra.gmra.mxu1 %v972_v19 }
  0x33   : > { %v508_v24 = vld.sshfl [vmem:[#allocation1] sm:$0xff pattern:$0x75316420]  ;;  %763 = vmatpush.bf16.msra.mxu2 %v964_v18 }
  0x35   : > { %v509_v25 = vld.sshfl [vmem:[#allocation1 + $0x10] sm:$0xff pattern:$0x75316420] }
  0x36   : > { %v512_v26 = vpack.c.bf16 %v509_v25, %v508_v24 }
  0x38   : > { %585 = vmatmul.bf16.vlgmr.msra.gmra.mxu0 %v512_v26 }
  0xad   : > { %v703_v35 = vpop.f32.mrf.mxu1 }
  0xb5   : > { %v586_v20 = vpop.f32.mrf.mxu0  ;;  %v705_v37 = vpop.f32.mrf.mxu1 }
  0xb6   : > { %v595_v27 = vmul.f32 %v995_v10, %v586_v20 }
  0xb8   : > { %v601_v29 = vadd.f32 %v996_v21, %v595_v27 }
  0xba   : > { %v603_v32 = vmax.f32 %v601_v29, 0.0 }
  0xbd   : > { %v588_v28 = vpop.f32.mrf.mxu0 }
  0xbe   : > { %v596_v30 = vmul.f32 %v995_v10, %v588_v28 }
  0xc0   : > { %v602_v31 = vadd.f32 %v996_v21, %v596_v30 }
  0xc2   : > { %v604_v33 = vmax.f32 %v602_v31, 0.0 }
  0xc4   : > { %v605_v34 = vpack.c.bf16 %v604_v33, %v603_v32 }
  0xc6   : > { %764 = vmatmul.bf16.vlgmr.msra.gmra.mxu2 %v605_v34 }
 0x149   : > { %v765_v11 = vpop.f32.mrf.mxu2 }
 0x14a   : > { %v766_v36 = vadd.f32 %v765_v11, %v703_v35 }
 0x14c   : > { %v770_v40 = vmax.f32 %v766_v36, 0.0 }
 0x151   : > { %v767_v38 = vpop.f32.mrf.mxu2 }
 0x152   : > { %v768_v39 = vadd.f32 %v767_v38, %v705_v37 }
 0x154   : > { %v771_v41 = vmax.f32 %v768_v39, 0.0 }
 0x156   : > { %v984_v42 = vpack.c.bf16 %v771_v41, %v770_v40 }
 0x158   : > { %985 = vst [vmem:[%s327_s28] sm:$0xff] %v984_v42  }
 0x159 PF: > { %s18_s27 = sadd.s32 1, %s1003_s27  }
 0x15a   : > { %p15_p5 = scmp.ge.s32.totalorder %s18_s27, 4  }
 0x15c   :  { %17 = sbr.rel (!%p15_p5) target bundleno = 1 (0x1), region = 88 }

// kernel: _lambda_.88
= control target key start
LH: loop header
LB: loop body
LE: loop exit
PB: predicated region body
PF: predicated region fallthrough
CT: control target
= control target key end

     0   :  { %s595_s15 = smov 0   ;;  %s670_s0 = inlined_call_operand.vmem [shape: bf16[32,256], index: 0, kind: input, shape index: {}]   ;;  %s671_s1 = inlined_call_operand.vmem [shape: bf16[256,128], index: 1, kind: input, shape index: {}]   ;;  %s672_s2 = inlined_call_operand.vmem [shape: f32[1,128], index: 2, kind: input, shape index: {}]   ;;  %s673_s3 = inlined_call_operand.vmem [shape: f32[1,128], index: 3, kind: input, shape index: {}]   ;;  %s674_s4 = inlined_call_operand.vmem [shape: bf16[32,128], index: 4, kind: output, shape index: {}]  }
   0x1 LB: > { %s444_s16 = sadd.s32 4294967295, %s568_s15   ;;  %p448_p0 = scmp.ge.s32.totalorder %s568_s15, 1  ;;  %s568_s15 = sphi %s595_s15, %s14_s15  }
   0x2   : > { %p164_p1 = scmp.lt.s32.totalorder %s568_s15, 3 }
   0x4   : > { %p165_p2 = pnand %p448_p0, %p164_p1 }
   0x5   : > { %s449_s29 = sshll.u32 (!%p165_p2), %s444_s16, 1 }
   0x6   : > { %168 = sbr.rel (%p165_p2) target bundleno = 187 (0xbb), region = 36  ;;  %p192_p3 = scmp.lt.s32.totalorder (!%p165_p2), %s449_s29, 3 }
   0xb   : > { %v538_v0 = vld [vmem:[%s671_s1 + $0x38] sm:$0xff]  ;;  %v537_v2 = vld [vmem:[%s671_s1 + $0x30] sm:$0xff]  ;;  %v536_v4 = vld [vmem:[%s671_s1 + $0x28] sm:$0xff]  ;;  %s676_s29 = smov (!%p192_p3, %s449_s29), 3 }
   0xc   : > { %v546_v1 = vld [vmem:[%s671_s1 + $0x78] sm:$0xff]  ;;  %344 = vmatpush.bf16.msra.mxu0 %v538_v0  ;;  %v545_v3 = vld [vmem:[%s671_s1 + $0x70] sm:$0xff]  ;;  %v544_v5 = vld [vmem:[%s671_s1 + $0x68] sm:$0xff]  ;;  %s528_s17 = sshll.u32 %s676_s29, 3  ;;  %s453_s8 = sshll.u32 %s676_s29, 2 }
   0xd   : > { %358 = vmatpush.bf16.msra.mxu1 %v546_v1  ;;  %v535_v6 = vld [vmem:[%s671_s1 + $0x20] sm:$0xff]  ;;  %v534_v8 = vld [vmem:[%s671_s1 + $0x18] sm:$0xff]  ;;  %v533_v10 = vld [vmem:[%s671_s1 + $0x10] sm:$0xff]  ;;  %s196_s24 = scalar_lea.vmem %s670_s0, %s528_s17  ;;  %s202_s11 = scalar_lea.vmem %s674_s4, %s453_s8 }
   0xe   : > { %v543_v7 = vld [vmem:[%s671_s1 + $0x60] sm:$0xff]  ;;  %v542_v9 = vld [vmem:[%s671_s1 + $0x58] sm:$0xff]  ;;  %v541_v11 = vld [vmem:[%s671_s1 + $0x50] sm:$0xff] }
   0xf   : > { %v532_v12 = vld [vmem:[%s671_s1 + $0x8] sm:$0xff]  ;;  %v531_v14 = vld [vmem:[%s671_s1] sm:$0xff] }
  0x10   : > { %345 = vmatpush.bf16.msra.mxu0 %v537_v2  ;;  %v540_v13 = vld [vmem:[%s671_s1 + $0x48] sm:$0xff]  ;;  %v539_v15 = vld [vmem:[%s671_s1 + $0x40] sm:$0xff] }
  0x11   : > { %359 = vmatpush.bf16.msra.mxu1 %v545_v3  ;;  %v456_v16 = vld [vmem:[%s196_s24] sm:$0xf]  ;;  %v530_v17 = vld [vmem:[%s196_s24 + $0x4] sm:$0xf0]  ;;  %v529_v18 = vld [vmem:[%s196_s24 + $0x4] sm:$0xf] }
  0x12   : > { %v458_v19 = vld [vmem:[%s196_s24 + $0x8] sm:$0xf0]  ;;  %v457_v20 = vor.u32 %v530_v17, %v456_v16  ;;  %v560_v25 = vld [vmem:[%s672_s2] ss:$0 sm:$0xff] }
  0x13   : > { %v461_v21 = vor.u32 %v529_v18, %v458_v19  ;;  %v561_v29 = vld [vmem:[%s673_s3] ss:$0 sm:$0xff] }
  0x14   : > { %346 = vmatpush.bf16.msra.mxu0 %v536_v4 }
  0x15   : > { %360 = vmatpush.bf16.msra.mxu1 %v544_v5 }
  0x18   : > { %347 = vmatpush.bf16.msra.mxu0 %v535_v6 }
  0x19   : > { %361 = vmatpush.bf16.msra.mxu1 %v543_v7 }
  0x1c   : > { %348 = vmatpush.bf16.msra.mxu0 %v534_v8 }
  0x1d   : > { %362 = vmatpush.bf16.msra.mxu1 %v542_v9 }
  0x20   : > { %349 = vmatpush.bf16.msra.mxu0 %v533_v10 }
  0x21   : > { %363 = vmatpush.bf16.msra.mxu1 %v541_v11 }
  0x24   : > { %350 = vmatpush.bf16.msra.mxu0 %v532_v12 }
  0x25   : > { %364 = vmatpush.bf16.msra.mxu1 %v540_v13 }
  0x28   : > { %351 = vmatpush.bf16.msra.mxu0 %v531_v14 }
  0x29   : > { %365 = vmatpush.bf16.msra.mxu1 %v539_v15 }
  0x2b   : > { %352 = vmatmul.bf16.vlgmr.msra.gmra.mxu0 %v457_v20 }
  0x2c   : > { %366 = vmatmul.bf16.vlgmr.msra.gmra.mxu1 %v461_v21 }
  0xa8   : > { %v353_v22 = vpop.f32.mrf.mxu0 }
  0xa9   : > { %v367_v23 = vpop.f32.mrf.mxu1 }
  0xaa   : > { %v368_v24 = vadd.f32 %v367_v23, %v353_v22 }
  0xac   : > { %v376_v28 = vmul.f32 %v560_v25, %v368_v24 }
  0xae   : > { %v382_v32 = vadd.f32 %v561_v29, %v376_v28 }
  0xb0   : > { %v355_v26 = vpop.f32.mrf.mxu0 }
  0xb1   : > { %v369_v27 = vpop.f32.mrf.mxu1 }
  0xb2   : > { %v370_v30 = vadd.f32 %v369_v27, %v355_v26 }
  0xb4   : > { %v377_v31 = vmul.f32 %v560_v25, %v370_v30 }
  0xb6   : > { %v383_v33 = vadd.f32 %v561_v29, %v377_v31 }
  0xb8   : > { %v550_v34 = vpack.c.bf16 %v383_v33, %v382_v32 }
  0xba   : > { %551 = vst [vmem:[%s202_s11] sm:$0xff] %v550_v34  }
  0xbb PF: > { %s14_s15 = sadd.s32 1, %s568_s15  }
  0xbc   : > { %p11_p4 = scmp.ge.s32.totalorder %s14_s15, 4  }
  0xbe   :  { %13 = sbr.rel (!%p11_p4) target bundleno = 1 (0x1), region = 66 }

// kernel: _lambda_.89
= control target key start
LH: loop header
LB: loop body
LE: loop exit
PB: predicated region body
PF: predicated region fallthrough
CT: control target
= control target key end

     0   :  { %s644_s18 = smov 0   ;;  %s687_s0 = inlined_call_operand.vmem [shape: bf16[128,64], index: 0, kind: input, shape index: {}]   ;;  %s688_s1 = inlined_call_operand.vmem [shape: bf16[64,128], index: 1, kind: input, shape index: {}]   ;;  %s689_s2 = inlined_call_operand.vmem [shape: f32[1,128], index: 2, kind: input, shape index: {}]   ;;  %s690_s3 = inlined_call_operand.vmem [shape: f32[1,128], index: 3, kind: input, shape index: {}]   ;;  %s691_s4 = inlined_call_operand.vmem [shape: bf16[128,128], index: 4, kind: input, shape index: {}]   ;;  %s692_s5 = inlined_call_operand.vmem [shape: bf16[128,128], index: 5, kind: output, shape index: {}]  }
   0x1 LB: > { %s485_s19 = sadd.s32 4294967295, %s612_s18   ;;  %p489_p0 = scmp.ge.s32.totalorder %s612_s18, 1  ;;  %s612_s18 = sphi %s644_s18, %s15_s18  }
   0x2   : > { %p199_p1 = scmp.lt.s32.totalorder %s612_s18, 3 }
   0x4   : > { %p200_p2 = pnand %p489_p0, %p199_p1 }
   0x5   : > { %s490_s22 = sshll.u32 (!%p200_p2), %s485_s19, 3 }
   0x6   : > { %203 = sbr.rel (%p200_p2) target bundleno = 178 (0xb2), region = 40  ;;  %p233_p3 = scmp.lt.s32.totalorder (!%p200_p2), %s490_s22, 15 }
   0xb   : > { %v541_v0 = vld [vmem:[%s688_s1 + $0x18] sm:$0xff]  ;;  %v540_v1 = vld [vmem:[%s688_s1 + $0x10] sm:$0xff]  ;;  %s694_s22 = smov (!%p233_p3, %s490_s22), 15  ;;  %v539_v2 = vld [vmem:[%s688_s1 + $0x8] sm:$0xff]  ;;  %vm311_vm0 = vcmask 523264  }
   0xc   : > { %328 = vmatpush.bf16.msra.mxu0 %v541_v0  ;;  %584 = vmatpush.bf16.msra.mxu1 %v541_v0  ;;  %s661_s27 = sshll.u32 %s694_s22, 2  ;;  %v538_v3 = vld [vmem:[%s688_s1] sm:$0xff] }
   0xd   : > { %585 = vmatpush.bf16.msra.mxu2 %v541_v0  ;;  %586 = vmatpush.bf16.msra.mxu3 %v541_v0  ;;  %s236_s7 = scalar_lea.vmem %s687_s0, %s661_s27  ;;  %v604_v10 = vld [vmem:[%s689_s2] ss:$0 sm:$0xff]  ;;  %s242_s12 = scalar_lea.vmem %s691_s4, %s661_s27 }
   0xe   : > { %v534_v4 = vld [vmem:[%s236_s7] sm:$0xff]  ;;  %v535_v5 = vld [vmem:[%s236_s7 + $0x8] sm:$0xff]  ;;  %v536_v6 = vld [vmem:[%s236_s7 + $0x10] sm:$0xff]  ;;  %s248_s17 = scalar_lea.vmem %s692_s5, %s661_s27 }
   0xf   : > { %v537_v7 = vld [vmem:[%s236_s7 + $0x18] sm:$0xff]  ;;  %v605_v12 = vld [vmem:[%s690_s3] ss:$0 sm:$0xff]  ;;  %v578_v15 = vld [vmem:[%s242_s12 + $0x8] sm:$0xff]  }
  0x10   : > { %329 = vmatpush.bf16.msra.mxu0 %v540_v1  ;;  %587 = vmatpush.bf16.msra.mxu1 %v540_v1  ;;  %v543_v13 = vld [vmem:[%s242_s12] sm:$0xff]   ;;  %v548_v19 = vunpack.c.l.bf16 %v578_v15  ;;  %v549_v23 = vunpack.c.h.bf16 %v578_v15  ;;  %v579_v28 = vld [vmem:[%s242_s12 + $0x10] sm:$0xff]   ;;  %v580_v29 = vld [vmem:[%s242_s12 + $0x18] sm:$0xff]  }
  0x11   : > { %588 = vmatpush.bf16.msra.mxu2 %v540_v1  ;;  %589 = vmatpush.bf16.msra.mxu3 %v540_v1  ;;  %v544_v18 = vunpack.c.l.bf16 %v543_v13  ;;  %v545_v21 = vunpack.c.h.bf16 %v543_v13  ;;  %v552_v38 = vunpack.c.l.bf16 %v579_v28  ;;  %v556_v39 = vunpack.c.l.bf16 %v580_v29 }
  0x12   : > { %v553_v43 = vunpack.c.h.bf16 %v579_v28  ;;  %v557_v45 = vunpack.c.h.bf16 %v580_v29 }
  0x14   : > { %330 = vmatpush.bf16.msra.mxu0 %v539_v2  ;;  %590 = vmatpush.bf16.msra.mxu1 %v539_v2 }
  0x15   : > { %591 = vmatpush.bf16.msra.mxu2 %v539_v2  ;;  %592 = vmatpush.bf16.msra.mxu3 %v539_v2 }
  0x18   : > { %331 = vmatpush.bf16.msra.mxu0 %v538_v3  ;;  %593 = vmatpush.bf16.msra.mxu1 %v538_v3 }
  0x19   : > { %594 = vmatpush.bf16.msra.mxu2 %v538_v3  ;;  %595 = vmatpush.bf16.msra.mxu3 %v538_v3 }
  0x1b   : > { %528 = vmatmul.msk.bf16.vlgmr.msra.gmra.mxu0 %vm311_vm0, %v534_v4  ;;  %529 = vmatmul.msk.bf16.vlgmr.msra.gmra.mxu1 %vm311_vm0, %v535_v5 }
  0x1c   : > { %530 = vmatmul.msk.bf16.vlgmr.msra.gmra.mxu2 %vm311_vm0, %v536_v6  ;;  %531 = vmatmul.msk.bf16.vlgmr.msra.gmra.mxu3 %vm311_vm0, %v537_v7 }
  0x98   : > { %v333_v8 = vpop.f32.mrf.mxu0  ;;  %v338_v9 = vpop.f32.mrf.mxu1 }
  0x99   : > { %v357_v11 = vmul.f32 %v604_v10, %v333_v8  ;;  %v359_v14 = vmul.f32 %v604_v10, %v338_v9 }
  0x9b   : > { %v369_v24 = vadd.f32 %v605_v12, %v357_v11  ;;  %v371_v25 = vadd.f32 %v605_v12, %v359_v14 }
  0x9d   : > { %v393_v34 = vadd.f32 %v544_v18, %v369_v24  ;;  %v395_v35 = vadd.f32 %v548_v19, %v371_v25 }
  0x9f   : > { %v343_v16 = vpop.f32.mrf.mxu2  ;;  %v348_v17 = vpop.f32.mrf.mxu3 }
  0xa0   : > { %v335_v20 = vpop.f32.mrf.mxu0  ;;  %v340_v22 = vpop.f32.mrf.mxu1  ;;  %v361_v32 = vmul.f32 %v604_v10, %v343_v16  ;;  %v363_v33 = vmul.f32 %v604_v10, %v348_v17 }
  0xa1   : > { %v358_v26 = vmul.f32 %v604_v10, %v335_v20  ;;  %v360_v27 = vmul.f32 %v604_v10, %v340_v22 }
  0xa2   : > { %v373_v46 = vadd.f32 %v605_v12, %v361_v32  ;;  %v375_v47 = vadd.f32 %v605_v12, %v363_v33 }
  0xa3   : > { %v370_v30 = vadd.f32 %v605_v12, %v358_v26  ;;  %v372_v31 = vadd.f32 %v605_v12, %v360_v27 }
  0xa4   : > { %v397_v52 = vadd.f32 %v552_v38, %v373_v46  ;;  %v399_v53 = vadd.f32 %v556_v39, %v375_v47 }
  0xa5   : > { %v394_v36 = vadd.f32 %v545_v21, %v370_v30  ;;  %v396_v37 = vadd.f32 %v549_v23, %v372_v31 }
  0xa7   : > { %v561_v40 = vpack.c.bf16 %v394_v36, %v393_v34  ;;  %v566_v41 = vpack.c.bf16 %v396_v37, %v395_v35  ;;  %v345_v42 = vpop.f32.mrf.mxu2  ;;  %v350_v44 = vpop.f32.mrf.mxu3 }
  0xa8   : > { %v362_v48 = vmul.f32 %v604_v10, %v345_v42  ;;  %v364_v49 = vmul.f32 %v604_v10, %v350_v44 }
  0xa9   : > { %562 = vst [vmem:[%s248_s17] sm:$0xff] %v561_v40  }
  0xaa   : > { %581 = vst [vmem:[%s248_s17 + $0x8] sm:$0xff] %v566_v41   ;;  %v374_v50 = vadd.f32 %v605_v12, %v362_v48  ;;  %v376_v51 = vadd.f32 %v605_v12, %v364_v49 }
  0xac   : > { %v398_v54 = vadd.f32 %v553_v43, %v374_v50  ;;  %v400_v55 = vadd.f32 %v557_v45, %v376_v51 }
  0xae   : > { %v571_v56 = vpack.c.bf16 %v398_v54, %v397_v52  ;;  %v576_v57 = vpack.c.bf16 %v400_v55, %v399_v53 }
  0xb0   : > { %582 = vst [vmem:[%s248_s17 + $0x10] sm:$0xff] %v571_v56  }
  0xb1   : > { %583 = vst [vmem:[%s248_s17 + $0x18] sm:$0xff] %v576_v57  }
  0xb2 PF: > { %s15_s18 = sadd.s32 1, %s612_s18  }
  0xb3   : > { %p12_p4 = scmp.ge.s32.totalorder %s15_s18, 4  }
  0xb5   :  { %14 = sbr.rel (!%p12_p4) target bundleno = 1 (0x1), region = 73 }

// kernel: _lambda_.90
= control target key start
LH: loop header
LB: loop body
LE: loop exit
PB: predicated region body
PF: predicated region fallthrough
CT: control target
= control target key end

     0   :  { %s797_s15 = smov 0   ;;  %s942_s0 = inlined_call_operand.vmem [shape: bf16[128,128], index: 0, kind: input, shape index: {}]   ;;  %s943_s1 = inlined_call_operand.vmem [shape: bf16[128,4], index: 1, kind: input, shape index: {}]   ;;  %s944_s2 = inlined_call_operand.vmem [shape: f32[1,4], index: 2, kind: input, shape index: {}]   ;;  %s945_s3 = inlined_call_operand.vmem [shape: bf16[32,8], index: 3, kind: input, shape index: {}]   ;;  %s946_s4 = inlined_call_operand.vmem [shape: bf16[2,8,32,4], index: 4, kind: output, shape index: {}]  }
   0x1 LB: > { %s803_s16 = sadd.s32 4294967295, %s770_s15   ;;  %p660_p0 = scmp.ge.s32.totalorder %s770_s15, 1  ;;  %s770_s15 = sphi %s797_s15, %s14_s15  }
   0x2   : > { %p163_p1 = scmp.lt.s32.totalorder %s770_s15, 3 }
   0x4   : > { %p164_p2 = pnand %p660_p0, %p163_p1 }
   0x5   : > { %s661_s25 = sshll.u32 (!%p164_p2), %s803_s16, 3  ;;  %p195_p4 = scmp.lt.s32.totalorder (!%p164_p2), %s803_s16, 1 }
   0x6   : > { %167 = sbr.rel (%p164_p2) target bundleno = 408 (0x198), region = 36  ;;  %p190_p3 = scmp.lt.s32.totalorder (!%p164_p2), %s661_s25, 15 }
   0xb   : > { %v751_v0 = vld [vmem:[%s943_s1 + $0x38] sm:$0xff]  ;;  %v750_v1 = vld [vmem:[%s943_s1 + $0x30] sm:$0xff]  ;;  %v749_v2 = vld [vmem:[%s943_s1 + $0x28] sm:$0xff]  ;;  %s948_s25 = smov (!%p190_p3, %s661_s25), 15  ;;  %vm359_vm0 = vcmask 1043456   ;;  %vm352_vm1 = vcmask 64512  }
   0xc   : > { %301 = vmatpush.bf16.msra.mxu0 %v751_v0  ;;  %v748_v3 = vld [vmem:[%s943_s1 + $0x20] sm:$0xff]  ;;  %v747_v4 = vld [vmem:[%s943_s1 + $0x18] sm:$0xff]  ;;  %v746_v5 = vld [vmem:[%s943_s1 + $0x10] sm:$0xff]  ;;  %s662_s6 = sshll.u32 %s948_s25, 2  ;;  %s950_s16 = smov (!%p195_p4, %s803_s16), 1  ;;  %vm568_vm2 = vcmask 27648  }
   0xd   : > { %v745_v6 = vld [vmem:[%s943_s1 + $0x8] sm:$0xff]  ;;  %v744_v7 = vld [vmem:[%s943_s1] sm:$0xff]  ;;  %s193_s11 = scalar_lea.vmem %s942_s0, %s662_s6  ;;  %s739_s20 = sshll.u32 %s950_s16, 7 }
   0xe   : > { %v740_v8 = vld [vmem:[%s193_s11] sm:$0xff]  ;;  %v741_v9 = vld [vmem:[%s193_s11 + $0x8] sm:$0xff]  ;;  %v742_v10 = vld [vmem:[%s193_s11 + $0x10] sm:$0xff]  ;;  %s873_s23 = scalar_lea.vmem %s946_s4, %s739_s20 }
   0xf   : > { %v743_v11 = vld [vmem:[%s193_s11 + $0x18] sm:$0xff]  ;;  %v763_v12 = vld [vmem:[%s944_s2] ss:$0 sm:$0xff]  ;;  %v753_v17 = vld [vmem:[%s945_s3 + $0x8] sm:$0xff] }
  0x10   : > { %302 = vmatpush.bf16.msra.mxu0 %v750_v1  ;;  %v752_v18 = vld [vmem:[%s945_s3] sm:$0xff] }
  0x14   : > { %303 = vmatpush.bf16.msra.mxu0 %v749_v2 }
  0x18   : > { %304 = vmatpush.bf16.msra.mxu0 %v748_v3 }
  0x1c   : > { %305 = vmatpush.bf16.msra.mxu0 %v747_v4 }
  0x20   : > { %306 = vmatpush.bf16.msra.mxu0 %v746_v5 }
  0x24   : > { %307 = vmatpush.bf16.msra.mxu0 %v745_v6 }
  0x28   : > { %308 = vmatpush.bf16.msra.mxu0 %v744_v7 }
  0x2b   : > { %309 = vmatmul.bf16.vlgmr.msra.gmra.mxu0 %v740_v8 }
  0x3b   : > { %314 = vmatmul.bf16.gmra.mxu0 %v741_v9 }
  0x4b   : > { %319 = vmatmul.bf16.gmra.mxu0 %v742_v10 }
  0x5b   : > { %324 = vmatmul.bf16.gmra.mxu0 %v743_v11 }
  0xa8   : > { %v310_v13 = vpop.f32.mrf.mxu0 }
  0xa9   : > { %v311_v14 = vadd.f32 %v763_v12, %v310_v13 }
  0xab   : > { %v330_v15 = vpack.c.bf16 %v311_v14, %v311_v14 }
  0xad   : > { %v361_v16 = vsel %vm359_vm0, %v330_v15, 0 }
  0xae   : > { %370 = vmatpush.bf16.msra.mxu1 %v361_v16  ;;  %754 = vmatpush.bf16.msra.mxu3 %v361_v16 }
  0xb0   : > { %v312_v19 = vpop.f32.mrf.mxu0 }
  0xb1   : > { %v313_v20 = vadd.f32 %v763_v12, %v312_v19  ;;  %722 = vmatmul.msk.bf16.vlgmr.msra.gmra.mxu3 %vm352_vm1, %v753_v17  ;;  %721 = vmatmul.msk.bf16.vlgmr.msra.gmra.mxu1 %vm352_vm1, %v752_v18 }
  0xb3   : > { %v331_v21 = vpack.c.bf16 %v313_v20, %v313_v20 }
  0xb5   : > { %v383_v22 = vsel %vm359_vm0, %v331_v21, 0 }
  0xb6   : > { %392 = vmatpush.bf16.msra.mxu2 %v383_v22 }
  0xb8   : > { %v315_v23 = vpop.f32.mrf.mxu0 }
  0xb9   : > { %v316_v24 = vadd.f32 %v763_v12, %v315_v23  ;;  %723 = vmatmul.msk.bf16.vlgmr.msra.gmra.mxu2 %vm352_vm1, %v752_v18 }
  0xbb   : > { %v332_v25 = vpack.c.bf16 %v316_v24, %v316_v24 }
  0xbd   : > { %v405_v26 = vsel %vm359_vm0, %v332_v25, 0 }
  0xbe   : > { %414 = vmatpush.bf16.msrb.mxu3 %v405_v26 }
  0xc0   : > { %v317_v27 = vpop.f32.mrf.mxu0 }
  0xc1   : > { %v318_v28 = vadd.f32 %v763_v12, %v317_v27  ;;  %725 = vmatmul.msk.bf16.vlgmr.msrb.gmra.mxu3 %vm352_vm1, %v752_v18 }
  0xc3   : > { %v333_v29 = vpack.c.bf16 %v318_v28, %v318_v28 }
  0xc5   : > { %v427_v30 = vsel %vm359_vm0, %v333_v29, 0 }
  0xc6   : > { %436 = vmatpush.bf16.msrb.mxu1 %v427_v30 }
  0xc8   : > { %v320_v31 = vpop.f32.mrf.mxu0 }
  0xc9   : > { %v321_v32 = vadd.f32 %v763_v12, %v320_v31  ;;  %724 = vmatmul.msk.bf16.gmra.mxu2 %vm352_vm1, %v753_v17  ;;  %727 = vmatmul.msk.bf16.vlgmr.msrb.gmra.mxu1 %vm352_vm1, %v752_v18 }
  0xcb   : > { %v334_v33 = vpack.c.bf16 %v321_v32, %v321_v32 }
  0xcd   : > { %v449_v34 = vsel %vm359_vm0, %v334_v33, 0 }
  0xce   : > { %458 = vmatpush.bf16.msrb.mxu2 %v449_v34 }
  0xd0   : > { %v322_v35 = vpop.f32.mrf.mxu0 }
  0xd1   : > { %v323_v36 = vadd.f32 %v763_v12, %v322_v35  ;;  %726 = vmatmul.msk.bf16.gmra.mxu3 %vm352_vm1, %v753_v17 }
  0xd3   : > { %v335_v37 = vpack.c.bf16 %v323_v36, %v323_v36 }
  0xd5   : > { %v471_v38 = vsel %vm359_vm0, %v335_v37, 0 }
  0xd6   : > { %480 = vmatpush.bf16.msra.mxu3 %v471_v38 }
  0xd8   : > { %v325_v39 = vpop.f32.mrf.mxu0 }
  0xd9   : > { %v326_v40 = vadd.f32 %v763_v12, %v325_v39  ;;  %729 = vmatmul.msk.bf16.vlgmr.msrb.gmra.mxu2 %vm352_vm1, %v752_v18  ;;  %728 = vmatmul.msk.bf16.gmra.mxu1 %vm352_vm1, %v753_v17 }
  0xdb   : > { %v336_v41 = vpack.c.bf16 %v326_v40, %v326_v40 }
  0xdd   : > { %v493_v42 = vsel %vm359_vm0, %v336_v41, 0 }
  0xde   : > { %502 = vmatpush.bf16.msra.mxu1 %v493_v42 }
  0xe0   : > { %v327_v43 = vpop.f32.mrf.mxu0 }
  0xe1   : > { %v328_v44 = vadd.f32 %v763_v12, %v327_v43  ;;  %731 = vmatmul.msk.bf16.vlgmr.msra.gmra.mxu3 %vm352_vm1, %v752_v18 }
  0xe3   : > { %v337_v45 = vpack.c.bf16 %v328_v44, %v328_v44 }
  0xe5   : > { %v515_v46 = vsel %vm359_vm0, %v337_v45, 0 }
  0xe6   : > { %524 = vmatpush.bf16.msra.mxu2 %v515_v46 }
  0xe9   : > { %730 = vmatmul.msk.bf16.gmra.mxu2 %vm352_vm1, %v753_v17  ;;  %733 = vmatmul.msk.bf16.vlgmr.msra.gmra.mxu1 %vm352_vm1, %v752_v18 }
  0xf1   : > { %732 = vmatmul.msk.bf16.gmra.mxu3 %vm352_vm1, %v753_v17 }
  0xf9   : > { %735 = vmatmul.msk.bf16.vlgmr.msra.gmra.mxu2 %vm352_vm1, %v752_v18  ;;  %734 = vmatmul.msk.bf16.gmra.mxu1 %vm352_vm1, %v753_v17 }
 0x109   : > { %736 = vmatmul.msk.bf16.gmra.mxu2 %vm352_vm1, %v753_v17 }
 0x12e   : > { %v372_v47 = vpop.f32.mrf.mxu1 }
 0x12f   : > { %v536_v48 = vpack.c.bf16 %v372_v47, %v372_v47 }
 0x131   : > { %569 = vst.msk [vmem:[%s873_s23] sm:$0xf] %vm568_vm2, %v536_v48 }
 0x134   : > { %v377_v49 = vpop.f32.mrf.mxu3 }
 0x135   : > { %v538_v50 = vpack.c.bf16 %v377_v49, %v377_v49 }
 0x136   : > { %v374_v51 = vpop.f32.mrf.mxu1 }
 0x137   : > { %571 = vst.msk [vmem:[%s873_s23 + $0x8] sm:$0xf] %vm568_vm2, %v538_v50  ;;  %v537_v52 = vpack.c.bf16 %v374_v51, %v374_v51 }
 0x139   : > { %570 = vst.msk [vmem:[%s873_s23 + $0x4] sm:$0xf] %vm568_vm2, %v537_v52 }
 0x13c   : > { %v394_v53 = vpop.f32.mrf.mxu2  ;;  %v379_v54 = vpop.f32.mrf.mxu3 }
 0x13d   : > { %v540_v55 = vpack.c.bf16 %v394_v53, %v394_v53  ;;  %v539_v56 = vpack.c.bf16 %v379_v54, %v379_v54 }
 0x13f   : > { %573 = vst.msk [vmem:[%s873_s23 + $0x10] sm:$0xf] %vm568_vm2, %v540_v55 }
 0x140   : > { %572 = vst.msk [vmem:[%s873_s23 + $0xc] sm:$0xf] %vm568_vm2, %v539_v56 }
 0x144   : > { %v396_v57 = vpop.f32.mrf.mxu2  ;;  %v416_v58 = vpop.f32.mrf.mxu3 }
 0x145   : > { %v541_v59 = vpack.c.bf16 %v396_v57, %v396_v57  ;;  %v544_v60 = vpack.c.bf16 %v416_v58, %v416_v58 }
 0x146   : > { %v438_v61 = vpop.f32.mrf.mxu1 }
 0x147   : > { %574 = vst.msk [vmem:[%s873_s23 + $0x14] sm:$0xf] %vm568_vm2, %v541_v59  ;;  %v548_v62 = vpack.c.bf16 %v438_v61, %v438_v61 }
 0x148   : > { %577 = vst.msk [vmem:[%s873_s23 + $0x20] sm:$0xf] %vm568_vm2, %v544_v60 }
 0x149   : > { %581 = vst.msk [vmem:[%s873_s23 + $0x30] sm:$0xf] %vm568_vm2, %v548_v62 }
 0x14c   : > { %v399_v63 = vpop.f32.mrf.mxu2  ;;  %v418_v0 = vpop.f32.mrf.mxu3 }
 0x14d   : > { %v542_v1 = vpack.c.bf16 %v399_v63, %v399_v63  ;;  %v545_v2 = vpack.c.bf16 %v418_v0, %v418_v0 }
 0x14e   : > { %v440_v3 = vpop.f32.mrf.mxu1 }
 0x14f   : > { %575 = vst.msk [vmem:[%s873_s23 + $0x18] sm:$0xf] %vm568_vm2, %v542_v1  ;;  %v549_v4 = vpack.c.bf16 %v440_v3, %v440_v3 }
 0x150   : > { %578 = vst.msk [vmem:[%s873_s23 + $0x24] sm:$0xf] %vm568_vm2, %v545_v2 }
 0x151   : > { %582 = vst.msk [vmem:[%s873_s23 + $0x34] sm:$0xf] %vm568_vm2, %v549_v4 }
 0x154   : > { %v401_v5 = vpop.f32.mrf.mxu2  ;;  %v421_v6 = vpop.f32.mrf.mxu3 }
 0x155   : > { %v543_v7 = vpack.c.bf16 %v401_v5, %v401_v5  ;;  %v546_v8 = vpack.c.bf16 %v421_v6, %v421_v6 }
 0x156   : > { %v443_v9 = vpop.f32.mrf.mxu1 }
 0x157   : > { %576 = vst.msk [vmem:[%s873_s23 + $0x1c] sm:$0xf] %vm568_vm2, %v543_v7  ;;  %v550_v10 = vpack.c.bf16 %v443_v9, %v443_v9 }
 0x158   : > { %579 = vst.msk [vmem:[%s873_s23 + $0x28] sm:$0xf] %vm568_vm2, %v546_v8 }
 0x159   : > { %583 = vst.msk [vmem:[%s873_s23 + $0x38] sm:$0xf] %vm568_vm2, %v550_v10 }
 0x15c   : > { %v460_v11 = vpop.f32.mrf.mxu2  ;;  %v423_v12 = vpop.f32.mrf.mxu3 }
 0x15d   : > { %v552_v13 = vpack.c.bf16 %v460_v11, %v460_v11  ;;  %v547_v14 = vpack.c.bf16 %v423_v12, %v423_v12 }
 0x15e   : > { %v445_v15 = vpop.f32.mrf.mxu1 }
 0x15f   : > { %585 = vst.msk [vmem:[%s873_s23 + $0x40] sm:$0xf] %vm568_vm2, %v552_v13  ;;  %v551_v16 = vpack.c.bf16 %v445_v15, %v445_v15 }
 0x160   : > { %580 = vst.msk [vmem:[%s873_s23 + $0x2c] sm:$0xf] %vm568_vm2, %v547_v14 }
 0x161   : > { %584 = vst.msk [vmem:[%s873_s23 + $0x3c] sm:$0xf] %vm568_vm2, %v551_v16 }
 0x164   : > { %v462_v17 = vpop.f32.mrf.mxu2  ;;  %v482_v18 = vpop.f32.mrf.mxu3 }
 0x165   : > { %v553_v19 = vpack.c.bf16 %v462_v17, %v462_v17  ;;  %v556_v20 = vpack.c.bf16 %v482_v18, %v482_v18 }
 0x166   : > { %v504_v21 = vpop.f32.mrf.mxu1 }
 0x167   : > { %586 = vst.msk [vmem:[%s873_s23 + $0x44] sm:$0xf] %vm568_vm2, %v553_v19  ;;  %v560_v22 = vpack.c.bf16 %v504_v21, %v504_v21 }
 0x168   : > { %589 = vst.msk [vmem:[%s873_s23 + $0x50] sm:$0xf] %vm568_vm2, %v556_v20 }
 0x169   : > { %593 = vst.msk [vmem:[%s873_s23 + $0x60] sm:$0xf] %vm568_vm2, %v560_v22 }
 0x16c   : > { %v465_v23 = vpop.f32.mrf.mxu2  ;;  %v484_v24 = vpop.f32.mrf.mxu3 }
 0x16d   : > { %v554_v25 = vpack.c.bf16 %v465_v23, %v465_v23  ;;  %v557_v26 = vpack.c.bf16 %v484_v24, %v484_v24 }
 0x16e   : > { %v506_v27 = vpop.f32.mrf.mxu1 }
 0x16f   : > { %587 = vst.msk [vmem:[%s873_s23 + $0x48] sm:$0xf] %vm568_vm2, %v554_v25  ;;  %v561_v28 = vpack.c.bf16 %v506_v27, %v506_v27 }
 0x170   : > { %590 = vst.msk [vmem:[%s873_s23 + $0x54] sm:$0xf] %vm568_vm2, %v557_v26 }
 0x171   : > { %594 = vst.msk [vmem:[%s873_s23 + $0x64] sm:$0xf] %vm568_vm2, %v561_v28 }
 0x174   : > { %v467_v29 = vpop.f32.mrf.mxu2  ;;  %v487_v30 = vpop.f32.mrf.mxu3 }
 0x175   : > { %v555_v31 = vpack.c.bf16 %v467_v29, %v467_v29  ;;  %v558_v32 = vpack.c.bf16 %v487_v30, %v487_v30 }
 0x176   : > { %v509_v33 = vpop.f32.mrf.mxu1 }
 0x177   : > { %588 = vst.msk [vmem:[%s873_s23 + $0x4c] sm:$0xf] %vm568_vm2, %v555_v31  ;;  %v562_v34 = vpack.c.bf16 %v509_v33, %v509_v33 }
 0x178   : > { %591 = vst.msk [vmem:[%s873_s23 + $0x58] sm:$0xf] %vm568_vm2, %v558_v32 }
 0x179   : > { %595 = vst.msk [vmem:[%s873_s23 + $0x68] sm:$0xf] %vm568_vm2, %v562_v34 }
 0x17c   : > { %v526_v35 = vpop.f32.mrf.mxu2  ;;  %v489_v36 = vpop.f32.mrf.mxu3 }
 0x17d   : > { %v564_v37 = vpack.c.bf16 %v526_v35, %v526_v35  ;;  %v559_v38 = vpack.c.bf16 %v489_v36, %v489_v36 }
 0x17e   : > { %v511_v39 = vpop.f32.mrf.mxu1 }
 0x17f   : > { %597 = vst.msk [vmem:[%s873_s23 + $0x70] sm:$0xf] %vm568_vm2, %v564_v37  ;;  %v563_v40 = vpack.c.bf16 %v511_v39, %v511_v39 }
 0x180   : > { %592 = vst.msk [vmem:[%s873_s23 + $0x5c] sm:$0xf] %vm568_vm2, %v559_v38 }
 0x181   : > { %596 = vst.msk [vmem:[%s873_s23 + $0x6c] sm:$0xf] %vm568_vm2, %v563_v40 }
 0x184   : > { %v528_v41 = vpop.f32.mrf.mxu2 }
 0x185   : > { %v565_v42 = vpack.c.bf16 %v528_v41, %v528_v41 }
 0x187   : > { %598 = vst.msk [vmem:[%s873_s23 + $0x74] sm:$0xf] %vm568_vm2, %v565_v42 }
 0x18c   : > { %v531_v43 = vpop.f32.mrf.mxu2 }
 0x18d   : > { %v566_v44 = vpack.c.bf16 %v531_v43, %v531_v43 }
 0x18f   : > { %599 = vst.msk [vmem:[%s873_s23 + $0x78] sm:$0xf] %vm568_vm2, %v566_v44 }
 0x194   : > { %v533_v45 = vpop.f32.mrf.mxu2 }
 0x195   : > { %v567_v46 = vpack.c.bf16 %v533_v45, %v533_v45 }
 0x197   : > { %600 = vst.msk [vmem:[%s873_s23 + $0x7c] sm:$0xf] %vm568_vm2, %v567_v46 }
 0x198 PF: > { %s14_s15 = sadd.s32 1, %s770_s15  }
 0x199   : > { %p11_p5 = scmp.ge.s32.totalorder %s14_s15, 4  }
 0x19b   :  { %13 = sbr.rel (!%p11_p5) target bundleno = 1 (0x1), region = 66 }

// kernel: _lambda_.91
= control target key start
LH: loop header
LB: loop body
LE: loop exit
PB: predicated region body
PF: predicated region fallthrough
CT: control target
= control target key end

     0   :  { %s301_s9 = smov 0   ;;  %s324_s0 = inlined_call_operand.vmem [shape: bf16[2,8,128], index: 0, kind: input, shape index: {}]   ;;  %s325_s1 = inlined_call_operand.vmem [shape: bf16[32,8], index: 1, kind: input, shape index: {}]   ;;  %s326_s2 = inlined_call_operand.vmem [shape: f32[2,32,128], index: 2, kind: output, shape index: {}]  }
   0x1 LB: > { %s246_s10 = sadd.s32 4294967295, %s284_s9   ;;  %p250_p0 = scmp.ge.s32.totalorder %s284_s9, 1  ;;  %s284_s9 = sphi %s301_s9, %s12_s9  }
   0x2   : > { %p111_p1 = scmp.lt.s32.totalorder %s284_s9, 3 }
   0x4   : > { %p112_p2 = pnand %p250_p0, %p111_p1 }
   0x5   : > { %p132_p3 = scmp.lt.s32.totalorder (!%p112_p2), %s246_s10, 1 }
   0x6   : > { %115 = sbr.rel (%p112_p2) target bundleno = 155 (0x9b), region = 28 }
   0xb   : > { %s328_s10 = smov (!%p132_p3, %s246_s10), 1  ;;  %vm164_vm0 = vcmask 1043456   ;;  %v267_v2 = vld [vmem:[%s325_s1] sm:$0xff]  ;;  %v268_v3 = vld [vmem:[%s325_s1 + $0x8] sm:$0xff]  ;;  %vm157_vm1 = vcmask 64512  }
   0xc   : > { %s251_s11 = sshll.u32 %s328_s10, 2  ;;  %s266_s19 = sshll.u32 %s328_s10, 5 }
   0xd   : > { %s135_s14 = scalar_lea.vmem %s324_s0, %s251_s11  ;;  %s140_s22 = scalar_lea.vmem %s326_s2, %s266_s19 }
   0xe   : > { %v146_v0 = vld [vmem:[%s135_s14] sm:$0xf] }
   0xf   : > { %v166_v1 = vsel %vm164_vm0, %v146_v0, 0 }
  0x10   : > { %175 = vmatpush.bf16.msra.mxu0 %v166_v1  ;;  %269 = vmatpush.bf16.msra.mxu1 %v166_v1 }
  0x13   : > { %262 = vmatmul.msk.bf16.vlgmr.msra.gmra.mxu0 %vm157_vm1, %v267_v2  ;;  %263 = vmatmul.msk.bf16.vlgmr.msra.gmra.mxu1 %vm157_vm1, %v268_v3 }
  0x90   : > { %v177_v4 = vpop.f32.mrf.mxu0  ;;  %v182_v5 = vpop.f32.mrf.mxu1 }
  0x91   : > { %187 = vst [vmem:[%s140_s22] sm:$0xff] %v177_v4 }
  0x92   : > { %189 = vst [vmem:[%s140_s22 + $0x10] sm:$0xff] %v182_v5 }
  0x98   : > { %v179_v6 = vpop.f32.mrf.mxu0  ;;  %v184_v7 = vpop.f32.mrf.mxu1 }
  0x99   : > { %188 = vst [vmem:[%s140_s22 + $0x8] sm:$0xff] %v179_v6 }
  0x9a   : > { %190 = vst [vmem:[%s140_s22 + $0x18] sm:$0xff] %v184_v7 }
  0x9b PF: > { %s12_s9 = sadd.s32 1, %s284_s9  }
  0x9c   : > { %p9_p4 = scmp.ge.s32.totalorder %s12_s9, 4  }
  0x9e   :  { %11 = sbr.rel (!%p9_p4) target bundleno = 1 (0x1), region = 58 }

</bundles_post_ra>
